<compile_context>
chip_gen: v5e
topology: v5e:2x2
jax: 0.10.0
libtpu: 0.0.40
codegen_flags: <defaults>
</compile_context>

<pallas_src>
import functools
import itertools
from collections import namedtuple

import numpy as np

import jax
import jax.numpy as jnp
from jax import lax
from jax.experimental import pallas as pl
from jax.experimental.pallas import tpu as pltpu


TILE = 1024                    # base lane tile along the flattened spatial axis
EPS = 1e-5
COMPUTE_DTYPE = jnp.bfloat16   # matmul operand / activation dtype (accumulation is f32)


# ----------------------------------------------------------------------------
# compiler params
# ----------------------------------------------------------------------------
@functools.lru_cache(maxsize=None)
def _vmem_limit_bytes():
    try:
        cap = int(pltpu.get_tpu_info().vmem_capacity_bytes)
        return int(min(cap // 2, 64 * 1024 * 1024))
    except Exception:
        return 32 * 1024 * 1024


def _compiler_params():
    return pltpu.CompilerParams(
        dimension_semantics=("parallel",),
        vmem_limit_bytes=_vmem_limit_bytes(),
    )


# ----------------------------------------------------------------------------
# flattened, zero-haloed layout helpers (channel-major (C, L))
# ----------------------------------------------------------------------------
Layout = namedtuple("Layout", "N D H W Dp Hp Wp S ts halo n_tiles L")


def make_layout(N, D, H, W, base_ts=TILE):
    Dp, Hp, Wp = D + 2, H + 2, W + 2
    S = N * Dp * Hp * Wp
    max_off = Hp * Wp + Wp + 1                     # largest |flat offset| of a 3x3x3 stencil
    halo = ((max_off + 127) // 128) * 128          # 128-multiple halo width
    ts = ((base_ts + halo - 1) // halo) * halo     # tile is a multiple of halo (>= base_ts)
    n_tiles = -(-S // ts)                          # cdiv
    L = (n_tiles + 2) * ts                         # one zero guard tile on each side
    return Layout(N, D, H, W, Dp, Hp, Wp, S, ts, halo, n_tiles, L)


def pack(x_cn, lay, dtype):
    """(C, N, D, H, W) -> (C, L): zero spatial halo, flatten, guard/tile pad."""
    C = x_cn.shape[0]
    xp = jnp.pad(x_cn, ((0, 0), (0, 0), (1, 1), (1, 1), (1, 1)))
    flat = xp.reshape(C, lay.S).astype(dtype)
    buf = jnp.zeros((C, lay.L), dtype)
    return buf.at[:, lay.ts: lay.ts + lay.S].set(flat)


def unpack(buf, lay):
    """(C, L) -> (C, N, D, H, W) interior."""
    C = buf.shape[0]
    flat = buf[:, lay.ts: lay.ts + lay.S]
    vol = flat.reshape(C, lay.N, lay.Dp, lay.Hp, lay.Wp)
    return vol[:, :, 1: lay.D + 1, 1: lay.H + 1, 1: lay.W + 1]


@functools.lru_cache(maxsize=None)
def _interior_mask_np(lay):
    m = np.zeros((lay.N, lay.Dp, lay.Hp, lay.Wp), np.float32)
    m[:, 1: lay.D + 1, 1: lay.H + 1, 1: lay.W + 1] = 1.0
    buf = np.zeros((1, lay.L), np.float32)
    buf[0, lay.ts: lay.ts + lay.S] = m.reshape(-1)
    return buf


def interior_mask(lay):
    """(1, L) f32: 1.0 at real voxels, 0.0 at halo / guard / slack padding."""
    return jnp.asarray(_interior_mask_np(lay))


# ----------------------------------------------------------------------------
# Pallas kernel: im2col-stack stencil conv (+ optional fused input BN/ReLU,
#                optional per-tile BN-statistics output)
# ----------------------------------------------------------------------------
def _make_conv_kernel(offsets, c_in, halo, ts, fuse_bn, with_stats):
    def kernel(*refs):
        it = iter(refs)
        xc = next(it)                      # (c_in, ts)   center tile
        xl = next(it)                      # (c_in, halo) left halo
        xr = next(it)                      # (c_in, halo) right halo
        w_ref = next(it)                   # (c_out, T*c_in)
        b_ref = next(it)                   # (c_out, 1) f32
        if fuse_bn:
            sc_ref = next(it)              # (c_in, 1) f32  scale of layer-1 BN
            sh_ref = next(it)              # (c_in, 1) f32  shift of layer-1 BN
        if fuse_bn or with_stats:
            mc_ref = next(it)              # (1, ts)   interior mask (center)
        if fuse_bn:
            ml_ref = next(it)              # (1, halo) mask (left halo)
            mr_ref = next(it)              # (1, halo) mask (right halo)
        y_ref = next(it)                   # (c_out, ts)
        if with_stats:
            stat_ref = next(it)            # (c_out, 128): lane0=sum, lane1=sumsq
        win_ref = next(it)                 # (c_in, halo + ts + halo) scratch
        stk_ref = next(it)                 # (T*c_in, ts)             scratch

        def stage(xv, mv):
            # Optional fused BatchNorm1 + ReLU + interior masking while staging the
            # window.  jnp.where (select) guarantees garbage in unwritten guard tiles
            # of the previous layer's output can never propagate (not even NaN*0).
            if not fuse_bn:
                return xv.astype(win_ref.dtype)
            v = xv.astype(jnp.float32) * sc_ref[...] + sh_ref[...]
            v = jnp.maximum(v, 0.0)
            v = jnp.where(mv > 0.5, v, 0.0)
            return v.astype(win_ref.dtype)

        # Assemble the haloed window (all stores 128-lane aligned).
        win_ref[:, 0:halo] = stage(xl[...], ml_ref[...] if fuse_bn else None)
        win_ref[:, halo:halo + ts] = stage(xc[...], mc_ref[...] if fuse_bn else None)
        win_ref[:, halo + ts:halo + 2 * ts if False else halo + ts + halo] = stage(
            xr[...], mr_ref[...] if fuse_bn else None)

        # Build the tap stack (one lane shift per tap, amortized over one big dot).
        for t, off in enumerate(offsets):
            stk_ref[t * c_in:(t + 1) * c_in, :] = win_ref[:, halo + off: halo + off + ts]

        # Single MXU dot: (c_out, T*c_in) @ (T*c_in, ts), f32 accumulation.
        acc = jnp.dot(w_ref[...], stk_ref[...], preferred_element_type=jnp.float32)
        acc = acc + b_ref[...]
        y_ref[...] = acc.astype(y_ref.dtype)

        if with_stats:
            c_out = y_ref.shape[0]
            ym = jnp.where(mc_ref[...] > 0.5, acc, 0.0)
            s = jnp.sum(ym, axis=1, keepdims=True)
            sq = jnp.sum(ym * ym, axis=1, keepdims=True)
            lane = lax.broadcasted_iota(jnp.int32, (c_out, 128), 1)
            stat_ref[...] = jnp.where(lane == 0, s, jnp.where(lane == 1, sq, 0.0))

    return kernel


def tap_conv(xbuf, w_mat, bias, offsets, lay, *, with_stats=False, mask=None,
             bn_in=None, out_dtype=jnp.float32):
    """Generic stencil conv on the flat (C, L) layout.

    xbuf:    (c_in, L)       activation buffer (zero halo / guard in interior inputs).
    w_mat:   (c_out, T*c_in) tap-stacked weight matrix (column block t <-> offsets[t]).
    offsets: T static flat offsets.
    bn_in:   optional (scale, shift) of the previous layer's BN, fused into staging.
    Returns y (c_out, L) [+ per-channel (sum, sumsq) of the masked output if with_stats].
    """
    c_in, _ = xbuf.shape
    c_out, K = w_mat.shape
    ts, halo, n_tiles = lay.ts, lay.halo, lay.n_tiles
    R = ts // halo
    offsets = tuple(int(o) for o in offsets)
    assert K == len(offsets) * c_in
    assert max(abs(o) for o in offsets) <= halo

    fuse_bn = bn_in is not None
    kernel = _make_conv_kernel(offsets, c_in, halo, ts, fuse_bn, with_stats)

    in_specs = [
        pl.BlockSpec((c_in, ts), lambda i: (0, i + 1)),
        pl.BlockSpec((c_in, halo), lambda i: (0, (i + 1) * R - 1)),
        pl.BlockSpec((c_in, halo), lambda i: (0, (i + 2) * R)),
        pl.BlockSpec((c_out, K), lambda i: (0, 0)),
        pl.BlockSpec((c_out, 1), lambda i: (0, 0)),
    ]
    operands = [xbuf, xbuf, xbuf,
                w_mat.astype(COMPUTE_DTYPE),
                bias.reshape(c_out, 1).astype(jnp.float32)]
    if fuse_bn:
        scale, shift = bn_in
        in_specs += [pl.BlockSpec((c_in, 1), lambda i: (0, 0)),
                     pl.BlockSpec((c_in, 1), lambda i: (0, 0))]
        operands += [scale.reshape(c_in, 1).astype(jnp.float32),
                     shift.reshape(c_in, 1).astype(jnp.float32)]
    if fuse_bn or with_stats:
        in_specs.append(pl.BlockSpec((1, ts), lambda i: (0, i + 1)))
        operands.append(mask)
    if fuse_bn:
        in_specs += [pl.BlockSpec((1, halo), lambda i: (0, (i + 1) * R - 1)),
                     pl.BlockSpec((1, halo), lambda i: (0, (i + 2) * R))]
        operands += [mask, mask]

    out_shape = [jax.ShapeDtypeStruct((c_out, lay.L), out_dtype)]
    out_specs = [pl.BlockSpec((c_out, ts), lambda i: (0, i + 1))]
    if with_stats:
        out_shape.append(jax.ShapeDtypeStruct((c_out, n_tiles * 128), jnp.float32))
        out_specs.append(pl.BlockSpec((c_out, 128), lambda i: (0, i)))

    outs = pl.pallas_call(
        kernel,
        grid=(n_tiles,),
        in_specs=in_specs,
        out_specs=out_specs,
        out_shape=out_shape,
        scratch_shapes=[pltpu.VMEM((c_in, ts + 2 * halo), COMPUTE_DTYPE),
                        pltpu.VMEM((K, ts), COMPUTE_DTYPE)],
        compiler_params=_compiler_params(),
    )(*operands)

    if with_stats:
        y, pstats = outs
        stats = pstats.reshape(c_out, n_tiles, 128).sum(axis=1)   # (c_out, 128)
        return y, stats[:, 0], stats[:, 1]
    return outs[0]


# ----------------------------------------------------------------------------
# Pallas kernel: tiled BatchNorm(scale/shift) + ReLU + interior masking
# ----------------------------------------------------------------------------
def _bn_relu_kernel(y_ref, scale_ref, shift_ref, mask_ref, o_ref):
    y = y_ref[...].astype(jnp.float32)
    a = jnp.maximum(y * scale_ref[...] + shift_ref[...], 0.0)
    o_ref[...] = jnp.where(mask_ref[...] > 0.5, a, 0.0).astype(o_ref.dtype)


def bn_relu_apply(ybuf, scale, shift, mask, out_dtype, lay):
    c, L = ybuf.shape
    ts = lay.ts
    n = L // ts
    return pl.pallas_call(
        _bn_relu_kernel,
        grid=(n,),
        in_specs=[pl.BlockSpec((c, ts), lambda i: (0, i)),
                  pl.BlockSpec((c, 1), lambda i: (0, 0)),
                  pl.BlockSpec((c, 1), lambda i: (0, 0)),
                  pl.BlockSpec((1, ts), lambda i: (0, i))],
        out_specs=pl.BlockSpec((c, ts), lambda i: (0, i)),
        out_shape=jax.ShapeDtypeStruct((c, L), out_dtype),
        compiler_params=_compiler_params(),
    )(ybuf, scale, shift, mask)


# ----------------------------------------------------------------------------
# weight preparation (precomputed numpy tables, no .at[].set chains)
# ----------------------------------------------------------------------------
def conv3_offsets(lay):
    return [(kd - 1) * lay.Hp * lay.Wp + (kh - 1) * lay.Wp + (kw - 1)
            for kd in range(3) for kh in range(3) for kw in range(3)]


def conv3_weight_mat(w):
    """(Cout, Cin, 3,3,3) -> (Cout, 27*Cin), column block t <-> tap t (kd,kh,kw)."""
    c_out, c_in = w.shape[0], w.shape[1]
    return jnp.transpose(w.reshape(c_out, c_in, 27), (0, 2, 1)).reshape(c_out, 27 * c_in)


@functools.lru_cache(maxsize=None)
def _polyphase_tables():
    # k_idx[p, g]: which of the 27 transposed-conv taps feeds output parity p from
    # input offset group g; valid[p, g]: whether that (parity, offset) pair exists.
    k_idx = np.zeros((8, 8), np.int32)
    valid = np.zeros((8, 8), np.float32)
    groups = list(itertools.product((0, 1), repeat=3))
    for g, (dd, dh, dw) in enumerate(groups):
        for p, (pd, ph, pw) in enumerate(groups):
            if dd <= pd and dh <= ph and dw <= pw:
                kd = 0 if dd == 1 else (1 if pd == 0 else 2)
                kh = 0 if dh == 1 else (1 if ph == 0 else 2)
                kw = 0 if dw == 1 else (1 if pw == 0 else 2)
                k_idx[p, g] = kd * 9 + kh * 3 + kw
                valid[p, g] = 1.0
    return k_idx, valid


def polyphase_weights(w_t, lay):
    """ConvTranspose3d weight (Cin, Cout, 3,3,3) -> (8*Cout, 8*Cin) block matrix whose
    row blocks are the 8 output parities and column blocks the 8 input-offset groups,
    plus the matching flat offsets."""
    c_in, c_out = w_t.shape[0], w_t.shape[1]
    k_idx, valid = _polyphase_tables()
    wt_flat = w_t.reshape(c_in, c_out, 27)
    g = jnp.take(wt_flat, jnp.asarray(k_idx), axis=2)           # (ci, co, 8p, 8g)
    g = g * jnp.asarray(valid)[None, None]
    w_mat = jnp.transpose(g, (2, 1, 3, 0)).reshape(8 * c_out, 8 * c_in)
    offs = [dd * lay.Hp * lay.Wp + dh * lay.Wp + dw
            for (dd, dh, dw) in itertools.product((0, 1), repeat=3)]
    return w_mat, offs


# ----------------------------------------------------------------------------
# upsample (parity de-interleave) + pad + concat, directly in the flat layout
# ----------------------------------------------------------------------------
@functools.lru_cache(maxsize=None)
def _up_gather_idx_np(lay1, lay2):
    """For each flat position of the concat layout, the source column in the
    parity-major flattened transposed-conv output (or a zero column)."""
    zero_idx = 8 * lay1.L
    idx = np.full((lay2.L,), zero_idx, np.int64)
    Du, Hu, Wu = 2 * lay1.D - 1, 2 * lay1.H - 1, 2 * lay1.W - 1
    # Reproduce the module's F.pad axis pairing exactly (diffX/Y/Z are "swapped").
    diffY, diffX, diffZ = lay2.D - Du, lay2.H - Hu, lay2.W - Wu
    pad_d, pad_h, pad_w = diffZ // 2, diffY // 2, diffX // 2
    n, d, h, w = np.meshgrid(np.arange(lay2.N), np.arange(lay2.D),
                             np.arange(lay2.H), np.arange(lay2.W), indexing="ij")
    ud, uh, uw = d - pad_d, h - pad_h, w - pad_w
    valid = ((ud >= 0) & (ud < Du) & (uh >= 0) & (uh < Hu) & (uw >= 0) & (uw < Wu))
    p = (ud % 2) * 4 + (uh % 2) * 2 + (uw % 2)
    qd, qh, qw = ud // 2, uh // 2, uw // 2
    col1 = ((n * lay1.Dp + qd + 1) * lay1.Hp + qh + 1) * lay1.Wp + qw + 1
    src = np.where(valid, p * lay1.L + lay1.ts + col1, zero_idx)
    col2 = ((n * lay2.Dp + d + 1) * lay2.Hp + h + 1) * lay2.Wp + w + 1
    idx[lay2.ts + col2.ravel()] = src.ravel()
    return idx.astype(np.int32)


def upsample_pad_concat(ybuf, x2c, lay1, lay2):
    c_half = x2c.shape[0]
    idx = jnp.asarray(_up_gather_idx_np(lay1, lay2))
    yb = ybuf.reshape(8, c_half, lay1.L).transpose(1, 0, 2).reshape(c_half, 8 * lay1.L)
    yb = jnp.concatenate([yb, jnp.zeros((c_half, 1), yb.dtype)], axis=1)
    up = jnp.take(yb, idx, axis=1)                               # (c_half, L2)
    x2buf = pack(x2c, lay2, COMPUTE_DTYPE)
    return jnp.concatenate([x2buf, up], axis=0)                  # (2*c_half, L2)


# ----------------------------------------------------------------------------
# BatchNorm (training-mode batch statistics) affine parameters
# ----------------------------------------------------------------------------
def bn_affine(ssum, ssq, gamma, beta, lay):
    count = float(lay.N * lay.D * lay.H * lay.W)
    mean = ssum / count
    var = jnp.maximum(ssq / count - mean * mean, 0.0)   # biased (training-mode) variance
    inv = lax.rsqrt(var + EPS)
    scale = gamma * inv
    shift = beta - mean * scale
    return scale, shift


# ----------------------------------------------------------------------------
# TransConv forward
# ----------------------------------------------------------------------------
@jax.jit
def trans_conv_forward(x1, x2, params):
    # NCDHW -> channel-major (C, N, D, H, W) only at the module boundary.
    x1c = jnp.transpose(x1, (1, 0, 2, 3, 4))
    x2c = jnp.transpose(x2, (1, 0, 2, 3, 4))
    c_half, N, D1, H1, W1 = x1c.shape
    _, _, D2, H2, W2 = x2c.shape

    lay1 = make_layout(N, D1, H1, W1)
    lay2 = make_layout(N, D2, H2, W2)

    # ConvTranspose3d(k=3, s=2, p=1): polyphase tap decomposition, one pallas_call.
    xbuf1 = pack(x1c, lay1, COMPUTE_DTYPE)
    w_poly, offs1 = polyphase_weights(params["w_t"], lay1)
    b_poly = jnp.tile(params["b_t"], 8)
    ybuf = tap_conv(xbuf1, w_poly, b_poly, offs1, lay1, out_dtype=COMPUTE_DTYPE)

    # Parity de-interleave + F.pad + channel concat, written straight into the
    # DoubleConv's flat (C, L) layout via one precomputed gather.
    xcat = upsample_pad_concat(ybuf, x2c, lay1, lay2)
    mask2 = interior_mask(lay2)
    offs2 = conv3_offsets(lay2)

    # conv1 + per-tile BN stats (BN1/ReLU applied fused inside conv2's staging).
    w1 = conv3_weight_mat(params["w1"])
    y1, s1, q1 = tap_conv(xcat, w1, params["b1"], offs2, lay2,
                          with_stats=True, mask=mask2, out_dtype=COMPUTE_DTYPE)
    scale1, shift1 = bn_affine(s1, q1, params["g1"], params["be1"], lay2)

    # conv2 with fused BN1+ReLU on its input, + its own per-tile BN stats.
    w2 = conv3_weight_mat(params["w2"])
    y2, s2, q2 = tap_conv(y1, w2, params["b2"], offs2, lay2,
                          with_stats=True, mask=mask2,
                          bn_in=(scale1, shift1), out_dtype=jnp.float32)
    scale2, shift2 = bn_affine(s2, q2, params["g2"], params["be2"], lay2)

    # Final BN2 + ReLU apply (lane-dense, masks/zeros guard & halo columns).
    out_buf = bn_relu_apply(y2, scale2.reshape(-1, 1), shift2.reshape(-1, 1),
                            mask2, jnp.float32, lay2)

    out = unpack(out_buf, lay2)                  # (C_out, N, D, H, W)
    return jnp.transpose(out, (1, 0, 2, 3, 4))   # back to NCDHW


def init_params(key, in_channels, out_channels):
    half = in_channels // 2
    ks = jax.random.split(key, 6)
    scale = 0.1
    return {
        # ConvTranspose3d(half, half, 3, stride=2, padding=1): weight (Cin, Cout, 3,3,3)
        "w_t": scale * jax.random.normal(ks[0], (half, half, 3, 3, 3), jnp.float32),
        "b_t": scale * jax.random.normal(ks[1], (half,), jnp.float32),
        # Conv3d(in_channels, in_channels, 3, padding=1)
        "w1": scale * jax.random.normal(ks[2], (in_channels, in_channels, 3, 3, 3), jnp.float32),
        "b1": scale * jax.random.normal(ks[3], (in_channels,), jnp.float32),
        "g1": jnp.ones((in_channels,), jnp.float32),
        "be1": jnp.zeros((in_channels,), jnp.float32),
        # Conv3d(in_channels, out_channels, 3, padding=1)
        "w2": scale * jax.random.normal(ks[4], (out_channels, in_channels, 3, 3, 3), jnp.float32),
        "b2": scale * jax.random.normal(ks[5], (out_channels,), jnp.float32),
        "g2": jnp.ones((out_channels,), jnp.float32),
        "be2": jnp.zeros((out_channels,), jnp.float32),
    }


if __name__ == "__main__":
    in_channels, out_channels = 8, 4
    key = jax.random.PRNGKey(0)
    k1, k2, kp = jax.random.split(key, 3)

    # x1: decoder feature (N, in_channels//2, 4, 4, 4)
    # x2: skip connection (N, in_channels//2, 8, 8, 8)
    x1 = jax.random.normal(k1, (2, in_channels // 2, 4, 4, 4), jnp.float32)
    x2 = jax.random.normal(k2, (2, in_channels // 2, 8, 8, 8), jnp.float32)
    params = init_params(kp, in_channels, out_channels)

    out = trans_conv_forward(x1, x2, params)
    jax.block_until_ready(out)
    assert out.shape == (2, out_channels, 8, 8, 8), out.shape
    assert bool(jnp.all(jnp.isfinite(out)))
    print("KERNEL_OK")
</pallas_src>

<mosaic_0001>
module attributes {stable_mosaic.version = 11 : i64} {
  func.func @kernel(%arg0: i32, %arg1: memref<4x1024xbf16, #tpu.memory_space<vmem>>, %arg2: memref<4x128xbf16, #tpu.memory_space<vmem>>, %arg3: memref<4x128xbf16, #tpu.memory_space<vmem>>, %arg4: memref<32x32xbf16, #tpu.memory_space<vmem>>, %arg5: memref<32x1xf32, #tpu.memory_space<vmem>>, %arg6: memref<32x1024xbf16, #tpu.memory_space<vmem>>, %arg7: memref<4x1280xbf16, #tpu.memory_space<vmem>>, %arg8: memref<32x1024xbf16, #tpu.memory_space<vmem>>) attributes {dimension_semantics = [#tpu.dimension_semantics<parallel>], iteration_bounds = array<i64: 1>, scalar_prefetch = 0 : i64, scratch_operands = 2 : i64, tpu.core_type = #tpu.core_type<tc>, window_params = [{transform_indices = @transform_0, window_bounds = array<i64: 4, 1024>}, {transform_indices = @transform_1, window_bounds = array<i64: 4, 128>}, {transform_indices = @transform_2, window_bounds = array<i64: 4, 128>}, {pipeline_mode = #tpu.pipeline_mode<synchronous>, transform_indices = @transform_3, window_bounds = array<i64: 32, 32>}, {pipeline_mode = #tpu.pipeline_mode<synchronous>, transform_indices = @transform_4, window_bounds = array<i64: 32, 1>}, {transform_indices = @transform_5, window_bounds = array<i64: 32, 1024>}]} {
    %c0 = arith.constant 0 : index
    %c0_0 = arith.constant 0 : index
    %0 = vector.load %arg2[%c0, %c0_0] : memref<4x128xbf16, #tpu.memory_space<vmem>>, vector<4x128xbf16>
    %c0_1 = arith.constant 0 : index
    %c0_2 = arith.constant 0 : index
    %1 = vector.load %arg7[%c0_1, %c0_2] : memref<4x1280xbf16, #tpu.memory_space<vmem>>, vector<4x128xbf16>
    tpu.vector_store %arg7[%c0_1, %c0_2], %0 {strides = array<i32>} : memref<4x1280xbf16, #tpu.memory_space<vmem>>, vector<4x128xbf16>,
    %c0_3 = arith.constant 0 : index
    %c0_4 = arith.constant 0 : index
    %2 = vector.load %arg1[%c0_3, %c0_4] : memref<4x1024xbf16, #tpu.memory_space<vmem>>, vector<4x1024xbf16>
    %c0_5 = arith.constant 0 : index
    %c128 = arith.constant 128 : index
    %3 = vector.load %arg7[%c0_5, %c128] : memref<4x1280xbf16, #tpu.memory_space<vmem>>, vector<4x1024xbf16>
    tpu.vector_store %arg7[%c0_5, %c128], %2 {strides = array<i32>} : memref<4x1280xbf16, #tpu.memory_space<vmem>>, vector<4x1024xbf16>,
    %c0_6 = arith.constant 0 : index
    %c0_7 = arith.constant 0 : index
    %4 = vector.load %arg3[%c0_6, %c0_7] : memref<4x128xbf16, #tpu.memory_space<vmem>>, vector<4x128xbf16>
    %c0_8 = arith.constant 0 : index
    %c1152 = arith.constant 1152 : index
    %5 = vector.load %arg7[%c0_8, %c1152] : memref<4x1280xbf16, #tpu.memory_space<vmem>>, vector<4x128xbf16>
    tpu.vector_store %arg7[%c0_8, %c1152], %4 {strides = array<i32>} : memref<4x1280xbf16, #tpu.memory_space<vmem>>, vector<4x128xbf16>,
    %c0_9 = arith.constant 0 : index
    %c128_10 = arith.constant 128 : index
    %6 = vector.load %arg7[%c0_9, %c128_10] : memref<4x1280xbf16, #tpu.memory_space<vmem>>, vector<4x1024xbf16>
    %c0_11 = arith.constant 0 : index
    %c0_12 = arith.constant 0 : index
    %7 = vector.load %arg8[%c0_11, %c0_12] : memref<32x1024xbf16, #tpu.memory_space<vmem>>, vector<4x1024xbf16>
    tpu.vector_store %arg8[%c0_11, %c0_12], %6 {strides = array<i32>} : memref<32x1024xbf16, #tpu.memory_space<vmem>>, vector<4x1024xbf16>,
    %c0_13 = arith.constant 0 : index
    %c129 = arith.constant 129 : index
    %8 = vector.load %arg7[%c0_13, %c129] : memref<4x1280xbf16, #tpu.memory_space<vmem>>, vector<4x1024xbf16>
    %c4 = arith.constant 4 : index
    %c0_14 = arith.constant 0 : index
    %9 = vector.load %arg8[%c4, %c0_14] : memref<32x1024xbf16, #tpu.memory_space<vmem>>, vector<4x1024xbf16>
    tpu.vector_store %arg8[%c4, %c0_14], %8 {strides = array<i32>} : memref<32x1024xbf16, #tpu.memory_space<vmem>>, vector<4x1024xbf16>,
    %c0_15 = arith.constant 0 : index
    %c134 = arith.constant 134 : index
    %10 = vector.load %arg7[%c0_15, %c134] : memref<4x1280xbf16, #tpu.memory_space<vmem>>, vector<4x1024xbf16>
    %c8 = arith.constant 8 : index
    %c0_16 = arith.constant 0 : index
    %11 = vector.load %arg8[%c8, %c0_16] : memref<32x1024xbf16, #tpu.memory_space<vmem>>, vector<4x1024xbf16>
    tpu.vector_store %arg8[%c8, %c0_16], %10 {strides = array<i32>} : memref<32x1024xbf16, #tpu.memory_space<vmem>>, vector<4x1024xbf16>,
    %c0_17 = arith.constant 0 : index
    %c135 = arith.constant 135 : index
    %12 = vector.load %arg7[%c0_17, %c135] : memref<4x1280xbf16, #tpu.memory_space<vmem>>, vector<4x1024xbf16>
    %c12 = arith.constant 12 : index
    %c0_18 = arith.constant 0 : index
    %13 = vector.load %arg8[%c12, %c0_18] : memref<32x1024xbf16, #tpu.memory_space<vmem>>, vector<4x1024xbf16>
    tpu.vector_store %arg8[%c12, %c0_18], %12 {strides = array<i32>} : memref<32x1024xbf16, #tpu.memory_space<vmem>>, vector<4x1024xbf16>,
    %c0_19 = arith.constant 0 : index
    %c164 = arith.constant 164 : index
    %14 = vector.load %arg7[%c0_19, %c164] : memref<4x1280xbf16, #tpu.memory_space<vmem>>, vector<4x1024xbf16>
    %c16 = arith.constant 16 : index
    %c0_20 = arith.constant 0 : index
    %15 = vector.load %arg8[%c16, %c0_20] : memref<32x1024xbf16, #tpu.memory_space<vmem>>, vector<4x1024xbf16>
    tpu.vector_store %arg8[%c16, %c0_20], %14 {strides = array<i32>} : memref<32x1024xbf16, #tpu.memory_space<vmem>>, vector<4x1024xbf16>,
    %c0_21 = arith.constant 0 : index
    %c165 = arith.constant 165 : index
    %16 = vector.load %arg7[%c0_21, %c165] : memref<4x1280xbf16, #tpu.memory_space<vmem>>, vector<4x1024xbf16>
    %c20 = arith.constant 20 : index
    %c0_22 = arith.constant 0 : index
    %17 = vector.load %arg8[%c20, %c0_22] : memref<32x1024xbf16, #tpu.memory_space<vmem>>, vector<4x1024xbf16>
    tpu.vector_store %arg8[%c20, %c0_22], %16 {strides = array<i32>} : memref<32x1024xbf16, #tpu.memory_space<vmem>>, vector<4x1024xbf16>,
    %c0_23 = arith.constant 0 : index
    %c170 = arith.constant 170 : index
    %18 = vector.load %arg7[%c0_23, %c170] : memref<4x1280xbf16, #tpu.memory_space<vmem>>, vector<4x1024xbf16>
    %c24 = arith.constant 24 : index
    %c0_24 = arith.constant 0 : index
    %19 = vector.load %arg8[%c24, %c0_24] : memref<32x1024xbf16, #tpu.memory_space<vmem>>, vector<4x1024xbf16>
    tpu.vector_store %arg8[%c24, %c0_24], %18 {strides = array<i32>} : memref<32x1024xbf16, #tpu.memory_space<vmem>>, vector<4x1024xbf16>,
    %c0_25 = arith.constant 0 : index
    %c171 = arith.constant 171 : index
    %20 = vector.load %arg7[%c0_25, %c171] : memref<4x1280xbf16, #tpu.memory_space<vmem>>, vector<4x1024xbf16>
    %c28 = arith.constant 28 : index
    %c0_26 = arith.constant 0 : index
    %21 = vector.load %arg8[%c28, %c0_26] : memref<32x1024xbf16, #tpu.memory_space<vmem>>, vector<4x1024xbf16>
    tpu.vector_store %arg8[%c28, %c0_26], %20 {strides = array<i32>} : memref<32x1024xbf16, #tpu.memory_space<vmem>>, vector<4x1024xbf16>,
    %c0_27 = arith.constant 0 : index
    %c0_28 = arith.constant 0 : index
    %22 = vector.load %arg4[%c0_27, %c0_28] : memref<32x32xbf16, #tpu.memory_space<vmem>>, vector<32x32xbf16>
    %c0_29 = arith.constant 0 : index
    %c0_30 = arith.constant 0 : index
    %23 = vector.load %arg8[%c0_29, %c0_30] : memref<32x1024xbf16, #tpu.memory_space<vmem>>, vector<32x1024xbf16>
    %cst = arith.constant dense<0.000000e+00> : vector<32x1024xf32>
    %24 = tpu.matmul %22, %23, %cst {dimension_numbers = #tpu.dot_dimension_numbers<[1], [0], [0], [1], [0, 0, 1, 1], [], []>} : vector<32x32xbf16>, vector<32x1024xbf16>, vector<32x1024xf32> -> vector<32x1024xf32>
    %c0_31 = arith.constant 0 : index
    %c0_32 = arith.constant 0 : index
    %25 = vector.load %arg5[%c0_31, %c0_32] : memref<32x1xf32, #tpu.memory_space<vmem>>, vector<32x1xf32>
    %26 = vector.broadcast %25 : vector<32x1xf32> to vector<32x1024xf32>
    %27 = arith.addf %24, %26 : vector<32x1024xf32>
    %28 = arith.truncf %27 : vector<32x1024xf32> to vector<32x1024xbf16>
    %c0_33 = arith.constant 0 : index
    %c0_34 = arith.constant 0 : index
    %29 = vector.load %arg6[%c0_33, %c0_34] : memref<32x1024xbf16, #tpu.memory_space<vmem>>, vector<32x1024xbf16>
    tpu.vector_store %arg6[%c0_33, %c0_34], %28 {strides = array<i32>} : memref<32x1024xbf16, #tpu.memory_space<vmem>>, vector<32x1024xbf16>,
    return
  }
  func.func @transform_0(%arg0: i32) -> (i32, i32) {
    %c1_i32 = arith.constant 1 : i32
    %0 = arith.addi %arg0, %c1_i32 : i32
    %c0_i32 = arith.constant 0 : i32
    %c0_i32_0 = arith.constant 0 : i32
    return %c0_i32, %0 : i32, i32
  }
  func.func @transform_1(%arg0: i32) -> (i32, i32) {
    %c1_i32 = arith.constant 1 : i32
    %0 = arith.addi %arg0, %c1_i32 : i32
    %c8_i32 = arith.constant 8 : i32
    %1 = arith.muli %0, %c8_i32 : i32
    %c1_i32_0 = arith.constant 1 : i32
    %2 = arith.subi %1, %c1_i32_0 : i32
    %c0_i32 = arith.constant 0 : i32
    %c0_i32_1 = arith.constant 0 : i32
    return %c0_i32, %2 : i32, i32
  }
  func.func @transform_2(%arg0: i32) -> (i32, i32) {
    %c2_i32 = arith.constant 2 : i32
    %0 = arith.addi %arg0, %c2_i32 : i32
    %c8_i32 = arith.constant 8 : i32
    %1 = arith.muli %0, %c8_i32 : i32
    %c0_i32 = arith.constant 0 : i32
    %c0_i32_0 = arith.constant 0 : i32
    return %c0_i32, %1 : i32, i32
  }
  func.func @transform_3(%arg0: i32) -> (i32, i32) {
    %c0_i32 = arith.constant 0 : i32
    %c0_i32_0 = arith.constant 0 : i32
    %c0_i32_1 = arith.constant 0 : i32
    return %c0_i32, %c0_i32_0 : i32, i32
  }
  func.func @transform_4(%arg0: i32) -> (i32, i32) {
    %c0_i32 = arith.constant 0 : i32
    %c0_i32_0 = arith.constant 0 : i32
    %c0_i32_1 = arith.constant 0 : i32
    return %c0_i32, %c0_i32_0 : i32, i32
  }
  func.func @transform_5(%arg0: i32) -> (i32, i32) {
    %c1_i32 = arith.constant 1 : i32
    %0 = arith.addi %arg0, %c1_i32 : i32
    %c0_i32 = arith.constant 0 : i32
    %c0_i32_0 = arith.constant 0 : i32
    return %c0_i32, %0 : i32, i32
  }
}

module attributes {stable_mosaic.version = 11 : i64} {
  func.func @kernel(%arg0: i32, %arg1: memref<8x1024xbf16, #tpu.memory_space<vmem>>, %arg2: memref<8x128xbf16, #tpu.memory_space<vmem>>, %arg3: memref<8x128xbf16, #tpu.memory_space<vmem>>, %arg4: memref<8x216xbf16, #tpu.memory_space<vmem>>, %arg5: memref<8x1xf32, #tpu.memory_space<vmem>>, %arg6: memref<1x1024xf32, #tpu.memory_space<vmem>>, %arg7: memref<8x1024xbf16, #tpu.memory_space<vmem>>, %arg8: memref<8x128xf32, #tpu.memory_space<vmem>>, %arg9: memref<8x1280xbf16, #tpu.memory_space<vmem>>, %arg10: memref<216x1024xbf16, #tpu.memory_space<vmem>>) attributes {dimension_semantics = [#tpu.dimension_semantics<parallel>], iteration_bounds = array<i64: 2>, scalar_prefetch = 0 : i64, scratch_operands = 2 : i64, tpu.core_type = #tpu.core_type<tc>, window_params = [{transform_indices = @transform_0, window_bounds = array<i64: 8, 1024>}, {transform_indices = @transform_1, window_bounds = array<i64: 8, 128>}, {transform_indices = @transform_2, window_bounds = array<i64: 8, 128>}, {pipeline_mode = #tpu.pipeline_mode<synchronous>, transform_indices = @transform_3, window_bounds = array<i64: 8, 216>}, {pipeline_mode = #tpu.pipeline_mode<synchronous>, transform_indices = @transform_4, window_bounds = array<i64: 8, 1>}, {transform_indices = @transform_5, window_bounds = array<i64: 1, 1024>}, {transform_indices = @transform_6, window_bounds = array<i64: 8, 1024>}, {transform_indices = @transform_7, window_bounds = array<i64: 8, 128>}]} {
    %c0 = arith.constant 0 : index
    %c0_0 = arith.constant 0 : index
    %0 = vector.load %arg2[%c0, %c0_0] : memref<8x128xbf16, #tpu.memory_space<vmem>>, vector<8x128xbf16>
    %c0_1 = arith.constant 0 : index
    %c0_2 = arith.constant 0 : index
    %1 = vector.load %arg9[%c0_1, %c0_2] : memref<8x1280xbf16, #tpu.memory_space<vmem>>, vector<8x128xbf16>
    tpu.vector_store %arg9[%c0_1, %c0_2], %0 {strides = array<i32>} : memref<8x1280xbf16, #tpu.memory_space<vmem>>, vector<8x128xbf16>,
    %c0_3 = arith.constant 0 : index
    %c0_4 = arith.constant 0 : index
    %2 = vector.load %arg1[%c0_3, %c0_4] : memref<8x1024xbf16, #tpu.memory_space<vmem>>, vector<8x1024xbf16>
    %c0_5 = arith.constant 0 : index
    %c128 = arith.constant 128 : index
    %3 = vector.load %arg9[%c0_5, %c128] : memref<8x1280xbf16, #tpu.memory_space<vmem>>, vector<8x1024xbf16>
    tpu.vector_store %arg9[%c0_5, %c128], %2 {strides = array<i32>} : memref<8x1280xbf16, #tpu.memory_space<vmem>>, vector<8x1024xbf16>,
    %c0_6 = arith.constant 0 : index
    %c0_7 = arith.constant 0 : index
    %4 = vector.load %arg3[%c0_6, %c0_7] : memref<8x128xbf16, #tpu.memory_space<vmem>>, vector<8x128xbf16>
    %c0_8 = arith.constant 0 : index
    %c1152 = arith.constant 1152 : index
    %5 = vector.load %arg9[%c0_8, %c1152] : memref<8x1280xbf16, #tpu.memory_space<vmem>>, vector<8x128xbf16>
    tpu.vector_store %arg9[%c0_8, %c1152], %4 {strides = array<i32>} : memref<8x1280xbf16, #tpu.memory_space<vmem>>, vector<8x128xbf16>,
    %c0_9 = arith.constant 0 : index
    %c17 = arith.constant 17 : index
    %6 = vector.load %arg9[%c0_9, %c17] : memref<8x1280xbf16, #tpu.memory_space<vmem>>, vector<8x1024xbf16>
    %c0_10 = arith.constant 0 : index
    %c0_11 = arith.constant 0 : index
    %7 = vector.load %arg10[%c0_10, %c0_11] : memref<216x1024xbf16, #tpu.memory_space<vmem>>, vector<8x1024xbf16>
    tpu.vector_store %arg10[%c0_10, %c0_11], %6 {strides = array<i32>} : memref<216x1024xbf16, #tpu.memory_space<vmem>>, vector<8x1024xbf16>,
    %c0_12 = arith.constant 0 : index
    %c18 = arith.constant 18 : index
    %8 = vector.load %arg9[%c0_12, %c18] : memref<8x1280xbf16, #tpu.memory_space<vmem>>, vector<8x1024xbf16>
    %c8 = arith.constant 8 : index
    %c0_13 = arith.constant 0 : index
    %9 = vector.load %arg10[%c8, %c0_13] : memref<216x1024xbf16, #tpu.memory_space<vmem>>, vector<8x1024xbf16>
    tpu.vector_store %arg10[%c8, %c0_13], %8 {strides = array<i32>} : memref<216x1024xbf16, #tpu.memory_space<vmem>>, vector<8x1024xbf16>,
    %c0_14 = arith.constant 0 : index
    %c19 = arith.constant 19 : index
    %10 = vector.load %arg9[%c0_14, %c19] : memref<8x1280xbf16, #tpu.memory_space<vmem>>, vector<8x1024xbf16>
    %c16 = arith.constant 16 : index
    %c0_15 = arith.constant 0 : index
    %11 = vector.load %arg10[%c16, %c0_15] : memref<216x1024xbf16, #tpu.memory_space<vmem>>, vector<8x1024xbf16>
    tpu.vector_store %arg10[%c16, %c0_15], %10 {strides = array<i32>} : memref<216x1024xbf16, #tpu.memory_space<vmem>>, vector<8x1024xbf16>,
    %c0_16 = arith.constant 0 : index
    %c27 = arith.constant 27 : index
    %12 = vector.load %arg9[%c0_16, %c27] : memref<8x1280xbf16, #tpu.memory_space<vmem>>, vector<8x1024xbf16>
    %c24 = arith.constant 24 : index
    %c0_17 = arith.constant 0 : index
    %13 = vector.load %arg10[%c24, %c0_17] : memref<216x1024xbf16, #tpu.memory_space<vmem>>, vector<8x1024xbf16>
    tpu.vector_store %arg10[%c24, %c0_17], %12 {strides = array<i32>} : memref<216x1024xbf16, #tpu.memory_space<vmem>>, vector<8x1024xbf16>,
    %c0_18 = arith.constant 0 : index
    %c28 = arith.constant 28 : index
    %14 = vector.load %arg9[%c0_18, %c28] : memref<8x1280xbf16, #tpu.memory_space<vmem>>, vector<8x1024xbf16>
    %c32 = arith.constant 32 : index
    %c0_19 = arith.constant 0 : index
    %15 = vector.load %arg10[%c32, %c0_19] : memref<216x1024xbf16, #tpu.memory_space<vmem>>, vector<8x1024xbf16>
    tpu.vector_store %arg10[%c32, %c0_19], %14 {strides = array<i32>} : memref<216x1024xbf16, #tpu.memory_space<vmem>>, vector<8x1024xbf16>,
    %c0_20 = arith.constant 0 : index
    %c29 = arith.constant 29 : index
    %16 = vector.load %arg9[%c0_20, %c29] : memref<8x1280xbf16, #tpu.memory_space<vmem>>, vector<8x1024xbf16>
    %c40 = arith.constant 40 : index
    %c0_21 = arith.constant 0 : index
    %17 = vector.load %arg10[%c40, %c0_21] : memref<216x1024xbf16, #tpu.memory_space<vmem>>, vector<8x1024xbf16>
    tpu.vector_store %arg10[%c40, %c0_21], %16 {strides = array<i32>} : memref<216x1024xbf16, #tpu.memory_space<vmem>>, vector<8x1024xbf16>,
    %c0_22 = arith.constant 0 : index
    %c37 = arith.constant 37 : index
    %18 = vector.load %arg9[%c0_22, %c37] : memref<8x1280xbf16, #tpu.memory_space<vmem>>, vector<8x1024xbf16>
    %c48 = arith.constant 48 : index
    %c0_23 = arith.constant 0 : index
    %19 = vector.load %arg10[%c48, %c0_23] : memref<216x1024xbf16, #tpu.memory_space<vmem>>, vector<8x1024xbf16>
    tpu.vector_store %arg10[%c48, %c0_23], %18 {strides = array<i32>} : memref<216x1024xbf16, #tpu.memory_space<vmem>>, vector<8x1024xbf16>,
    %c0_24 = arith.constant 0 : index
    %c38 = arith.constant 38 : index
    %20 = vector.load %arg9[%c0_24, %c38] : memref<8x1280xbf16, #tpu.memory_space<vmem>>, vector<8x1024xbf16>
    %c56 = arith.constant 56 : index
    %c0_25 = arith.constant 0 : index
    %21 = vector.load %arg10[%c56, %c0_25] : memref<216x1024xbf16, #tpu.memory_space<vmem>>, vector<8x1024xbf16>
    tpu.vector_store %arg10[%c56, %c0_25], %20 {strides = array<i32>} : memref<216x1024xbf16, #tpu.memory_space<vmem>>, vector<8x1024xbf16>,
    %c0_26 = arith.constant 0 : index
    %c39 = arith.constant 39 : index
    %22 = vector.load %arg9[%c0_26, %c39] : memref<8x1280xbf16, #tpu.memory_space<vmem>>, vector<8x1024xbf16>
    %c64 = arith.constant 64 : index
    %c0_27 = arith.constant 0 : index
    %23 = vector.load %arg10[%c64, %c0_27] : memref<216x1024xbf16, #tpu.memory_space<vmem>>, vector<8x1024xbf16>
    tpu.vector_store %arg10[%c64, %c0_27], %22 {strides = array<i32>} : memref<216x1024xbf16, #tpu.memory_space<vmem>>, vector<8x1024xbf16>,
    %c0_28 = arith.constant 0 : index
    %c117 = arith.constant 117 : index
    %24 = vector.load %arg9[%c0_28, %c117] : memref<8x1280xbf16, #tpu.memory_space<vmem>>, vector<8x1024xbf16>
    %c72 = arith.constant 72 : index
    %c0_29 = arith.constant 0 : index
    %25 = vector.load %arg10[%c72, %c0_29] : memref<216x1024xbf16, #tpu.memory_space<vmem>>, vector<8x1024xbf16>
    tpu.vector_store %arg10[%c72, %c0_29], %24 {strides = array<i32>} : memref<216x1024xbf16, #tpu.memory_space<vmem>>, vector<8x1024xbf16>,
    %c0_30 = arith.constant 0 : index
    %c118 = arith.constant 118 : index
    %26 = vector.load %arg9[%c0_30, %c118] : memref<8x1280xbf16, #tpu.memory_space<vmem>>, vector<8x1024xbf16>
    %c80 = arith.constant 80 : index
    %c0_31 = arith.constant 0 : index
    %27 = vector.load %arg10[%c80, %c0_31] : memref<216x1024xbf16, #tpu.memory_space<vmem>>, vector<8x1024xbf16>
    tpu.vector_store %arg10[%c80, %c0_31], %26 {strides = array<i32>} : memref<216x1024xbf16, #tpu.memory_space<vmem>>, vector<8x1024xbf16>,
    %c0_32 = arith.constant 0 : index
    %c119 = arith.constant 119 : index
    %28 = vector.load %arg9[%c0_32, %c119] : memref<8x1280xbf16, #tpu.memory_space<vmem>>, vector<8x1024xbf16>
    %c88 = arith.constant 88 : index
    %c0_33 = arith.constant 0 : index
    %29 = vector.load %arg10[%c88, %c0_33] : memref<216x1024xbf16, #tpu.memory_space<vmem>>, vector<8x1024xbf16>
    tpu.vector_store %arg10[%c88, %c0_33], %28 {strides = array<i32>} : memref<216x1024xbf16, #tpu.memory_space<vmem>>, vector<8x1024xbf16>,
    %c0_34 = arith.constant 0 : index
    %c127 = arith.constant 127 : index
    %30 = vector.load %arg9[%c0_34, %c127] : memref<8x1280xbf16, #tpu.memory_space<vmem>>, vector<8x1024xbf16>
    %c96 = arith.constant 96 : index
    %c0_35 = arith.constant 0 : index
    %31 = vector.load %arg10[%c96, %c0_35] : memref<216x1024xbf16, #tpu.memory_space<vmem>>, vector<8x1024xbf16>
    tpu.vector_store %arg10[%c96, %c0_35], %30 {strides = array<i32>} : memref<216x1024xbf16, #tpu.memory_space<vmem>>, vector<8x1024xbf16>,
    %c0_36 = arith.constant 0 : index
    %c128_37 = arith.constant 128 : index
    %32 = vector.load %arg9[%c0_36, %c128_37] : memref<8x1280xbf16, #tpu.memory_space<vmem>>, vector<8x1024xbf16>
    %c104 = arith.constant 104 : index
    %c0_38 = arith.constant 0 : index
    %33 = vector.load %arg10[%c104, %c0_38] : memref<216x1024xbf16, #tpu.memory_space<vmem>>, vector<8x1024xbf16>
    tpu.vector_store %arg10[%c104, %c0_38], %32 {strides = array<i32>} : memref<216x1024xbf16, #tpu.memory_space<vmem>>, vector<8x1024xbf16>,
    %c0_39 = arith.constant 0 : index
    %c129 = arith.constant 129 : index
    %34 = vector.load %arg9[%c0_39, %c129] : memref<8x1280xbf16, #tpu.memory_space<vmem>>, vector<8x1024xbf16>
    %c112 = arith.constant 112 : index
    %c0_40 = arith.constant 0 : index
    %35 = vector.load %arg10[%c112, %c0_40] : memref<216x1024xbf16, #tpu.memory_space<vmem>>, vector<8x1024xbf16>
    tpu.vector_store %arg10[%c112, %c0_40], %34 {strides = array<i32>} : memref<216x1024xbf16, #tpu.memory_space<vmem>>, vector<8x1024xbf16>,
    %c0_41 = arith.constant 0 : index
    %c137 = arith.constant 137 : index
    %36 = vector.load %arg9[%c0_41, %c137] : memref<8x1280xbf16, #tpu.memory_space<vmem>>, vector<8x1024xbf16>
    %c120 = arith.constant 120 : index
    %c0_42 = arith.constant 0 : index
    %37 = vector.load %arg10[%c120, %c0_42] : memref<216x1024xbf16, #tpu.memory_space<vmem>>, vector<8x1024xbf16>
    tpu.vector_store %arg10[%c120, %c0_42], %36 {strides = array<i32>} : memref<216x1024xbf16, #tpu.memory_space<vmem>>, vector<8x1024xbf16>,
    %c0_43 = arith.constant 0 : index
    %c138 = arith.constant 138 : index
    %38 = vector.load %arg9[%c0_43, %c138] : memref<8x1280xbf16, #tpu.memory_space<vmem>>, vector<8x1024xbf16>
    %c128_44 = arith.constant 128 : index
    %c0_45 = arith.constant 0 : index
    %39 = vector.load %arg10[%c128_44, %c0_45] : memref<216x1024xbf16, #tpu.memory_space<vmem>>, vector<8x1024xbf16>
    tpu.vector_store %arg10[%c128_44, %c0_45], %38 {strides = array<i32>} : memref<216x1024xbf16, #tpu.memory_space<vmem>>, vector<8x1024xbf16>,
    %c0_46 = arith.constant 0 : index
    %c139 = arith.constant 139 : index
    %40 = vector.load %arg9[%c0_46, %c139] : memref<8x1280xbf16, #tpu.memory_space<vmem>>, vector<8x1024xbf16>
    %c136 = arith.constant 136 : index
    %c0_47 = arith.constant 0 : index
    %41 = vector.load %arg10[%c136, %c0_47] : memref<216x1024xbf16, #tpu.memory_space<vmem>>, vector<8x1024xbf16>
    tpu.vector_store %arg10[%c136, %c0_47], %40 {strides = array<i32>} : memref<216x1024xbf16, #tpu.memory_space<vmem>>, vector<8x1024xbf16>,
    %c0_48 = arith.constant 0 : index
    %c217 = arith.constant 217 : index
    %42 = vector.load %arg9[%c0_48, %c217] : memref<8x1280xbf16, #tpu.memory_space<vmem>>, vector<8x1024xbf16>
    %c144 = arith.constant 144 : index
    %c0_49 = arith.constant 0 : index
    %43 = vector.load %arg10[%c144, %c0_49] : memref<216x1024xbf16, #tpu.memory_space<vmem>>, vector<8x1024xbf16>
    tpu.vector_store %arg10[%c144, %c0_49], %42 {strides = array<i32>} : memref<216x1024xbf16, #tpu.memory_space<vmem>>, vector<8x1024xbf16>,
    %c0_50 = arith.constant 0 : index
    %c218 = arith.constant 218 : index
    %44 = vector.load %arg9[%c0_50, %c218] : memref<8x1280xbf16, #tpu.memory_space<vmem>>, vector<8x1024xbf16>
    %c152 = arith.constant 152 : index
    %c0_51 = arith.constant 0 : index
    %45 = vector.load %arg10[%c152, %c0_51] : memref<216x1024xbf16, #tpu.memory_space<vmem>>, vector<8x1024xbf16>
    tpu.vector_store %arg10[%c152, %c0_51], %44 {strides = array<i32>} : memref<216x1024xbf16, #tpu.memory_space<vmem>>, vector<8x1024xbf16>,
    %c0_52 = arith.constant 0 : index
    %c219 = arith.constant 219 : index
    %46 = vector.load %arg9[%c0_52, %c219] : memref<8x1280xbf16, #tpu.memory_space<vmem>>, vector<8x1024xbf16>
    %c160 = arith.constant 160 : index
    %c0_53 = arith.constant 0 : index
    %47 = vector.load %arg10[%c160, %c0_53] : memref<216x1024xbf16, #tpu.memory_space<vmem>>, vector<8x1024xbf16>
    tpu.vector_store %arg10[%c160, %c0_53], %46 {strides = array<i32>} : memref<216x1024xbf16, #tpu.memory_space<vmem>>, vector<8x1024xbf16>,
    %c0_54 = arith.constant 0 : index
    %c227 = arith.constant 227 : index
    %48 = vector.load %arg9[%c0_54, %c227] : memref<8x1280xbf16, #tpu.memory_space<vmem>>, vector<8x1024xbf16>
    %c168 = arith.constant 168 : index
    %c0_55 = arith.constant 0 : index
    %49 = vector.load %arg10[%c168, %c0_55] : memref<216x1024xbf16, #tpu.memory_space<vmem>>, vector<8x1024xbf16>
    tpu.vector_store %arg10[%c168, %c0_55], %48 {strides = array<i32>} : memref<216x1024xbf16, #tpu.memory_space<vmem>>, vector<8x1024xbf16>,
    %c0_56 = arith.constant 0 : index
    %c228 = arith.constant 228 : index
    %50 = vector.load %arg9[%c0_56, %c228] : memref<8x1280xbf16, #tpu.memory_space<vmem>>, vector<8x1024xbf16>
    %c176 = arith.constant 176 : index
    %c0_57 = arith.constant 0 : index
    %51 = vector.load %arg10[%c176, %c0_57] : memref<216x1024xbf16, #tpu.memory_space<vmem>>, vector<8x1024xbf16>
    tpu.vector_store %arg10[%c176, %c0_57], %50 {strides = array<i32>} : memref<216x1024xbf16, #tpu.memory_space<vmem>>, vector<8x1024xbf16>,
    %c0_58 = arith.constant 0 : index
    %c229 = arith.constant 229 : index
    %52 = vector.load %arg9[%c0_58, %c229] : memref<8x1280xbf16, #tpu.memory_space<vmem>>, vector<8x1024xbf16>
    %c184 = arith.constant 184 : index
    %c0_59 = arith.constant 0 : index
    %53 = vector.load %arg10[%c184, %c0_59] : memref<216x1024xbf16, #tpu.memory_space<vmem>>, vector<8x1024xbf16>
    tpu.vector_store %arg10[%c184, %c0_59], %52 {strides = array<i32>} : memref<216x1024xbf16, #tpu.memory_space<vmem>>, vector<8x1024xbf16>,
    %c0_60 = arith.constant 0 : index
    %c237 = arith.constant 237 : index
    %54 = vector.load %arg9[%c0_60, %c237] : memref<8x1280xbf16, #tpu.memory_space<vmem>>, vector<8x1024xbf16>
    %c192 = arith.constant 192 : index
    %c0_61 = arith.constant 0 : index
    %55 = vector.load %arg10[%c192, %c0_61] : memref<216x1024xbf16, #tpu.memory_space<vmem>>, vector<8x1024xbf16>
    tpu.vector_store %arg10[%c192, %c0_61], %54 {strides = array<i32>} : memref<216x1024xbf16, #tpu.memory_space<vmem>>, vector<8x1024xbf16>,
    %c0_62 = arith.constant 0 : index
    %c238 = arith.constant 238 : index
    %56 = vector.load %arg9[%c0_62, %c238] : memref<8x1280xbf16, #tpu.memory_space<vmem>>, vector<8x1024xbf16>
    %c200 = arith.constant 200 : index
    %c0_63 = arith.constant 0 : index
    %57 = vector.load %arg10[%c200, %c0_63] : memref<216x1024xbf16, #tpu.memory_space<vmem>>, vector<8x1024xbf16>
    tpu.vector_store %arg10[%c200, %c0_63], %56 {strides = array<i32>} : memref<216x1024xbf16, #tpu.memory_space<vmem>>, vector<8x1024xbf16>,
    %c0_64 = arith.constant 0 : index
    %c239 = arith.constant 239 : index
    %58 = vector.load %arg9[%c0_64, %c239] : memref<8x1280xbf16, #tpu.memory_space<vmem>>, vector<8x1024xbf16>
    %c208 = arith.constant 208 : index
    %c0_65 = arith.constant 0 : index
    %59 = vector.load %arg10[%c208, %c0_65] : memref<216x1024xbf16, #tpu.memory_space<vmem>>, vector<8x1024xbf16>
    tpu.vector_store %arg10[%c208, %c0_65], %58 {strides = array<i32>} : memref<216x1024xbf16, #tpu.memory_space<vmem>>, vector<8x1024xbf16>,
    %c0_66 = arith.constant 0 : index
    %c0_67 = arith.constant 0 : index
    %60 = vector.load %arg4[%c0_66, %c0_67] : memref<8x216xbf16, #tpu.memory_space<vmem>>, vector<8x216xbf16>
    %c0_68 = arith.constant 0 : index
    %c0_69 = arith.constant 0 : index
    %61 = vector.load %arg10[%c0_68, %c0_69] : memref<216x1024xbf16, #tpu.memory_space<vmem>>, vector<216x1024xbf16>
    %cst = arith.constant dense<0.000000e+00> : vector<8x1024xf32>
    %62 = tpu.matmul %60, %61, %cst {dimension_numbers = #tpu.dot_dimension_numbers<[1], [0], [0], [1], [0, 0, 1, 1], [], []>} : vector<8x216xbf16>, vector<216x1024xbf16>, vector<8x1024xf32> -> vector<8x1024xf32>
    %c0_70 = arith.constant 0 : index
    %c0_71 = arith.constant 0 : index
    %63 = vector.load %arg5[%c0_70, %c0_71] : memref<8x1xf32, #tpu.memory_space<vmem>>, vector<8x1xf32>
    %64 = vector.broadcast %63 : vector<8x1xf32> to vector<8x1024xf32>
    %65 = arith.addf %62, %64 : vector<8x1024xf32>
    %66 = arith.truncf %65 : vector<8x1024xf32> to vector<8x1024xbf16>
    %c0_72 = arith.constant 0 : index
    %c0_73 = arith.constant 0 : index
    %67 = vector.load %arg7[%c0_72, %c0_73] : memref<8x1024xbf16, #tpu.memory_space<vmem>>, vector<8x1024xbf16>
    tpu.vector_store %arg7[%c0_72, %c0_73], %66 {strides = array<i32>} : memref<8x1024xbf16, #tpu.memory_space<vmem>>, vector<8x1024xbf16>,
    %c0_74 = arith.constant 0 : index
    %c0_75 = arith.constant 0 : index
    %68 = vector.load %arg6[%c0_74, %c0_75] : memref<1x1024xf32, #tpu.memory_space<vmem>>, vector<1x1024xf32>
    %cst_76 = arith.constant 5.000000e-01 : f32
    %69 = vector.broadcast %cst_76 : f32 to vector<1x1024xf32>
    %70 = arith.cmpf ogt, %68, %69 : vector<1x1024xf32>
    %cst_77 = arith.constant 0.000000e+00 : f32
    %71 = vector.shape_cast %70 : vector<1x1024xi1> to vector<1x1024xi1>
    %72 = vector.broadcast %71 : vector<1x1024xi1> to vector<8x1024xi1>
    %73 = vector.broadcast %cst_77 : f32 to vector<8x1024xf32>
    %74 = arith.select %72, %65, %73 : vector<8x1024xi1>, vector<8x1024xf32>
    %cst_78 = arith.constant dense<0.000000e+00> : vector<8xf32>
    %75 = vector.multi_reduction <add>, %74, %cst_78 [1] : vector<8x1024xf32> to vector<8xf32>
    %76 = vector.shape_cast %75 : vector<8xf32> to vector<8x1xf32>
    %77 = arith.mulf %74, %74 : vector<8x1024xf32>
    %cst_79 = arith.constant dense<0.000000e+00> : vector<8xf32>
    %78 = vector.multi_reduction <add>, %77, %cst_79 [1] : vector<8x1024xf32> to vector<8xf32>
    %79 = vector.shape_cast %78 : vector<8xf32> to vector<8x1xf32>
    %80 = tpu.iota {dimensions = array<i32: 1>} : vector<8x128xi32>
    %c0_i32 = arith.constant 0 : i32
    %81 = vector.broadcast %c0_i32 : i32 to vector<8x128xi32>
    %82 = arith.cmpi eq, %80, %81 : vector<8x128xi32>
    %c1_i32 = arith.constant 1 : i32
    %83 = vector.broadcast %c1_i32 : i32 to vector<8x128xi32>
    %84 = arith.cmpi eq, %80, %83 : vector<8x128xi32>
    %cst_80 = arith.constant 0.000000e+00 : f32
    %85 = vector.shape_cast %79 : vector<8x1xf32> to vector<8x1xf32>
    %86 = vector.broadcast %85 : vector<8x1xf32> to vector<8x128xf32>
    %87 = vector.broadcast %cst_80 : f32 to vector<8x128xf32>
    %88 = arith.select %84, %86, %87 : vector<8x128xi1>, vector<8x128xf32>
    %89 = vector.shape_cast %76 : vector<8x1xf32> to vector<8x1xf32>
    %90 = vector.broadcast %89 : vector<8x1xf32> to vector<8x128xf32>
    %91 = arith.select %82, %90, %88 : vector<8x128xi1>, vector<8x128xf32>
    %c0_81 = arith.constant 0 : index
    %c0_82 = arith.constant 0 : index
    %92 = vector.load %arg8[%c0_81, %c0_82] : memref<8x128xf32, #tpu.memory_space<vmem>>, vector<8x128xf32>
    tpu.vector_store %arg8[%c0_81, %c0_82], %91 {strides = array<i32>} : memref<8x128xf32, #tpu.memory_space<vmem>>, vector<8x128xf32>,
    return
  }
  func.func @transform_0(%arg0: i32) -> (i32, i32) {
    %c1_i32 = arith.constant 1 : i32
    %0 = arith.addi %arg0, %c1_i32 : i32
    %c0_i32 = arith.constant 0 : i32
    %c0_i32_0 = arith.constant 0 : i32
    return %c0_i32, %0 : i32, i32
  }
  func.func @transform_1(%arg0: i32) -> (i32, i32) {
    %c1_i32 = arith.constant 1 : i32
    %0 = arith.addi %arg0, %c1_i32 : i32
    %c8_i32 = arith.constant 8 : i32
    %1 = arith.muli %0, %c8_i32 : i32
    %c1_i32_0 = arith.constant 1 : i32
    %2 = arith.subi %1, %c1_i32_0 : i32
    %c0_i32 = arith.constant 0 : i32
    %c0_i32_1 = arith.constant 0 : i32
    return %c0_i32, %2 : i32, i32
  }
  func.func @transform_2(%arg0: i32) -> (i32, i32) {
    %c2_i32 = arith.constant 2 : i32
    %0 = arith.addi %arg0, %c2_i32 : i32
    %c8_i32 = arith.constant 8 : i32
    %1 = arith.muli %0, %c8_i32 : i32
    %c0_i32 = arith.constant 0 : i32
    %c0_i32_0 = arith.constant 0 : i32
    return %c0_i32, %1 : i32, i32
  }
  func.func @transform_3(%arg0: i32) -> (i32, i32) {
    %c0_i32 = arith.constant 0 : i32
    %c0_i32_0 = arith.constant 0 : i32
    %c0_i32_1 = arith.constant 0 : i32
    return %c0_i32, %c0_i32_0 : i32, i32
  }
  func.func @transform_4(%arg0: i32) -> (i32, i32) {
    %c0_i32 = arith.constant 0 : i32
    %c0_i32_0 = arith.constant 0 : i32
    %c0_i32_1 = arith.constant 0 : i32
    return %c0_i32, %c0_i32_0 : i32, i32
  }
  func.func @transform_5(%arg0: i32) -> (i32, i32) {
    %c1_i32 = arith.constant 1 : i32
    %0 = arith.addi %arg0, %c1_i32 : i32
    %c0_i32 = arith.constant 0 : i32
    %c0_i32_0 = arith.constant 0 : i32
    return %c0_i32, %0 : i32, i32
  }
  func.func @transform_6(%arg0: i32) -> (i32, i32) {
    %c1_i32 = arith.constant 1 : i32
    %0 = arith.addi %arg0, %c1_i32 : i32
    %c0_i32 = arith.constant 0 : i32
    %c0_i32_0 = arith.constant 0 : i32
    return %c0_i32, %0 : i32, i32
  }
  func.func @transform_7(%arg0: i32) -> (i32, i32) {
    %c0_i32 = arith.constant 0 : i32
    %c0_i32_0 = arith.constant 0 : i32
    return %c0_i32, %arg0 : i32, i32
  }
}

module attributes {stable_mosaic.version = 11 : i64} {
  func.func @kernel(%arg0: i32, %arg1: memref<8x1024xbf16, #tpu.memory_space<vmem>>, %arg2: memref<8x128xbf16, #tpu.memory_space<vmem>>, %arg3: memref<8x128xbf16, #tpu.memory_space<vmem>>, %arg4: memref<4x216xbf16, #tpu.memory_space<vmem>>, %arg5: memref<4x1xf32, #tpu.memory_space<vmem>>, %arg6: memref<8x1xf32, #tpu.memory_space<vmem>>, %arg7: memref<8x1xf32, #tpu.memory_space<vmem>>, %arg8: memref<1x1024xf32, #tpu.memory_space<vmem>>, %arg9: memref<1x128xf32, #tpu.memory_space<vmem>>, %arg10: memref<1x128xf32, #tpu.memory_space<vmem>>, %arg11: memref<4x1024xf32, #tpu.memory_space<vmem>>, %arg12: memref<4x128xf32, #tpu.memory_space<vmem>>, %arg13: memref<8x1280xbf16, #tpu.memory_space<vmem>>, %arg14: memref<216x1024xbf16, #tpu.memory_space<vmem>>) attributes {dimension_semantics = [#tpu.dimension_semantics<parallel>], iteration_bounds = array<i64: 2>, scalar_prefetch = 0 : i64, scratch_operands = 2 : i64, tpu.core_type = #tpu.core_type<tc>, window_params = [{transform_indices = @transform_0, window_bounds = array<i64: 8, 1024>}, {transform_indices = @transform_1, window_bounds = array<i64: 8, 128>}, {transform_indices = @transform_2, window_bounds = array<i64: 8, 128>}, {pipeline_mode = #tpu.pipeline_mode<synchronous>, transform_indices = @transform_3, window_bounds = array<i64: 4, 216>}, {pipeline_mode = #tpu.pipeline_mode<synchronous>, transform_indices = @transform_4, window_bounds = array<i64: 4, 1>}, {pipeline_mode = #tpu.pipeline_mode<synchronous>, transform_indices = @transform_5, window_bounds = array<i64: 8, 1>}, {pipeline_mode = #tpu.pipeline_mode<synchronous>, transform_indices = @transform_6, window_bounds = array<i64: 8, 1>}, {transform_indices = @transform_7, window_bounds = array<i64: 1, 1024>}, {transform_indices = @transform_8, window_bounds = array<i64: 1, 128>}, {transform_indices = @transform_9, window_bounds = array<i64: 1, 128>}, {transform_indices = @transform_10, window_bounds = array<i64: 4, 1024>}, {transform_indices = @transform_11, window_bounds = array<i64: 4, 128>}]} {
    %c0 = arith.constant 0 : index
    %c0_0 = arith.constant 0 : index
    %0 = vector.load %arg2[%c0, %c0_0] : memref<8x128xbf16, #tpu.memory_space<vmem>>, vector<8x128xbf16>
    %c0_1 = arith.constant 0 : index
    %c0_2 = arith.constant 0 : index
    %1 = vector.load %arg9[%c0_1, %c0_2] : memref<1x128xf32, #tpu.memory_space<vmem>>, vector<1x128xf32>
    %2 = arith.extf %0 : vector<8x128xbf16> to vector<8x128xf32>
    %c0_3 = arith.constant 0 : index
    %c0_4 = arith.constant 0 : index
    %3 = vector.load %arg6[%c0_3, %c0_4] : memref<8x1xf32, #tpu.memory_space<vmem>>, vector<8x1xf32>
    %4 = vector.broadcast %3 : vector<8x1xf32> to vector<8x128xf32>
    %5 = arith.mulf %2, %4 : vector<8x128xf32>
    %c0_5 = arith.constant 0 : index
    %c0_6 = arith.constant 0 : index
    %6 = vector.load %arg7[%c0_5, %c0_6] : memref<8x1xf32, #tpu.memory_space<vmem>>, vector<8x1xf32>
    %7 = vector.broadcast %6 : vector<8x1xf32> to vector<8x128xf32>
    %8 = arith.addf %5, %7 : vector<8x128xf32>
    %cst = arith.constant 0.000000e+00 : f32
    %9 = vector.broadcast %cst : f32 to vector<8x128xf32>
    %10 = arith.maximumf %8, %9 : vector<8x128xf32>
    %cst_7 = arith.constant 5.000000e-01 : f32
    %11 = vector.broadcast %cst_7 : f32 to vector<1x128xf32>
    %12 = arith.cmpf ogt, %1, %11 : vector<1x128xf32>
    %cst_8 = arith.constant 0.000000e+00 : f32
    %13 = vector.shape_cast %12 : vector<1x128xi1> to vector<1x128xi1>
    %14 = vector.broadcast %13 : vector<1x128xi1> to vector<8x128xi1>
    %15 = vector.broadcast %cst_8 : f32 to vector<8x128xf32>
    %16 = arith.select %14, %10, %15 : vector<8x128xi1>, vector<8x128xf32>
    %17 = arith.truncf %16 : vector<8x128xf32> to vector<8x128xbf16>
    %c0_9 = arith.constant 0 : index
    %c0_10 = arith.constant 0 : index
    %18 = vector.load %arg13[%c0_9, %c0_10] : memref<8x1280xbf16, #tpu.memory_space<vmem>>, vector<8x128xbf16>
    tpu.vector_store %arg13[%c0_9, %c0_10], %17 {strides = array<i32>} : memref<8x1280xbf16, #tpu.memory_space<vmem>>, vector<8x128xbf16>,
    %c0_11 = arith.constant 0 : index
    %c0_12 = arith.constant 0 : index
    %19 = vector.load %arg1[%c0_11, %c0_12] : memref<8x1024xbf16, #tpu.memory_space<vmem>>, vector<8x1024xbf16>
    %c0_13 = arith.constant 0 : index
    %c0_14 = arith.constant 0 : index
    %20 = vector.load %arg8[%c0_13, %c0_14] : memref<1x1024xf32, #tpu.memory_space<vmem>>, vector<1x1024xf32>
    %21 = arith.extf %19 : vector<8x1024xbf16> to vector<8x1024xf32>
    %c0_15 = arith.constant 0 : index
    %c0_16 = arith.constant 0 : index
    %22 = vector.load %arg6[%c0_15, %c0_16] : memref<8x1xf32, #tpu.memory_space<vmem>>, vector<8x1xf32>
    %23 = vector.broadcast %22 : vector<8x1xf32> to vector<8x1024xf32>
    %24 = arith.mulf %21, %23 : vector<8x1024xf32>
    %c0_17 = arith.constant 0 : index
    %c0_18 = arith.constant 0 : index
    %25 = vector.load %arg7[%c0_17, %c0_18] : memref<8x1xf32, #tpu.memory_space<vmem>>, vector<8x1xf32>
    %26 = vector.broadcast %25 : vector<8x1xf32> to vector<8x1024xf32>
    %27 = arith.addf %24, %26 : vector<8x1024xf32>
    %cst_19 = arith.constant 0.000000e+00 : f32
    %28 = vector.broadcast %cst_19 : f32 to vector<8x1024xf32>
    %29 = arith.maximumf %27, %28 : vector<8x1024xf32>
    %cst_20 = arith.constant 5.000000e-01 : f32
    %30 = vector.broadcast %cst_20 : f32 to vector<1x1024xf32>
    %31 = arith.cmpf ogt, %20, %30 : vector<1x1024xf32>
    %cst_21 = arith.constant 0.000000e+00 : f32
    %32 = vector.shape_cast %31 : vector<1x1024xi1> to vector<1x1024xi1>
    %33 = vector.broadcast %32 : vector<1x1024xi1> to vector<8x1024xi1>
    %34 = vector.broadcast %cst_21 : f32 to vector<8x1024xf32>
    %35 = arith.select %33, %29, %34 : vector<8x1024xi1>, vector<8x1024xf32>
    %36 = arith.truncf %35 : vector<8x1024xf32> to vector<8x1024xbf16>
    %c0_22 = arith.constant 0 : index
    %c128 = arith.constant 128 : index
    %37 = vector.load %arg13[%c0_22, %c128] : memref<8x1280xbf16, #tpu.memory_space<vmem>>, vector<8x1024xbf16>
    tpu.vector_store %arg13[%c0_22, %c128], %36 {strides = array<i32>} : memref<8x1280xbf16, #tpu.memory_space<vmem>>, vector<8x1024xbf16>,
    %c0_23 = arith.constant 0 : index
    %c0_24 = arith.constant 0 : index
    %38 = vector.load %arg3[%c0_23, %c0_24] : memref<8x128xbf16, #tpu.memory_space<vmem>>, vector<8x128xbf16>
    %c0_25 = arith.constant 0 : index
    %c0_26 = arith.constant 0 : index
    %39 = vector.load %arg10[%c0_25, %c0_26] : memref<1x128xf32, #tpu.memory_space<vmem>>, vector<1x128xf32>
    %40 = arith.extf %38 : vector<8x128xbf16> to vector<8x128xf32>
    %c0_27 = arith.constant 0 : index
    %c0_28 = arith.constant 0 : index
    %41 = vector.load %arg6[%c0_27, %c0_28] : memref<8x1xf32, #tpu.memory_space<vmem>>, vector<8x1xf32>
    %42 = vector.broadcast %41 : vector<8x1xf32> to vector<8x128xf32>
    %43 = arith.mulf %40, %42 : vector<8x128xf32>
    %c0_29 = arith.constant 0 : index
    %c0_30 = arith.constant 0 : index
    %44 = vector.load %arg7[%c0_29, %c0_30] : memref<8x1xf32, #tpu.memory_space<vmem>>, vector<8x1xf32>
    %45 = vector.broadcast %44 : vector<8x1xf32> to vector<8x128xf32>
    %46 = arith.addf %43, %45 : vector<8x128xf32>
    %cst_31 = arith.constant 0.000000e+00 : f32
    %47 = vector.broadcast %cst_31 : f32 to vector<8x128xf32>
    %48 = arith.maximumf %46, %47 : vector<8x128xf32>
    %cst_32 = arith.constant 5.000000e-01 : f32
    %49 = vector.broadcast %cst_32 : f32 to vector<1x128xf32>
    %50 = arith.cmpf ogt, %39, %49 : vector<1x128xf32>
    %cst_33 = arith.constant 0.000000e+00 : f32
    %51 = vector.shape_cast %50 : vector<1x128xi1> to vector<1x128xi1>
    %52 = vector.broadcast %51 : vector<1x128xi1> to vector<8x128xi1>
    %53 = vector.broadcast %cst_33 : f32 to vector<8x128xf32>
    %54 = arith.select %52, %48, %53 : vector<8x128xi1>, vector<8x128xf32>
    %55 = arith.truncf %54 : vector<8x128xf32> to vector<8x128xbf16>
    %c0_34 = arith.constant 0 : index
    %c1152 = arith.constant 1152 : index
    %56 = vector.load %arg13[%c0_34, %c1152] : memref<8x1280xbf16, #tpu.memory_space<vmem>>, vector<8x128xbf16>
    tpu.vector_store %arg13[%c0_34, %c1152], %55 {strides = array<i32>} : memref<8x1280xbf16, #tpu.memory_space<vmem>>, vector<8x128xbf16>,
    %c0_35 = arith.constant 0 : index
    %c17 = arith.constant 17 : index
    %57 = vector.load %arg13[%c0_35, %c17] : memref<8x1280xbf16, #tpu.memory_space<vmem>>, vector<8x1024xbf16>
    %c0_36 = arith.constant 0 : index
    %c0_37 = arith.constant 0 : index
    %58 = vector.load %arg14[%c0_36, %c0_37] : memref<216x1024xbf16, #tpu.memory_space<vmem>>, vector<8x1024xbf16>
    tpu.vector_store %arg14[%c0_36, %c0_37], %57 {strides = array<i32>} : memref<216x1024xbf16, #tpu.memory_space<vmem>>, vector<8x1024xbf16>,
    %c0_38 = arith.constant 0 : index
    %c18 = arith.constant 18 : index
    %59 = vector.load %arg13[%c0_38, %c18] : memref<8x1280xbf16, #tpu.memory_space<vmem>>, vector<8x1024xbf16>
    %c8 = arith.constant 8 : index
    %c0_39 = arith.constant 0 : index
    %60 = vector.load %arg14[%c8, %c0_39] : memref<216x1024xbf16, #tpu.memory_space<vmem>>, vector<8x1024xbf16>
    tpu.vector_store %arg14[%c8, %c0_39], %59 {strides = array<i32>} : memref<216x1024xbf16, #tpu.memory_space<vmem>>, vector<8x1024xbf16>,
    %c0_40 = arith.constant 0 : index
    %c19 = arith.constant 19 : index
    %61 = vector.load %arg13[%c0_40, %c19] : memref<8x1280xbf16, #tpu.memory_space<vmem>>, vector<8x1024xbf16>
    %c16 = arith.constant 16 : index
    %c0_41 = arith.constant 0 : index
    %62 = vector.load %arg14[%c16, %c0_41] : memref<216x1024xbf16, #tpu.memory_space<vmem>>, vector<8x1024xbf16>
    tpu.vector_store %arg14[%c16, %c0_41], %61 {strides = array<i32>} : memref<216x1024xbf16, #tpu.memory_space<vmem>>, vector<8x1024xbf16>,
    %c0_42 = arith.constant 0 : index
    %c27 = arith.constant 27 : index
    %63 = vector.load %arg13[%c0_42, %c27] : memref<8x1280xbf16, #tpu.memory_space<vmem>>, vector<8x1024xbf16>
    %c24 = arith.constant 24 : index
    %c0_43 = arith.constant 0 : index
    %64 = vector.load %arg14[%c24, %c0_43] : memref<216x1024xbf16, #tpu.memory_space<vmem>>, vector<8x1024xbf16>
    tpu.vector_store %arg14[%c24, %c0_43], %63 {strides = array<i32>} : memref<216x1024xbf16, #tpu.memory_space<vmem>>, vector<8x1024xbf16>,
    %c0_44 = arith.constant 0 : index
    %c28 = arith.constant 28 : index
    %65 = vector.load %arg13[%c0_44, %c28] : memref<8x1280xbf16, #tpu.memory_space<vmem>>, vector<8x1024xbf16>
    %c32 = arith.constant 32 : index
    %c0_45 = arith.constant 0 : index
    %66 = vector.load %arg14[%c32, %c0_45] : memref<216x1024xbf16, #tpu.memory_space<vmem>>, vector<8x1024xbf16>
    tpu.vector_store %arg14[%c32, %c0_45], %65 {strides = array<i32>} : memref<216x1024xbf16, #tpu.memory_space<vmem>>, vector<8x1024xbf16>,
    %c0_46 = arith.constant 0 : index
    %c29 = arith.constant 29 : index
    %67 = vector.load %arg13[%c0_46, %c29] : memref<8x1280xbf16, #tpu.memory_space<vmem>>, vector<8x1024xbf16>
    %c40 = arith.constant 40 : index
    %c0_47 = arith.constant 0 : index
    %68 = vector.load %arg14[%c40, %c0_47] : memref<216x1024xbf16, #tpu.memory_space<vmem>>, vector<8x1024xbf16>
    tpu.vector_store %arg14[%c40, %c0_47], %67 {strides = array<i32>} : memref<216x1024xbf16, #tpu.memory_space<vmem>>, vector<8x1024xbf16>,
    %c0_48 = arith.constant 0 : index
    %c37 = arith.constant 37 : index
    %69 = vector.load %arg13[%c0_48, %c37] : memref<8x1280xbf16, #tpu.memory_space<vmem>>, vector<8x1024xbf16>
    %c48 = arith.constant 48 : index
    %c0_49 = arith.constant 0 : index
    %70 = vector.load %arg14[%c48, %c0_49] : memref<216x1024xbf16, #tpu.memory_space<vmem>>, vector<8x1024xbf16>
    tpu.vector_store %arg14[%c48, %c0_49], %69 {strides = array<i32>} : memref<216x1024xbf16, #tpu.memory_space<vmem>>, vector<8x1024xbf16>,
    %c0_50 = arith.constant 0 : index
    %c38 = arith.constant 38 : index
    %71 = vector.load %arg13[%c0_50, %c38] : memref<8x1280xbf16, #tpu.memory_space<vmem>>, vector<8x1024xbf16>
    %c56 = arith.constant 56 : index
    %c0_51 = arith.constant 0 : index
    %72 = vector.load %arg14[%c56, %c0_51] : memref<216x1024xbf16, #tpu.memory_space<vmem>>, vector<8x1024xbf16>
    tpu.vector_store %arg14[%c56, %c0_51], %71 {strides = array<i32>} : memref<216x1024xbf16, #tpu.memory_space<vmem>>, vector<8x1024xbf16>,
    %c0_52 = arith.constant 0 : index
    %c39 = arith.constant 39 : index
    %73 = vector.load %arg13[%c0_52, %c39] : memref<8x1280xbf16, #tpu.memory_space<vmem>>, vector<8x1024xbf16>
    %c64 = arith.constant 64 : index
    %c0_53 = arith.constant 0 : index
    %74 = vector.load %arg14[%c64, %c0_53] : memref<216x1024xbf16, #tpu.memory_space<vmem>>, vector<8x1024xbf16>
    tpu.vector_store %arg14[%c64, %c0_53], %73 {strides = array<i32>} : memref<216x1024xbf16, #tpu.memory_space<vmem>>, vector<8x1024xbf16>,
    %c0_54 = arith.constant 0 : index
    %c117 = arith.constant 117 : index
    %75 = vector.load %arg13[%c0_54, %c117] : memref<8x1280xbf16, #tpu.memory_space<vmem>>, vector<8x1024xbf16>
    %c72 = arith.constant 72 : index
    %c0_55 = arith.constant 0 : index
    %76 = vector.load %arg14[%c72, %c0_55] : memref<216x1024xbf16, #tpu.memory_space<vmem>>, vector<8x1024xbf16>
    tpu.vector_store %arg14[%c72, %c0_55], %75 {strides = array<i32>} : memref<216x1024xbf16, #tpu.memory_space<vmem>>, vector<8x1024xbf16>,
    %c0_56 = arith.constant 0 : index
    %c118 = arith.constant 118 : index
    %77 = vector.load %arg13[%c0_56, %c118] : memref<8x1280xbf16, #tpu.memory_space<vmem>>, vector<8x1024xbf16>
    %c80 = arith.constant 80 : index
    %c0_57 = arith.constant 0 : index
    %78 = vector.load %arg14[%c80, %c0_57] : memref<216x1024xbf16, #tpu.memory_space<vmem>>, vector<8x1024xbf16>
    tpu.vector_store %arg14[%c80, %c0_57], %77 {strides = array<i32>} : memref<216x1024xbf16, #tpu.memory_space<vmem>>, vector<8x1024xbf16>,
    %c0_58 = arith.constant 0 : index
    %c119 = arith.constant 119 : index
    %79 = vector.load %arg13[%c0_58, %c119] : memref<8x1280xbf16, #tpu.memory_space<vmem>>, vector<8x1024xbf16>
    %c88 = arith.constant 88 : index
    %c0_59 = arith.constant 0 : index
    %80 = vector.load %arg14[%c88, %c0_59] : memref<216x1024xbf16, #tpu.memory_space<vmem>>, vector<8x1024xbf16>
    tpu.vector_store %arg14[%c88, %c0_59], %79 {strides = array<i32>} : memref<216x1024xbf16, #tpu.memory_space<vmem>>, vector<8x1024xbf16>,
    %c0_60 = arith.constant 0 : index
    %c127 = arith.constant 127 : index
    %81 = vector.load %arg13[%c0_60, %c127] : memref<8x1280xbf16, #tpu.memory_space<vmem>>, vector<8x1024xbf16>
    %c96 = arith.constant 96 : index
    %c0_61 = arith.constant 0 : index
    %82 = vector.load %arg14[%c96, %c0_61] : memref<216x1024xbf16, #tpu.memory_space<vmem>>, vector<8x1024xbf16>
    tpu.vector_store %arg14[%c96, %c0_61], %81 {strides = array<i32>} : memref<216x1024xbf16, #tpu.memory_space<vmem>>, vector<8x1024xbf16>,
    %c0_62 = arith.constant 0 : index
    %c128_63 = arith.constant 128 : index
    %83 = vector.load %arg13[%c0_62, %c128_63] : memref<8x1280xbf16, #tpu.memory_space<vmem>>, vector<8x1024xbf16>
    %c104 = arith.constant 104 : index
    %c0_64 = arith.constant 0 : index
    %84 = vector.load %arg14[%c104, %c0_64] : memref<216x1024xbf16, #tpu.memory_space<vmem>>, vector<8x1024xbf16>
    tpu.vector_store %arg14[%c104, %c0_64], %83 {strides = array<i32>} : memref<216x1024xbf16, #tpu.memory_space<vmem>>, vector<8x1024xbf16>,
    %c0_65 = arith.constant 0 : index
    %c129 = arith.constant 129 : index
    %85 = vector.load %arg13[%c0_65, %c129] : memref<8x1280xbf16, #tpu.memory_space<vmem>>, vector<8x1024xbf16>
    %c112 = arith.constant 112 : index
    %c0_66 = arith.constant 0 : index
    %86 = vector.load %arg14[%c112, %c0_66] : memref<216x1024xbf16, #tpu.memory_space<vmem>>, vector<8x1024xbf16>
    tpu.vector_store %arg14[%c112, %c0_66], %85 {strides = array<i32>} : memref<216x1024xbf16, #tpu.memory_space<vmem>>, vector<8x1024xbf16>,
    %c0_67 = arith.constant 0 : index
    %c137 = arith.constant 137 : index
    %87 = vector.load %arg13[%c0_67, %c137] : memref<8x1280xbf16, #tpu.memory_space<vmem>>, vector<8x1024xbf16>
    %c120 = arith.constant 120 : index
    %c0_68 = arith.constant 0 : index
    %88 = vector.load %arg14[%c120, %c0_68] : memref<216x1024xbf16, #tpu.memory_space<vmem>>, vector<8x1024xbf16>
    tpu.vector_store %arg14[%c120, %c0_68], %87 {strides = array<i32>} : memref<216x1024xbf16, #tpu.memory_space<vmem>>, vector<8x1024xbf16>,
    %c0_69 = arith.constant 0 : index
    %c138 = arith.constant 138 : index
    %89 = vector.load %arg13[%c0_69, %c138] : memref<8x1280xbf16, #tpu.memory_space<vmem>>, vector<8x1024xbf16>
    %c128_70 = arith.constant 128 : index
    %c0_71 = arith.constant 0 : index
    %90 = vector.load %arg14[%c128_70, %c0_71] : memref<216x1024xbf16, #tpu.memory_space<vmem>>, vector<8x1024xbf16>
    tpu.vector_store %arg14[%c128_70, %c0_71], %89 {strides = array<i32>} : memref<216x1024xbf16, #tpu.memory_space<vmem>>, vector<8x1024xbf16>,
    %c0_72 = arith.constant 0 : index
    %c139 = arith.constant 139 : index
    %91 = vector.load %arg13[%c0_72, %c139] : memref<8x1280xbf16, #tpu.memory_space<vmem>>, vector<8x1024xbf16>
    %c136 = arith.constant 136 : index
    %c0_73 = arith.constant 0 : index
    %92 = vector.load %arg14[%c136, %c0_73] : memref<216x1024xbf16, #tpu.memory_space<vmem>>, vector<8x1024xbf16>
    tpu.vector_store %arg14[%c136, %c0_73], %91 {strides = array<i32>} : memref<216x1024xbf16, #tpu.memory_space<vmem>>, vector<8x1024xbf16>,
    %c0_74 = arith.constant 0 : index
    %c217 = arith.constant 217 : index
    %93 = vector.load %arg13[%c0_74, %c217] : memref<8x1280xbf16, #tpu.memory_space<vmem>>, vector<8x1024xbf16>
    %c144 = arith.constant 144 : index
    %c0_75 = arith.constant 0 : index
    %94 = vector.load %arg14[%c144, %c0_75] : memref<216x1024xbf16, #tpu.memory_space<vmem>>, vector<8x1024xbf16>
    tpu.vector_store %arg14[%c144, %c0_75], %93 {strides = array<i32>} : memref<216x1024xbf16, #tpu.memory_space<vmem>>, vector<8x1024xbf16>,
    %c0_76 = arith.constant 0 : index
    %c218 = arith.constant 218 : index
    %95 = vector.load %arg13[%c0_76, %c218] : memref<8x1280xbf16, #tpu.memory_space<vmem>>, vector<8x1024xbf16>
    %c152 = arith.constant 152 : index
    %c0_77 = arith.constant 0 : index
    %96 = vector.load %arg14[%c152, %c0_77] : memref<216x1024xbf16, #tpu.memory_space<vmem>>, vector<8x1024xbf16>
    tpu.vector_store %arg14[%c152, %c0_77], %95 {strides = array<i32>} : memref<216x1024xbf16, #tpu.memory_space<vmem>>, vector<8x1024xbf16>,
    %c0_78 = arith.constant 0 : index
    %c219 = arith.constant 219 : index
    %97 = vector.load %arg13[%c0_78, %c219] : memref<8x1280xbf16, #tpu.memory_space<vmem>>, vector<8x1024xbf16>
    %c160 = arith.constant 160 : index
    %c0_79 = arith.constant 0 : index
    %98 = vector.load %arg14[%c160, %c0_79] : memref<216x1024xbf16, #tpu.memory_space<vmem>>, vector<8x1024xbf16>
    tpu.vector_store %arg14[%c160, %c0_79], %97 {strides = array<i32>} : memref<216x1024xbf16, #tpu.memory_space<vmem>>, vector<8x1024xbf16>,
    %c0_80 = arith.constant 0 : index
    %c227 = arith.constant 227 : index
    %99 = vector.load %arg13[%c0_80, %c227] : memref<8x1280xbf16, #tpu.memory_space<vmem>>, vector<8x1024xbf16>
    %c168 = arith.constant 168 : index
    %c0_81 = arith.constant 0 : index
    %100 = vector.load %arg14[%c168, %c0_81] : memref<216x1024xbf16, #tpu.memory_space<vmem>>, vector<8x1024xbf16>
    tpu.vector_store %arg14[%c168, %c0_81], %99 {strides = array<i32>} : memref<216x1024xbf16, #tpu.memory_space<vmem>>, vector<8x1024xbf16>,
    %c0_82 = arith.constant 0 : index
    %c228 = arith.constant 228 : index
    %101 = vector.load %arg13[%c0_82, %c228] : memref<8x1280xbf16, #tpu.memory_space<vmem>>, vector<8x1024xbf16>
    %c176 = arith.constant 176 : index
    %c0_83 = arith.constant 0 : index
    %102 = vector.load %arg14[%c176, %c0_83] : memref<216x1024xbf16, #tpu.memory_space<vmem>>, vector<8x1024xbf16>
    tpu.vector_store %arg14[%c176, %c0_83], %101 {strides = array<i32>} : memref<216x1024xbf16, #tpu.memory_space<vmem>>, vector<8x1024xbf16>,
    %c0_84 = arith.constant 0 : index
    %c229 = arith.constant 229 : index
    %103 = vector.load %arg13[%c0_84, %c229] : memref<8x1280xbf16, #tpu.memory_space<vmem>>, vector<8x1024xbf16>
    %c184 = arith.constant 184 : index
    %c0_85 = arith.constant 0 : index
    %104 = vector.load %arg14[%c184, %c0_85] : memref<216x1024xbf16, #tpu.memory_space<vmem>>, vector<8x1024xbf16>
    tpu.vector_store %arg14[%c184, %c0_85], %103 {strides = array<i32>} : memref<216x1024xbf16, #tpu.memory_space<vmem>>, vector<8x1024xbf16>,
    %c0_86 = arith.constant 0 : index
    %c237 = arith.constant 237 : index
    %105 = vector.load %arg13[%c0_86, %c237] : memref<8x1280xbf16, #tpu.memory_space<vmem>>, vector<8x1024xbf16>
    %c192 = arith.constant 192 : index
    %c0_87 = arith.constant 0 : index
    %106 = vector.load %arg14[%c192, %c0_87] : memref<216x1024xbf16, #tpu.memory_space<vmem>>, vector<8x1024xbf16>
    tpu.vector_store %arg14[%c192, %c0_87], %105 {strides = array<i32>} : memref<216x1024xbf16, #tpu.memory_space<vmem>>, vector<8x1024xbf16>,
    %c0_88 = arith.constant 0 : index
    %c238 = arith.constant 238 : index
    %107 = vector.load %arg13[%c0_88, %c238] : memref<8x1280xbf16, #tpu.memory_space<vmem>>, vector<8x1024xbf16>
    %c200 = arith.constant 200 : index
    %c0_89 = arith.constant 0 : index
    %108 = vector.load %arg14[%c200, %c0_89] : memref<216x1024xbf16, #tpu.memory_space<vmem>>, vector<8x1024xbf16>
    tpu.vector_store %arg14[%c200, %c0_89], %107 {strides = array<i32>} : memref<216x1024xbf16, #tpu.memory_space<vmem>>, vector<8x1024xbf16>,
    %c0_90 = arith.constant 0 : index
    %c239 = arith.constant 239 : index
    %109 = vector.load %arg13[%c0_90, %c239] : memref<8x1280xbf16, #tpu.memory_space<vmem>>, vector<8x1024xbf16>
    %c208 = arith.constant 208 : index
    %c0_91 = arith.constant 0 : index
    %110 = vector.load %arg14[%c208, %c0_91] : memref<216x1024xbf16, #tpu.memory_space<vmem>>, vector<8x1024xbf16>
    tpu.vector_store %arg14[%c208, %c0_91], %109 {strides = array<i32>} : memref<216x1024xbf16, #tpu.memory_space<vmem>>, vector<8x1024xbf16>,
    %c0_92 = arith.constant 0 : index
    %c0_93 = arith.constant 0 : index
    %111 = vector.load %arg4[%c0_92, %c0_93] : memref<4x216xbf16, #tpu.memory_space<vmem>>, vector<4x216xbf16>
    %c0_94 = arith.constant 0 : index
    %c0_95 = arith.constant 0 : index
    %112 = vector.load %arg14[%c0_94, %c0_95] : memref<216x1024xbf16, #tpu.memory_space<vmem>>, vector<216x1024xbf16>
    %cst_96 = arith.constant dense<0.000000e+00> : vector<4x1024xf32>
    %113 = tpu.matmul %111, %112, %cst_96 {dimension_numbers = #tpu.dot_dimension_numbers<[1], [0], [0], [1], [0, 0, 1, 1], [], []>} : vector<4x216xbf16>, vector<216x1024xbf16>, vector<4x1024xf32> -> vector<4x1024xf32>
    %c0_97 = arith.constant 0 : index
    %c0_98 = arith.constant 0 : index
    %114 = vector.load %arg5[%c0_97, %c0_98] : memref<4x1xf32, #tpu.memory_space<vmem>>, vector<4x1xf32>
    %115 = vector.broadcast %114 : vector<4x1xf32> to vector<4x1024xf32>
    %116 = arith.addf %113, %115 : vector<4x1024xf32>
    %c0_99 = arith.constant 0 : index
    %c0_100 = arith.constant 0 : index
    %117 = vector.load %arg11[%c0_99, %c0_100] : memref<4x1024xf32, #tpu.memory_space<vmem>>, vector<4x1024xf32>
    tpu.vector_store %arg11[%c0_99, %c0_100], %116 {strides = array<i32>} : memref<4x1024xf32, #tpu.memory_space<vmem>>, vector<4x1024xf32>,
    %c0_101 = arith.constant 0 : index
    %c0_102 = arith.constant 0 : index
    %118 = vector.load %arg8[%c0_101, %c0_102] : memref<1x1024xf32, #tpu.memory_space<vmem>>, vector<1x1024xf32>
    %cst_103 = arith.constant 5.000000e-01 : f32
    %119 = vector.broadcast %cst_103 : f32 to vector<1x1024xf32>
    %120 = arith.cmpf ogt, %118, %119 : vector<1x1024xf32>
    %cst_104 = arith.constant 0.000000e+00 : f32
    %121 = vector.shape_cast %120 : vector<1x1024xi1> to vector<1x1024xi1>
    %122 = vector.broadcast %121 : vector<1x1024xi1> to vector<4x1024xi1>
    %123 = vector.broadcast %cst_104 : f32 to vector<4x1024xf32>
    %124 = arith.select %122, %116, %123 : vector<4x1024xi1>, vector<4x1024xf32>
    %cst_105 = arith.constant dense<0.000000e+00> : vector<4xf32>
    %125 = vector.multi_reduction <add>, %124, %cst_105 [1] : vector<4x1024xf32> to vector<4xf32>
    %126 = vector.shape_cast %125 : vector<4xf32> to vector<4x1xf32>
    %127 = arith.mulf %124, %124 : vector<4x1024xf32>
    %cst_106 = arith.constant dense<0.000000e+00> : vector<4xf32>
    %128 = vector.multi_reduction <add>, %127, %cst_106 [1] : vector<4x1024xf32> to vector<4xf32>
    %129 = vector.shape_cast %128 : vector<4xf32> to vector<4x1xf32>
    %130 = tpu.iota {dimensions = array<i32: 1>} : vector<4x128xi32>
    %c0_i32 = arith.constant 0 : i32
    %131 = vector.broadcast %c0_i32 : i32 to vector<4x128xi32>
    %132 = arith.cmpi eq, %130, %131 : vector<4x128xi32>
    %c1_i32 = arith.constant 1 : i32
    %133 = vector.broadcast %c1_i32 : i32 to vector<4x128xi32>
    %134 = arith.cmpi eq, %130, %133 : vector<4x128xi32>
    %cst_107 = arith.constant 0.000000e+00 : f32
    %135 = vector.shape_cast %129 : vector<4x1xf32> to vector<4x1xf32>
    %136 = vector.broadcast %135 : vector<4x1xf32> to vector<4x128xf32>
    %137 = vector.broadcast %cst_107 : f32 to vector<4x128xf32>
    %138 = arith.select %134, %136, %137 : vector<4x128xi1>, vector<4x128xf32>
    %139 = vector.shape_cast %126 : vector<4x1xf32> to vector<4x1xf32>
    %140 = vector.broadcast %139 : vector<4x1xf32> to vector<4x128xf32>
    %141 = arith.select %132, %140, %138 : vector<4x128xi1>, vector<4x128xf32>
    %c0_108 = arith.constant 0 : index
    %c0_109 = arith.constant 0 : index
    %142 = vector.load %arg12[%c0_108, %c0_109] : memref<4x128xf32, #tpu.memory_space<vmem>>, vector<4x128xf32>
    tpu.vector_store %arg12[%c0_108, %c0_109], %141 {strides = array<i32>} : memref<4x128xf32, #tpu.memory_space<vmem>>, vector<4x128xf32>,
    return
  }
  func.func @transform_0(%arg0: i32) -> (i32, i32) {
    %c1_i32 = arith.constant 1 : i32
    %0 = arith.addi %arg0, %c1_i32 : i32
    %c0_i32 = arith.constant 0 : i32
    %c0_i32_0 = arith.constant 0 : i32
    return %c0_i32, %0 : i32, i32
  }
  func.func @transform_1(%arg0: i32) -> (i32, i32) {
    %c1_i32 = arith.constant 1 : i32
    %0 = arith.addi %arg0, %c1_i32 : i32
    %c8_i32 = arith.constant 8 : i32
    %1 = arith.muli %0, %c8_i32 : i32
    %c1_i32_0 = arith.constant 1 : i32
    %2 = arith.subi %1, %c1_i32_0 : i32
    %c0_i32 = arith.constant 0 : i32
    %c0_i32_1 = arith.constant 0 : i32
    return %c0_i32, %2 : i32, i32
  }
  func.func @transform_2(%arg0: i32) -> (i32, i32) {
    %c2_i32 = arith.constant 2 : i32
    %0 = arith.addi %arg0, %c2_i32 : i32
    %c8_i32 = arith.constant 8 : i32
    %1 = arith.muli %0, %c8_i32 : i32
    %c0_i32 = arith.constant 0 : i32
    %c0_i32_0 = arith.constant 0 : i32
    return %c0_i32, %1 : i32, i32
  }
  func.func @transform_3(%arg0: i32) -> (i32, i32) {
    %c0_i32 = arith.constant 0 : i32
    %c0_i32_0 = arith.constant 0 : i32
    %c0_i32_1 = arith.constant 0 : i32
    return %c0_i32, %c0_i32_0 : i32, i32
  }
  func.func @transform_4(%arg0: i32) -> (i32, i32) {
    %c0_i32 = arith.constant 0 : i32
    %c0_i32_0 = arith.constant 0 : i32
    %c0_i32_1 = arith.constant 0 : i32
    return %c0_i32, %c0_i32_0 : i32, i32
  }
  func.func @transform_5(%arg0: i32) -> (i32, i32) {
    %c0_i32 = arith.constant 0 : i32
    %c0_i32_0 = arith.constant 0 : i32
    %c0_i32_1 = arith.constant 0 : i32
    return %c0_i32, %c0_i32_0 : i32, i32
  }
  func.func @transform_6(%arg0: i32) -> (i32, i32) {
    %c0_i32 = arith.constant 0 : i32
    %c0_i32_0 = arith.constant 0 : i32
    %c0_i32_1 = arith.constant 0 : i32
    return %c0_i32, %c0_i32_0 : i32, i32
  }
  func.func @transform_7(%arg0: i32) -> (i32, i32) {
    %c1_i32 = arith.constant 1 : i32
    %0 = arith.addi %arg0, %c1_i32 : i32
    %c0_i32 = arith.constant 0 : i32
    %c0_i32_0 = arith.constant 0 : i32
    return %c0_i32, %0 : i32, i32
  }
  func.func @transform_8(%arg0: i32) -> (i32, i32) {
    %c1_i32 = arith.constant 1 : i32
    %0 = arith.addi %arg0, %c1_i32 : i32
    %c8_i32 = arith.constant 8 : i32
    %1 = arith.muli %0, %c8_i32 : i32
    %c1_i32_0 = arith.constant 1 : i32
    %2 = arith.subi %1, %c1_i32_0 : i32
    %c0_i32 = arith.constant 0 : i32
    %c0_i32_1 = arith.constant 0 : i32
    return %c0_i32, %2 : i32, i32
  }
  func.func @transform_9(%arg0: i32) -> (i32, i32) {
    %c2_i32 = arith.constant 2 : i32
    %0 = arith.addi %arg0, %c2_i32 : i32
    %c8_i32 = arith.constant 8 : i32
    %1 = arith.muli %0, %c8_i32 : i32
    %c0_i32 = arith.constant 0 : i32
    %c0_i32_0 = arith.constant 0 : i32
    return %c0_i32, %1 : i32, i32
  }
  func.func @transform_10(%arg0: i32) -> (i32, i32) {
    %c1_i32 = arith.constant 1 : i32
    %0 = arith.addi %arg0, %c1_i32 : i32
    %c0_i32 = arith.constant 0 : i32
    %c0_i32_0 = arith.constant 0 : i32
    return %c0_i32, %0 : i32, i32
  }
  func.func @transform_11(%arg0: i32) -> (i32, i32) {
    %c0_i32 = arith.constant 0 : i32
    %c0_i32_0 = arith.constant 0 : i32
    return %c0_i32, %arg0 : i32, i32
  }
}

module attributes {stable_mosaic.version = 11 : i64} {
  func.func @_bn_relu_kernel(%arg0: i32, %arg1: memref<4x1024xf32, #tpu.memory_space<vmem>>, %arg2: memref<4x1xf32, #tpu.memory_space<vmem>>, %arg3: memref<4x1xf32, #tpu.memory_space<vmem>>, %arg4: memref<1x1024xf32, #tpu.memory_space<vmem>>, %arg5: memref<4x1024xf32, #tpu.memory_space<vmem>>) attributes {dimension_semantics = [#tpu.dimension_semantics<parallel>], iteration_bounds = array<i64: 4>, scalar_prefetch = 0 : i64, scratch_operands = 0 : i64, tpu.core_type = #tpu.core_type<tc>, window_params = [{transform_indices = @transform_0, window_bounds = array<i64: 4, 1024>}, {pipeline_mode = #tpu.pipeline_mode<synchronous>, transform_indices = @transform_1, window_bounds = array<i64: 4, 1>}, {pipeline_mode = #tpu.pipeline_mode<synchronous>, transform_indices = @transform_2, window_bounds = array<i64: 4, 1>}, {transform_indices = @transform_3, window_bounds = array<i64: 1, 1024>}, {transform_indices = @transform_4, window_bounds = array<i64: 4, 1024>}]} {
    %c0 = arith.constant 0 : index
    %c0_0 = arith.constant 0 : index
    %0 = vector.load %arg1[%c0, %c0_0] : memref<4x1024xf32, #tpu.memory_space<vmem>>, vector<4x1024xf32>
    %c0_1 = arith.constant 0 : index
    %c0_2 = arith.constant 0 : index
    %1 = vector.load %arg2[%c0_1, %c0_2] : memref<4x1xf32, #tpu.memory_space<vmem>>, vector<4x1xf32>
    %2 = vector.broadcast %1 : vector<4x1xf32> to vector<4x1024xf32>
    %3 = arith.mulf %0, %2 : vector<4x1024xf32>
    %c0_3 = arith.constant 0 : index
    %c0_4 = arith.constant 0 : index
    %4 = vector.load %arg3[%c0_3, %c0_4] : memref<4x1xf32, #tpu.memory_space<vmem>>, vector<4x1xf32>
    %5 = vector.broadcast %4 : vector<4x1xf32> to vector<4x1024xf32>
    %6 = arith.addf %3, %5 : vector<4x1024xf32>
    %cst = arith.constant 0.000000e+00 : f32
    %7 = vector.broadcast %cst : f32 to vector<4x1024xf32>
    %8 = arith.maximumf %6, %7 : vector<4x1024xf32>
    %c0_5 = arith.constant 0 : index
    %c0_6 = arith.constant 0 : index
    %9 = vector.load %arg4[%c0_5, %c0_6] : memref<1x1024xf32, #tpu.memory_space<vmem>>, vector<1x1024xf32>
    %cst_7 = arith.constant 5.000000e-01 : f32
    %10 = vector.broadcast %cst_7 : f32 to vector<1x1024xf32>
    %11 = arith.cmpf ogt, %9, %10 : vector<1x1024xf32>
    %cst_8 = arith.constant 0.000000e+00 : f32
    %12 = vector.shape_cast %11 : vector<1x1024xi1> to vector<1x1024xi1>
    %13 = vector.broadcast %12 : vector<1x1024xi1> to vector<4x1024xi1>
    %14 = vector.broadcast %cst_8 : f32 to vector<4x1024xf32>
    %15 = arith.select %13, %8, %14 : vector<4x1024xi1>, vector<4x1024xf32>
    %c0_9 = arith.constant 0 : index
    %c0_10 = arith.constant 0 : index
    %16 = vector.load %arg5[%c0_9, %c0_10] : memref<4x1024xf32, #tpu.memory_space<vmem>>, vector<4x1024xf32>
    tpu.vector_store %arg5[%c0_9, %c0_10], %15 {strides = array<i32>} : memref<4x1024xf32, #tpu.memory_space<vmem>>, vector<4x1024xf32>,
    return
  }
  func.func @transform_0(%arg0: i32) -> (i32, i32) {
    %c0_i32 = arith.constant 0 : i32
    %c0_i32_0 = arith.constant 0 : i32
    return %c0_i32, %arg0 : i32, i32
  }
  func.func @transform_1(%arg0: i32) -> (i32, i32) {
    %c0_i32 = arith.constant 0 : i32
    %c0_i32_0 = arith.constant 0 : i32
    %c0_i32_1 = arith.constant 0 : i32
    return %c0_i32, %c0_i32_0 : i32, i32
  }
  func.func @transform_2(%arg0: i32) -> (i32, i32) {
    %c0_i32 = arith.constant 0 : i32
    %c0_i32_0 = arith.constant 0 : i32
    %c0_i32_1 = arith.constant 0 : i32
    return %c0_i32, %c0_i32_0 : i32, i32
  }
  func.func @transform_3(%arg0: i32) -> (i32, i32) {
    %c0_i32 = arith.constant 0 : i32
    %c0_i32_0 = arith.constant 0 : i32
    return %c0_i32, %arg0 : i32, i32
  }
  func.func @transform_4(%arg0: i32) -> (i32, i32) {
    %c0_i32 = arith.constant 0 : i32
    %c0_i32_0 = arith.constant 0 : i32
    return %c0_i32, %arg0 : i32, i32
  }
}

</mosaic_0001>

<bundles_post_ra>
// kernel: tile.8
= control target key start
LH: loop header
LB: loop body
LE: loop exit
PB: predicated region body
PF: predicated region fallthrough
CT: control target
= control target key end

     0   :  { %2 = vsyncpa [#allocation1], 0  ;;  %s48_s8 = smov [#allocation0]   ;;  %s65_s0 = inlined_call_operand.hbm [shape: f32[4], index: 0, kind: input, shape index: {}]   ;;  %s66_s1 = inlined_call_operand.vmem [shape: f32[8,4], index: 1, kind: output, shape index: {}]  }
   0x1   :  { %s8_s0 = sshll.u32 %s65_s0, 4  ;;  %s10_s9 = sshll.u32 %s48_s8, 4  ;;  %s9_s0 = int_to_ptr.hbm [resolvable:$true] %s8_s0  ;;  %s11_s9 = int_to_ptr.vmem [resolvable:$true] %s10_s9 }
   0x2   :  { %13 = dma.hbm_to_vmem [thread:$0]  %s9_s0, 16, %s11_s9, [#allocation1]  }
   0x3   :  { %46 = dma.done.wait [#allocation1], 16  }
   0x4   :  { %47 = vsyncadd [#allocation1], 4294967280  ;;  %v18_v0 = vld [vmem:[#allocation0] ss:$0 sm:$0xff] }
   0x5   :  { %19 = vst [vmem:[%s66_s1] sm:$0xff] %v18_v0 }
   0x6   :  { %20 = vsyncpa [#allocation1], 1 }

// kernel: tile.0
= control target key start
LH: loop header
LB: loop body
LE: loop exit
PB: predicated region body
PF: predicated region fallthrough
CT: control target
= control target key end

     0   :  { %vm3_vm0 = vcmask 7168   ;;  %s30_s8 = smov 125   ;;  %s31_s11 = smov 126   ;;  %s57_s0 = inlined_call_operand.vmem [shape: f32[8,4], index: 0, kind: input, shape index: {}]   ;;  %s58_s1 = inlined_call_operand.vmem [shape: f32[32,1], index: 1, kind: output, shape index: {}]  }
   0x1   :  { %v5_v0 = vld [vmem:[%s57_s0] sm:$0xff]   ;;  %s29_s0 = smov 127  }
   0x2   :  { %6 = vrot.lane.b32.xlu0 %v5_v0, %s29_s0  ;;  %18 = vrot.lane.b32.xlu1 %v5_v0, %s30_s8  ;;  %4 = vst.msk [vmem:[%s58_s1] ss:$4 sm:$0xff] %vm3_vm0, %v5_v0  }
   0xa   :  { %12 = vrot.lane.b32.xlu0 %v5_v0, %s31_s11 }
  0x74   :  { %v7_v1 = vpop.permute.xlu0 %6   ;;  %v19_v2 = vpop.permute.xlu1 %18  }
  0x75   :  { %23 = vst.msk [vmem:[%s58_s1 + $0x1] ss:$4 sm:$0xff] %vm3_vm0, %v7_v1  }
  0x76   :  { %25 = vst.msk [vmem:[%s58_s1 + $0x3] ss:$4 sm:$0xff] %vm3_vm0, %v19_v2  }
  0x7c   :  { %v13_v3 = vpop.permute.xlu0 %12  }
  0x7d   :  { %24 = vst.msk [vmem:[%s58_s1 + $0x2] ss:$4 sm:$0xff] %vm3_vm0, %v13_v3  }

// kernel: trans_conv_forward.4
= control target key start
LH: loop header
LB: loop body
LE: loop exit
PB: predicated region body
PF: predicated region fallthrough
CT: control target
= control target key end

     0   :  { %s1039_s23 = smov 121   ;;  %s1040_s24 = smov 92   ;;  %vm158_vm0 = vcmask 1043456   ;;  %vm160_vm1 = vcmask 1039360   ;;  %vm213_vm2 = vcmask 998400   ;;  %vm267_vm3 = vcmask 990208   ;;  %s1400_s0 = inlined_call_operand.vmem [shape: bf16[4,3072], index: 0, kind: input, shape index: {}, may-alias: {0,1,2}]   ;;  %s1401_s1 = inlined_call_operand.vmem [shape: bf16[4,3072], index: 1, kind: input, shape index: {}, may-alias: {0,1,2}]   ;;  %s1402_s2 = inlined_call_operand.vmem [shape: bf16[4,3072], index: 2, kind: input, shape index: {}, may-alias: {0,1,2}]   ;;  %s1403_s3 = inlined_call_operand.vmem [shape: bf16[32,32], index: 3, kind: input, shape index: {}]   ;;  %s1404_s4 = inlined_call_operand.vmem [shape: f32[32,1], index: 4, kind: input, shape index: {}]   ;;  %s1405_s5 = inlined_call_operand.vmem [shape: bf16[32,3072], index: 5, kind: output, shape index: {}]  }
   0x1   :  { %v1078_v0 = vld [vmem:[%s1400_s0 + $0x18] sm:$0xff]  ;;  %v1083_v1 = vld [vmem:[%s1400_s0 + $0x10] sm:$0xff]  ;;  %v903_v2 = vld [vmem:[%s1402_s2 + $0x20] sm:$0x3]  ;;  %s1037_s0 = smov 127   ;;  %s1038_s2 = smov 122  }
   0x2   :  { %108 = vst [vmem:[#allocation1 + $0x10] ss:$2 sm:$0xff] %v1078_v0  ;;  %s1041_s25 = smov 91   ;;  %s1042_s26 = smov 86   ;;  %vm320_vm4 = vcmask 752640   ;;  %vm427_vm5 = vcmask 703488  }
   0x3   :  { %105 = vst [vmem:[#allocation1] ss:$2 sm:$0xff] %v1083_v1  ;;  %s1043_s27 = smov 85   ;;  %vm374_vm6 = vcmask 744448   ;;  %vm481_vm7 = vcmask 695296   ;;  %vm631_vm8 = vcmask 261120  }
   0x4   :  { %101 = vst [vmem:[#allocation2 + $0x12] sm:$0x3] %v903_v2 }
   0x9   :  { %v111_v3 = vld.sshfl [vmem:[#allocation1 + $0x10] sm:$0xff pattern:$0x75643120]  ;;  %v112_v4 = vld.sshfl [vmem:[#allocation1 + $0x18] sm:$0xff pattern:$0x75643120] }
   0xa   :  { %129 = vst [vmem:[#allocation1 + $0x11] ss:$2 sm:$0xff] %v1078_v0  ;;  %v109_v5 = vld.sshfl [vmem:[#allocation1] sm:$0xff pattern:$0x75643120] }
   0xb   :  { %119 = vst [vmem:[#allocation3 + $0x10] sm:$0x33] %v111_v3  ;;  %v110_v6 = vld.sshfl [vmem:[#allocation1 + $0x8] sm:$0xff pattern:$0x75643120] }
   0xc   :  { %120 = vst [vmem:[#allocation3 + $0x18] sm:$0x33] %v112_v4  ;;  %v123_v7 = vld [vmem:[#allocation2 + $0x12] sm:$0x3] }
   0xd   :  { %126 = vst [vmem:[#allocation1 + $0x1] ss:$2 sm:$0xff] %v1083_v1  ;;  %v178_v12 = vld [vmem:[#allocation2 + $0x12] sm:$0x3] }
   0xe   :  { %117 = vst [vmem:[#allocation3] sm:$0x33] %v109_v5  ;;  %v231_v18 = vld [vmem:[#allocation2 + $0x12] sm:$0x3] }
   0xf   :  { %118 = vst [vmem:[#allocation3 + $0x8] sm:$0x33] %v110_v6  ;;  %v285_v24 = vld [vmem:[#allocation2 + $0x12] sm:$0x3] }
  0x10   :  { %132 = vst [vmem:[#allocation1 + $0x21] ss:$2 sm:$0xff] %v123_v7  ;;  %v338_v30 = vld [vmem:[#allocation2 + $0x12] sm:$0x3] }
  0x11   :  { %v137_v8 = vld.sshfl [vmem:[#allocation1 + $0x10] sm:$0xff pattern:$0x75643120]  ;;  %v1092_v9 = vld.sshfl [vmem:[#allocation1 + $0x18] sm:$0xff pattern:$0x75643120] }
  0x12   :  { %147 = vrot.lane.b32.xlu0 %v137_v8, %s1037_s0  ;;  %183 = vst [vmem:[#allocation1 + $0x10] ss:$2 sm:$0xff] %v1078_v0  ;;  %v392_v36 = vld [vmem:[#allocation2 + $0x12] sm:$0x3] }
  0x13   :  { %v445_v42 = vld [vmem:[#allocation2 + $0x12] sm:$0x3] }
  0x14   :  { %v135_v10 = vld.sshfl [vmem:[#allocation1 + $0x8] sm:$0xff pattern:$0x75643120]  ;;  %v133_v11 = vld.sshfl [vmem:[#allocation1] sm:$0xff pattern:$0x75643120] }
  0x15   :  { %145 = vrot.lane.b32.xlu2 %v135_v10, %s1037_s0  ;;  %180 = vst [vmem:[#allocation1] ss:$2 sm:$0xff] %v1083_v1 }
  0x17   :  { %v1098_v13 = vld.sshfl [vmem:[#allocation1 + $0x20] sm:$0xff pattern:$0x75643120] }
  0x18   :  { %186 = vst [vmem:[#allocation1 + $0x20] ss:$2 sm:$0xff] %v178_v12 }
  0x19   :  { %v191_v14 = vld.sshfl [vmem:[#allocation1 + $0x10] sm:$0xff pattern:$0x75643120]  ;;  %v1100_v15 = vld.sshfl [vmem:[#allocation1 + $0x18] sm:$0xff pattern:$0x75643120] }
  0x1a   :  { %143 = vrot.lane.b32.xlu0 %v133_v11, %s1037_s0  ;;  %237 = vst [vmem:[#allocation1 + $0x11] ss:$2 sm:$0xff] %v1078_v0 }
  0x1c   :  { %v189_v16 = vld.sshfl [vmem:[#allocation1 + $0x8] sm:$0xff pattern:$0x75643120]  ;;  %v187_v17 = vld.sshfl [vmem:[#allocation1] sm:$0xff pattern:$0x75643120] }
  0x1d   :  { %199 = vrot.lane.b32.xlu1 %v189_v16, %s1038_s2  ;;  %201 = vrot.lane.b32.xlu2 %v191_v14, %s1038_s2  ;;  %234 = vst [vmem:[#allocation1 + $0x1] ss:$2 sm:$0xff] %v1083_v1 }
  0x1f   :  { %v1107_v19 = vld.sshfl [vmem:[#allocation1 + $0x20] sm:$0xff pattern:$0x75643120] }
  0x20   :  { %240 = vst [vmem:[#allocation1 + $0x21] ss:$2 sm:$0xff] %v231_v18 }
  0x21   :  { %v245_v20 = vld.sshfl [vmem:[#allocation1 + $0x10] sm:$0xff pattern:$0x75643120]  ;;  %v1109_v21 = vld.sshfl [vmem:[#allocation1 + $0x18] sm:$0xff pattern:$0x75643120] }
  0x22   :  { %290 = vst [vmem:[#allocation1 + $0x10] ss:$2 sm:$0xff] %v1078_v0 }
  0x24   :  { %v243_v22 = vld.sshfl [vmem:[#allocation1 + $0x8] sm:$0xff pattern:$0x75643120]  ;;  %v241_v23 = vld.sshfl [vmem:[#allocation1] sm:$0xff pattern:$0x75643120] }
  0x25   :  { %197 = vrot.lane.b32.xlu1 %v187_v17, %s1038_s2  ;;  %253 = vrot.lane.b32.xlu0 %v243_v22, %s1039_s23  ;;  %287 = vst [vmem:[#allocation1] ss:$2 sm:$0xff] %v1083_v1 }
  0x26   :  { %251 = vrot.lane.b32.xlu2 %v241_v23, %s1039_s23 }
  0x27   :  { %v1116_v25 = vld.sshfl [vmem:[#allocation1 + $0x20] sm:$0xff pattern:$0x75643120] }
  0x28   :  { %293 = vst [vmem:[#allocation1 + $0x20] ss:$2 sm:$0xff] %v285_v24 }
  0x29   :  { %v300_v26 = vld.sshfl [vmem:[#allocation1 + $0x18] sm:$0xff pattern:$0x75643120]  ;;  %v298_v27 = vld.sshfl [vmem:[#allocation1 + $0x10] sm:$0xff pattern:$0x75643120] }
  0x2a   :  { %344 = vst [vmem:[#allocation1 + $0x11] ss:$2 sm:$0xff] %v1078_v0 }
  0x2c   :  { %v296_v28 = vld.sshfl [vmem:[#allocation1 + $0x8] sm:$0xff pattern:$0x75643120]  ;;  %v294_v29 = vld.sshfl [vmem:[#allocation1] sm:$0xff pattern:$0x75643120] }
  0x2d   :  { %255 = vrot.lane.b32.xlu1 %v245_v20, %s1039_s23  ;;  %306 = vrot.lane.b32.xlu0 %v296_v28, %s1040_s24  ;;  %341 = vst [vmem:[#allocation1 + $0x1] ss:$2 sm:$0xff] %v1083_v1 }
  0x2e   :  { %304 = vrot.lane.b32.xlu2 %v294_v29, %s1040_s24 }
  0x2f   :  { %v302_v31 = vld.sshfl [vmem:[#allocation1 + $0x20] sm:$0xff pattern:$0x75643120] }
  0x30   :  { %347 = vst [vmem:[#allocation1 + $0x21] ss:$2 sm:$0xff] %v338_v30 }
  0x31   :  { %v352_v32 = vld.sshfl [vmem:[#allocation1 + $0x10] sm:$0xff pattern:$0x75643120]  ;;  %v354_v33 = vld.sshfl [vmem:[#allocation1 + $0x18] sm:$0xff pattern:$0x75643120] }
  0x32   :  { %397 = vst [vmem:[#allocation1 + $0x10] ss:$2 sm:$0xff] %v1078_v0 }
  0x34   :  { %v350_v34 = vld.sshfl [vmem:[#allocation1 + $0x8] sm:$0xff pattern:$0x75643120]  ;;  %v348_v35 = vld.sshfl [vmem:[#allocation1] sm:$0xff pattern:$0x75643120] }
  0x35   :  { %308 = vrot.lane.b32.xlu0 %v298_v27, %s1040_s24  ;;  %360 = vrot.lane.b32.xlu1 %v350_v34, %s1041_s25  ;;  %394 = vst [vmem:[#allocation1] ss:$2 sm:$0xff] %v1083_v1 }
  0x37   :  { %v356_v37 = vld.sshfl [vmem:[#allocation1 + $0x20] sm:$0xff pattern:$0x75643120] }
  0x38   :  { %400 = vst [vmem:[#allocation1 + $0x20] ss:$2 sm:$0xff] %v392_v36 }
  0x39   :  { %v405_v38 = vld.sshfl [vmem:[#allocation1 + $0x10] sm:$0xff pattern:$0x75643120]  ;;  %v407_v39 = vld.sshfl [vmem:[#allocation1 + $0x18] sm:$0xff pattern:$0x75643120] }
  0x3a   :  { %451 = vst [vmem:[#allocation1 + $0x11] ss:$2 sm:$0xff] %v1078_v0 }
  0x3c   :  { %v403_v40 = vld.sshfl [vmem:[#allocation1 + $0x8] sm:$0xff pattern:$0x75643120]  ;;  %v401_v41 = vld.sshfl [vmem:[#allocation1] sm:$0xff pattern:$0x75643120] }
  0x3d   :  { %362 = vrot.lane.b32.xlu1 %v352_v32, %s1041_s25  ;;  %358 = vrot.lane.b32.xlu0 %v348_v35, %s1041_s25  ;;  %448 = vst [vmem:[#allocation1 + $0x1] ss:$2 sm:$0xff] %v1083_v1 }
  0x3e   :  { %413 = vrot.lane.b32.xlu2 %v403_v40, %s1042_s26 }
  0x3f   :  { %v409_v43 = vld.sshfl [vmem:[#allocation1 + $0x20] sm:$0xff pattern:$0x75643120] }
  0x40   :  { %454 = vst [vmem:[#allocation1 + $0x21] ss:$2 sm:$0xff] %v445_v42 }
  0x41   :  { %v459_v45 = vld.sshfl [vmem:[#allocation1 + $0x10] sm:$0xff pattern:$0x75643120]  ;;  %v461_v47 = vld.sshfl [vmem:[#allocation1 + $0x18] sm:$0xff pattern:$0x75643120] }
  0x44   :  { %v457_v44 = vld.sshfl [vmem:[#allocation1 + $0x8] sm:$0xff pattern:$0x75643120]  ;;  %v455_v46 = vld.sshfl [vmem:[#allocation1] sm:$0xff pattern:$0x75643120] }
  0x45   :  { %411 = vrot.lane.b32.xlu1 %v401_v41, %s1042_s26  ;;  %467 = vrot.lane.b32.xlu0 %v457_v44, %s1043_s27 }
  0x46   :  { %415 = vrot.lane.b32.xlu2 %v405_v38, %s1042_s26 }
  0x47   :  { %v463_v48 = vld.sshfl [vmem:[#allocation1 + $0x20] sm:$0xff pattern:$0x75643120] }
  0x4d   :  { %469 = vrot.lane.b32.xlu1 %v459_v45, %s1043_s27  ;;  %310 = vrot.lane.b32.xlu0 %v300_v26, %s1040_s24 }
  0x4e   :  { %465 = vrot.lane.b32.xlu2 %v455_v46, %s1043_s27 }
  0x55   :  { %312 = vrot.lane.b32.xlu1 %v302_v31, %s1040_s24  ;;  %366 = vrot.lane.b32.xlu0 %v356_v37, %s1041_s25 }
  0x56   :  { %364 = vrot.lane.b32.xlu2 %v354_v33, %s1041_s25 }
  0x5d   :  { %417 = vrot.lane.b32.xlu1 %v407_v39, %s1042_s26  ;;  %471 = vrot.lane.b32.xlu0 %v461_v47, %s1043_s27 }
  0x5e   :  { %419 = vrot.lane.b32.xlu2 %v409_v43, %s1042_s26 }
  0x65   :  { %473 = vrot.lane.b32.xlu1 %v463_v48, %s1043_s27  ;;  %151 = vrot.lane.b32.xlu0 %v1098_v13, %s1037_s0 }
  0x66   :  { %149 = vrot.lane.b32.xlu2 %v1092_v9, %s1037_s0 }
  0x6d   :  { %203 = vrot.lane.b32.xlu1 %v1100_v15, %s1038_s2  ;;  %257 = vrot.lane.b32.xlu0 %v1109_v21, %s1039_s23 }
  0x6e   :  { %205 = vrot.lane.b32.xlu2 %v1107_v19, %s1038_s2 }
  0x6f   :  { %v146_v49 = vpop.permute.xlu2 %145 }
  0x70   :  { %v154_v51 = vrot.slane %v146_v49, 4 }
  0x75   :  { %259 = vrot.lane.b32.xlu1 %v1116_v25, %s1039_s23 }
  0x77   :  { %v1147_v50 = vpop.permute.xlu2 %201 }
  0x78   :  { %v209_v59 = vrot.slane %v1147_v50, 4 }
  0x80   :  { %v252_v53 = vpop.permute.xlu2 %251 }
  0x81   :  { %v261_v3 = vrot.slane %v252_v53, 4 }
  0x84   :  { %v1149_v52 = vpop.permute.xlu0 %147 }
  0x85   :  { %v155_v54 = vrot.slane %v1149_v52, 4 }
  0x87   :  { %v162_v55 = vsel %vm158_vm0, %v154_v51, %v155_v54 }
  0x88   :  { %v163_v56 = vsel %vm160_vm1, %v146_v49, %v162_v55  ;;  %v305_v60 = vpop.permute.xlu2 %304 }
  0x89   :  { %173 = vst [vmem:[#allocation3 + $0x8] sm:$0xcc] %v163_v56  ;;  %v314_v13 = vrot.slane %v305_v60, 4 }
  0x8c   :  { %v144_v57 = vpop.permute.xlu0 %143 }
  0x8d   :  { %v153_v58 = vrot.slane %v144_v57, 4 }
  0x8f   :  { %v159_v61 = vsel %vm158_vm0, %v153_v58, %v154_v51  ;;  %v200_v62 = vpop.permute.xlu1 %199 }
  0x90   :  { %v161_v63 = vsel %vm160_vm1, %v144_v57, %v159_v61  ;;  %v208_v0 = vrot.slane %v200_v62, 4 }
  0x91   :  { %172 = vst [vmem:[#allocation3] sm:$0xcc] %v161_v63 }
  0x92   :  { %v215_v1 = vsel %vm158_vm0, %v208_v0, %v209_v59 }
  0x93   :  { %v216_v2 = vsel %vm213_vm2, %v200_v62, %v215_v1 }
  0x94   :  { %226 = vst [vmem:[#allocation3 + $0x28] sm:$0x33] %v216_v2 }
  0x97   :  { %v198_v4 = vpop.permute.xlu1 %197  ;;  %v254_v5 = vpop.permute.xlu0 %253 }
  0x98   :  { %v207_v6 = vrot.slane %v198_v4, 4  ;;  %v262_v7 = vrot.slane %v254_v5, 4  ;;  %v414_v8 = vpop.permute.xlu2 %413 }
  0x99   :  { %v422_v14 = vrot.slane %v414_v8, 4 }
  0x9a   :  { %v212_v9 = vsel %vm158_vm0, %v207_v6, %v208_v0  ;;  %v266_v10 = vsel %vm158_vm0, %v261_v3, %v262_v7 }
  0x9b   :  { %v214_v11 = vsel %vm213_vm2, %v198_v4, %v212_v9  ;;  %v268_v12 = vsel %vm267_vm3, %v252_v53, %v266_v10 }
  0x9c   :  { %225 = vst [vmem:[#allocation3 + $0x20] sm:$0x33] %v214_v11 }
  0x9d   :  { %279 = vst [vmem:[#allocation3 + $0x20] sm:$0xcc] %v268_v12 }
  0x9f   :  { %v1167_v15 = vpop.permute.xlu1 %255  ;;  %v307_v16 = vpop.permute.xlu0 %306 }
  0xa0   :  { %v263_v17 = vrot.slane %v1167_v15, 4  ;;  %v315_v18 = vrot.slane %v307_v16, 4  ;;  %v1170_v19 = vpop.permute.xlu2 %415 }
  0xa1   :  { %v423_v20 = vrot.slane %v1170_v19, 4 }
  0xa2   :  { %v269_v21 = vsel %vm158_vm0, %v262_v7, %v263_v17  ;;  %v319_v22 = vsel %vm158_vm0, %v314_v13, %v315_v18 }
  0xa3   :  { %v270_v23 = vsel %vm267_vm3, %v254_v5, %v269_v21  ;;  %v321_v24 = vsel %vm320_vm4, %v305_v60, %v319_v22  ;;  %v429_v25 = vsel %vm158_vm0, %v422_v14, %v423_v20 }
  0xa4   :  { %280 = vst [vmem:[#allocation3 + $0x28] sm:$0xcc] %v270_v23  ;;  %v430_v26 = vsel %vm427_vm5, %v414_v8, %v429_v25  ;;  %v914_v23 = vld [vmem:[#allocation3] sm:$0xf] }
  0xa5   :  { %332 = vst [vmem:[#allocation3 + $0x40] sm:$0x33] %v321_v24  ;;  %v1010_v24 = vld [vmem:[#allocation3 + $0x4] sm:$0xf] }
  0xa6   :  { %440 = vst [vmem:[#allocation3 + $0x68] sm:$0x33] %v430_v26 }
  0xa7   :  { %v309_v27 = vpop.permute.xlu0 %308  ;;  %v361_v28 = vpop.permute.xlu1 %360 }
  0xa8   :  { %v316_v29 = vrot.slane %v309_v27, 4  ;;  %v466_v30 = vpop.permute.xlu2 %465  ;;  %v369_v35 = vrot.slane %v361_v28, 4 }
  0xa9   :  { %v475_v46 = vrot.slane %v466_v30, 4 }
  0xaa   :  { %v322_v31 = vsel %vm158_vm0, %v315_v18, %v316_v29 }
  0xab   :  { %v323_v32 = vsel %vm320_vm4, %v307_v16, %v322_v31  ;;  %v916_v16 = vld [vmem:[#allocation3 + $0x20] sm:$0xf0] }
  0xac   :  { %333 = vst [vmem:[#allocation3 + $0x48] sm:$0x33] %v323_v32  ;;  %v919_v26 = vor.u32 %v1010_v24, %v916_v16 }
  0xaf   :  { %v363_v33 = vpop.permute.xlu1 %362  ;;  %v359_v34 = vpop.permute.xlu0 %358 }
  0xb0   :  { %v370_v36 = vrot.slane %v363_v33, 4  ;;  %v368_v37 = vrot.slane %v359_v34, 4  ;;  %v1185_v38 = vpop.permute.xlu2 %364 }
  0xb1   :  { %v371_v39 = vrot.slane %v1185_v38, 4 }
  0xb2   :  { %v376_v40 = vsel %vm158_vm0, %v369_v35, %v370_v36  ;;  %v373_v41 = vsel %vm158_vm0, %v368_v37, %v369_v35  ;;  %v1015_v37 = vld [vmem:[#allocation3 + $0x24] sm:$0xf0] }
  0xb3   :  { %v377_v42 = vsel %vm374_vm6, %v361_v28, %v376_v40  ;;  %v375_v43 = vsel %vm374_vm6, %v359_v34, %v373_v41  ;;  %v378_v44 = vsel %vm158_vm0, %v370_v36, %v371_v39  ;;  %v518_v34 = vld [vmem:[%s1404_s4 + $0x8] sm:$0xff] }
  0xb4   :  { %387 = vst [vmem:[#allocation3 + $0x48] sm:$0xcc] %v377_v42  ;;  %v379_v45 = vsel %vm374_vm6, %v363_v33, %v378_v44  ;;  %v924_v40 = vld [vmem:[#allocation3 + $0x28] sm:$0xf0]  ;;  %v922_v44 = vld [vmem:[#allocation3 + $0x8] sm:$0xf] }
  0xb5   :  { %386 = vst [vmem:[#allocation3 + $0x40] sm:$0xcc] %v375_v43 }
  0xb6   :  { %388 = vst [vmem:[#allocation3 + $0x50] sm:$0xcc] %v379_v45  ;;  %v1011_v45 = vld [vmem:[#allocation3 + $0xc] sm:$0xf] }
  0xb7   :  { %v412_v47 = vpop.permute.xlu1 %411  ;;  %v468_v48 = vpop.permute.xlu0 %467 }
  0xb8   :  { %v421_v49 = vrot.slane %v412_v47, 4  ;;  %v476_v51 = vrot.slane %v468_v48, 4  ;;  %v1194_v53 = vpop.permute.xlu2 %419 }
  0xb9   :  { %v425_v41 = vrot.slane %v1194_v53, 4 }
  0xba   :  { %v426_v55 = vsel %vm158_vm0, %v421_v49, %v422_v14  ;;  %v480_v56 = vsel %vm158_vm0, %v475_v46, %v476_v51  ;;  %v1014_v14 = vld [vmem:[#allocation3 + $0x1c] sm:$0xf0]  ;;  %v927_v49 = vor.u32 %v1011_v45, %v924_v40 }
  0xbb   :  { %v428_v57 = vsel %vm427_vm5, %v412_v47, %v426_v55  ;;  %v482_v58 = vsel %vm481_vm7, %v466_v30, %v480_v56  ;;  %v915_v25 = vor.u32 %v1014_v14, %v914_v23  ;;  %v954_v28 = vld [vmem:[#allocation3 + $0x48] sm:$0xf] }
  0xbc   :  { %439 = vst [vmem:[#allocation3 + $0x60] sm:$0x33] %v428_v57  ;;  %v946_v7 = vld [vmem:[#allocation3 + $0x40] sm:$0xf]  ;;  %v1018_v8 = vld [vmem:[#allocation3 + $0x44] sm:$0xf] }
  0xbd   :  { %493 = vst [vmem:[#allocation3 + $0x60] sm:$0xcc] %v482_v58 }
  0xbf   :  { %v1200_v60 = vpop.permute.xlu1 %469  ;;  %v311_v61 = vpop.permute.xlu0 %310 }
  0xc0   :  { %v477_v62 = vrot.slane %v1200_v60, 4  ;;  %v317_v63 = vrot.slane %v311_v61, 4  ;;  %v1203_v0 = vpop.permute.xlu2 %149 }
  0xc1   :  { %v156_v1 = vrot.slane %v1203_v0, 4 }
  0xc2   :  { %v483_v2 = vsel %vm158_vm0, %v476_v51, %v477_v62  ;;  %v324_v3 = vsel %vm158_vm0, %v316_v29, %v317_v63  ;;  %v1019_v29 = vld [vmem:[#allocation3 + $0x4c] sm:$0xf] }
  0xc3   :  { %v484_v4 = vsel %vm481_vm7, %v468_v48, %v483_v2  ;;  %v325_v5 = vsel %vm320_vm4, %v309_v27, %v324_v3  ;;  %v164_v6 = vsel %vm158_vm0, %v155_v54, %v156_v1  ;;  %v923_v48 = vor.u32 %v1015_v37, %v922_v44 }
  0xc4   :  { %494 = vst [vmem:[#allocation3 + $0x68] sm:$0xcc] %v484_v4  ;;  %v165_v9 = vsel %vm160_vm1, %v1149_v52, %v164_v6  ;;  %v1022_v10 = vld [vmem:[#allocation3 + $0x5c] sm:$0xf0]  ;;  %v948_v11 = vld [vmem:[#allocation3 + $0x60] sm:$0xf0] }
  0xc5   :  { %334 = vst [vmem:[#allocation3 + $0x50] sm:$0x33] %v325_v5  ;;  %v947_v12 = vor.u32 %v1022_v10, %v946_v7  ;;  %v951_v13 = vor.u32 %v1018_v8, %v948_v11  ;;  %v1266_v6 = vld [vmem:[%s1403_s3 + $0x8] sm:$0xff] }
  0xc6   :  { %174 = vst [vmem:[#allocation3 + $0x10] sm:$0xcc] %v165_v9 }
  0xc7   :  { %644 = vmatpush.bf16.msra.mxu0 %v947_v12  ;;  %663 = vmatpush.bf16.msra.mxu1 %v951_v13  ;;  %v313_v18 = vpop.permute.xlu1 %312  ;;  %v367_v21 = vpop.permute.xlu0 %366 }
  0xc8   :  { %v318_v22 = vrot.slane %v313_v18, 4  ;;  %v372_v54 = vrot.slane %v367_v21, 4  ;;  %v206_v5 = vpop.permute.xlu2 %205 }
  0xc9   :  { %v211_v12 = vrot.slane %v206_v5, 4 }
  0xca   :  { %v326_v52 = vsel %vm158_vm0, %v317_v63, %v318_v22  ;;  %v380_v27 = vsel %vm158_vm0, %v371_v39, %v372_v54  ;;  %v1044_v39 = vmov 0  }
  0xcb   :  { %v327_v30 = vsel %vm320_vm4, %v311_v61, %v326_v52  ;;  %v381_v31 = vsel %vm374_vm6, %v1185_v38, %v380_v27  ;;  %645 = vmatpush.bf16.msra.mxu0 %v915_v25  ;;  %664 = vmatpush.bf16.msra.mxu1 %v919_v26  ;;  %v1023_v32 = vld [vmem:[#allocation3 + $0x64] sm:$0xf0]  ;;  %v956_v33 = vld [vmem:[#allocation3 + $0x68] sm:$0xf0] }
  0xcc   :  { %335 = vst [vmem:[#allocation3 + $0x58] sm:$0x33] %v327_v30  ;;  %v955_v35 = vor.u32 %v1023_v32, %v954_v28  ;;  %v959_v36 = vor.u32 %v1019_v29, %v956_v33  ;;  %1035 = vset.pattern.permute.xlu0 %v1044_v39  ;;  %1036 = vset.pattern.permute.xlu1 %v1044_v39  ;;  %v1230_v38 = vld [vmem:[%s1403_s3] sm:$0xff]  ;;  %v962_v7 = vld [vmem:[#allocation3 + $0x50] sm:$0xf]  ;;  %v520_v29 = vld [vmem:[%s1404_s4 + $0x18] sm:$0xff] }
  0xcd   :  { %389 = vst [vmem:[#allocation3 + $0x58] sm:$0xcc] %v381_v31  ;;  %528 = vperm.xlu0 %1035, %v518_v34   ;;  %1034 = vset.pattern.permute.xlu2 %v1044_v39  ;;  %v1020_v8 = vld [vmem:[#allocation3 + $0x54] sm:$0xf]  ;;  %v930_v32 = vld [vmem:[#allocation3 + $0x10] sm:$0xf] }
  0xce   :  { %682 = vmatpush.bf16.msra.mxu2 %v955_v35  ;;  %701 = vmatpush.bf16.msra.mxu3 %v959_v36  ;;  %v1012_v33 = vld [vmem:[#allocation3 + $0x14] sm:$0xf] }
  0xcf   :  { %v418_v42 = vpop.permute.xlu1 %417  ;;  %v472_v43 = vpop.permute.xlu0 %471  ;;  %976 = vmatmul.msk.bf16.vlgmr.msra.gmra.mxu0 %vm631_vm8, %v1230_v38  ;;  %978 = vmatmul.msk.bf16.vlgmr.msra.gmra.mxu1 %vm631_vm8, %v1230_v38 }
  0xd0   :  { %v424_v46 = vrot.slane %v418_v42, 4  ;;  %v478_v47 = vrot.slane %v472_v43, 4 }
  0xd2   :  { %v431_v51 = vsel %vm158_vm0, %v423_v20, %v424_v46  ;;  %v433_v53 = vsel %vm158_vm0, %v424_v46, %v425_v41  ;;  %v485_v55 = vsel %vm158_vm0, %v477_v62, %v478_v47  ;;  %683 = vmatpush.bf16.msra.mxu2 %v923_v48  ;;  %702 = vmatpush.bf16.msra.mxu3 %v927_v49 }
  0xd3   :  { %v432_v56 = vsel %vm427_vm5, %v1170_v19, %v431_v51  ;;  %v434_v57 = vsel %vm427_vm5, %v418_v42, %v433_v53  ;;  %v486_v58 = vsel %vm481_vm7, %v1200_v60, %v485_v55  ;;  %v519_v19 = vld [vmem:[%s1404_s4 + $0x10] sm:$0xff] }
  0xd4   :  { %441 = vst [vmem:[#allocation3 + $0x70] sm:$0x33] %v432_v56  ;;  %533 = vperm.xlu1 %1036, %v519_v19   ;;  %v970_v54 = vld [vmem:[#allocation3 + $0x58] sm:$0xf]  ;;  %v1021_v23 = vld [vmem:[#allocation3 + $0x5c] sm:$0xf] }
  0xd5   :  { %442 = vst [vmem:[#allocation3 + $0x78] sm:$0x33] %v434_v57  ;;  %980 = vmatmul.msk.bf16.vlgmr.msra.gmra.mxu2 %vm631_vm8, %v1230_v38  ;;  %982 = vmatmul.msk.bf16.vlgmr.msra.gmra.mxu3 %vm631_vm8, %v1230_v38 }
  0xd6   :  { %495 = vst [vmem:[#allocation3 + $0x70] sm:$0xcc] %v486_v58 }
  0xd7   :  { %v474_v20 = vpop.permute.xlu1 %473  ;;  %v152_v61 = vpop.permute.xlu0 %151 }
  0xd8   :  { %v479_v62 = vrot.slane %v474_v20, 4  ;;  %v157_v63 = vrot.slane %v152_v61, 4 }
  0xda   :  { %v487_v2 = vsel %vm158_vm0, %v478_v47, %v479_v62  ;;  %v166_v60 = vsel %vm158_vm0, %v156_v1, %v157_v63 }
  0xdb   :  { %v488_v3 = vsel %vm481_vm7, %v472_v43, %v487_v2  ;;  %v167_v4 = vsel %vm160_vm1, %v1203_v0, %v166_v60 }
  0xdc   :  { %496 = vst [vmem:[#allocation3 + $0x78] sm:$0xcc] %v488_v3 }
  0xdd   :  { %175 = vst [vmem:[#allocation3 + $0x18] sm:$0xcc] %v167_v4  ;;  %v1024_v9 = vld [vmem:[#allocation3 + $0x6c] sm:$0xf0]  ;;  %v964_v10 = vld [vmem:[#allocation3 + $0x70] sm:$0xf0] }
  0xde   :  { %v963_v11 = vor.u32 %v1024_v9, %v962_v7  ;;  %v967_v1 = vor.u32 %v1020_v8, %v964_v10 }
  0xdf   :  { %v204_v13 = vpop.permute.xlu1 %203  ;;  %v258_v14 = vpop.permute.xlu0 %257  ;;  %977 = vmatmul.msk.bf16.gmra.mxu0 %vm631_vm8, %v1266_v6  ;;  %979 = vmatmul.msk.bf16.gmra.mxu1 %vm631_vm8, %v1266_v6 }
  0xe0   :  { %720 = vmatpush.bf16.msrb.mxu0 %v963_v11  ;;  %739 = vmatpush.bf16.msrb.mxu1 %v967_v1  ;;  %v210_v0 = vrot.slane %v204_v13, 4  ;;  %v264_v16 = vrot.slane %v258_v14, 4 }
  0xe2   :  { %v217_v18 = vsel %vm158_vm0, %v209_v59, %v210_v0  ;;  %v271_v21 = vsel %vm158_vm0, %v263_v17, %v264_v16  ;;  %v219_v22 = vsel %vm158_vm0, %v210_v0, %v211_v12  ;;  %v517_v59 = vld [vmem:[%s1404_s4] sm:$0xff] }
  0xe3   :  { %v218_v24 = vsel %vm213_vm2, %v1147_v50, %v217_v18  ;;  %v272_v25 = vsel %vm267_vm3, %v1167_v15, %v271_v21  ;;  %v220_v26 = vsel %vm213_vm2, %v204_v13, %v219_v22  ;;  %v1025_v52 = vld [vmem:[#allocation3 + $0x74] sm:$0xf0]  ;;  %v972_v27 = vld [vmem:[#allocation3 + $0x78] sm:$0xf0]  ;;  %523 = vperm.xlu2 %1034, %v517_v59  }
  0xe4   :  { %227 = vst [vmem:[#allocation3 + $0x30] sm:$0x33] %v218_v24  ;;  %v971_v17 = vor.u32 %v1025_v52, %v970_v54  ;;  %v975_v28 = vor.u32 %v1021_v23, %v972_v27  ;;  %v938_v39 = vld [vmem:[#allocation3 + $0x18] sm:$0xf]  ;;  %v1013_v41 = vld [vmem:[#allocation3 + $0x1c] sm:$0xf] }
  0xe5   :  { %281 = vst [vmem:[#allocation3 + $0x30] sm:$0xcc] %v272_v25  ;;  %981 = vmatmul.msk.bf16.gmra.mxu2 %vm631_vm8, %v1266_v6  ;;  %983 = vmatmul.msk.bf16.gmra.mxu3 %vm631_vm8, %v1266_v6 }
  0xe6   :  { %228 = vst [vmem:[#allocation3 + $0x38] sm:$0x33] %v220_v26  ;;  %758 = vmatpush.bf16.msrb.mxu2 %v971_v17  ;;  %777 = vmatpush.bf16.msrb.mxu3 %v975_v28 }
  0xe7   :  { %v260_v50 = vpop.permute.xlu1 %259 }
  0xe8   :  { %v265_v15 = vrot.slane %v260_v50, 4 }
  0xea   :  { %v273_v30 = vsel %vm158_vm0, %v264_v16, %v265_v15 }
  0xeb   :  { %v274_v31 = vsel %vm267_vm3, %v258_v14, %v273_v30  ;;  %538 = vperm.xlu2 %1034, %v520_v29  }
  0xec   :  { %282 = vst [vmem:[#allocation3 + $0x38] sm:$0xcc] %v274_v31  ;;  %v1016_v34 = vld [vmem:[#allocation3 + $0x2c] sm:$0xf0]  ;;  %v932_v35 = vld [vmem:[#allocation3 + $0x30] sm:$0xf0] }
  0xed   :  { %v931_v36 = vor.u32 %v1016_v34, %v930_v32  ;;  %v935_v37 = vor.u32 %v1012_v33, %v932_v35 }
  0xef   :  { %721 = vmatpush.bf16.msrb.mxu0 %v931_v36  ;;  %740 = vmatpush.bf16.msrb.mxu1 %v935_v37 }
  0xf2   :  { %984 = vmatmul.msk.bf16.vlgmr.msrb.gmra.mxu0 %vm631_vm8, %v1230_v38  ;;  %986 = vmatmul.msk.bf16.vlgmr.msrb.gmra.mxu1 %vm631_vm8, %v1230_v38 }
  0xf3   :  { %v1017_v40 = vld [vmem:[#allocation3 + $0x34] sm:$0xf0]  ;;  %v940_v42 = vld [vmem:[#allocation3 + $0x38] sm:$0xf0] }
  0xf4   :  { %v939_v43 = vor.u32 %v1017_v40, %v938_v39  ;;  %v943_v44 = vor.u32 %v1013_v41, %v940_v42 }
  0xf6   :  { %759 = vmatpush.bf16.msrb.mxu2 %v939_v43  ;;  %778 = vmatpush.bf16.msrb.mxu3 %v943_v44 }
  0xf9   :  { %988 = vmatmul.msk.bf16.vlgmr.msrb.gmra.mxu2 %vm631_vm8, %v1230_v38  ;;  %990 = vmatmul.msk.bf16.vlgmr.msrb.gmra.mxu3 %vm631_vm8, %v1230_v38 }
 0x102   :  { %985 = vmatmul.msk.bf16.gmra.mxu0 %vm631_vm8, %v1266_v6  ;;  %987 = vmatmul.msk.bf16.gmra.mxu1 %vm631_vm8, %v1266_v6 }
 0x109   :  { %989 = vmatmul.msk.bf16.gmra.mxu2 %vm631_vm8, %v1266_v6  ;;  %991 = vmatmul.msk.bf16.gmra.mxu3 %vm631_vm8, %v1266_v6 }
 0x13d   :  { %v1312_v45 = vpop.permute.xlu2 %523 }
 0x13f   :  { %v1319_v51 = vpop.permute.xlu0 %528 }
 0x145   :  { %v1340_v11 = vpop.permute.xlu2 %538 }
 0x146   :  { %v1328_v19 = vpop.permute.xlu1 %533 }
 0x14c   :  { %v647_v46 = vpop.f32.mrf.mxu0  ;;  %v666_v47 = vpop.f32.mrf.mxu1 }
 0x14d   :  { %v648_v48 = vadd.f32 %v647_v46, %v1312_v45  ;;  %v667_v38 = vadd.f32 %v666_v47, %v1312_v45 }
 0x14f   :  { %v790_v49 = vpack.c.bf16 %v667_v38, %v648_v48 }
 0x151   :  { %992 = vst [vmem:[%s1405_s5 + $0x20] sm:$0xff] %v790_v49 }
 0x154   :  { %v649_v53 = vpop.f32.mrf.mxu0  ;;  %v668_v55 = vpop.f32.mrf.mxu1 }
 0x155   :  { %v650_v56 = vadd.f32 %v649_v53, %v1319_v51  ;;  %v669_v57 = vadd.f32 %v668_v55, %v1319_v51 }
 0x157   :  { %v794_v58 = vpack.c.bf16 %v669_v57, %v650_v56 }
 0x158   :  { %v685_v20 = vpop.f32.mrf.mxu2  ;;  %v704_v61 = vpop.f32.mrf.mxu3 }
 0x159   :  { %v686_v62 = vadd.f32 %v685_v20, %v1312_v45  ;;  %v705_v63 = vadd.f32 %v704_v61, %v1312_v45  ;;  %996 = vst [vmem:[%s1405_s5 + $0x80] sm:$0xff] %v794_v58 }
 0x15b   :  { %v791_v2 = vpack.c.bf16 %v705_v63, %v686_v62 }
 0x15c   :  { %v652_v60 = vpop.f32.mrf.mxu0  ;;  %v671_v3 = vpop.f32.mrf.mxu1 }
 0x15d   :  { %993 = vst [vmem:[%s1405_s5 + $0x28] sm:$0xff] %v791_v2  ;;  %v653_v4 = vadd.f32 %v652_v60, %v1328_v19  ;;  %v672_v5 = vadd.f32 %v671_v3, %v1328_v19 }
 0x15f   :  { %v798_v6 = vpack.c.bf16 %v672_v5, %v653_v4 }
 0x160   :  { %v687_v7 = vpop.f32.mrf.mxu2  ;;  %v706_v8 = vpop.f32.mrf.mxu3 }
 0x161   :  { %v688_v9 = vadd.f32 %v687_v7, %v1319_v51  ;;  %v707_v10 = vadd.f32 %v706_v8, %v1319_v51  ;;  %1000 = vst [vmem:[%s1405_s5 + $0xe0] sm:$0xff] %v798_v6 }
 0x163   :  { %v795_v1 = vpack.c.bf16 %v707_v10, %v688_v9 }
 0x164   :  { %v654_v12 = vpop.f32.mrf.mxu0  ;;  %v673_v13 = vpop.f32.mrf.mxu1 }
 0x165   :  { %997 = vst [vmem:[%s1405_s5 + $0x88] sm:$0xff] %v795_v1  ;;  %v655_v14 = vadd.f32 %v654_v12, %v1340_v11  ;;  %v674_v0 = vadd.f32 %v673_v13, %v1340_v11 }
 0x167   :  { %v802_v16 = vpack.c.bf16 %v674_v0, %v655_v14 }
 0x168   :  { %v690_v18 = vpop.f32.mrf.mxu2  ;;  %v709_v21 = vpop.f32.mrf.mxu3 }
 0x169   :  { %v691_v22 = vadd.f32 %v690_v18, %v1328_v19  ;;  %v710_v54 = vadd.f32 %v709_v21, %v1328_v19  ;;  %1004 = vst [vmem:[%s1405_s5 + $0x140] sm:$0xff] %v802_v16 }
 0x16b   :  { %v799_v23 = vpack.c.bf16 %v710_v54, %v691_v22 }
 0x16d   :  { %1001 = vst [vmem:[%s1405_s5 + $0xe8] sm:$0xff] %v799_v23 }
 0x16f   :  { %v723_v24 = vpop.f32.mrf.mxu0  ;;  %v742_v25 = vpop.f32.mrf.mxu1 }
 0x170   :  { %v692_v26 = vpop.f32.mrf.mxu2  ;;  %v711_v52 = vpop.f32.mrf.mxu3  ;;  %v724_v27 = vadd.f32 %v723_v24, %v1312_v45  ;;  %v743_v59 = vadd.f32 %v742_v25, %v1312_v45 }
 0x171   :  { %v693_v17 = vadd.f32 %v692_v26, %v1340_v11  ;;  %v712_v28 = vadd.f32 %v711_v52, %v1340_v11 }
 0x172   :  { %v792_v50 = vpack.c.bf16 %v743_v59, %v724_v27 }
 0x173   :  { %v803_v15 = vpack.c.bf16 %v712_v28, %v693_v17 }
 0x174   :  { %994 = vst [vmem:[%s1405_s5 + $0x30] sm:$0xff] %v792_v50 }
 0x175   :  { %1005 = vst [vmem:[%s1405_s5 + $0x148] sm:$0xff] %v803_v15 }
 0x177   :  { %v725_v29 = vpop.f32.mrf.mxu0  ;;  %v744_v30 = vpop.f32.mrf.mxu1 }
 0x178   :  { %v726_v31 = vadd.f32 %v725_v29, %v1319_v51  ;;  %v745_v32 = vadd.f32 %v744_v30, %v1319_v51 }
 0x17a   :  { %v796_v33 = vpack.c.bf16 %v745_v32, %v726_v31 }
 0x17c   :  { %v761_v34 = vpop.f32.mrf.mxu2  ;;  %v780_v35 = vpop.f32.mrf.mxu3  ;;  %998 = vst [vmem:[%s1405_s5 + $0x90] sm:$0xff] %v796_v33 }
 0x17d   :  { %v762_v36 = vadd.f32 %v761_v34, %v1312_v45  ;;  %v781_v37 = vadd.f32 %v780_v35, %v1312_v45 }
 0x17f   :  { %v793_v39 = vpack.c.bf16 %v781_v37, %v762_v36  ;;  %v728_v40 = vpop.f32.mrf.mxu0  ;;  %v747_v41 = vpop.f32.mrf.mxu1 }
 0x180   :  { %v729_v42 = vadd.f32 %v728_v40, %v1328_v19  ;;  %v748_v43 = vadd.f32 %v747_v41, %v1328_v19 }
 0x181   :  { %995 = vst [vmem:[%s1405_s5 + $0x38] sm:$0xff] %v793_v39 }
 0x182   :  { %v800_v44 = vpack.c.bf16 %v748_v43, %v729_v42 }
 0x184   :  { %v763_v46 = vpop.f32.mrf.mxu2  ;;  %v782_v47 = vpop.f32.mrf.mxu3  ;;  %1002 = vst [vmem:[%s1405_s5 + $0xf0] sm:$0xff] %v800_v44 }
 0x185   :  { %v764_v45 = vadd.f32 %v763_v46, %v1319_v51  ;;  %v783_v48 = vadd.f32 %v782_v47, %v1319_v51 }
 0x187   :  { %v797_v38 = vpack.c.bf16 %v783_v48, %v764_v45  ;;  %v730_v49 = vpop.f32.mrf.mxu0  ;;  %v749_v53 = vpop.f32.mrf.mxu1 }
 0x188   :  { %v731_v55 = vadd.f32 %v730_v49, %v1340_v11  ;;  %v750_v56 = vadd.f32 %v749_v53, %v1340_v11 }
 0x189   :  { %999 = vst [vmem:[%s1405_s5 + $0x98] sm:$0xff] %v797_v38 }
 0x18a   :  { %v804_v57 = vpack.c.bf16 %v750_v56, %v731_v55 }
 0x18c   :  { %v766_v58 = vpop.f32.mrf.mxu2  ;;  %v785_v20 = vpop.f32.mrf.mxu3  ;;  %1006 = vst [vmem:[%s1405_s5 + $0x150] sm:$0xff] %v804_v57 }
 0x18d   :  { %v767_v51 = vadd.f32 %v766_v58, %v1328_v19  ;;  %v786_v61 = vadd.f32 %v785_v20, %v1328_v19 }
 0x18f   :  { %v801_v62 = vpack.c.bf16 %v786_v61, %v767_v51 }
 0x191   :  { %1003 = vst [vmem:[%s1405_s5 + $0xf8] sm:$0xff] %v801_v62 }
 0x194   :  { %v768_v63 = vpop.f32.mrf.mxu2  ;;  %v787_v2 = vpop.f32.mrf.mxu3 }
 0x195   :  { %v769_v60 = vadd.f32 %v768_v63, %v1340_v11  ;;  %v788_v3 = vadd.f32 %v787_v2, %v1340_v11 }
 0x197   :  { %v805_v4 = vpack.c.bf16 %v788_v3, %v769_v60 }
 0x199   :  { %1007 = vst [vmem:[%s1405_s5 + $0x158] sm:$0xff] %v805_v4 }

// kernel: trans_conv_forward.7
= control target key start
LH: loop header
LB: loop body
LE: loop exit
PB: predicated region body
PF: predicated region fallthrough
CT: control target
= control target key end

     0   :  { %s458_s15 = smov 0   ;;  %s544_s0 = inlined_call_operand.vmem [shape: f32[4,4096], index: 0, kind: input, shape index: {}]   ;;  %s545_s1 = inlined_call_operand.vmem [shape: f32[4,1], index: 1, kind: input, shape index: {}]   ;;  %s546_s2 = inlined_call_operand.vmem [shape: f32[4,1], index: 2, kind: input, shape index: {}]   ;;  %s547_s3 = inlined_call_operand.vmem [shape: f32[1,4096], index: 3, kind: input, shape index: {}]   ;;  %s548_s4 = inlined_call_operand.vmem [shape: f32[4,4096], index: 4, kind: output, shape index: {}]  }
   0x1 LB: > { %s400_s16 = sadd.s32 4294967295, %s429_s15   ;;  %p404_p0 = scmp.ge.s32.totalorder %s429_s15, 1  ;;  %s429_s15 = sphi %s458_s15, %s14_s15  }
   0x2   : > { %p173_p1 = scmp.lt.s32.totalorder %s429_s15, 5 }
   0x4   : > { %p174_p2 = pnand %p404_p0, %p173_p1 }
   0x5   : > { %s405_s21 = sshll.u32 (!%p174_p2), %s400_s16, 3 }
   0x6   : > { %177 = sbr.rel (%p174_p2) target bundleno = 160 (0xa0), region = 36  ;;  %p204_p3 = scmp.lt.s32.totalorder (!%p174_p2), %s405_s21, 31 }
   0xb   : > { %v224_v0 = vld [vmem:[%s545_s1] sm:$0xf]  ;;  %v431_v1 = vmov 0   ;;  %s566_s21 = smov (!%p204_p3, %s405_s21), 31  ;;  %v432_v3 = vmov 839922192  }
   0xc   : > { %422 = vset.pattern.permute.xlu0 %v431_v1  ;;  %v238_v2 = vld [vmem:[%s546_s2] sm:$0xf]  ;;  %v230_v4 = vunpack.c.l.s4 %v432_v3  ;;  %s406_s22 = sshll.u32 %s566_s21, 2  ;;  %s212_s28 = scalar_lea.vmem %s547_s3, %s566_s21  ;;  %vm322_vm9 = vcmask 1043456  }
   0xd   : > { %227 = vperm.xlu0 %422, %v224_v0   ;;  %s207_s25 = scalar_lea.vmem %s544_s0, %s406_s22  ;;  %v256_v12 = vld [vmem:[%s212_s28] sm:$0xff]  ;;  %s218_s5 = scalar_lea.vmem %s548_s4, %s406_s22 }
   0xe   : > { %v231_v5 = vunpack.c.0.s8 %v230_v4  ;;  %v220_v8 = vld [vmem:[%s207_s25] sm:$0xff]  ;;  %v221_v9 = vld [vmem:[%s207_s25 + $0x8] sm:$0xff]  ;;  %v222_v10 = vld [vmem:[%s207_s25 + $0x10] sm:$0xff]  ;;  %vm257_vm0 = vcmp.gt.f32.partialorder %v256_v12, 0.5 }
   0xf   : > { %v223_v11 = vld [vmem:[%s207_s25 + $0x18] sm:$0xff]  ;;  %v258_v26 = vsel %vm257_vm0, 1, %v431_v1 }
  0x10   : > { %v259_v28 = vperm.slane %v258_v26, 0  ;;  %v260_v29 = vperm.slane %v258_v26, 1  ;;  %v261_v30 = vperm.slane %v258_v26, 2  ;;  %v262_v31 = vperm.slane %v258_v26, 3 }
  0x11   : > { %v263_v32 = vperm.slane %v258_v26, 4  ;;  %v264_v33 = vperm.slane %v258_v26, 5  ;;  %v266_v34 = vperm.slane %v258_v26, 7  ;;  %v265_v35 = vperm.slane %v258_v26, 6 }
  0x12   : > { %vm484_vm1 = vcmp.eq.s32.totalorder %v259_v28, 1  ;;  %vm488_vm2 = vcmp.eq.s32.totalorder %v260_v29, 1  ;;  %vm492_vm3 = vcmp.eq.s32.totalorder %v261_v30, 1  ;;  %vm496_vm4 = vcmp.eq.s32.totalorder %v262_v31, 1 }
  0x13   : > { %vm500_vm5 = vcmp.eq.s32.totalorder %v263_v32, 1  ;;  %vm504_vm6 = vcmp.eq.s32.totalorder %v264_v33, 1  ;;  %vm508_vm7 = vcmp.eq.s32.totalorder %v266_v34, 1  ;;  %vm512_vm8 = vcmp.eq.s32.totalorder %v265_v35, 1 }
  0x15   : > { %241 = vperm.xlu0 %422, %v238_v2  }
  0x7f   : > { %v228_v6 = vpop.permute.xlu0 %227 }
  0x80   : > { %v232_v7 = vperm.slane %v228_v6, %v231_v5 }
  0x82   : > { %v234_v13 = vmul.f32 %v232_v7, %v220_v8  ;;  %v235_v15 = vmul.f32 %v232_v7, %v221_v9  ;;  %v236_v16 = vmul.f32 %v232_v7, %v222_v10  ;;  %v237_v17 = vmul.f32 %v232_v7, %v223_v11 }
  0x87   : > { %v242_v14 = vpop.permute.xlu0 %241 }
  0x88   : > { %v246_v18 = vperm.slane %v242_v14, %v231_v5 }
  0x8a   : > { %v248_v19 = vadd.f32 %v246_v18, %v234_v13  ;;  %v249_v20 = vadd.f32 %v246_v18, %v235_v15  ;;  %v250_v21 = vadd.f32 %v246_v18, %v236_v16  ;;  %v251_v22 = vadd.f32 %v246_v18, %v237_v17 }
  0x8c   : > { %v252_v23 = vmax.f32 %v248_v19, 0.0  ;;  %v253_v24 = vmax.f32 %v249_v20, 0.0  ;;  %v254_v25 = vmax.f32 %v250_v21, 0.0  ;;  %v255_v27 = vmax.f32 %v251_v22, 0.0 }
  0x8e   : > { %279 = vst [vmem:[#allocation1] ss:$2 sm:$0xff] %v252_v23 }
  0x8f   : > { %281 = vst [vmem:[#allocation1 + $0x10] ss:$2 sm:$0xff] %v253_v24 }
  0x90   : > { %283 = vst [vmem:[#allocation1 + $0x20] ss:$2 sm:$0xff] %v254_v25 }
  0x91   : > { %285 = vst [vmem:[#allocation1 + $0x30] ss:$2 sm:$0xff] %v255_v27 }
  0x95   : > { %v287_v43 = vld.sshfl [vmem:[#allocation1 + $0x8] sm:$0xff pattern:$0x75316420]  ;;  %v286_v45 = vld.sshfl [vmem:[#allocation1] sm:$0xff pattern:$0x75316420] }
  0x96   : > { %v289_v44 = vld.sshfl [vmem:[#allocation1 + $0x18] sm:$0xff pattern:$0x75316420]  ;;  %v288_v47 = vld.sshfl [vmem:[#allocation1 + $0x10] sm:$0xff pattern:$0x75316420] }
  0x97   : > { %v291_v46 = vld.sshfl [vmem:[#allocation1 + $0x28] sm:$0xff pattern:$0x75316420]  ;;  %v290_v50 = vld.sshfl [vmem:[#allocation1 + $0x20] sm:$0xff pattern:$0x75316420] }
  0x98   : > { %v293_v48 = vld.sshfl [vmem:[#allocation1 + $0x38] sm:$0xff pattern:$0x75316420]  ;;  %v303_v51 = vsel %vm488_vm2, %v287_v43, 0.0  ;;  %v305_v52 = vsel %vm496_vm4, %v289_v44, 0.0  ;;  %v307_v54 = vsel %vm504_vm6, %v291_v46, 0.0 }
  0x99   : > { %v292_v53 = vld.sshfl [vmem:[#allocation1 + $0x30] sm:$0xff pattern:$0x75316420]  ;;  %v309_v55 = vsel %vm508_vm7, %v293_v48, 0.0  ;;  %v318_v56 = vrot.slane %v303_v51, 4  ;;  %v319_v57 = vrot.slane %v305_v52, 4 }
  0x9a   : > { %v320_v58 = vrot.slane %v307_v54, 4  ;;  %v321_v59 = vrot.slane %v309_v55, 4  ;;  %v302_v60 = vsel %vm484_vm1, %v286_v45, 0.0  ;;  %v304_v61 = vsel %vm492_vm3, %v288_v47, 0.0 }
  0x9b   : > { %v306_v62 = vsel %vm500_vm5, %v290_v50, 0.0  ;;  %v308_v63 = vsel %vm512_vm8, %v292_v53, 0.0  ;;  %v323_v0 = vsel %vm322_vm9, %v302_v60, %v318_v56  ;;  %v324_v1 = vsel %vm322_vm9, %v304_v61, %v319_v57 }
  0x9c   : > { %v325_v2 = vsel %vm322_vm9, %v306_v62, %v320_v58  ;;  %v326_v3 = vsel %vm322_vm9, %v308_v63, %v321_v59  ;;  %331 = vst [vmem:[%s218_s5] sm:$0xff] %v323_v0 }
  0x9d   : > { %332 = vst [vmem:[%s218_s5 + $0x8] sm:$0xff] %v324_v1 }
  0x9e   : > { %333 = vst [vmem:[%s218_s5 + $0x10] sm:$0xff] %v325_v2 }
  0x9f   : > { %334 = vst [vmem:[%s218_s5 + $0x18] sm:$0xff] %v326_v3 }
  0xa0 PF: > { %s14_s15 = sadd.s32 1, %s429_s15  }
  0xa1   : > { %p11_p4 = scmp.ge.s32.totalorder %s14_s15, 6  }
  0xa3   :  { %13 = sbr.rel (!%p11_p4) target bundleno = 1 (0x1), region = 72 }

// kernel: trans_conv_forward.5
= control target key start
LH: loop header
LB: loop body
LE: loop exit
PB: predicated region body
PF: predicated region fallthrough
CT: control target
= control target key end

     0   :  { %s3285_s24 = smov 0   ;;  %s4362_s0 = inlined_call_operand.vmem [shape: bf16[8,4096], index: 0, kind: input, shape index: {}, may-alias: {0,1,2}]   ;;  %s4363_s1 = inlined_call_operand.vmem [shape: bf16[8,4096], index: 1, kind: input, shape index: {}, may-alias: {0,1,2}]   ;;  %s4364_s2 = inlined_call_operand.vmem [shape: bf16[8,4096], index: 2, kind: input, shape index: {}, may-alias: {0,1,2}]   ;;  %s4365_s3 = inlined_call_operand.vmem [shape: bf16[8,216], index: 3, kind: input, shape index: {}]   ;;  %s4366_s4 = inlined_call_operand.vmem [shape: f32[8,1], index: 4, kind: input, shape index: {}]   ;;  %s4367_s5 = inlined_call_operand.vmem [shape: f32[1,4096], index: 5, kind: input, shape index: {}]   ;;  %s4368_s6 = inlined_call_operand.vmem [shape: bf16[8,4096], index: 6, kind: output, shape index: {0}]   ;;  %s4369_s7 = inlined_call_operand.vmem [shape: f32[8,256], index: 7, kind: output, shape index: {1}]  }
   0x1 LB: > { %s3291_s25 = sadd.s32 4294967295, %s3216_s24   ;;  %p2613_p0 = scmp.ge.s32.totalorder %s3216_s24, 1  ;;  %s3216_s24 = sphi %s3285_s24, %s18_s24  }
   0x2   : > { %p299_p1 = scmp.lt.s32.totalorder %s3216_s24, 3 }
   0x4   : > { %p300_p2 = pnand %p2613_p0, %p299_p1 }
   0x5   : > { %s3059_s26 = sshll.u32 (!%p300_p2), %s3291_s25, 3  ;;  %s3218_s14 = smov (!%p300_p2), 111  }
   0x6   : > { %303 = sbr.rel (%p300_p2) target bundleno = 762 (0x2fa), region = 44  ;;  %s3060_s27 = sadd.s32 (!%p300_p2), 8, %s3059_s26 }
   0x7   : > { %p357_p3 = scmp.lt.s32.totalorder (!%p300_p2), %s3060_s27, 31  ;;  %s2617_s28 = sadd.s32 (!%p300_p2), 4294967295, %s3060_s27 }
   0x8   : > { %p366_p4 = scmp.lt.s32.totalorder (!%p300_p2), %s2617_s28, 31  ;;  %s3219_s15 = smov (!%p300_p2), 110  }
   0x9   : > { %s3220_s16 = smov (!%p300_p2), 109   ;;  %s3221_s17 = smov (!%p300_p2), 101  }
   0xa   : > { %s3222_s18 = smov (!%p300_p2), 100   ;;  %s3223_s19 = smov (!%p300_p2), 99  }
   0xb   : > { %s4405_s27 = smov (!%p357_p3, %s3060_s27), 31  ;;  %s4407_s28 = smov (!%p366_p4, %s2617_s28), 31  ;;  %vm438_vm0 = vcmask 1043456   ;;  %vm440_vm1 = vcmask 908288   ;;  %vm482_vm2 = vcmask 900096   ;;  %vm524_vm3 = vcmask 891904  }
   0xc   : > { %s4370_s29 = sshll.u32 %s4405_s27, 2  ;;  %s2618_s10 = sshll.u32 %s4407_s28, 2  ;;  %vm566_vm4 = vcmask 826368   ;;  %vm608_vm5 = vcmask 818176   ;;  %vm650_vm6 = vcmask 809984   ;;  %vm4377_vm7 = vcmask 744448  }
   0xd   : > { %s360_s9 = scalar_lea.vmem %s4362_s0, %s4370_s29  ;;  %s369_s13 = scalar_lea.vmem %s4363_s1, %s2618_s10  ;;  %vm994_vm8 = vcmask 1039360   ;;  %vm4380_vm9 = vcmask 973824   ;;  %vm4379_vm10 = vcmask 7168   ;;  %vm4378_vm11 = vcmask 138240  }
   0xe   : > { %v3306_v0 = vld [vmem:[%s360_s9 + $0x18] sm:$0xff]  ;;  %v3308_v1 = vld [vmem:[%s360_s9 + $0x8] sm:$0xff]  ;;  %v3310_v2 = vld [vmem:[%s360_s9 + $0x10] sm:$0xff]  ;;  %s4371_s20 = smov 91   ;;  %s4376_s21 = smov 127   ;;  %vm860_vm12 = vcmask 80896  }
   0xf   : > { %410 = vst [vmem:[#allocation2 + $0x1c] sm:$0xff] %v3306_v0  ;;  %v3316_v3 = vld [vmem:[%s360_s9] sm:$0xff]  ;;  %s3226_s22 = smov 17   ;;  %s3227_s23 = smov 119   ;;  %vm1414_vm13 = vcmask 154624   ;;  %vm902_vm14 = vcmask 72704  }
  0x10   : > { %408 = vst [vmem:[#allocation2 + $0xc] sm:$0xff] %v3308_v1  ;;  %v401_v4 = vld [vmem:[%s369_s13] sm:$0xf]  ;;  %s3228_s28 = smov 1   ;;  %s3229_s30 = smov 9   ;;  %vm1456_vm15 = vcmask 146432  }
  0x11   : > { %409 = vst [vmem:[#allocation2 + $0x14] sm:$0xff] %v3310_v2  ;;  %s3230_s8 = smov 10   ;;  %s4372_s9 = smov 19  }
  0x12   : > { %407 = vst [vmem:[#allocation2 + $0x4] sm:$0xff] %v3316_v3  ;;  %s3232_s10 = smov 89   ;;  %s3233_s11 = smov 18  }
  0x13   : > { %402 = vst [vmem:[#allocation2] sm:$0xf] %v401_v4  ;;  %s3234_s12 = smov 11   ;;  %s4374_s13 = smov 27  }
  0x14   : > { %964 = vst [vmem:[#allocation3 + $0x1a0] sm:$0xff] %v3316_v3  ;;  %s3242_s29 = smov 118   ;;  %p396_p6 = scmp.lt.s32.totalorder %s3291_s25, 1 }
  0x16   : > { %v417_v5 = vld [vmem:[#allocation2 + $0x20] sm:$0xf]  ;;  %s4411_s25 = smov (!%p396_p6, %s3291_s25), 1 }
  0x17   : > { %431 = vrot.lane.b32.xlu2 %v417_v5, %s3218_s14  ;;  %v460_v10 = vld [vmem:[#allocation2 + $0x20] sm:$0xf] }
  0x18   : > { %v3322_v6 = vld [vmem:[#allocation2 + $0x10] sm:$0xff]  ;;  %v3328_v8 = vld [vmem:[#allocation2 + $0x18] sm:$0xff]  ;;  %v502_v11 = vld [vmem:[#allocation2 + $0x20] sm:$0xf] }
  0x19   : > { %427 = vrot.lane.b32.xlu1 %v3322_v6, %s3218_s14  ;;  %v3325_v7 = vld [vmem:[#allocation2 + $0x8] sm:$0xff]  ;;  %v544_v12 = vld [vmem:[#allocation2 + $0x20] sm:$0xf] }
  0x1a   : > { %425 = vrot.lane.b32.xlu0 %v3325_v7, %s3218_s14  ;;  %v3333_v9 = vld [vmem:[#allocation2] sm:$0xff] }
  0x1b   : > { %v586_v13 = vld [vmem:[#allocation2 + $0x20] sm:$0xf] }
  0x1c   : > { %v628_v14 = vld [vmem:[#allocation2 + $0x20] sm:$0xf] }
  0x1f   : > { %472 = vrot.lane.b32.xlu2 %v3328_v8, %s3219_s15 }
  0x21   : > { %429 = vrot.lane.b32.xlu1 %v3328_v8, %s3218_s14 }
  0x22   : > { %468 = vrot.lane.b32.xlu0 %v3325_v7, %s3219_s15 }
  0x27   : > { %466 = vrot.lane.b32.xlu2 %v3333_v9, %s3219_s15 }
  0x29   : > { %470 = vrot.lane.b32.xlu1 %v3322_v6, %s3219_s15 }
  0x2a   : > { %423 = vrot.lane.b32.xlu0 %v3333_v9, %s3218_s14  ;;  %s3236_s14 = smov 28  }
  0x2f   : > { %510 = vrot.lane.b32.xlu2 %v3325_v7, %s3220_s16 }
  0x31   : > { %508 = vrot.lane.b32.xlu1 %v3333_v9, %s3220_s16 }
  0x32   : > { %474 = vrot.lane.b32.xlu0 %v460_v10, %s3219_s15  ;;  %s3237_s15 = smov 90  }
  0x37   : > { %516 = vrot.lane.b32.xlu2 %v502_v11, %s3220_s16 }
  0x39   : > { %514 = vrot.lane.b32.xlu1 %v3328_v8, %s3220_s16 }
  0x3a   : > { %512 = vrot.lane.b32.xlu0 %v3322_v6, %s3220_s16  ;;  %s3238_s16 = smov 37  }
  0x3f   : > { %554 = vrot.lane.b32.xlu2 %v3322_v6, %s3221_s17 }
  0x41   : > { %552 = vrot.lane.b32.xlu1 %v3325_v7, %s3221_s17 }
  0x42   : > { %550 = vrot.lane.b32.xlu0 %v3333_v9, %s3221_s17 }
  0x47   : > { %592 = vrot.lane.b32.xlu2 %v3333_v9, %s3222_s18 }
  0x49   : > { %558 = vrot.lane.b32.xlu1 %v544_v12, %s3221_s17 }
  0x4a   : > { %556 = vrot.lane.b32.xlu0 %v3328_v8, %s3221_s17  ;;  %s3239_s17 = smov 29  }
  0x4f   : > { %598 = vrot.lane.b32.xlu2 %v3328_v8, %s3222_s18 }
  0x51   : > { %596 = vrot.lane.b32.xlu1 %v3322_v6, %s3222_s18 }
  0x52   : > { %594 = vrot.lane.b32.xlu0 %v3325_v7, %s3222_s18 }
  0x57   : > { %636 = vrot.lane.b32.xlu2 %v3325_v7, %s3223_s19 }
  0x59   : > { %634 = vrot.lane.b32.xlu1 %v3333_v9, %s3223_s19 }
  0x5a   : > { %600 = vrot.lane.b32.xlu0 %v586_v13, %s3222_s18  ;;  %s3240_s18 = smov 39  }
  0x5f   : > { %642 = vrot.lane.b32.xlu2 %v628_v14, %s3223_s19 }
  0x61   : > { %640 = vrot.lane.b32.xlu1 %v3328_v8, %s3223_s19 }
  0x62   : > { %638 = vrot.lane.b32.xlu0 %v3322_v6, %s3223_s19  ;;  %s3241_s19 = smov 38  }
  0x67   : > { %680 = vrot.lane.b32.xlu2 %v3322_v6, %s4371_s20 }
  0x69   : > { %678 = vrot.lane.b32.xlu1 %v3325_v7, %s4371_s20 }
  0x6a   : > { %676 = vrot.lane.b32.xlu0 %v3333_v9, %s4371_s20 }
  0x6f   : > { %980 = vrot.lane.b32.xlu2 %v3308_v1, %s4376_s21 }
  0x71   : > { %978 = vrot.lane.b32.xlu1 %v3316_v3, %s4376_s21  ;;  %v432_v15 = vpop.permute.xlu2 %431 }
  0x72   : > { %682 = vrot.lane.b32.xlu0 %v3328_v8, %s4371_s20  ;;  %v437_v26 = vrot.slane %v432_v15, 4  ;;  %s3243_s20 = smov 117  }
  0x77   : > { %1482 = vrot.lane.b32.xlu2 %v3316_v3, %s3226_s22 }
  0x79   : > { %1022 = vrot.lane.b32.xlu1 %v3308_v1, %s3227_s23  ;;  %v3370_v16 = vpop.permute.xlu2 %472 }
  0x7a   : > { %1020 = vrot.lane.b32.xlu0 %v3316_v3, %s3227_s23  ;;  %v479_v39 = vrot.slane %v3370_v16, 4 }
  0x7f   : > { %930 = vrot.lane.b32.xlu2 %v3325_v7, %s3228_s28 }
  0x81   : > { %928 = vrot.lane.b32.xlu1 %v3333_v9, %s3228_s28  ;;  %v467_v17 = vpop.permute.xlu2 %466 }
  0x82   : > { %1484 = vrot.lane.b32.xlu0 %v3308_v1, %s3226_s22  ;;  %v476_v27 = vrot.slane %v467_v17, 4 }
  0x87   : > { %886 = vrot.lane.b32.xlu2 %v3333_v9, %s3229_s30 }
  0x89   : > { %846 = vrot.lane.b32.xlu1 %v3325_v7, %s3230_s8  ;;  %v3384_v18 = vpop.permute.xlu2 %510 }
  0x8a   : > { %844 = vrot.lane.b32.xlu0 %v3333_v9, %s3230_s8  ;;  %v519_v51 = vrot.slane %v3384_v18, 4 }
  0x8b   : > { %v428_v19 = vpop.permute.xlu1 %427 }
  0x8c   : > { %v435_v20 = vrot.slane %v428_v19, 4  ;;  %v426_v21 = vpop.permute.xlu0 %425 }
  0x8d   : > { %v434_v22 = vrot.slane %v426_v21, 4 }
  0x8f   : > { %v442_v23 = vsel %vm438_vm0, %v434_v22, %v435_v20  ;;  %1400 = vrot.lane.b32.xlu2 %v3308_v1, %s4372_s9 }
  0x90   : > { %v443_v24 = vsel %vm440_vm1, %v426_v21, %v442_v23 }
  0x91   : > { %453 = vst [vmem:[#allocation3 + $0x8] sm:$0xff] %v443_v24  ;;  %1398 = vrot.lane.b32.xlu1 %v3316_v3, %s4372_s9  ;;  %v3394_v25 = vpop.permute.xlu2 %516 }
  0x92   : > { %888 = vrot.lane.b32.xlu0 %v3325_v7, %s3229_s30  ;;  %v522_v61 = vrot.slane %v3394_v25, 4 }
  0x93   : > { %v430_v28 = vpop.permute.xlu1 %429 }
  0x94   : > { %v436_v29 = vrot.slane %v430_v28, 4  ;;  %v469_v30 = vpop.permute.xlu0 %468 }
  0x95   : > { %v477_v31 = vrot.slane %v469_v30, 4 }
  0x96   : > { %v444_v32 = vsel %vm438_vm0, %v435_v20, %v436_v29  ;;  %v446_v33 = vsel %vm438_vm0, %v436_v29, %v437_v26 }
  0x97   : > { %v445_v34 = vsel %vm440_vm1, %v428_v19, %v444_v32  ;;  %v447_v35 = vsel %vm440_vm1, %v430_v28, %v446_v33  ;;  %v481_v36 = vsel %vm438_vm0, %v476_v27, %v477_v31  ;;  %760 = vrot.lane.b32.xlu2 %v3333_v9, %s3232_s10 }
  0x98   : > { %454 = vst [vmem:[#allocation3 + $0x10] sm:$0xff] %v445_v34  ;;  %v483_v37 = vsel %vm482_vm2, %v467_v17, %v481_v36 }
  0x99   : > { %455 = vst [vmem:[#allocation3 + $0x18] sm:$0xff] %v447_v35  ;;  %1442 = vrot.lane.b32.xlu1 %v3308_v1, %s3233_s11  ;;  %v3408_v38 = vpop.permute.xlu2 %554 }
  0x9a   : > { %1440 = vrot.lane.b32.xlu0 %v3316_v3, %s3233_s11  ;;  %494 = vst [vmem:[#allocation3 + $0x20] sm:$0xff] %v483_v37  ;;  %v562_v17 = vrot.slane %v3408_v38, 4 }
  0x9b   : > { %v471_v40 = vpop.permute.xlu1 %470 }
  0x9c   : > { %v478_v41 = vrot.slane %v471_v40, 4  ;;  %v424_v42 = vpop.permute.xlu0 %423 }
  0x9d   : > { %v433_v43 = vrot.slane %v424_v42, 4 }
  0x9e   : > { %v484_v44 = vsel %vm438_vm0, %v477_v31, %v478_v41  ;;  %v486_v45 = vsel %vm438_vm0, %v478_v41, %v479_v39 }
  0x9f   : > { %v485_v46 = vsel %vm482_vm2, %v469_v30, %v484_v44  ;;  %v487_v47 = vsel %vm482_vm2, %v471_v40, %v486_v45  ;;  %v439_v48 = vsel %vm438_vm0, %v433_v43, %v434_v22  ;;  %804 = vrot.lane.b32.xlu2 %v3325_v7, %s3234_s12 }
  0xa0   : > { %495 = vst [vmem:[#allocation3 + $0x28] sm:$0xff] %v485_v46  ;;  %v441_v49 = vsel %vm440_vm1, %v424_v42, %v439_v48  ;;  %vm818_vm1 = vcmask 89088  }
  0xa1   : > { %496 = vst [vmem:[#allocation3 + $0x30] sm:$0xff] %v487_v47  ;;  %802 = vrot.lane.b32.xlu1 %v3333_v9, %s3234_s12  ;;  %v3423_v50 = vpop.permute.xlu2 %592 }
  0xa2   : > { %452 = vst [vmem:[#allocation3] sm:$0xff] %v441_v49  ;;  %762 = vrot.lane.b32.xlu0 %v3325_v7, %s3232_s10  ;;  %v602_v35 = vrot.slane %v3423_v50, 4 }
  0xa3   : > { %v509_v52 = vpop.permute.xlu1 %508 }
  0xa4   : > { %v518_v53 = vrot.slane %v509_v52, 4  ;;  %v475_v54 = vpop.permute.xlu0 %474 }
  0xa5   : > { %v480_v55 = vrot.slane %v475_v54, 4 }
  0xa6   : > { %v523_v56 = vsel %vm438_vm0, %v518_v53, %v519_v51 }
  0xa7   : > { %v525_v57 = vsel %vm524_vm3, %v509_v52, %v523_v56  ;;  %v488_v58 = vsel %vm438_vm0, %v479_v39, %v480_v55  ;;  %1356 = vrot.lane.b32.xlu2 %v3316_v3, %s4374_s13 }
  0xa8   : > { %536 = vst [vmem:[#allocation3 + $0x40] sm:$0xff] %v525_v57  ;;  %v489_v59 = vsel %vm482_vm2, %v3370_v16, %v488_v58  ;;  %vm776_vm2 = vcmask 728064  }
  0xa9   : > { %497 = vst [vmem:[#allocation3 + $0x38] sm:$0xff] %v489_v59  ;;  %1316 = vrot.lane.b32.xlu1 %v3308_v1, %s3236_s14  ;;  %v3437_v60 = vpop.permute.xlu2 %598 }
  0xaa   : > { %1314 = vrot.lane.b32.xlu0 %v3316_v3, %s3236_s14  ;;  %v605_v34 = vrot.slane %v3437_v60, 4 }
  0xab   : > { %v515_v62 = vpop.permute.xlu1 %514 }
  0xac   : > { %v521_v63 = vrot.slane %v515_v62, 4  ;;  %v513_v4 = vpop.permute.xlu0 %512 }
  0xad   : > { %v520_v5 = vrot.slane %v513_v4, 4 }
  0xae   : > { %v530_v10 = vsel %vm438_vm0, %v521_v63, %v522_v61 }
  0xaf   : > { %v531_v11 = vsel %vm524_vm3, %v515_v62, %v530_v10  ;;  %v526_v12 = vsel %vm438_vm0, %v519_v51, %v520_v5  ;;  %v528_v13 = vsel %vm438_vm0, %v520_v5, %v521_v63  ;;  %720 = vrot.lane.b32.xlu2 %v3325_v7, %s3237_s15 }
  0xb0   : > { %539 = vst [vmem:[#allocation3 + $0x58] sm:$0xff] %v531_v11  ;;  %v527_v14 = vsel %vm524_vm3, %v3384_v18, %v526_v12  ;;  %v529_v15 = vsel %vm524_vm3, %v513_v4, %v528_v13  ;;  %vm4384_vm3 = vcmask 228352  }
  0xb1   : > { %537 = vst [vmem:[#allocation3 + $0x48] sm:$0xff] %v527_v14  ;;  %718 = vrot.lane.b32.xlu1 %v3333_v9, %s3237_s15  ;;  %v3453_v16 = vpop.permute.xlu2 %636 }
  0xb2   : > { %538 = vst [vmem:[#allocation3 + $0x50] sm:$0xff] %v529_v15  ;;  %1358 = vrot.lane.b32.xlu0 %v3308_v1, %s4374_s13  ;;  %v645_v47 = vrot.slane %v3453_v16, 4 }
  0xb3   : > { %v553_v19 = vpop.permute.xlu1 %552 }
  0xb4   : > { %v561_v7 = vrot.slane %v553_v19, 4  ;;  %v551_v20 = vpop.permute.xlu0 %550 }
  0xb5   : > { %v560_v21 = vrot.slane %v551_v20, 4 }
  0xb6   : > { %v568_v18 = vsel %vm438_vm0, %v561_v7, %v562_v17 }
  0xb7   : > { %v569_v22 = vsel %vm566_vm4, %v553_v19, %v568_v18  ;;  %v565_v23 = vsel %vm438_vm0, %v560_v21, %v561_v7  ;;  %1230 = vrot.lane.b32.xlu2 %v3316_v3, %s3238_s16 }
  0xb8   : > { %579 = vst [vmem:[#allocation3 + $0x68] sm:$0xff] %v569_v22  ;;  %v567_v9 = vsel %vm566_vm4, %v551_v20, %v565_v23 }
  0xb9   : > { %578 = vst [vmem:[#allocation3 + $0x60] sm:$0xff] %v567_v9  ;;  %1024 = vrot.lane.b32.xlu1 %v3310_v2, %s3227_s23  ;;  %v643_v24 = vpop.permute.xlu2 %642 }
  0xba   : > { %982 = vrot.lane.b32.xlu0 %v3310_v2, %s4376_s21  ;;  %v648_v57 = vrot.slane %v643_v24, 4 }
  0xbb   : > { %v559_v25 = vpop.permute.xlu1 %558 }
  0xbc   : > { %v564_v26 = vrot.slane %v559_v25, 4  ;;  %v557_v27 = vpop.permute.xlu0 %556 }
  0xbd   : > { %v563_v28 = vrot.slane %v557_v27, 4 }
  0xbf   : > { %v570_v29 = vsel %vm438_vm0, %v562_v17, %v563_v28  ;;  %v572_v30 = vsel %vm438_vm0, %v563_v28, %v564_v26  ;;  %1274 = vrot.lane.b32.xlu2 %v3308_v1, %s3239_s17 }
  0xc0   : > { %v571_v31 = vsel %vm566_vm4, %v3408_v38, %v570_v29  ;;  %v573_v32 = vsel %vm566_vm4, %v557_v27, %v572_v30  ;;  %vm734_vm4 = vcmask 736256  }
  0xc1   : > { %580 = vst [vmem:[#allocation3 + $0x70] sm:$0xff] %v571_v31  ;;  %1272 = vrot.lane.b32.xlu1 %v3316_v3, %s3239_s17  ;;  %v3477_v33 = vpop.permute.xlu2 %680 }
  0xc2   : > { %581 = vst [vmem:[#allocation3 + $0x78] sm:$0xff] %v573_v32  ;;  %1232 = vrot.lane.b32.xlu0 %v3308_v1, %s3238_s16  ;;  %v688_v13 = vrot.slane %v3477_v33, 4 }
  0xc3   : > { %v597_v36 = vpop.permute.xlu1 %596 }
  0xc4   : > { %v604_v37 = vrot.slane %v597_v36, 4  ;;  %v595_v38 = vpop.permute.xlu0 %594 }
  0xc5   : > { %v603_v39 = vrot.slane %v595_v38, 4 }
  0xc6   : > { %v612_v40 = vsel %vm438_vm0, %v604_v37, %v605_v34 }
  0xc7   : > { %v613_v41 = vsel %vm608_vm5, %v597_v36, %v612_v40  ;;  %v607_v42 = vsel %vm438_vm0, %v602_v35, %v603_v39  ;;  %v610_v43 = vsel %vm438_vm0, %v603_v39, %v604_v37  ;;  %1146 = vrot.lane.b32.xlu2 %v3316_v3, %s3240_s18 }
  0xc8   : > { %622 = vst [vmem:[#allocation3 + $0x90] sm:$0xff] %v613_v41  ;;  %v609_v44 = vsel %vm608_vm5, %v3423_v50, %v607_v42  ;;  %v611_v45 = vsel %vm608_vm5, %v595_v38, %v610_v43 }
  0xc9   : > { %620 = vst [vmem:[#allocation3 + $0x80] sm:$0xff] %v609_v44  ;;  %932 = vrot.lane.b32.xlu1 %v3322_v6, %s3228_s28  ;;  %v3494_v46 = vpop.permute.xlu2 %980 }
  0xca   : > { %621 = vst [vmem:[#allocation3 + $0x88] sm:$0xff] %v611_v45  ;;  %1486 = vrot.lane.b32.xlu0 %v3310_v2, %s3226_s22  ;;  %v989_v22 = vrot.slane %v3494_v46, 4 }
  0xcb   : > { %v635_v48 = vpop.permute.xlu1 %634 }
  0xcc   : > { %v644_v49 = vrot.slane %v635_v48, 4  ;;  %v601_v51 = vpop.permute.xlu0 %600 }
  0xcd   : > { %v606_v52 = vrot.slane %v601_v51, 4 }
  0xce   : > { %v649_v50 = vsel %vm438_vm0, %v644_v49, %v645_v47 }
  0xcf   : > { %v651_v53 = vsel %vm650_vm6, %v635_v48, %v649_v50  ;;  %v614_v54 = vsel %vm438_vm0, %v605_v34, %v606_v52  ;;  %1190 = vrot.lane.b32.xlu2 %v3308_v1, %s3241_s19 }
  0xd0   : > { %662 = vst [vmem:[#allocation3 + $0xa0] sm:$0xff] %v651_v53  ;;  %v615_v55 = vsel %vm608_vm5, %v3437_v60, %v614_v54  ;;  %vm1372_vm5 = vcmask 220160  }
  0xd1   : > { %623 = vst [vmem:[#allocation3 + $0x98] sm:$0xff] %v615_v55  ;;  %1188 = vrot.lane.b32.xlu1 %v3316_v3, %s3241_s19  ;;  %v3508_v56 = vpop.permute.xlu2 %1482 }
  0xd2   : > { %1148 = vrot.lane.b32.xlu0 %v3308_v1, %s3240_s18  ;;  %v1492_v37 = vrot.slane %v3508_v56, 4 }
  0xd3   : > { %v641_v58 = vpop.permute.xlu1 %640 }
  0xd4   : > { %v647_v59 = vrot.slane %v641_v58, 4  ;;  %v639_v61 = vpop.permute.xlu0 %638 }
  0xd5   : > { %v646_v62 = vrot.slane %v639_v61, 4 }
  0xd6   : > { %v656_v63 = vsel %vm438_vm0, %v647_v59, %v648_v57 }
  0xd7   : > { %v657_v4 = vsel %vm650_vm6, %v641_v58, %v656_v63  ;;  %v652_v60 = vsel %vm438_vm0, %v645_v47, %v646_v62  ;;  %v654_v5 = vsel %vm438_vm0, %v646_v62, %v647_v59  ;;  %1062 = vrot.lane.b32.xlu2 %v3316_v3, %s3242_s29  ;;  %v2821_v63 = vld [vmem:[#allocation3 + $0x1a0] sm:$0xf0] }
  0xd8   : > { %665 = vst [vmem:[#allocation3 + $0xb8] sm:$0xff] %v657_v4  ;;  %v653_v10 = vsel %vm650_vm6, %v3453_v16, %v652_v60  ;;  %v655_v11 = vsel %vm650_vm6, %v639_v61, %v654_v5  ;;  %v3121_v61 = vld [vmem:[#allocation3 + $0x19c] sm:$0xf0]  ;;  %vm4383_vm6 = vcmask 236544  }
  0xd9   : > { %663 = vst [vmem:[#allocation3 + $0xa8] sm:$0xff] %v653_v10  ;;  %890 = vrot.lane.b32.xlu1 %v3322_v6, %s3229_s30  ;;  %v3523_v12 = vpop.permute.xlu2 %930 }
  0xda   : > { %664 = vst [vmem:[#allocation3 + $0xb0] sm:$0xff] %v655_v11  ;;  %848 = vrot.lane.b32.xlu0 %v3322_v6, %s3230_s8  ;;  %v939_v36 = vrot.slane %v3523_v12, 4 }
  0xdb   : > { %v679_v14 = vpop.permute.xlu1 %678 }
  0xdc   : > { %v687_v15 = vrot.slane %v679_v14, 4  ;;  %v677_v17 = vpop.permute.xlu0 %676 }
  0xdd   : > { %v686_v19 = vrot.slane %v677_v17, 4 }
  0xde   : > { %v694_v16 = vsel %vm438_vm0, %v687_v15, %v688_v13 }
  0xdf   : > { %v695_v7 = vsel %vm4377_vm7, %v679_v14, %v694_v16  ;;  %v691_v20 = vsel %vm438_vm0, %v686_v19, %v687_v15  ;;  %1106 = vrot.lane.b32.xlu2 %v3308_v1, %s3243_s20 }
  0xe0   : > { %705 = vst [vmem:[#allocation3 + $0xc8] sm:$0xff] %v695_v7  ;;  %v693_v21 = vsel %vm4377_vm7, %v677_v17, %v691_v20 }
  0xe1   : > { %704 = vst [vmem:[#allocation3 + $0xc0] sm:$0xff] %v693_v21  ;;  %1104 = vrot.lane.b32.xlu1 %v3316_v3, %s3243_s20  ;;  %v3536_v18 = vpop.permute.xlu2 %886 }
  0xe2   : > { %1064 = vrot.lane.b32.xlu0 %v3308_v1, %s3242_s29  ;;  %v896_v7 = vrot.slane %v3536_v18, 4 }
  0xe3   : > { %v979_v23 = vpop.permute.xlu1 %978 }
  0xe4   : > { %v988_v9 = vrot.slane %v979_v23, 4  ;;  %v3541_v24 = vpop.permute.xlu0 %682 }
  0xe5   : > { %v689_v25 = vrot.slane %v3541_v24, 4 }
  0xe6   : > { %v993_v26 = vsel %vm438_vm0, %v988_v9, %v989_v22 }
  0xe7   : > { %v995_v3 = vsel %vm994_vm8, %v979_v23, %v993_v26  ;;  %v696_v27 = vsel %vm438_vm0, %v688_v13, %v689_v25  ;;  %764 = vrot.lane.b32.xlu2 %v3322_v6, %s3232_s10 }
  0xe8   : > { %1006 = vst [vmem:[#allocation3 + $0x1c0] sm:$0xff] %v995_v3  ;;  %v697_v1 = vsel %vm4377_vm7, %v3477_v33, %v696_v27  ;;  %vm1246_vm7 = vcmask 302080  }
  0xe9   : > { %706 = vst [vmem:[#allocation3 + $0xd0] sm:$0xff] %v697_v1  ;;  %1444 = vrot.lane.b32.xlu1 %v3310_v2, %s3233_s11  ;;  %v3557_v28 = vpop.permute.xlu2 %1400 }
  0xea   : > { %1402 = vrot.lane.b32.xlu0 %v3310_v2, %s4372_s9  ;;  %s3064_s9 = sadd.s32 16, %s3059_s26  ;;  %v1409_v19 = vrot.slane %v3557_v28, 4 }
  0xeb   : > { %v3561_v29 = vpop.permute.xlu1 %1022  ;;  %p375_p5 = scmp.lt.s32.totalorder %s3064_s9, 31 }
  0xec   : > { %v1031_v30 = vrot.slane %v3561_v29, 4  ;;  %v1021_v31 = vpop.permute.xlu0 %1020 }
  0xed   : > { %v1030_v32 = vrot.slane %v1021_v31, 4  ;;  %s4409_s9 = smov (!%p375_p5, %s3064_s9), 31 }
  0xee   : > { %s2620_s26 = sshll.u32 %s4409_s9, 2 }
  0xef   : > { %v1035_v33 = vsel %vm438_vm0, %v1030_v32, %v1031_v30  ;;  %1026 = vrot.lane.b32.xlu2 %v3306_v0, %s3227_s23  ;;  %v2851_v45 = vld [vmem:[#allocation3 + $0x1c0] sm:$0xf]  ;;  %v3125_v47 = vld [vmem:[#allocation3 + $0x1c4] sm:$0xf] }
  0xf0   : > { %v1037_v34 = vsel %vm4380_vm9, %v1021_v31, %v1035_v33 }
  0xf1   : > { %1048 = vst [vmem:[#allocation3 + $0x1e0] sm:$0xff] %v1037_v34  ;;  %984 = vrot.lane.b32.xlu1 %v3306_v0, %s4376_s21  ;;  %v3572_v35 = vpop.permute.xlu2 %760  ;;  %s378_s21 = scalar_lea.vmem %s4364_s2, %s2620_s26 }
  0xf2   : > { %806 = vrot.lane.b32.xlu0 %v3322_v6, %s3234_s12  ;;  %v411_v16 = vld [vmem:[%s378_s21] sm:$0xf]  ;;  %s4385_s21 = smov 19  }
  0xf3   : > { %v929_v38 = vpop.permute.xlu1 %928  ;;  %412 = vst [vmem:[#allocation2 + $0x24] sm:$0xf] %v411_v16  ;;  %v711_v16 = vld [vmem:[#allocation2 + $0x18] sm:$0xff] }
  0xf4   : > { %v938_v39 = vrot.slane %v929_v38, 4  ;;  %v3580_v40 = vpop.permute.xlu0 %1484 }
  0xf5   : > { %v1493_v41 = vrot.slane %v3580_v40, 4 }
  0xf6   : > { %v943_v42 = vsel %vm438_vm0, %v938_v39, %v939_v36 }
  0xf7   : > { %v945_v43 = vsel %vm4379_vm10, %v929_v38, %v943_v42  ;;  %v1497_v44 = vsel %vm438_vm0, %v1492_v37, %v1493_v41  ;;  %722 = vrot.lane.b32.xlu2 %v3322_v6, %s3237_s15 }
  0xf8   : > { %956 = vst [vmem:[#allocation3 + $0x180] sm:$0xff] %v945_v43  ;;  %v1499_v48 = vsel %vm4378_vm11, %v3508_v56, %v1497_v44  ;;  %v3129_v49 = vld [vmem:[#allocation3 + $0x1dc] sm:$0xf0]  ;;  %v2853_v51 = vld [vmem:[#allocation3 + $0x1e0] sm:$0xf0] }
  0xf9   : > { %1360 = vrot.lane.b32.xlu1 %v3310_v2, %s4374_s13  ;;  %v2852_v52 = vor.u32 %v3129_v49, %v2851_v45  ;;  %v2856_v50 = vor.u32 %v3125_v47, %v2853_v51  ;;  %v3598_v53 = vpop.permute.xlu2 %804  ;;  %v1951_v54 = vunpack.c.l.b16 %v1499_v48  ;;  %v1952_v6 = vunpack.c.h.b16 %v1499_v48  ;;  %s4386_s13 = smov 127  }
  0xfa   : > { %1318 = vrot.lane.b32.xlu0 %v3310_v2, %s3236_s14  ;;  %v813_v49 = vrot.slane %v3598_v53, 4  ;;  %v770_v51 = vrot.slane %v3572_v35, 4 }
  0xfb   : > { %2204 = vmatpush.bf16.msra.mxu0 %v2852_v52  ;;  %2230 = vmatpush.bf16.msra.mxu2 %v2856_v50  ;;  %v3602_v55 = vpop.permute.xlu1 %846  ;;  %v2063_v56 = vpack.c.b16 %v1951_v54, %v1951_v54  ;;  %v2064_v57 = vpack.c.b16 %v1952_v6, %v1952_v6 }
  0xfc   : > { %v855_v58 = vrot.slane %v3602_v55, 4  ;;  %v845_v59 = vpop.permute.xlu0 %844 }
  0xfd   : > { %v854_v62 = vrot.slane %v845_v59, 4  ;;  %v2181_v4 = vsel %vm438_vm0, %v2063_v56, 0  ;;  %v2184_v60 = vsel %vm438_vm0, %v2064_v57, 0 }
  0xfe   : > { %2219 = vmatpush.bf16.msra.mxu1 %v2181_v4  ;;  %2245 = vmatpush.bf16.msra.mxu3 %v2184_v60 }
  0xff   : > { %v859_v5 = vsel %vm438_vm0, %v854_v62, %v855_v58  ;;  %1276 = vrot.lane.b32.xlu2 %v3310_v2, %s3239_s17  ;;  %v2819_v10 = vld [vmem:[#allocation3 + $0x180] sm:$0xf]  ;;  %v3117_v11 = vld [vmem:[#allocation3 + $0x184] sm:$0xf] }
 0x100   : > { %v861_v13 = vsel %vm860_vm12, %v845_v59, %v859_v5  ;;  %v2820_v14 = vor.u32 %v3121_v61, %v2819_v10  ;;  %v2824_v15 = vor.u32 %v3117_v11, %v2821_v63 }
 0x101   : > { %872 = vst [vmem:[#allocation3 + $0x140] sm:$0xff] %v861_v13  ;;  %1234 = vrot.lane.b32.xlu1 %v3310_v2, %s3238_s16  ;;  %v3619_v17 = vpop.permute.xlu2 %1356 }
 0x102   : > { %934 = vrot.lane.b32.xlu0 %v3328_v8, %s3228_s28  ;;  %2205 = vmatpush.bf16.msra.mxu0 %v2820_v14  ;;  %v3685_v14 = vld [vmem:[#allocation2 + $0x1c] sm:$0xff] }
 0x103   : > { %v1399_v20 = vpop.permute.xlu1 %1398  ;;  %2231 = vmatpush.bf16.msra.mxu2 %v2824_v15 }
 0x104   : > { %v1408_v21 = vrot.slane %v1399_v20, 4  ;;  %v3625_v23 = vpop.permute.xlu0 %888 }
 0x105   : > { %v897_v9 = vrot.slane %v3625_v23, 4 }
 0x106   : > { %v1413_v26 = vsel %vm438_vm0, %v1408_v21, %v1409_v19 }
 0x107   : > { %v1415_v3 = vsel %vm1414_vm13, %v1399_v20, %v1413_v26  ;;  %v901_v27 = vsel %vm438_vm0, %v896_v7, %v897_v9  ;;  %1150 = vrot.lane.b32.xlu2 %v3310_v2, %s3240_s18 }
 0x108   : > { %1426 = vst [vmem:[#allocation3 + $0x300] sm:$0xff] %v1415_v3  ;;  %v903_v1 = vsel %vm902_vm14, %v3536_v18, %v901_v27  ;;  %v2787_v38 = vld [vmem:[#allocation3 + $0x140] sm:$0xf]  ;;  %v3109_v43 = vld [vmem:[#allocation3 + $0x144] sm:$0xf] }
 0x109   : > { %914 = vst [vmem:[#allocation3 + $0x160] sm:$0xff] %v903_v1  ;;  %892 = vrot.lane.b32.xlu1 %v3328_v8, %s3229_s30  ;;  %v3641_v31 = vpop.permute.xlu2 %720 }
 0x10a   : > { %850 = vrot.lane.b32.xlu0 %v3328_v8, %s3230_s8 }
 0x10b   : > { %v3645_v32 = vpop.permute.xlu1 %1442 }
 0x10c   : > { %v1451_v33 = vrot.slane %v3645_v32, 4  ;;  %v1441_v34 = vpop.permute.xlu0 %1440 }
 0x10d   : > { %v1450_v37 = vrot.slane %v1441_v34, 4 }
 0x10f   : > { %v1455_v18 = vsel %vm438_vm0, %v1450_v37, %v1451_v33  ;;  %766 = vrot.lane.b32.xlu2 %v3328_v8, %s3232_s10  ;;  %v3011_v59 = vld [vmem:[#allocation3 + $0x300] sm:$0xf]  ;;  %v3165_v61 = vld [vmem:[#allocation3 + $0x304] sm:$0xf]  ;;  %v729_v37 = vrot.slane %v3641_v31, 4 }
 0x110   : > { %v1457_v39 = vsel %vm1456_vm15, %v1441_v34, %v1455_v18  ;;  %v3113_v42 = vld [vmem:[#allocation3 + $0x15c] sm:$0xf0]  ;;  %v2789_v44 = vld [vmem:[#allocation3 + $0x160] sm:$0xf0]  ;;  %v1366_v18 = vrot.slane %v3619_v17, 4 }
 0x111   : > { %1468 = vst [vmem:[#allocation3 + $0x320] sm:$0xff] %v1457_v39  ;;  %1488 = vrot.lane.b32.xlu1 %v3306_v0, %s3226_s22  ;;  %v2788_v45 = vor.u32 %v3113_v42, %v2787_v38  ;;  %v2792_v47 = vor.u32 %v3109_v43, %v2789_v44  ;;  %v3656_v48 = vpop.permute.xlu2 %1230  ;;  %v961_v34 = vld [vmem:[#allocation2 + $0xc] sm:$0xff] }
 0x112   : > { %1192 = vrot.lane.b32.xlu0 %v3310_v2, %s3241_s19  ;;  %965 = vst [vmem:[#allocation3 + $0x1a8] sm:$0xff] %v961_v34 }
 0x113   : > { %2206 = vmatpush.bf16.msra.mxu0 %v2788_v45  ;;  %2232 = vmatpush.bf16.msra.mxu2 %v2792_v47  ;;  %v803_v52 = vpop.permute.xlu1 %802  ;;  %v1014_v45 = vld [vmem:[#allocation2 + $0x24] sm:$0xf] }
 0x114   : > { %v812_v50 = vrot.slane %v803_v52, 4  ;;  %v3662_v54 = vpop.permute.xlu0 %762 }
 0x115   : > { %v771_v0 = vrot.slane %v3662_v54, 4 }
 0x116   : > { %v817_v6 = vsel %vm438_vm0, %v812_v50, %v813_v49 }
 0x117   : > { %v819_v56 = vsel %vm818_vm1, %v803_v52, %v817_v6  ;;  %v775_v57 = vsel %vm438_vm0, %v770_v51, %v771_v0  ;;  %1108 = vrot.lane.b32.xlu2 %v3310_v2, %s3243_s20  ;;  %v972_v52 = vld [vmem:[#allocation2 + $0x24] sm:$0xf] }
 0x118   : > { %830 = vst [vmem:[#allocation3 + $0x120] sm:$0xff] %v819_v56  ;;  %v777_v62 = vsel %vm776_vm2, %v3572_v35, %v775_v57  ;;  %v3169_v63 = vld [vmem:[#allocation3 + $0x31c] sm:$0xf0]  ;;  %v3013_v4 = vld [vmem:[#allocation3 + $0x320] sm:$0xf0] }
 0x119   : > { %788 = vst [vmem:[#allocation3 + $0x100] sm:$0xff] %v777_v62  ;;  %1066 = vrot.lane.b32.xlu1 %v3310_v2, %s3242_s29  ;;  %v3012_v60 = vor.u32 %v3169_v63, %v3011_v59  ;;  %v3016_v5 = vor.u32 %v3165_v61, %v3013_v4  ;;  %v3678_v10 = vpop.permute.xlu2 %1274  ;;  %v922_v61 = vld [vmem:[#allocation2 + $0x20] sm:$0xf]  ;;  %v2723_v63 = vld [vmem:[#allocation3 + $0xc0] sm:$0xf] }
 0x11a   : > { %808 = vrot.lane.b32.xlu0 %v3328_v8, %s3234_s12  ;;  %v1476_v4 = vld [vmem:[#allocation2 + $0x24] sm:$0xf]  ;;  %v1283_v34 = vrot.slane %v3678_v10, 4 }
 0x11b   : > { %2220 = vmatpush.bf16.msra.mxu1 %v3012_v60  ;;  %2246 = vmatpush.bf16.msra.mxu3 %v3016_v5  ;;  %v3682_v11 = vpop.permute.xlu1 %1316  ;;  %v3093_v5 = vld [vmem:[#allocation3 + $0xc4] sm:$0xf] }
 0x11c   : > { %v1325_v13 = vrot.slane %v3682_v11, 4  ;;  %v1315_v35 = vpop.permute.xlu0 %1314 }
 0x11d   : > { %v1324_v15 = vrot.slane %v1315_v35, 4 }
 0x11f   : > { %v1329_v2 = vsel %vm438_vm0, %v1324_v15, %v1325_v13  ;;  %1446 = vrot.lane.b32.xlu2 %v3685_v14, %s3233_s11  ;;  %v3105_v8 = vld [vmem:[#allocation3 + $0x11c] sm:$0xf0]  ;;  %v2757_v7 = vld [vmem:[#allocation3 + $0x120] sm:$0xf0] }
 0x120   : > { %v1331_v20 = vsel %vm4384_vm3, %v1315_v35, %v1329_v2  ;;  %v2755_v21 = vld [vmem:[#allocation3 + $0x100] sm:$0xf]  ;;  %v3101_v26 = vld [vmem:[#allocation3 + $0x104] sm:$0xf] }
 0x121   : > { %1342 = vst [vmem:[#allocation3 + $0x2c0] sm:$0xff] %v1331_v20  ;;  %1404 = vrot.lane.b32.xlu1 %v3685_v14, %s4385_s21  ;;  %v2756_v3 = vor.u32 %v3105_v8, %v2755_v21  ;;  %v2760_v27 = vor.u32 %v3101_v26, %v2757_v7  ;;  %v3695_v1 = vpop.permute.xlu2 %1146 }
 0x122   : > { %724 = vrot.lane.b32.xlu0 %v711_v16, %s3237_s15 }
 0x123   : > { %2207 = vmatpush.bf16.msra.mxu0 %v2756_v3  ;;  %2233 = vmatpush.bf16.msra.mxu2 %v2760_v27  ;;  %v719_v38 = vpop.permute.xlu1 %718 }
 0x124   : > { %v728_v39 = vrot.slane %v719_v38, 4  ;;  %v3700_v42 = vpop.permute.xlu0 %1358 }
 0x125   : > { %v1367_v43 = vrot.slane %v3700_v42, 4 }
 0x126   : > { %v733_v44 = vsel %vm438_vm0, %v728_v39, %v729_v37  ;;  %v2691_v39 = vld [vmem:[#allocation3 + $0x80] sm:$0xf] }
 0x127   : > { %v735_v47 = vsel %vm734_vm4, %v719_v38, %v733_v44  ;;  %v1371_v51 = vsel %vm438_vm0, %v1366_v18, %v1367_v43  ;;  %1320 = vrot.lane.b32.xlu2 %v3685_v14, %s3236_s14  ;;  %v2693_v18 = vld [vmem:[#allocation3 + $0xa0] sm:$0xf0] }
 0x128   : > { %746 = vst [vmem:[#allocation3 + $0xe0] sm:$0xff] %v735_v47  ;;  %v1373_v50 = vsel %vm1372_vm5, %v3619_v17, %v1371_v51  ;;  %v2979_v60 = vld [vmem:[#allocation3 + $0x2c0] sm:$0xf]  ;;  %v3157_v8 = vld [vmem:[#allocation3 + $0x2c4] sm:$0xf] }
 0x129   : > { %1384 = vst [vmem:[#allocation3 + $0x2e0] sm:$0xff] %v1373_v50  ;;  %1028 = vrot.lane.b32.xlu1 %v1014_v45, %s3227_s23  ;;  %v3715_v6 = vpop.permute.xlu2 %1190  ;;  %s4387_s23 = smov 27   ;;  %v3085_v51 = vld [vmem:[#allocation3 + $0x84] sm:$0xf] }
 0x12a   : > { %986 = vrot.lane.b32.xlu0 %v972_v52, %s4386_s13  ;;  %v838_v52 = vld [vmem:[#allocation2 + $0x20] sm:$0xf] }
 0x12b   : > { %v3718_v56 = vpop.permute.xlu1 %1024 }
 0x12c   : > { %v1032_v57 = vrot.slane %v3718_v56, 4  ;;  %v3721_v59 = vpop.permute.xlu0 %982 }
 0x12d   : > { %v990_v62 = vrot.slane %v3721_v59, 4 }
 0x12e   : > { %v1038_v17 = vsel %vm438_vm0, %v1031_v30, %v1032_v57 }
 0x12f   : > { %v1039_v35 = vsel %vm4380_vm9, %v3561_v29, %v1038_v17  ;;  %v996_v15 = vsel %vm438_vm0, %v989_v22, %v990_v62  ;;  %936 = vrot.lane.b32.xlu2 %v922_v61, %s3228_s28  ;;  %v3097_v2 = vld [vmem:[#allocation3 + $0xdc] sm:$0xf0]  ;;  %v2725_v16 = vld [vmem:[#allocation3 + $0xe0] sm:$0xf0]  ;;  %v2696_v61 = vor.u32 %v3085_v51, %v2693_v18 }
 0x130   : > { %1049 = vst [vmem:[#allocation3 + $0x1e8] sm:$0xff] %v1039_v35  ;;  %v997_v30 = vsel %vm994_vm8, %v3494_v46, %v996_v15  ;;  %v2724_v7 = vor.u32 %v3097_v2, %v2723_v63  ;;  %v3161_v20 = vld [vmem:[#allocation3 + $0x2dc] sm:$0xf0]  ;;  %v2728_v21 = vor.u32 %v3093_v5, %v2725_v16  ;;  %v2981_v26 = vld [vmem:[#allocation3 + $0x2e0] sm:$0xf0]  ;;  %v1240_v46 = vrot.slane %v3656_v48, 4 }
 0x131   : > { %1007 = vst [vmem:[#allocation3 + $0x1c8] sm:$0xff] %v997_v30  ;;  %1490 = vrot.lane.b32.xlu1 %v1476_v4, %s3226_s22  ;;  %v2980_v29 = vor.u32 %v3161_v20, %v2979_v60  ;;  %v2984_v3 = vor.u32 %v3157_v8, %v2981_v26  ;;  %v3740_v27 = vpop.permute.xlu2 %1062  ;;  %v3089_v22 = vld [vmem:[#allocation3 + $0x9c] sm:$0xf0]  ;;  %v2661_v4 = vld [vmem:[#allocation3 + $0x60] sm:$0xf0]  ;;  %s4388_s22 = smov 91  }
 0x132   : > { %1362 = vrot.lane.b32.xlu0 %v3685_v14, %s4387_s23  ;;  %2208 = vmatpush.bf16.msra.mxu0 %v2724_v7  ;;  %v2692_v47 = vor.u32 %v3089_v22, %v2691_v39  ;;  %v3081_v63 = vld [vmem:[#allocation3 + $0x5c] sm:$0xf0]  ;;  %v3077_v16 = vld [vmem:[#allocation3 + $0x44] sm:$0xf] }
 0x133   : > { %2221 = vmatpush.bf16.msra.mxu1 %v2980_v29  ;;  %2234 = vmatpush.bf16.msra.mxu2 %v2728_v21  ;;  %v1273_v38 = vpop.permute.xlu1 %1272  ;;  %v2659_v35 = vld [vmem:[#allocation3 + $0x40] sm:$0xf]  ;;  %v2664_v8 = vor.u32 %v3077_v16, %v2661_v4  ;;  %v3069_v20 = vld [vmem:[#allocation3 + $0x4] sm:$0xf] }
 0x134   : > { %2247 = vmatpush.bf16.msra.mxu3 %v2984_v3  ;;  %v1282_v44 = vrot.slane %v1273_v38, 4  ;;  %v3746_v45 = vpop.permute.xlu0 %1232  ;;  %v2660_v2 = vor.u32 %v3081_v63, %v2659_v35  ;;  %v2627_v7 = vld [vmem:[#allocation3] sm:$0xf] }
 0x135   : > { %v1241_v50 = vrot.slane %v3746_v45, 4 }
 0x136   : > { %v1287_v17 = vsel %vm438_vm0, %v1282_v44, %v1283_v34  ;;  %2209 = vmatpush.bf16.msra.mxu0 %v2692_v47 }
 0x137   : > { %v1289_v60 = vsel %vm4383_vm6, %v1273_v38, %v1287_v17  ;;  %v1245_v5 = vsel %vm438_vm0, %v1240_v46, %v1241_v50  ;;  %2235 = vmatpush.bf16.msra.mxu2 %v2696_v61  ;;  %852 = vrot.lane.b32.xlu2 %v838_v52, %s3230_s8  ;;  %v2861_v26 = vld [vmem:[#allocation3 + $0x1e8] sm:$0xf0]  ;;  %v2629_v46 = vld [vmem:[#allocation3 + $0x20] sm:$0xf0]  ;;  %v880_v61 = vld [vmem:[#allocation2 + $0x20] sm:$0xf] }
 0x138   : > { %1300 = vst [vmem:[#allocation3 + $0x2a0] sm:$0xff] %v1289_v60  ;;  %v1247_v15 = vsel %vm1246_vm7, %v3656_v48, %v1245_v5  ;;  %v3126_v21 = vld [vmem:[#allocation3 + $0x1cc] sm:$0xf]  ;;  %v3073_v48 = vld [vmem:[#allocation3 + $0x1c] sm:$0xf0]  ;;  %v2632_v39 = vor.u32 %v3069_v20, %v2629_v46 }
 0x139   : > { %1258 = vst [vmem:[#allocation3 + $0x280] sm:$0xff] %v1247_v15  ;;  %1278 = vrot.lane.b32.xlu1 %v3685_v14, %s3239_s17  ;;  %v3761_v30 = vpop.permute.xlu2 %1106  ;;  %v2628_v18 = vor.u32 %v3073_v48, %v2627_v7  ;;  %v2864_v44 = vor.u32 %v3126_v21, %v2861_v26  ;;  %v1199_v15 = vrot.slane %v3715_v6, 4  ;;  %v2829_v46 = vld [vmem:[#allocation3 + $0x1a8] sm:$0xf0] }
 0x13a   : > { %1236 = vrot.lane.b32.xlu0 %v3685_v14, %s3238_s16  ;;  %2210 = vmatpush.bf16.msra.mxu0 %v2660_v2  ;;  %v1156_v2 = vrot.slane %v3695_v1, 4 }
 0x13b   : > { %2236 = vmatpush.bf16.msra.mxu2 %v2664_v8  ;;  %v3765_v29 = vpop.permute.xlu1 %932 }
 0x13c   : > { %v940_v3 = vrot.slane %v3765_v29, 4  ;;  %v3768_v22 = vpop.permute.xlu0 %1486 }
 0x13d   : > { %v1494_v38 = vrot.slane %v3768_v22, 4 }
 0x13e   : > { %v946_v47 = vsel %vm438_vm0, %v939_v36, %v940_v3  ;;  %2211 = vmatpush.bf16.msra.mxu0 %v2628_v18  ;;  %v754_v18 = vld [vmem:[#allocation2 + $0x20] sm:$0xf] }
 0x13f   : > { %v947_v51 = vsel %vm4379_vm10, %v3523_v12, %v946_v47  ;;  %v1500_v52 = vsel %vm438_vm0, %v1493_v41, %v1494_v38  ;;  %2237 = vmatpush.bf16.msra.mxu2 %v2632_v39  ;;  %v3153_v63 = vld [vmem:[#allocation3 + $0x29c] sm:$0xf0]  ;;  %v2949_v17 = vld [vmem:[#allocation3 + $0x2a0] sm:$0xf0]  ;;  %1194 = vrot.lane.b32.xlu2 %v3685_v14, %s3241_s19  ;;  %vm4382_vm10 = vcmask 318464  }
 0x140   : > { %957 = vst [vmem:[#allocation3 + $0x188] sm:$0xff] %v947_v51  ;;  %v3785_v4 = vsel %vm4378_vm11, %v3580_v40, %v1500_v52  ;;  %v2947_v12 = vld [vmem:[#allocation3 + $0x280] sm:$0xf]  ;;  %v3149_v36 = vld [vmem:[#allocation3 + $0x284] sm:$0xf]  ;;  %vm4381_vm11 = vcmask 310272  }
 0x141   : > { %1152 = vrot.lane.b32.xlu1 %v3685_v14, %s3240_s18  ;;  %v2948_v60 = vor.u32 %v3153_v63, %v2947_v12  ;;  %v2952_v41 = vor.u32 %v3149_v36, %v2949_v17  ;;  %v3791_v5 = vpop.permute.xlu2 %764  ;;  %v1954_v35 = vunpack.c.h.b16 %v3785_v4  ;;  %v1434_v47 = vld [vmem:[#allocation2 + $0x24] sm:$0xf] }
 0x142   : > { %2282 = vmatpush.bf16.msrb.mxu0 %v2864_v44  ;;  %894 = vrot.lane.b32.xlu0 %v880_v61, %s3229_s30  ;;  %v772_v40 = vrot.slane %v3791_v5, 4 }
 0x143   : > { %2222 = vmatpush.bf16.msra.mxu1 %v2948_v60  ;;  %2248 = vmatpush.bf16.msra.mxu3 %v2952_v41  ;;  %v1189_v16 = vpop.permute.xlu1 %1188  ;;  %v2066_v8 = vpack.c.b16 %v1954_v35, %v1954_v35 }
 0x144   : > { %v1198_v7 = vrot.slane %v1189_v16, 4  ;;  %v778_v20 = vsel %vm438_vm0, %v771_v0, %v772_v40  ;;  %v3803_v21 = vpop.permute.xlu0 %1148 }
 0x145   : > { %v779_v26 = vsel %vm776_vm2, %v3662_v54, %v778_v20  ;;  %v1157_v48 = vrot.slane %v3803_v21, 4  ;;  %v2190_v39 = vsel %vm438_vm0, %v2066_v8, 0  ;;  %v1392_v54 = vld [vmem:[#allocation2 + $0x24] sm:$0xf] }
 0x146   : > { %v1203_v44 = vsel %vm438_vm0, %v1198_v7, %v1199_v15  ;;  %789 = vst [vmem:[#allocation3 + $0x108] sm:$0xff] %v779_v26  ;;  %2297 = vmatpush.bf16.msrb.mxu2 %v2190_v39  ;;  %v796_v7 = vld [vmem:[#allocation2 + $0x20] sm:$0xf] }
 0x147   : > { %v1205_v0 = vsel %vm4381_vm11, %v1189_v16, %v1203_v44  ;;  %v1161_v51 = vsel %vm438_vm0, %v1156_v2, %v1157_v48  ;;  %v3118_v52 = vld [vmem:[#allocation3 + $0x18c] sm:$0xf]  ;;  %768 = vrot.lane.b32.xlu2 %v754_v18, %s3232_s10  ;;  %vm1078_vm11 = vcmask 965632  }
 0x148   : > { %1216 = vst [vmem:[#allocation3 + $0x260] sm:$0xff] %v1205_v0  ;;  %v1163_v61 = vsel %vm4382_vm10, %v3695_v1, %v1161_v51  ;;  %v2832_v63 = vor.u32 %v3118_v52, %v2829_v46 }
 0x149   : > { %1174 = vst [vmem:[#allocation3 + $0x240] sm:$0xff] %v1163_v61  ;;  %1448 = vrot.lane.b32.xlu1 %v1434_v47, %s3233_s11  ;;  %v3820_v17 = vpop.permute.xlu2 %1026  ;;  %v670_v61 = vld [vmem:[#allocation2 + $0x20] sm:$0xf]  ;;  %s385_s11 = scalar_lea.vmem %s4367_s5, %s4405_s27 }
 0x14a   : > { %1406 = vrot.lane.b32.xlu0 %v1392_v54, %s4385_s21  ;;  %2283 = vmatpush.bf16.msrb.mxu0 %v2832_v63  ;;  %v1033_v12 = vrot.slane %v3820_v17, 4 }
 0x14b   : > { %v3824_v36 = vpop.permute.xlu1 %890 }
 0x14c   : > { %v898_v60 = vrot.slane %v3824_v36, 4  ;;  %v1040_v1 = vsel %vm438_vm0, %v1032_v57, %v1033_v12  ;;  %v3832_v41 = vpop.permute.xlu0 %848 }
 0x14d   : > { %v1041_v35 = vsel %vm4380_vm9, %v3718_v56, %v1040_v1  ;;  %v856_v2 = vrot.slane %v3832_v41, 4  ;;  %vm1120_vm9 = vcmask 957440   ;;  %v1350_v1 = vld [vmem:[#allocation2 + $0x24] sm:$0xf] }
 0x14e   : > { %v904_v16 = vsel %vm438_vm0, %v897_v9, %v898_v60  ;;  %1050 = vst [vmem:[#allocation3 + $0x1f0] sm:$0xff] %v1041_v35 }
 0x14f   : > { %v905_v8 = vsel %vm902_vm14, %v3625_v23, %v904_v16  ;;  %v862_v57 = vsel %vm438_vm0, %v855_v58, %v856_v2  ;;  %v3145_v56 = vld [vmem:[#allocation3 + $0x25c] sm:$0xf0]  ;;  %v2917_v20 = vld [vmem:[#allocation3 + $0x260] sm:$0xf0]  ;;  %1110 = vrot.lane.b32.xlu2 %v3685_v14, %s3243_s20  ;;  %v1115_v58 = vrot.slane %v3761_v30, 4 }
 0x150   : > { %915 = vst [vmem:[#allocation3 + $0x168] sm:$0xff] %v905_v8  ;;  %v863_v26 = vsel %vm860_vm12, %v3602_v55, %v862_v57  ;;  %v2915_v9 = vld [vmem:[#allocation3 + $0x240] sm:$0xf]  ;;  %v3141_v18 = vld [vmem:[#allocation3 + $0x244] sm:$0xf]  ;;  %v1072_v55 = vrot.slane %v3740_v27, 4 }
 0x151   : > { %873 = vst [vmem:[#allocation3 + $0x148] sm:$0xff] %v863_v26  ;;  %1068 = vrot.lane.b32.xlu1 %v3685_v14, %s3242_s29  ;;  %v2916_v23 = vor.u32 %v3145_v56, %v2915_v9  ;;  %v2920_v46 = vor.u32 %v3141_v18, %v2917_v20  ;;  %v3855_v39 = vpop.permute.xlu2 %722  ;;  %v1308_v16 = vld [vmem:[#allocation2 + $0x24] sm:$0xf]  ;;  %v962_v20 = vld [vmem:[#allocation2 + $0x14] sm:$0xff] }
 0x152   : > { %810 = vrot.lane.b32.xlu0 %v796_v7, %s3234_s12  ;;  %v730_v44 = vrot.slane %v3855_v39, 4  ;;  %966 = vst [vmem:[#allocation3 + $0x1b0] sm:$0xff] %v962_v20  ;;  %s4403_s12 = sshll.u32 %s4405_s27, 2  ;;  %s2624_s27 = sshll.u32 %s4411_s25, 3 }
 0x153   : > { %2223 = vmatpush.bf16.msra.mxu1 %v2916_v23  ;;  %2249 = vmatpush.bf16.msra.mxu3 %v2920_v46  ;;  %v1105_v47 = vpop.permute.xlu1 %1104 }
 0x154   : > { %v1114_v0 = vrot.slane %v1105_v47, 4  ;;  %v736_v14 = vsel %vm438_vm0, %v729_v37, %v730_v44  ;;  %v3866_v51 = vpop.permute.xlu0 %1064 }
 0x155   : > { %v737_v54 = vsel %vm734_vm4, %v3641_v31, %v736_v14  ;;  %v1073_v52 = vrot.slane %v3866_v51, 4  ;;  %v3130_v14 = vld [vmem:[#allocation3 + $0x1e4] sm:$0xf0] }
 0x156   : > { %v1119_v63 = vsel %vm438_vm0, %v1114_v0, %v1115_v58  ;;  %747 = vst [vmem:[#allocation3 + $0xe8] sm:$0xff] %v737_v54  ;;  %v1266_v0 = vld [vmem:[#allocation2 + $0x24] sm:$0xf] }
 0x157   : > { %v1121_v35 = vsel %vm1120_vm9, %v1105_v47, %v1119_v63  ;;  %v1077_v37 = vsel %vm438_vm0, %v1072_v55, %v1073_v52  ;;  %v2797_v8 = vld [vmem:[#allocation3 + $0x168] sm:$0xf0]  ;;  %684 = vrot.lane.b32.xlu2 %v670_v61, %s4388_s22  ;;  %v1224_v54 = vld [vmem:[#allocation2 + $0x24] sm:$0xf]  ;;  %v2859_v61 = vld [vmem:[#allocation3 + $0x1c8] sm:$0xf] }
 0x158   : > { %1132 = vst [vmem:[#allocation3 + $0x220] sm:$0xff] %v1121_v35  ;;  %v1079_v31 = vsel %vm1078_vm11, %v3740_v27, %v1077_v37  ;;  %v3110_v57 = vld [vmem:[#allocation3 + $0x14c] sm:$0xf]  ;;  %v1953_v27 = vunpack.c.l.b16 %v3785_v4  ;;  %v712_v63 = vld [vmem:[#allocation2 + $0x20] sm:$0xf] }
 0x159   : > { %1090 = vst [vmem:[#allocation3 + $0x200] sm:$0xff] %v1079_v31  ;;  %1364 = vrot.lane.b32.xlu1 %v1350_v1, %s4387_s23  ;;  %v2800_v7 = vor.u32 %v3110_v57, %v2797_v8  ;;  %v3882_v56 = vpop.permute.xlu2 %1276 }
 0x15a   : > { %1322 = vrot.lane.b32.xlu0 %v1308_v16, %s3236_s14  ;;  %v1284_v26 = vrot.slane %v3882_v56, 4  ;;  %v2065_v37 = vpack.c.b16 %v1953_v27, %v1953_v27  ;;  %v2827_v27 = vld [vmem:[#allocation3 + $0x188] sm:$0xf] }
 0x15b   : > { %2284 = vmatpush.bf16.msrb.mxu0 %v2800_v7  ;;  %v3886_v9 = vpop.permute.xlu1 %1444  ;;  %v2860_v7 = vor.u32 %v3130_v14, %v2859_v61  ;;  %v1182_v61 = vld [vmem:[#allocation2 + $0x24] sm:$0xf] }
 0x15c   : > { %v1452_v18 = vrot.slane %v3886_v9, 4  ;;  %v1290_v23 = vsel %vm438_vm0, %v1283_v34, %v1284_v26  ;;  %v3895_v46 = vpop.permute.xlu0 %1402 }
 0x15d   : > { %v1291_v55 = vsel %vm4383_vm6, %v3678_v10, %v1290_v23  ;;  %v1410_v47 = vrot.slane %v3895_v46, 4  ;;  %v3122_v23 = vld [vmem:[#allocation3 + $0x1a4] sm:$0xf0]  ;;  %vm4389_vm6 = vcmask 7168  }
 0x15e   : > { %v1458_v4 = vsel %vm438_vm0, %v1451_v33, %v1452_v18  ;;  %1301 = vst [vmem:[#allocation3 + $0x2a8] sm:$0xff] %v1291_v55 }
 0x15f   : > { %v1459_v34 = vsel %vm1456_vm15, %v3645_v32, %v1458_v4  ;;  %v1416_v10 = vsel %vm438_vm0, %v1409_v19, %v1410_v47  ;;  %v3137_v1 = vld [vmem:[#allocation3 + $0x21c] sm:$0xf0]  ;;  %v2885_v35 = vld [vmem:[#allocation3 + $0x220] sm:$0xf0]  ;;  %1280 = vrot.lane.b32.xlu2 %v1266_v0, %s3239_s17 }
 0x160   : > { %1469 = vst [vmem:[#allocation3 + $0x328] sm:$0xff] %v1459_v34  ;;  %v1417_v33 = vsel %vm1414_vm13, %v3557_v28, %v1416_v10  ;;  %v2883_v16 = vld [vmem:[#allocation3 + $0x200] sm:$0xf]  ;;  %v3133_v8 = vld [vmem:[#allocation3 + $0x204] sm:$0xf]  ;;  %v2187_v28 = vsel %vm438_vm0, %v2065_v37, 0 }
 0x161   : > { %1427 = vst [vmem:[#allocation3 + $0x308] sm:$0xff] %v1417_v33  ;;  %1238 = vrot.lane.b32.xlu1 %v1224_v54, %s3238_s16  ;;  %v2884_v32 = vor.u32 %v3137_v1, %v2883_v16  ;;  %v2888_v31 = vor.u32 %v3133_v8, %v2885_v35  ;;  %v3916_v57 = vpop.permute.xlu2 %1150  ;;  %v1056_v34 = vld [vmem:[#allocation2 + $0x24] sm:$0xf]  ;;  %v3114_v1 = vld [vmem:[#allocation3 + $0x164] sm:$0xf0]  ;;  %s4340_s16 = scalar_lea.vmem %s4368_s6, %s4403_s12 }
 0x162   : > { %726 = vrot.lane.b32.xlu0 %v712_v63, %s3237_s15  ;;  %v1158_v19 = vrot.slane %v3916_v57, 4  ;;  %v2828_v63 = vor.u32 %v3122_v23, %v2827_v27  ;;  %v2795_v16 = vld [vmem:[#allocation3 + $0x148] sm:$0xf] }
 0x163   : > { %2224 = vmatpush.bf16.msra.mxu1 %v2884_v32  ;;  %2250 = vmatpush.bf16.msra.mxu3 %v2888_v31  ;;  %v3920_v20 = vpop.permute.xlu1 %984 }
 0x164   : > { %v991_v55 = vrot.slane %v3920_v20, 4  ;;  %v1164_v0 = vsel %vm438_vm0, %v1157_v48, %v1158_v19  ;;  %v3929_v4 = vpop.permute.xlu0 %806  ;;  %v1140_v48 = vld [vmem:[#allocation2 + $0x24] sm:$0xf] }
 0x165   : > { %v1165_v14 = vsel %vm4382_vm10, %v3803_v21, %v1164_v0  ;;  %v814_v54 = vrot.slane %v3929_v4, 4  ;;  %vm2175_vm10 = vcmask 719872  }
 0x166   : > { %v998_v10 = vsel %vm438_vm0, %v990_v62, %v991_v55  ;;  %1175 = vst [vmem:[#allocation3 + $0x248] sm:$0xff] %v1165_v14 }
 0x167   : > { %2256 = vmatpush.bf16.msrb.mxu1 %v2860_v7  ;;  %2271 = vmatpush.bf16.msrb.mxu3 %v2187_v28  ;;  %v999_v35 = vsel %vm994_vm8, %v3721_v59, %v998_v10  ;;  %v820_v21 = vsel %vm438_vm0, %v813_v49, %v814_v54  ;;  %v3170_v37 = vld [vmem:[#allocation3 + $0x324] sm:$0xf0]  ;;  %v3021_v33 = vld [vmem:[#allocation3 + $0x328] sm:$0xf0]  ;;  %v2796_v28 = vor.u32 %v3114_v1, %v2795_v16 }
 0x168   : > { %1008 = vst [vmem:[#allocation3 + $0x1d0] sm:$0xff] %v999_v35  ;;  %v821_v62 = vsel %vm818_vm1, %v3598_v53, %v820_v21  ;;  %1070 = vrot.lane.b32.xlu2 %v1056_v34, %s3242_s29  ;;  %v3019_v8 = vld [vmem:[#allocation3 + $0x308] sm:$0xf]  ;;  %v3166_v32 = vld [vmem:[#allocation3 + $0x30c] sm:$0xf]  ;;  %v1514_v53 = vld [vmem:[%s4365_s3] sm:$0xff] }
 0x169   : > { %831 = vst [vmem:[#allocation3 + $0x128] sm:$0xff] %v821_v62  ;;  %1196 = vrot.lane.b32.xlu1 %v1182_v61, %s3241_s19  ;;  %v3020_v59 = vor.u32 %v3170_v37, %v3019_v8  ;;  %v3024_v31 = vor.u32 %v3166_v32, %v3021_v33  ;;  %v3950_v7 = vpop.permute.xlu2 %766  ;;  %v1630_v23 = vunpack.c.l.b16 %v1514_v53  ;;  %v1631_v0 = vunpack.c.h.b16 %v1514_v53  ;;  %v1098_v21 = vld [vmem:[#allocation2 + $0x24] sm:$0xf]  ;;  %v2763_v37 = vld [vmem:[#allocation3 + $0x108] sm:$0xf]  ;;  %v963_v32 = vld [vmem:[#allocation2 + $0x1c] sm:$0xff]  ;;  %s399_s19 = scalar_lea.vmem %s4369_s7, %s2624_s27 }
 0x16a   : > { %1154 = vrot.lane.b32.xlu0 %v1140_v48, %s3240_s18  ;;  %v773_v49 = vrot.slane %v3950_v7, 4  ;;  %v3102_v33 = vld [vmem:[#allocation3 + $0x10c] sm:$0xf]  ;;  %967 = vst [vmem:[#allocation3 + $0x1b8] sm:$0xff] %v963_v32 }
 0x16b   : > { %2257 = vmatpush.bf16.msrb.mxu1 %v2828_v63  ;;  %2272 = vmatpush.bf16.msrb.mxu3 %v3020_v59  ;;  %v3957_v27 = vpop.permute.xlu1 %1360  ;;  %v3970_v48 = vpack.c.b16 %v1630_v23, %v1630_v23  ;;  %v3972_v1 = vpack.c.b16 %v1631_v0, %v1631_v0 }
 0x16c   : > { %2298 = vmatpush.bf16.msrb.mxu2 %v3024_v31  ;;  %v1368_v14 = vrot.slane %v3957_v27, 4  ;;  %v780_v61 = vsel %vm438_vm0, %v772_v40, %v773_v49  ;;  %v3965_v34 = vpop.permute.xlu0 %1318  ;;  %v3098_v31 = vld [vmem:[#allocation3 + $0xe4] sm:$0xf0] }
 0x16d   : > { %v781_v10 = vsel %vm776_vm2, %v3791_v5, %v780_v61  ;;  %v1326_v63 = vrot.slane %v3965_v34, 4  ;;  %2212 = vmatmul.bf16.vlgmr.msra.gmra.mxu0 %v3970_v48  ;;  %3041 = vmatmul.msk.bf16.vlgmr.msra.gmra.mxu1 %vm2175_vm10, %v3972_v1  ;;  %v2731_v61 = vld [vmem:[#allocation3 + $0xc8] sm:$0xf] }
 0x16e   : > { %v1374_v35 = vsel %vm438_vm0, %v1367_v43, %v1368_v14  ;;  %790 = vst [vmem:[#allocation3 + $0x110] sm:$0xff] %v781_v10  ;;  %2238 = vmatmul.bf16.vlgmr.msra.gmra.mxu2 %v3970_v48  ;;  %3042 = vmatmul.msk.bf16.vlgmr.msra.gmra.mxu3 %vm2175_vm10, %v3972_v1  ;;  %v3094_v10 = vld [vmem:[#allocation3 + $0xcc] sm:$0xf] }
 0x16f   : > { %2258 = vmatpush.bf16.msrb.mxu1 %v2796_v28  ;;  %v1375_v40 = vsel %vm1372_vm5, %v3700_v42, %v1374_v35  ;;  %v1332_v5 = vsel %vm438_vm0, %v1325_v13, %v1326_v63  ;;  %v2733_v28 = vld [vmem:[#allocation3 + $0xe8] sm:$0xf0] }
 0x170   : > { %1385 = vst [vmem:[#allocation3 + $0x2e8] sm:$0xff] %v1375_v40  ;;  %v1333_v43 = vsel %vm4384_vm3, %v3682_v11, %v1332_v5  ;;  %v3106_v16 = vld [vmem:[#allocation3 + $0x124] sm:$0xf0]  ;;  %v2765_v42 = vld [vmem:[#allocation3 + $0x128] sm:$0xf0]  ;;  %v2732_v5 = vor.u32 %v3098_v31, %v2731_v61 }
 0x171   : > { %1343 = vst [vmem:[#allocation3 + $0x2c8] sm:$0xff] %v1333_v43  ;;  %v2764_v13 = vor.u32 %v3106_v16, %v2763_v37  ;;  %v2768_v62 = vor.u32 %v3102_v33, %v2765_v42  ;;  %v3994_v8 = vpop.permute.xlu2 %1108  ;;  %v2699_v33 = vld [vmem:[#allocation3 + $0x88] sm:$0xf]  ;;  %v2701_v42 = vld [vmem:[#allocation3 + $0xa8] sm:$0xf0] }
 0x172   : > { %1112 = vrot.lane.b32.xlu0 %v1098_v21, %s3243_s20  ;;  %v1116_v59 = vrot.slane %v3994_v8, 4  ;;  %v2736_v21 = vor.u32 %v3094_v10, %v2733_v28  ;;  %v3086_v28 = vld [vmem:[#allocation3 + $0x8c] sm:$0xf] }
 0x173   : > { %2259 = vmatpush.bf16.msrb.mxu1 %v2764_v13  ;;  %2285 = vmatpush.bf16.msrb.mxu0 %v2768_v62  ;;  %v3998_v11 = vpop.permute.xlu1 %1234  ;;  %v2704_v10 = vor.u32 %v3086_v28, %v2701_v42  ;;  %v3078_v42 = vld [vmem:[#allocation3 + $0x4c] sm:$0xf] }
 0x174   : > { %v1242_v53 = vrot.slane %v3998_v11, 4  ;;  %v1122_v23 = vsel %vm438_vm0, %v1115_v58, %v1116_v59  ;;  %v4006_v0 = vpop.permute.xlu0 %934  ;;  %v3090_v58 = vld [vmem:[#allocation3 + $0xa4] sm:$0xf0] }
 0x175   : > { %v1123_v35 = vsel %vm1120_vm9, %v3761_v30, %v1122_v23  ;;  %v941_v40 = vrot.slane %v4006_v0, 4  ;;  %v2700_v31 = vor.u32 %v3090_v58, %v2699_v33  ;;  %v2667_v58 = vld [vmem:[#allocation3 + $0x48] sm:$0xf] }
 0x176   : > { %v1248_v37 = vsel %vm438_vm0, %v1241_v50, %v1242_v53  ;;  %1133 = vst [vmem:[#allocation3 + $0x228] sm:$0xff] %v1123_v35  ;;  %v3082_v35 = vld [vmem:[#allocation3 + $0x64] sm:$0xf0] }
 0x177   : > { %v1249_v43 = vsel %vm1246_vm7, %v3746_v45, %v1248_v37  ;;  %v948_v30 = vsel %vm438_vm0, %v940_v3, %v941_v40  ;;  %2260 = vmatpush.bf16.msrb.mxu1 %v2732_v5  ;;  %2286 = vmatpush.bf16.msrb.mxu0 %v2736_v21  ;;  %v3162_v16 = vld [vmem:[#allocation3 + $0x2e4] sm:$0xf0]  ;;  %v2989_v13 = vld [vmem:[#allocation3 + $0x2e8] sm:$0xf0] }
 0x178   : > { %1259 = vst [vmem:[#allocation3 + $0x288] sm:$0xff] %v1249_v43  ;;  %v949_v50 = vsel %vm4389_vm6, %v3765_v29, %v948_v30  ;;  %v2987_v62 = vld [vmem:[#allocation3 + $0x2c8] sm:$0xf]  ;;  %v3158_v32 = vld [vmem:[#allocation3 + $0x2cc] sm:$0xf]  ;;  %vm4390_vm6 = vcmask 138240  }
 0x179   : > { %958 = vst [vmem:[#allocation3 + $0x190] sm:$0xff] %v949_v50  ;;  %v2988_v45 = vor.u32 %v3162_v16, %v2987_v62  ;;  %v2992_v23 = vor.u32 %v3158_v32, %v2989_v13  ;;  %v4025_v61 = vpop.permute.xlu2 %1446  ;;  %v2669_v21 = vld [vmem:[#allocation3 + $0x68] sm:$0xf0]  ;;  %v2668_v16 = vor.u32 %v3082_v35, %v2667_v58  ;;  %v3074_v13 = vld [vmem:[#allocation3 + $0x24] sm:$0xf0] }
 0x17a   : > { %v1453_v3 = vrot.slane %v4025_v61, 4  ;;  %v2672_v62 = vor.u32 %v3078_v42, %v2669_v21  ;;  %v2637_v32 = vld [vmem:[#allocation3 + $0x28] sm:$0xf0] }
 0x17b   : > { %2261 = vmatpush.bf16.msrb.mxu1 %v2700_v31  ;;  %2273 = vmatpush.bf16.msrb.mxu3 %v2988_v45  ;;  %v4028_v5 = vpop.permute.xlu1 %892 }
 0x17c   : > { %2287 = vmatpush.bf16.msrb.mxu0 %v2704_v10  ;;  %2299 = vmatpush.bf16.msrb.mxu2 %v2992_v23  ;;  %v899_v29 = vrot.slane %v4028_v5, 4  ;;  %v1460_v37 = vsel %vm438_vm0, %v1452_v18, %v1453_v3  ;;  %v4036_v33 = vpop.permute.xlu0 %850  ;;  %v3154_v18 = vld [vmem:[#allocation3 + $0x2a4] sm:$0xf0]  ;;  %v2957_v23 = vld [vmem:[#allocation3 + $0x2a8] sm:$0xf0] }
 0x17d   : > { %v1461_v43 = vsel %vm1456_vm15, %v3886_v9, %v1460_v37  ;;  %v857_v30 = vrot.slane %v4036_v33, 4  ;;  %v2635_v10 = vld [vmem:[#allocation3 + $0x8] sm:$0xf]  ;;  %v3070_v37 = vld [vmem:[#allocation3 + $0xc] sm:$0xf] }
 0x17e   : > { %v906_v50 = vsel %vm438_vm0, %v898_v60, %v899_v29  ;;  %1470 = vst [vmem:[#allocation3 + $0x330] sm:$0xff] %v1461_v43  ;;  %v2640_v43 = vor.u32 %v3070_v37, %v2637_v32 }
 0x17f   : > { %v907_v31 = vsel %vm902_vm14, %v3824_v36, %v906_v50  ;;  %v864_v9 = vsel %vm438_vm0, %v856_v2, %v857_v30  ;;  %2262 = vmatpush.bf16.msrb.mxu1 %v2668_v16  ;;  %v2955_v45 = vld [vmem:[#allocation3 + $0x288] sm:$0xf]  ;;  %v3150_v28 = vld [vmem:[#allocation3 + $0x28c] sm:$0xf]  ;;  %v2636_v36 = vor.u32 %v3074_v13, %v2635_v10 }
 0x180   : > { %916 = vst [vmem:[#allocation3 + $0x170] sm:$0xff] %v907_v31  ;;  %v865_v60 = vsel %vm860_vm12, %v3832_v41, %v864_v9  ;;  %2288 = vmatpush.bf16.msrb.mxu0 %v2672_v62  ;;  %v2956_v35 = vor.u32 %v3154_v18, %v2955_v45  ;;  %v2960_v21 = vor.u32 %v3150_v28, %v2957_v23 }
 0x181   : > { %874 = vst [vmem:[#allocation3 + $0x150] sm:$0xff] %v865_v60  ;;  %v4055_v58 = vpop.permute.xlu2 %1320 }
 0x182   : > { %2274 = vmatpush.bf16.msrb.mxu3 %v2956_v35  ;;  %2300 = vmatpush.bf16.msrb.mxu2 %v2960_v21  ;;  %v1327_v2 = vrot.slane %v4055_v58, 4 }
 0x183   : > { %2263 = vmatpush.bf16.msrb.mxu1 %v2636_v36  ;;  %v4058_v16 = vpop.permute.xlu1 %1488 }
 0x184   : > { %2289 = vmatpush.bf16.msrb.mxu0 %v2640_v43  ;;  %v1495_v41 = vrot.slane %v4058_v16, 4  ;;  %v1334_v42 = vsel %vm438_vm0, %v1326_v63, %v1327_v2  ;;  %v4066_v13 = vpop.permute.xlu0 %1192  ;;  %v2923_v43 = vld [vmem:[#allocation3 + $0x248] sm:$0xf] }
 0x185   : > { %v1335_v50 = vsel %vm4384_vm3, %v3965_v34, %v1334_v42  ;;  %v1200_v62 = vrot.slane %v4066_v13, 4  ;;  %vm4391_vm3 = vcmask 310272   ;;  %v3142_v42 = vld [vmem:[#allocation3 + $0x24c] sm:$0xf] }
 0x186   : > { %v1502_v18 = vsel %vm438_vm0, %v1494_v38, %v1495_v41  ;;  %1344 = vst [vmem:[#allocation3 + $0x2d0] sm:$0xff] %v1335_v50  ;;  %2264 = vmatmul.bf16.vlgmr.msrb.gmra.mxu1 %v3970_v48 }
 0x187   : > { %v1503_v32 = vsel %vm4390_vm6, %v3768_v22, %v1502_v18  ;;  %v1206_v34 = vsel %vm438_vm0, %v1199_v15, %v1200_v62  ;;  %2290 = vmatmul.bf16.vlgmr.msrb.gmra.mxu0 %v3970_v48  ;;  %vm4394_vm6 = vcmask 973824  }
 0x188   : > { %v1207_v63 = vsel %vm4391_vm3, %v3715_v6, %v1206_v34  ;;  %v1955_v31 = vunpack.c.l.b16 %v1503_v32  ;;  %v1956_v9 = vunpack.c.h.b16 %v1503_v32  ;;  %vm4392_vm3 = vcmask 7168  }
 0x189   : > { %1217 = vst [vmem:[#allocation3 + $0x268] sm:$0xff] %v1207_v63  ;;  %v937_v38 = vpop.permute.xlu2 %936 }
 0x18a   : > { %v942_v45 = vrot.slane %v937_v38, 4  ;;  %v2067_v28 = vpack.c.b16 %v1955_v31, %v1955_v31  ;;  %v2068_v23 = vpack.c.b16 %v1956_v9, %v1956_v9 }
 0x18b   : > { %v4087_v60 = vpop.permute.xlu1 %1066 }
 0x18c   : > { %v1074_v22 = vrot.slane %v4087_v60, 4  ;;  %v950_v15 = vsel %vm438_vm0, %v941_v40, %v942_v45  ;;  %v4093_v10 = vpop.permute.xlu0 %808  ;;  %v2193_v35 = vsel %vm438_vm0, %v2067_v28, 0  ;;  %v2196_v6 = vsel %vm438_vm0, %v2068_v23, 0  ;;  %v2867_v28 = vld [vmem:[#allocation3 + $0x1d0] sm:$0xf] }
 0x18d   : > { %v951_v21 = vsel %vm4392_vm3, %v4006_v0, %v950_v15  ;;  %v815_v36 = vrot.slane %v4093_v10, 4  ;;  %2323 = vmatpush.bf16.msra.mxu1 %v2193_v35  ;;  %2349 = vmatpush.bf16.msra.mxu0 %v2196_v6  ;;  %v3138_v15 = vld [vmem:[#allocation3 + $0x224] sm:$0xf0]  ;;  %v3127_v35 = vld [vmem:[#allocation3 + $0x1d4] sm:$0xf]  ;;  %vm4397_vm3 = vcmask 744448  }
 0x18e   : > { %v1080_v37 = vsel %vm438_vm0, %v1073_v52, %v1074_v22  ;;  %959 = vst [vmem:[#allocation3 + $0x198] sm:$0xff] %v951_v21 }
 0x18f   : > { %v1081_v40 = vsel %vm1078_vm11, %v3866_v51, %v1080_v37  ;;  %v822_v0 = vsel %vm438_vm0, %v814_v54, %v815_v36  ;;  %v2893_v37 = vld [vmem:[#allocation3 + $0x228] sm:$0xf0] }
 0x190   : > { %1091 = vst [vmem:[#allocation3 + $0x208] sm:$0xff] %v1081_v40  ;;  %v823_v50 = vsel %vm818_vm1, %v3929_v4, %v822_v0  ;;  %v3146_v18 = vld [vmem:[#allocation3 + $0x264] sm:$0xf0]  ;;  %v2925_v32 = vld [vmem:[#allocation3 + $0x268] sm:$0xf0] }
 0x191   : > { %832 = vst [vmem:[#allocation3 + $0x130] sm:$0xff] %v823_v50  ;;  %v2924_v52 = vor.u32 %v3146_v18, %v2923_v43  ;;  %v2928_v34 = vor.u32 %v3142_v42, %v2925_v32  ;;  %v853_v63 = vpop.permute.xlu2 %852  ;;  %v3131_v43 = vld [vmem:[#allocation3 + $0x1ec] sm:$0xf0]  ;;  %v2869_v42 = vld [vmem:[#allocation3 + $0x1f0] sm:$0xf0] }
 0x192   : > { %v858_v31 = vrot.slane %v853_v63, 4  ;;  %v2868_v50 = vor.u32 %v3131_v43, %v2867_v28  ;;  %v3123_v18 = vld [vmem:[#allocation3 + $0x1ac] sm:$0xf0] }
 0x193   : > { %2275 = vmatpush.bf16.msrb.mxu3 %v2924_v52  ;;  %2301 = vmatpush.bf16.msrb.mxu2 %v2928_v34  ;;  %v4114_v51 = vpop.permute.xlu1 %1404  ;;  %v3119_v52 = vld [vmem:[#allocation3 + $0x194] sm:$0xf] }
 0x194   : > { %v1411_v9 = vrot.slane %v4114_v51, 4  ;;  %v866_v54 = vsel %vm438_vm0, %v857_v30, %v858_v31  ;;  %v4120_v38 = vpop.permute.xlu0 %724  ;;  %v2837_v34 = vld [vmem:[#allocation3 + $0x1b0] sm:$0xf0] }
 0x195   : > { %v867_v4 = vsel %vm860_vm12, %v4036_v33, %v866_v54  ;;  %v731_v45 = vrot.slane %v4120_v38, 4  ;;  %vm4393_vm12 = vcmask 310272  }
 0x196   : > { %v1418_v23 = vsel %vm438_vm0, %v1410_v47, %v1411_v9  ;;  %875 = vst [vmem:[#allocation3 + $0x158] sm:$0xff] %v867_v4 }
 0x197   : > { %v1419_v30 = vsel %vm1414_vm13, %v3895_v46, %v1418_v23  ;;  %v738_v33 = vsel %vm438_vm0, %v730_v44, %v731_v45  ;;  %v2891_v6 = vld [vmem:[#allocation3 + $0x208] sm:$0xf]  ;;  %v3134_v21 = vld [vmem:[#allocation3 + $0x20c] sm:$0xf]  ;;  %v2872_v46 = vor.u32 %v3127_v35, %v2869_v42  ;;  %v2835_v44 = vld [vmem:[#allocation3 + $0x190] sm:$0xf] }
 0x198   : > { %1428 = vst [vmem:[#allocation3 + $0x310] sm:$0xff] %v1419_v30  ;;  %v739_v40 = vsel %vm734_vm4, %v3855_v39, %v738_v33  ;;  %v2892_v47 = vor.u32 %v3138_v15, %v2891_v6  ;;  %v2896_v0 = vor.u32 %v3134_v21, %v2893_v37  ;;  %v2836_v23 = vor.u32 %v3123_v18, %v2835_v44  ;;  %v3171_v35 = vld [vmem:[#allocation3 + $0x32c] sm:$0xf0]  ;;  %v3029_v30 = vld [vmem:[#allocation3 + $0x330] sm:$0xf0] }
 0x199   : > { %748 = vst [vmem:[#allocation3 + $0xf0] sm:$0xff] %v739_v40  ;;  %v4139_v32 = vpop.permute.xlu2 %1194  ;;  %v2840_v15 = vor.u32 %v3119_v52, %v2837_v34  ;;  %v3115_v33 = vld [vmem:[#allocation3 + $0x16c] sm:$0xf0]  ;;  %v3111_v37 = vld [vmem:[#allocation3 + $0x154] sm:$0xf] }
 0x19a   : > { %2276 = vmatpush.bf16.msrb.mxu3 %v2892_v47  ;;  %2302 = vmatpush.bf16.msrb.mxu2 %v2896_v0  ;;  %v1201_v31 = vrot.slane %v4139_v32, 4  ;;  %v2805_v40 = vld [vmem:[#allocation3 + $0x170] sm:$0xf0]  ;;  %v3107_v44 = vld [vmem:[#allocation3 + $0x12c] sm:$0xf0] }
 0x19b   : > { %v1029_v63 = vpop.permute.xlu1 %1028  ;;  %v2808_v18 = vor.u32 %v3111_v37, %v2805_v40  ;;  %v2773_v52 = vld [vmem:[#allocation3 + $0x130] sm:$0xf0] }
 0x19c   : > { %v1034_v39 = vrot.slane %v1029_v63, 4  ;;  %v987_v54 = vpop.permute.xlu0 %986  ;;  %v1208_v4 = vsel %vm438_vm0, %v1200_v62, %v1201_v31  ;;  %v2803_v62 = vld [vmem:[#allocation3 + $0x150] sm:$0xf] }
 0x19d   : > { %v992_v28 = vrot.slane %v987_v54, 4  ;;  %3043 = vmatmul.msk.bf16.vlgmr.msrb.gmra.mxu3 %vm2175_vm10, %v3972_v1  ;;  %3044 = vmatmul.msk.bf16.vlgmr.msrb.gmra.mxu2 %vm2175_vm10, %v3972_v1  ;;  %v1209_v21 = vsel %vm4393_vm12, %v4066_v13, %v1208_v4  ;;  %v2771_v54 = vld [vmem:[#allocation3 + $0x110] sm:$0xf]  ;;  %v3103_v4 = vld [vmem:[#allocation3 + $0x114] sm:$0xf]  ;;  %vm4398_vm12 = vcmask 318464  }
 0x19e   : > { %2308 = vmatpush.bf16.msra.mxu3 %v2868_v50  ;;  %2334 = vmatpush.bf16.msra.mxu2 %v2872_v46  ;;  %v1042_v6 = vsel %vm438_vm0, %v1033_v12, %v1034_v39  ;;  %1218 = vst [vmem:[#allocation3 + $0x270] sm:$0xff] %v1209_v21  ;;  %v2804_v46 = vor.u32 %v3115_v33, %v2803_v62  ;;  %v2739_v62 = vld [vmem:[#allocation3 + $0xd0] sm:$0xf] }
 0x19f   : > { %v1043_v47 = vsel %vm4394_vm6, %v3820_v17, %v1042_v6  ;;  %v1000_v0 = vsel %vm438_vm0, %v991_v55, %v992_v28  ;;  %v3027_v43 = vld [vmem:[#allocation3 + $0x310] sm:$0xf]  ;;  %v3167_v42 = vld [vmem:[#allocation3 + $0x314] sm:$0xf] }
 0x1a0   : > { %1051 = vst [vmem:[#allocation3 + $0x1f8] sm:$0xff] %v1043_v47  ;;  %v1001_v12 = vsel %vm994_vm8, %v3920_v20, %v1000_v0  ;;  %v3028_v13 = vor.u32 %v3171_v35, %v3027_v43  ;;  %v3032_v50 = vor.u32 %v3167_v42, %v3029_v30  ;;  %v3099_v33 = vld [vmem:[#allocation3 + $0xec] sm:$0xf0]  ;;  %v2741_v6 = vld [vmem:[#allocation3 + $0xf0] sm:$0xf0]  ;;  %vm4395_vm8 = vcmask 138240  }
 0x1a1   : > { %1009 = vst [vmem:[#allocation3 + $0x1d8] sm:$0xff] %v1001_v12  ;;  %v769_v17 = vpop.permute.xlu2 %768  ;;  %v2740_v37 = vor.u32 %v3099_v33, %v2739_v62  ;;  %v2709_v0 = vld [vmem:[#allocation3 + $0xb0] sm:$0xf0]  ;;  %v2675_v33 = vld [vmem:[#allocation3 + $0x50] sm:$0xf] }
 0x1a2   : > { %2309 = vmatpush.bf16.msra.mxu3 %v2836_v23  ;;  %2335 = vmatpush.bf16.msra.mxu2 %v2840_v15  ;;  %v774_v55 = vrot.slane %v769_v17, 4  ;;  %v2772_v23 = vor.u32 %v3107_v44, %v2771_v54  ;;  %v2776_v15 = vor.u32 %v3103_v4, %v2773_v52  ;;  %v2995_v54 = vld [vmem:[#allocation3 + $0x2d0] sm:$0xf]  ;;  %v3159_v4 = vld [vmem:[#allocation3 + $0x2d4] sm:$0xf] }
 0x1a3   : > { %2324 = vmatpush.bf16.msra.mxu1 %v3028_v13  ;;  %2350 = vmatpush.bf16.msra.mxu0 %v3032_v50  ;;  %v1491_v34 = vpop.permute.xlu1 %1490  ;;  %v3087_v13 = vld [vmem:[#allocation3 + $0x94] sm:$0xf] }
 0x1a4   : > { %v1496_v63 = vrot.slane %v1491_v34, 4  ;;  %v4163_v39 = vpop.permute.xlu0 %1362  ;;  %v782_v20 = vsel %vm438_vm0, %v773_v49, %v774_v55  ;;  %v2712_v17 = vor.u32 %v3087_v13, %v2709_v0  ;;  %v3083_v34 = vld [vmem:[#allocation3 + $0x6c] sm:$0xf0]  ;;  %v2677_v55 = vld [vmem:[#allocation3 + $0x70] sm:$0xf0] }
 0x1a5   : > { %v1369_v28 = vrot.slane %v4163_v39, 4  ;;  %v783_v30 = vsel %vm776_vm2, %v3950_v7, %v782_v20  ;;  %v3095_v7 = vld [vmem:[#allocation3 + $0xd4] sm:$0xf]  ;;  %vm4396_vm2 = vcmask 236544  }
 0x1a6   : > { %2310 = vmatpush.bf16.msra.mxu3 %v2804_v46  ;;  %2336 = vmatpush.bf16.msra.mxu2 %v2808_v18  ;;  %v1504_v35 = vsel %vm438_vm0, %v1495_v41, %v1496_v63  ;;  %791 = vst [vmem:[#allocation3 + $0x118] sm:$0xff] %v783_v30  ;;  %v2744_v40 = vor.u32 %v3095_v7, %v2741_v6  ;;  %v3079_v6 = vld [vmem:[#allocation3 + $0x54] sm:$0xf] }
 0x1a7   : > { %v4176_v21 = vsel %vm4395_vm8, %v4058_v16, %v1504_v35  ;;  %v1376_v49 = vsel %vm438_vm0, %v1368_v14, %v1369_v28  ;;  %v3091_v16 = vld [vmem:[#allocation3 + $0xac] sm:$0xf0]  ;;  %v3244_v35 = vmov 0   ;;  %v2680_v62 = vor.u32 %v3079_v6, %v2677_v55 }
 0x1a8   : > { %v1377_v41 = vsel %vm1372_vm5, %v3957_v27, %v1376_v49  ;;  %v2707_v27 = vld [vmem:[#allocation3 + $0x90] sm:$0xf]  ;;  %3208 = vset.pattern.permute.xlu1 %v3244_v35  ;;  %3209 = vset.pattern.permute.xlu0 %v3244_v35 }
 0x1a9   : > { %1386 = vst [vmem:[#allocation3 + $0x2f0] sm:$0xff] %v1377_v41  ;;  %v4185_v47 = vpop.permute.xlu2 %1110  ;;  %v2708_v18 = vor.u32 %v3091_v16, %v2707_v27  ;;  %v2676_v41 = vor.u32 %v3083_v34, %v2675_v33 }
 0x1aa   : > { %2311 = vmatpush.bf16.msra.mxu3 %v2772_v23  ;;  %2337 = vmatpush.bf16.msra.mxu2 %v2776_v15  ;;  %v1117_v42 = vrot.slane %v4185_v47, 4  ;;  %v1958_v15 = vunpack.c.h.b16 %v4176_v21 }
 0x1ab   : > { %v4187_v43 = vpop.permute.xlu1 %1278 }
 0x1ac   : > { %v1285_v14 = vrot.slane %v4187_v43, 4  ;;  %v4191_v12 = vpop.permute.xlu0 %1236  ;;  %v1124_v50 = vsel %vm438_vm0, %v1116_v59, %v1117_v42  ;;  %v2070_v27 = vpack.c.b16 %v1958_v15, %v1958_v15 }
 0x1ad   : > { %v1243_v46 = vrot.slane %v4191_v12, 4  ;;  %v1125_v52 = vsel %vm1120_vm9, %v3994_v8, %v1124_v50  ;;  %v1623_v8 = vld [vmem:[%s4366_s4] sm:$0xff] }
 0x1ae   : > { %2312 = vmatpush.bf16.msra.mxu3 %v2740_v37  ;;  %2338 = vmatpush.bf16.msra.mxu2 %v2744_v40  ;;  %v1292_v44 = vsel %vm438_vm0, %v1284_v26, %v1285_v14  ;;  %1134 = vst [vmem:[#allocation3 + $0x230] sm:$0xff] %v1125_v52  ;;  %v1957_v26 = vunpack.c.l.b16 %v4176_v21  ;;  %v3075_v21 = vld [vmem:[#allocation3 + $0x2c] sm:$0xf0]  ;;  %v2645_v37 = vld [vmem:[#allocation3 + $0x30] sm:$0xf0] }
 0x1af   : > { %v1293_v63 = vsel %vm4396_vm2, %v3882_v56, %v1292_v44  ;;  %v1250_v59 = vsel %vm438_vm0, %v1242_v53, %v1243_v46  ;;  %1626 = vperm.xlu1 %3208, %v1623_v8  }
 0x1b0   : > { %1302 = vst [vmem:[#allocation3 + $0x2b0] sm:$0xff] %v1293_v63  ;;  %v1251_v56 = vsel %vm1246_vm7, %v3998_v11, %v1250_v59  ;;  %v3163_v20 = vld [vmem:[#allocation3 + $0x2ec] sm:$0xf0]  ;;  %v2997_v23 = vld [vmem:[#allocation3 + $0x2f0] sm:$0xf0]  ;;  %v2069_v40 = vpack.c.b16 %v1957_v26, %v1957_v26 }
 0x1b1   : > { %1260 = vst [vmem:[#allocation3 + $0x290] sm:$0xff] %v1251_v56  ;;  %v2996_v53 = vor.u32 %v3163_v20, %v2995_v54  ;;  %v3000_v30 = vor.u32 %v3159_v4, %v2997_v23  ;;  %v685_v49 = vpop.permute.xlu2 %684 }
 0x1b2   : > { %2313 = vmatpush.bf16.msra.mxu3 %v2708_v18  ;;  %2339 = vmatpush.bf16.msra.mxu2 %v2712_v17  ;;  %v690_v7 = vrot.slane %v685_v49, 4  ;;  %v2643_v18 = vld [vmem:[#allocation3 + $0x10] sm:$0xf]  ;;  %v3071_v17 = vld [vmem:[#allocation3 + $0x14] sm:$0xf]  ;;  %v2199_v59 = vsel %vm438_vm0, %v2069_v40, 0 }
 0x1b3   : > { %2325 = vmatpush.bf16.msra.mxu1 %v2996_v53  ;;  %2351 = vmatpush.bf16.msra.mxu0 %v3000_v30  ;;  %v4222_v11 = vpop.permute.xlu1 %1152  ;;  %v2644_v34 = vor.u32 %v3075_v21, %v2643_v18  ;;  %v2648_v55 = vor.u32 %v3071_v17, %v2645_v37  ;;  %v3147_v49 = vld [vmem:[#allocation3 + $0x26c] sm:$0xf0] }
 0x1b4   : > { %v1159_v16 = vrot.slane %v4222_v11, 4  ;;  %v895_v0 = vpop.permute.xlu0 %894  ;;  %v698_v13 = vsel %vm438_vm0, %v689_v25, %v690_v7 }
 0x1b5   : > { %v900_v50 = vrot.slane %v895_v0, 4  ;;  %v699_v52 = vsel %vm4397_vm3, %v3541_v24, %v698_v13  ;;  %v2202_v24 = vsel %vm438_vm0, %v2070_v27, 0 }
 0x1b6   : > { %2314 = vmatpush.bf16.msra.mxu3 %v2676_v41  ;;  %2340 = vmatpush.bf16.msra.mxu2 %v2680_v62  ;;  %v1166_v44 = vsel %vm438_vm0, %v1158_v19, %v1159_v16  ;;  %707 = vst [vmem:[#allocation3 + $0xd8] sm:$0xff] %v699_v52  ;;  %v2933_v41 = vld [vmem:[#allocation3 + $0x270] sm:$0xf0] }
 0x1b7   : > { %v1167_v63 = vsel %vm4398_vm12, %v3916_v57, %v1166_v44  ;;  %v908_v25 = vsel %vm438_vm0, %v899_v29, %v900_v50  ;;  %v3155_v54 = vld [vmem:[#allocation3 + $0x2ac] sm:$0xf0]  ;;  %v2965_v4 = vld [vmem:[#allocation3 + $0x2b0] sm:$0xf0] }
 0x1b8   : > { %1176 = vst [vmem:[#allocation3 + $0x250] sm:$0xff] %v1167_v63  ;;  %v909_v19 = vsel %vm902_vm14, %v4028_v5, %v908_v25  ;;  %v2963_v26 = vld [vmem:[#allocation3 + $0x290] sm:$0xf]  ;;  %v3151_v8 = vld [vmem:[#allocation3 + $0x294] sm:$0xf]  ;;  %vm4399_vm14 = vmmov %vm4396_vm2 }
 0x1b9   : > { %917 = vst [vmem:[#allocation3 + $0x178] sm:$0xff] %v909_v19  ;;  %v2964_v57 = vor.u32 %v3155_v54, %v2963_v26  ;;  %v2968_v56 = vor.u32 %v3151_v8, %v2965_v4  ;;  %v1281_v29 = vpop.permute.xlu2 %1280  ;;  %v3132_v19 = vld [vmem:[#allocation3 + $0x1f4] sm:$0xf0]  ;;  %v3139_v8 = vld [vmem:[#allocation3 + $0x22c] sm:$0xf0] }
 0x1ba   : > { %2315 = vmatpush.bf16.msra.mxu3 %v2644_v34  ;;  %2341 = vmatpush.bf16.msra.mxu2 %v2648_v55  ;;  %v1286_v23 = vrot.slane %v1281_v29, 4 }
 0x1bb   : > { %2326 = vmatpush.bf16.msra.mxu1 %v2964_v57  ;;  %2352 = vmatpush.bf16.msra.mxu0 %v2968_v56  ;;  %v1449_v20 = vpop.permute.xlu1 %1448  ;;  %v3128_v57 = vld [vmem:[#allocation3 + $0x1dc] sm:$0xf] }
 0x1bc   : > { %v1454_v15 = vrot.slane %v1449_v20, 4  ;;  %v1407_v53 = vpop.permute.xlu0 %1406  ;;  %v1294_v5 = vsel %vm438_vm0, %v1285_v14, %v1286_v23 }
 0x1bd   : > { %2316 = vmatmul.bf16.vlgmr.msra.gmra.mxu3 %v3970_v48  ;;  %2342 = vmatmul.bf16.vlgmr.msra.gmra.mxu2 %v3970_v48  ;;  %v1412_v30 = vrot.slane %v1407_v53, 4  ;;  %v1295_v6 = vsel %vm4399_vm14, %v4187_v43, %v1294_v5 }
 0x1be   : > { %2375 = vmatpush.bf16.msrb.mxu3 %v2199_v59  ;;  %2401 = vmatpush.bf16.msrb.mxu2 %v2202_v24  ;;  %v1462_v33 = vsel %vm438_vm0, %v1453_v3, %v1454_v15  ;;  %1303 = vst [vmem:[#allocation3 + $0x2b8] sm:$0xff] %v1295_v6  ;;  %v2877_v24 = vld [vmem:[#allocation3 + $0x1f8] sm:$0xf0]  ;;  %v2901_v15 = vld [vmem:[#allocation3 + $0x230] sm:$0xf0] }
 0x1bf   : > { %v1463_v62 = vsel %vm1456_vm15, %v4025_v61, %v1462_v33  ;;  %v1420_v7 = vsel %vm438_vm0, %v1411_v9, %v1412_v30  ;;  %v2931_v21 = vld [vmem:[#allocation3 + $0x250] sm:$0xf]  ;;  %v3143_v14 = vld [vmem:[#allocation3 + $0x254] sm:$0xf]  ;;  %v2880_v33 = vor.u32 %v3128_v57, %v2877_v24  ;;  %v3124_v6 = vld [vmem:[#allocation3 + $0x1b4] sm:$0xf0] }
 0x1c0   : > { %1471 = vst [vmem:[#allocation3 + $0x338] sm:$0xff] %v1463_v62  ;;  %v1421_v37 = vsel %vm1414_vm13, %v4114_v51, %v1420_v7  ;;  %v2932_v3 = vor.u32 %v3147_v49, %v2931_v21  ;;  %v2936_v40 = vor.u32 %v3143_v14, %v2933_v41  ;;  %v3120_v49 = vld [vmem:[#allocation3 + $0x19c] sm:$0xf]  ;;  %vm4402_vm13 = vmmov %vm4398_vm12 }
 0x1c1   : > { %1429 = vst [vmem:[#allocation3 + $0x318] sm:$0xff] %v1421_v37  ;;  %v2845_v41 = vld [vmem:[#allocation3 + $0x1b8] sm:$0xf0] }
 0x1c2   : > { %2327 = vmatpush.bf16.msra.mxu1 %v2932_v3  ;;  %2353 = vmatpush.bf16.msra.mxu0 %v2936_v40  ;;  %v1071_v43 = vpop.permute.xlu2 %1070  ;;  %v2848_v14 = vor.u32 %v3120_v49, %v2845_v41  ;;  %v3116_v3 = vld [vmem:[#allocation3 + $0x174] sm:$0xf0] }
 0x1c3   : > { %v1069_v0 = vpop.permute.xlu1 %1068  ;;  %v1076_v27 = vrot.slane %v1071_v43, 4 }
 0x1c4   : > { %v1075_v61 = vrot.slane %v1069_v0, 4  ;;  %v811_v13 = vpop.permute.xlu0 %810 }
 0x1c5   : > { %v816_v50 = vrot.slane %v811_v13, 4  ;;  %v2973_v57 = vld [vmem:[#allocation3 + $0x2b8] sm:$0xf0] }
 0x1c6   : > { %v1082_v9 = vsel %vm438_vm0, %v1074_v22, %v1075_v61  ;;  %v1084_v18 = vsel %vm438_vm0, %v1075_v61, %v1076_v27  ;;  %v2813_v61 = vld [vmem:[#allocation3 + $0x178] sm:$0xf0] }
 0x1c7   : > { %v1083_v51 = vsel %vm1078_vm11, %v4087_v60, %v1082_v9  ;;  %v824_v17 = vsel %vm438_vm0, %v815_v36, %v816_v50  ;;  %v1085_v44 = vsel %vm1078_vm11, %v1069_v0, %v1084_v18  ;;  %v3172_v52 = vld [vmem:[#allocation3 + $0x334] sm:$0xf0]  ;;  %v3037_v34 = vld [vmem:[#allocation3 + $0x338] sm:$0xf0]  ;;  %vm4400_vm11 = vcmask 228352  }
 0x1c8   : > { %1092 = vst [vmem:[#allocation3 + $0x210] sm:$0xff] %v1083_v51  ;;  %v825_v55 = vsel %vm818_vm1, %v4093_v10, %v824_v17  ;;  %v3035_v63 = vld [vmem:[#allocation3 + $0x318] sm:$0xf]  ;;  %v3168_v25 = vld [vmem:[#allocation3 + $0x31c] sm:$0xf] }
 0x1c9   : > { %833 = vst [vmem:[#allocation3 + $0x138] sm:$0xff] %v825_v55  ;;  %v3036_v22 = vor.u32 %v3172_v52, %v3035_v63  ;;  %v3040_v59 = vor.u32 %v3168_v25, %v3037_v34  ;;  %v2875_v10 = vld [vmem:[#allocation3 + $0x1d8] sm:$0xf] }
 0x1ca   : > { %1093 = vst [vmem:[#allocation3 + $0x218] sm:$0xff] %v1085_v44  ;;  %v2811_v51 = vld [vmem:[#allocation3 + $0x158] sm:$0xf] }
 0x1cb   : > { %2376 = vmatpush.bf16.msrb.mxu3 %v3036_v22  ;;  %2402 = vmatpush.bf16.msrb.mxu2 %v3040_v59  ;;  %v1365_v60 = vpop.permute.xlu1 %1364  ;;  %v2812_v17 = vor.u32 %v3116_v3, %v2811_v51  ;;  %v3104_v22 = vld [vmem:[#allocation3 + $0x11c] sm:$0xf]  ;;  %v2683_v3 = vld [vmem:[#allocation3 + $0x58] sm:$0xf] }
 0x1cc   : > { %v1370_v54 = vrot.slane %v1365_v60, 4  ;;  %v1323_v4 = vpop.permute.xlu0 %1322 }
 0x1cd   : > { %v1328_v36 = vrot.slane %v1323_v4, 4  ;;  %v3156_v4 = vld [vmem:[#allocation3 + $0x2b4] sm:$0xf0] }
 0x1ce   : > { %v1378_v26 = vsel %vm438_vm0, %v1369_v28, %v1370_v54  ;;  %v2876_v28 = vor.u32 %v3132_v19, %v2875_v10  ;;  %v3096_v19 = vld [vmem:[#allocation3 + $0xdc] sm:$0xf] }
 0x1cf   : > { %v1379_v56 = vsel %vm1372_vm5, %v4163_v39, %v1378_v26  ;;  %v1336_v29 = vsel %vm438_vm0, %v1327_v2, %v1328_v36  ;;  %v2899_v20 = vld [vmem:[#allocation3 + $0x210] sm:$0xf]  ;;  %v3135_v23 = vld [vmem:[#allocation3 + $0x214] sm:$0xf]  ;;  %v2843_v39 = vld [vmem:[#allocation3 + $0x198] sm:$0xf] }
 0x1d0   : > { %1387 = vst [vmem:[#allocation3 + $0x2f8] sm:$0xff] %v1379_v56  ;;  %v1337_v53 = vsel %vm4400_vm11, %v4055_v58, %v1336_v29  ;;  %v2900_v5 = vor.u32 %v3139_v8, %v2899_v20  ;;  %v2904_v30 = vor.u32 %v3135_v23, %v2901_v15  ;;  %v2844_v58 = vor.u32 %v3124_v6, %v2843_v39  ;;  %v3108_v52 = vld [vmem:[#allocation3 + $0x134] sm:$0xf0]  ;;  %v2781_v34 = vld [vmem:[#allocation3 + $0x138] sm:$0xf0] }
 0x1d1   : > { %1345 = vst [vmem:[#allocation3 + $0x2d8] sm:$0xff] %v1337_v53  ;;  %v2784_v54 = vor.u32 %v3104_v22, %v2781_v34  ;;  %v2747_v36 = vld [vmem:[#allocation3 + $0xd8] sm:$0xf] }
 0x1d2   : > { %2328 = vmatpush.bf16.msra.mxu1 %v2900_v5  ;;  %2354 = vmatpush.bf16.msra.mxu0 %v2904_v30  ;;  %v3092_v53 = vld [vmem:[#allocation3 + $0xb4] sm:$0xf0] }
 0x1d3   : > { %v1239_v62 = vpop.permute.xlu1 %1238  ;;  %v3084_v39 = vld [vmem:[#allocation3 + $0x74] sm:$0xf0] }
 0x1d4   : > { %v1244_v2 = vrot.slane %v1239_v62, 4  ;;  %v727_v7 = vpop.permute.xlu0 %726 }
 0x1d5   : > { %v732_v21 = vrot.slane %v727_v7, 4  ;;  %3045 = vmatmul.msk.bf16.vlgmr.msra.gmra.mxu1 %vm2175_vm10, %v3972_v1  ;;  %3046 = vmatmul.msk.bf16.vlgmr.msra.gmra.mxu0 %vm2175_vm10, %v3972_v1 }
 0x1d6   : > { %2360 = vmatpush.bf16.msrb.mxu1 %v2876_v28  ;;  %2386 = vmatpush.bf16.msrb.mxu0 %v2880_v33  ;;  %v1252_v37 = vsel %vm438_vm0, %v1243_v46, %v1244_v2  ;;  %v2715_v28 = vld [vmem:[#allocation3 + $0x98] sm:$0xf]  ;;  %v3088_v33 = vld [vmem:[#allocation3 + $0x9c] sm:$0xf] }
 0x1d7   : > { %v1253_v40 = vsel %vm1246_vm7, %v4191_v12, %v1252_v37  ;;  %v740_v43 = vsel %vm438_vm0, %v731_v45, %v732_v21  ;;  %v3164_v0 = vld [vmem:[#allocation3 + $0x2f4] sm:$0xf0]  ;;  %v3005_v27 = vld [vmem:[#allocation3 + $0x2f8] sm:$0xf0]  ;;  %vm4401_vm7 = vcmask 310272  }
 0x1d8   : > { %1261 = vst [vmem:[#allocation3 + $0x298] sm:$0xff] %v1253_v40  ;;  %v741_v13 = vsel %vm734_vm4, %v4120_v38, %v740_v43  ;;  %v3003_v50 = vld [vmem:[#allocation3 + $0x2d8] sm:$0xf]  ;;  %v3160_v9 = vld [vmem:[#allocation3 + $0x2dc] sm:$0xf]  ;;  %v2684_v43 = vor.u32 %v3084_v39, %v2683_v3 }
 0x1d9   : > { %749 = vst [vmem:[#allocation3 + $0xf8] sm:$0xff] %v741_v13  ;;  %v3004_v46 = vor.u32 %v3164_v0, %v3003_v50  ;;  %v3008_v18 = vor.u32 %v3160_v9, %v3005_v27  ;;  %v3112_v12 = vld [vmem:[#allocation3 + $0x15c] sm:$0xf]  ;;  %v2779_v38 = vld [vmem:[#allocation3 + $0x118] sm:$0xf] }
 0x1da   : > { %2361 = vmatpush.bf16.msrb.mxu1 %v2844_v58  ;;  %2387 = vmatpush.bf16.msrb.mxu0 %v2848_v14  ;;  %v2816_v44 = vor.u32 %v3112_v12, %v2813_v61  ;;  %v2780_v60 = vor.u32 %v3108_v52, %v2779_v38  ;;  %v2685_v2 = vld [vmem:[#allocation3 + $0x78] sm:$0xf0] }
 0x1db   : > { %2377 = vmatpush.bf16.msrb.mxu3 %v3004_v46  ;;  %2403 = vmatpush.bf16.msrb.mxu2 %v3008_v18  ;;  %v1197_v45 = vpop.permute.xlu1 %1196  ;;  %v3080_v40 = vld [vmem:[#allocation3 + $0x5c] sm:$0xf]  ;;  %v2907_v18 = vld [vmem:[#allocation3 + $0x218] sm:$0xf] }
 0x1dc   : > { %v1202_v55 = vrot.slane %v1197_v45, 4  ;;  %v1155_v63 = vpop.permute.xlu0 %1154  ;;  %v2688_v0 = vor.u32 %v3080_v40, %v2685_v2  ;;  %v2653_v27 = vld [vmem:[#allocation3 + $0x38] sm:$0xf0] }
 0x1dd   : > { %v1160_v25 = vrot.slane %v1155_v63, 4  ;;  %v3072_v50 = vld [vmem:[#allocation3 + $0x1c] sm:$0xf] }
 0x1de   : > { %2362 = vmatpush.bf16.msrb.mxu1 %v2812_v17  ;;  %2388 = vmatpush.bf16.msrb.mxu0 %v2816_v44  ;;  %v1210_v59 = vsel %vm438_vm0, %v1201_v31, %v1202_v55  ;;  %v2656_v46 = vor.u32 %v3072_v50, %v2653_v27  ;;  %v3136_v12 = vld [vmem:[#allocation3 + $0x21c] sm:$0xf] }
 0x1df   : > { %v1211_v24 = vsel %vm4401_vm7, %v4139_v32, %v1210_v59  ;;  %v1168_v26 = vsel %vm438_vm0, %v1159_v16, %v1160_v25  ;;  %v2971_v8 = vld [vmem:[#allocation3 + $0x298] sm:$0xf]  ;;  %v3152_v10 = vld [vmem:[#allocation3 + $0x29c] sm:$0xf] }
 0x1e0   : > { %1219 = vst [vmem:[#allocation3 + $0x278] sm:$0xff] %v1211_v24  ;;  %v1169_v56 = vsel %vm4402_vm13, %v4222_v11, %v1168_v26  ;;  %v2972_v31 = vor.u32 %v3156_v4, %v2971_v8  ;;  %v2976_v29 = vor.u32 %v3152_v10, %v2973_v57  ;;  %v3100_v20 = vld [vmem:[#allocation3 + $0xf4] sm:$0xf0]  ;;  %v2749_v23 = vld [vmem:[#allocation3 + $0xf8] sm:$0xf0]  ;;  %v2716_v11 = vor.u32 %v3092_v53, %v2715_v28 }
 0x1e1   : > { %1177 = vst [vmem:[#allocation3 + $0x258] sm:$0xff] %v1169_v56  ;;  %v2748_v15 = vor.u32 %v3100_v20, %v2747_v36  ;;  %v2752_v32 = vor.u32 %v3096_v19, %v2749_v23  ;;  %v2717_v16 = vld [vmem:[#allocation3 + $0xb8] sm:$0xf0] }
 0x1e2   : > { %2363 = vmatpush.bf16.msrb.mxu1 %v2780_v60  ;;  %2389 = vmatpush.bf16.msrb.mxu0 %v2784_v54  ;;  %v2720_v6 = vor.u32 %v3088_v33, %v2717_v16 }
 0x1e3   : > { %2378 = vmatpush.bf16.msrb.mxu3 %v2972_v31  ;;  %2404 = vmatpush.bf16.msrb.mxu2 %v2976_v29 }
 0x1e4   : > { %v1113_v5 = vpop.permute.xlu0 %1112 }
 0x1e5   : > { %v1118_v30 = vrot.slane %v1113_v5, 4 }
 0x1e6   : > { %2364 = vmatpush.bf16.msrb.mxu1 %v2748_v15  ;;  %2390 = vmatpush.bf16.msrb.mxu0 %v2752_v32 }
 0x1e7   : > { %v1126_v49 = vsel %vm438_vm0, %v1117_v42, %v1118_v30  ;;  %v3148_v41 = vld [vmem:[#allocation3 + $0x274] sm:$0xf0]  ;;  %v2941_v62 = vld [vmem:[#allocation3 + $0x278] sm:$0xf0] }
 0x1e8   : > { %v1127_v7 = vsel %vm1120_vm9, %v4185_v47, %v1126_v49  ;;  %v2939_v21 = vld [vmem:[#allocation3 + $0x258] sm:$0xf]  ;;  %v3144_v58 = vld [vmem:[#allocation3 + $0x25c] sm:$0xf] }
 0x1e9   : > { %1135 = vst [vmem:[#allocation3 + $0x238] sm:$0xff] %v1127_v7  ;;  %v2940_v14 = vor.u32 %v3148_v41, %v2939_v21  ;;  %v2944_v37 = vor.u32 %v3144_v58, %v2941_v62  ;;  %v3076_v42 = vld [vmem:[#allocation3 + $0x34] sm:$0xf0] }
 0x1ea   : > { %2365 = vmatpush.bf16.msrb.mxu1 %v2716_v11  ;;  %2391 = vmatpush.bf16.msrb.mxu0 %v2720_v6  ;;  %v2226_v61 = vpop.f32.mrf.mxu1  ;;  %v2213_v13 = vpop.f32.mrf.mxu0  ;;  %v2651_v47 = vld [vmem:[#allocation3 + $0x18] sm:$0xf] }
 0x1eb   : > { %2379 = vmatpush.bf16.msrb.mxu3 %v2940_v14  ;;  %2405 = vmatpush.bf16.msrb.mxu2 %v2944_v37  ;;  %v2652_v9 = vor.u32 %v3076_v42, %v2651_v47 }
 0x1ee   : > { %2366 = vmatpush.bf16.msrb.mxu1 %v2684_v43  ;;  %2392 = vmatpush.bf16.msrb.mxu0 %v2688_v0 }
 0x1f0   : > { %v3140_v51 = vld [vmem:[#allocation3 + $0x234] sm:$0xf0]  ;;  %v2909_v17 = vld [vmem:[#allocation3 + $0x238] sm:$0xf0] }
 0x1f1   : > { %v2908_v44 = vor.u32 %v3140_v51, %v2907_v18  ;;  %v2912_v45 = vor.u32 %v3136_v12, %v2909_v17  ;;  %v2252_v52 = vpop.f32.mrf.mxu3  ;;  %v2239_v34 = vpop.f32.mrf.mxu2 }
 0x1f2   : > { %2367 = vmatpush.bf16.msrb.mxu1 %v2652_v9  ;;  %2393 = vmatpush.bf16.msrb.mxu0 %v2656_v46  ;;  %v2228_v55 = vpop.f32.mrf.mxu1  ;;  %v2215_v63 = vpop.f32.mrf.mxu0 }
 0x1f3   : > { %2380 = vmatpush.bf16.msrb.mxu3 %v2908_v44  ;;  %2406 = vmatpush.bf16.msrb.mxu2 %v2912_v45 }
 0x1f5   : > { %2368 = vmatmul.bf16.vlgmr.msrb.gmra.mxu1 %v3970_v48  ;;  %2394 = vmatmul.bf16.vlgmr.msrb.gmra.mxu0 %v3970_v48  ;;  %v2420_v48 = vld [vmem:[%s385_s11] sm:$0xff] }
 0x1f6   : > { %3047 = vmatmul.msk.bf16.vlgmr.msrb.gmra.mxu3 %vm2175_vm10, %v3972_v1  ;;  %3048 = vmatmul.msk.bf16.vlgmr.msrb.gmra.mxu2 %vm2175_vm10, %v3972_v1  ;;  %vm2421_vm0 = vcmp.gt.f32.partialorder %v2420_v48, 0.5 }
 0x1f7   : > { %v4323_v4 = vsel %vm2421_vm0, 1, %v3244_v35 }
 0x1f8   : > { %v2423_v24 = vperm.slane %v4323_v4, 0  ;;  %v2424_v1 = vperm.slane %v4323_v4, 1  ;;  %v2425_v26 = vperm.slane %v4323_v4, 2  ;;  %v2426_v10 = vperm.slane %v4323_v4, 3 }
 0x1f9   : > { %v2254_v25 = vpop.f32.mrf.mxu3  ;;  %v2241_v38 = vpop.f32.mrf.mxu2  ;;  %v2427_v0 = vperm.slane %v4323_v4, 4  ;;  %v2428_v42 = vperm.slane %v4323_v4, 5 }
 0x1fa   : > { %vm2431_vm9 = vcmp.eq.s32.totalorder %v2423_v24, 1  ;;  %vm2432_vm10 = vcmp.eq.s32.totalorder %v2424_v1, 1  ;;  %vm2433_vm15 = vcmp.eq.s32.totalorder %v2425_v26, 1  ;;  %vm2434_vm1 = vcmp.eq.s32.totalorder %v2426_v10, 1 }
 0x1fb   : > { %vm2435_vm4 = vcmp.eq.s32.totalorder %v2427_v0, 1  ;;  %vm2436_vm5 = vcmp.eq.s32.totalorder %v2428_v42, 1 }
 0x203   : > { %v2265_v22 = vpop.f32.mrf.mxu1 }
 0x204   : > { %v2291_v59 = vpop.f32.mrf.mxu0 }
 0x20b   : > { %v2267_v60 = vpop.f32.mrf.mxu1 }
 0x20c   : > { %v2293_v54 = vpop.f32.mrf.mxu0 }
 0x220   : > { %v2278_v36 = vpop.f32.mrf.mxu3  ;;  %v2304_v19 = vpop.f32.mrf.mxu2 }
 0x221   : > { %v4328_v8 = vpop.permute.xlu1 %1626 }
 0x222   : > { %v2214_v57 = vadd.f32 %v2213_v13, %v4328_v8  ;;  %v2240_v56 = vadd.f32 %v2239_v34, %v4328_v8  ;;  %v2266_v35 = vadd.f32 %v2265_v22, %v4328_v8  ;;  %v2292_v31 = vadd.f32 %v2291_v59, %v4328_v8 }
 0x223   : > { %v2429_v22 = vperm.slane %v4323_v4, 6  ;;  %v2430_v59 = vperm.slane %v4323_v4, 7 }
 0x224   : > { %v2227_v29 = vadd.f32 %v2226_v61, %v2214_v57  ;;  %v2253_v20 = vadd.f32 %v2252_v52, %v2240_v56  ;;  %v2279_v23 = vadd.f32 %v2278_v36, %v2266_v35  ;;  %v2305_v15 = vadd.f32 %v2304_v19, %v2292_v31 }
 0x225   : > { %vm2437_vm6 = vcmp.eq.s32.totalorder %v2429_v22, 1  ;;  %vm2438_vm8 = vcmp.eq.s32.totalorder %v2430_v59, 1 }
 0x226   : > { %v2412_v32 = vpack.c.bf16 %v2253_v20, %v2227_v29  ;;  %v2439_v53 = vsel %vm2431_vm9, %v2227_v29, 0.0  ;;  %v2440_v16 = vsel %vm2432_vm10, %v2253_v20, 0.0  ;;  %v2441_v5 = vsel %vm2433_vm15, %v2279_v23, 0.0 }
 0x227   : > { %v2447_v33 = vadd.f32 %v2440_v16, %v2439_v53  ;;  %v2456_v11 = vmul.f32 %v2439_v53, %v2439_v53  ;;  %v2457_v6 = vmul.f32 %v2440_v16, %v2440_v16  ;;  %v2458_v39 = vmul.f32 %v2441_v5, %v2441_v5 }
 0x228   : > { %v2280_v30 = vpop.f32.mrf.mxu3  ;;  %v2306_v28 = vpop.f32.mrf.mxu2  ;;  %v2413_v49 = vpack.c.bf16 %v2305_v15, %v2279_v23  ;;  %2416 = vst [vmem:[%s4340_s16] sm:$0xff] %v2412_v32  ;;  %v2442_v41 = vsel %vm2434_vm1, %v2305_v15, 0.0  ;;  %v2473_v32 = vlaneseq }
 0x229   : > { %v2448_v62 = vadd.f32 %v2447_v33, %v2441_v5  ;;  %v2464_v2 = vadd.f32 %v2457_v6, %v2456_v11  ;;  %v2459_v7 = vmul.f32 %v2442_v41, %v2442_v41 }
 0x22a   : > { %2417 = vst [vmem:[%s4340_s16 + $0x8] sm:$0xff] %v2413_v49  ;;  %v2474_v53 = vand.u32 127, %v2473_v32 }
 0x22b   : > { %v2465_v21 = vadd.f32 %v2464_v2, %v2458_v39  ;;  %v2449_v58 = vadd.f32 %v2448_v62, %v2442_v41 }
 0x22c   : > { %vm2476_vm2 = vcmp.eq.s32.totalorder %v2474_v53, 1  ;;  %vm2475_vm3 = vcmp.eq.s32.totalorder %v2474_v53, 0 }
 0x22d   : > { %v2466_v14 = vadd.f32 %v2465_v21, %v2459_v7 }
 0x240   : > { %v2317_v37 = vpop.f32.mrf.mxu3  ;;  %v2343_v3 = vpop.f32.mrf.mxu2 }
 0x241   : > { %v2318_v27 = vadd.f32 %v2317_v37, %v4328_v8  ;;  %v2344_v61 = vadd.f32 %v2343_v3, %v4328_v8 }
 0x248   : > { %v2319_v40 = vpop.f32.mrf.mxu3  ;;  %v2345_v43 = vpop.f32.mrf.mxu2 }
 0x252   : > { %v2330_v13 = vpop.f32.mrf.mxu1  ;;  %v2356_v47 = vpop.f32.mrf.mxu0 }
 0x253   : > { %v2331_v50 = vadd.f32 %v2330_v13, %v2318_v27  ;;  %v2357_v9 = vadd.f32 %v2356_v47, %v2344_v61 }
 0x255   : > { %v2443_v46 = vsel %vm2435_vm4, %v2331_v50, 0.0  ;;  %v2414_v18 = vpack.c.bf16 %v2357_v9, %v2331_v50  ;;  %v2444_v51 = vsel %vm2436_vm5, %v2357_v9, 0.0 }
 0x256   : > { %v2450_v12 = vadd.f32 %v2449_v58, %v2443_v46  ;;  %v2460_v17 = vmul.f32 %v2443_v46, %v2443_v46  ;;  %v2461_v44 = vmul.f32 %v2444_v51, %v2444_v51 }
 0x257   : > { %2418 = vst [vmem:[%s4340_s16 + $0x10] sm:$0xff] %v2414_v18 }
 0x258   : > { %v2467_v45 = vadd.f32 %v2466_v14, %v2460_v17  ;;  %v2451_v52 = vadd.f32 %v2450_v12, %v2444_v51 }
 0x25a   : > { %v2332_v34 = vpop.f32.mrf.mxu1  ;;  %v2358_v55 = vpop.f32.mrf.mxu0  ;;  %v2468_v63 = vadd.f32 %v2467_v45, %v2461_v44 }
 0x272   : > { %v2369_v25 = vpop.f32.mrf.mxu1  ;;  %v2395_v38 = vpop.f32.mrf.mxu0 }
 0x273   : > { %v2370_v60 = vadd.f32 %v2369_v25, %v4328_v8  ;;  %v2396_v48 = vadd.f32 %v2395_v38, %v4328_v8 }
 0x279   : > { %v2382_v36 = vpop.f32.mrf.mxu3  ;;  %v2408_v1 = vpop.f32.mrf.mxu2 }
 0x27a   : > { %v2371_v54 = vpop.f32.mrf.mxu1  ;;  %v2397_v19 = vpop.f32.mrf.mxu0  ;;  %v2383_v24 = vadd.f32 %v2382_v36, %v2370_v60  ;;  %v2409_v26 = vadd.f32 %v2408_v1, %v2396_v48 }
 0x27c   : > { %v2445_v10 = vsel %vm2437_vm6, %v2383_v24, 0.0  ;;  %v2415_v56 = vpack.c.bf16 %v2409_v26, %v2383_v24  ;;  %v2446_v35 = vsel %vm2438_vm8, %v2409_v26, 0.0 }
 0x27d   : > { %v2462_v57 = vmul.f32 %v2445_v10, %v2445_v10  ;;  %v2452_v4 = vadd.f32 %v2451_v52, %v2445_v10  ;;  %v2463_v29 = vmul.f32 %v2446_v35, %v2446_v35 }
 0x27e   : > { %2419 = vst [vmem:[%s4340_s16 + $0x18] sm:$0xff] %v2415_v56 }
 0x27f   : > { %v2453_v31 = vadd.f32 %v2452_v4, %v2446_v35  ;;  %v2469_v20 = vadd.f32 %v2468_v63, %v2462_v57 }
 0x281   : > { %v2384_v23 = vpop.f32.mrf.mxu3  ;;  %2454 = vadd.xlane.f32.xlu0 %v2453_v31  ;;  %v2470_v8 = vadd.f32 %v2469_v20, %v2463_v29  ;;  %v2410_v15 = vpop.f32.mrf.mxu2 }
 0x283   : > { %2471 = vadd.xlane.f32.xlu2 %v2470_v8 }
 0x2f4   : > { %v2455_v5 = vpop.xlane.xlu0 %2454 }
 0x2f6   : > { %v2472_v16 = vpop.xlane.xlu2 %2471 }
 0x2f7   : > { %v2477_v30 = vsel %vm2476_vm2, %v2472_v16, 0.0 }
 0x2f8   : > { %v2478_v28 = vsel %vm2475_vm3, %v2455_v5, %v2477_v30 }
 0x2f9   : > { %2479 = vst [vmem:[%s399_s19] sm:$0xff] %v2478_v28 }
 0x2fa PF: > { %s18_s24 = sadd.s32 1, %s3216_s24  }
 0x2fb   : > { %p15_p7 = scmp.ge.s32.totalorder %s18_s24, 4  }
 0x2fd   :  { %17 = sbr.rel (!%p15_p7) target bundleno = 1 (0x1), region = 95 }

// kernel: trans_conv_forward.6
= control target key start
LH: loop header
LB: loop body
LE: loop exit
PB: predicated region body
PF: predicated region fallthrough
CT: control target
= control target key end

     0   :  { %s3669_s17 = smov 0   ;;  %s4825_s0 = inlined_call_operand.vmem [shape: bf16[8,4096], index: 0, kind: input, shape index: {}, may-alias: {0,1,2}]   ;;  %s4826_s1 = inlined_call_operand.vmem [shape: bf16[8,4096], index: 1, kind: input, shape index: {}, may-alias: {0,1,2}]   ;;  %s4827_s2 = inlined_call_operand.vmem [shape: bf16[8,4096], index: 2, kind: input, shape index: {}, may-alias: {0,1,2}]   ;;  %s4828_s3 = inlined_call_operand.vmem [shape: bf16[4,216], index: 3, kind: input, shape index: {}]   ;;  %s4829_s4 = inlined_call_operand.vmem [shape: f32[4,1], index: 4, kind: input, shape index: {}]   ;;  %s4830_s5 = inlined_call_operand.vmem [shape: f32[8,1], index: 5, kind: input, shape index: {}]   ;;  %s4831_s6 = inlined_call_operand.vmem [shape: f32[8,1], index: 6, kind: input, shape index: {}]   ;;  %s4832_s7 = inlined_call_operand.vmem [shape: f32[1,4096], index: 7, kind: input, shape index: {}, may-alias: {7,8,9}]   ;;  %s4833_s8 = inlined_call_operand.vmem [shape: f32[1,4096], index: 8, kind: input, shape index: {}, may-alias: {7,8,9}]   ;;  %s4834_s9 = inlined_call_operand.vmem [shape: f32[1,4096], index: 9, kind: input, shape index: {}, may-alias: {7,8,9}]   ;;  %s4835_s10 = inlined_call_operand.vmem [shape: f32[4,4096], index: 10, kind: output, shape index: {0}]   ;;  %s4836_s11 = inlined_call_operand.vmem [shape: f32[4,256], index: 11, kind: output, shape index: {1}]  }
   0x1 LB: > { %s3675_s18 = sadd.s32 4294967295, %s3580_s17   ;;  %p2959_p0 = scmp.ge.s32.totalorder %s3580_s17, 1  ;;  %s3580_s17 = sphi %s3669_s17, %s22_s17  }
   0x2   : > { %p435_p1 = scmp.lt.s32.totalorder %s3580_s17, 3 }
   0x4   : > { %p436_p2 = pnand %p2959_p0, %p435_p1 }
   0x5   : > { %s3416_s23 = sshll.u32 (!%p436_p2), %s3675_s18, 3  ;;  %s3584_s26 = smov (!%p436_p2), 110  }
   0x6   : > { %439 = sbr.rel (%p436_p2) target bundleno = 895 (0x37f), region = 60  ;;  %s3417_s24 = sadd.s32 (!%p436_p2), 8, %s3416_s23 }
   0x7   : > { %s2963_s25 = sadd.s32 (!%p436_p2), 4294967295, %s3417_s24  ;;  %p512_p3 = scmp.lt.s32.totalorder (!%p436_p2), %s3417_s24, 31 }
   0x8   : > { %p521_p4 = scmp.lt.s32.totalorder (!%p436_p2), %s2963_s25, 31  ;;  %s3585_s27 = smov (!%p436_p2), 109  }
   0x9   : > { %s3586_s12 = smov (!%p436_p2), 101   ;;  %s3588_s21 = smov (!%p436_p2), 99  }
   0xa   : > { %s3596_s13 = smov (!%p436_p2), 19   ;;  %s3600_s16 = smov (!%p436_p2), 28  }
   0xb   : > { %v610_v0 = vld [vmem:[%s4830_s5] sm:$0xff]  ;;  %v3582_v1 = vmov 0   ;;  %s4951_s24 = smov (!%p512_p3, %s3417_s24), 31  ;;  %s4953_s25 = smov (!%p521_p4, %s2963_s25), 31  ;;  %vm730_vm13 = vcmask 1043456   ;;  %vm732_vm14 = vcmask 908288  }
   0xc   : > { %3570 = vset.pattern.permute.xlu1 %v3582_v1  ;;  %3569 = vset.pattern.permute.xlu0 %v3582_v1  ;;  %v624_v2 = vld [vmem:[%s4831_s6] sm:$0xff]  ;;  %s540_s28 = scalar_lea.vmem %s4832_s7, %s4951_s24  ;;  %s2964_s29 = sshll.u32 %s4953_s25, 2  ;;  %vm774_vm15 = vcmask 900096  }
   0xd   : > { %613 = vperm.xlu1 %3570, %v610_v0   ;;  %578 = vperm.xlu0 %3569, %v610_v0   ;;  %s4837_s30 = sshll.u32 %s4951_s24, 2  ;;  %v601_v3 = vld [vmem:[%s540_s28] sm:$0xff]  ;;  %s524_s14 = scalar_lea.vmem %s4826_s1, %s2964_s29 }
   0xe   : > { %3571 = vset.pattern.permute.xlu2 %v3582_v1  ;;  %s515_s19 = scalar_lea.vmem %s4825_s0, %s4837_s30  ;;  %vm646_vm0 = vcmp.gt.f32.partialorder %v601_v3, 0.5  ;;  %s548_s22 = scalar_lea.vmem %s4833_s8, %s4953_s25  ;;  %v572_v4 = vld [vmem:[%s524_s14] sm:$0xf] }
   0xf   : > { %686 = vperm.xlu2 %3571, %v610_v0   ;;  %v597_v5 = vld [vmem:[%s515_s19] sm:$0xff]  ;;  %v647_v6 = vsel %vm646_vm0, 1, %v3582_v1  ;;  %v574_v8 = vunpack.c.l.bf16 %v572_v4  ;;  %v598_v9 = vld [vmem:[%s515_s19 + $0x8] sm:$0xff]  ;;  %v599_v11 = vld [vmem:[%s515_s19 + $0x10] sm:$0xff]  ;;  %s3583_s25 = smov 111   ;;  %s3421_s28 = sadd.s32 16, %s3416_s23 }
  0x10   : > { %v573_v7 = vld [vmem:[%s548_s22] sm:$0x1]  ;;  %v602_v12 = vunpack.c.l.bf16 %v597_v5  ;;  %v648_v13 = vperm.slane %v647_v6, 0  ;;  %v649_v14 = vperm.slane %v647_v6, 1  ;;  %v600_v15 = vld [vmem:[%s515_s19 + $0x18] sm:$0xff]  ;;  %v650_v16 = vperm.slane %v647_v6, 2 }
  0x11   : > { %vm590_vm1 = vcmp.gt.f32.partialorder %v573_v7, 0.5  ;;  %v651_v17 = vperm.slane %v647_v6, 3  ;;  %v652_v18 = vperm.slane %v647_v6, 4  ;;  %v653_v19 = vperm.slane %v647_v6, 5  ;;  %p530_p5 = scmp.lt.s32.totalorder %s3421_s28, 31  ;;  %s3587_s23 = smov 100  }
  0x12   : > { %v603_v20 = vunpack.c.h.bf16 %v597_v5  ;;  %v604_v21 = vunpack.c.l.bf16 %v598_v9  ;;  %v654_v22 = vperm.slane %v647_v6, 6  ;;  %v655_v23 = vperm.slane %v647_v6, 7  ;;  %s4838_s22 = smov 91   ;;  %s3597_s14 = smov 18  }
  0x13   : > { %v605_v25 = vunpack.c.h.bf16 %v598_v9  ;;  %v606_v26 = vunpack.c.l.bf16 %v599_v11  ;;  %v607_v27 = vunpack.c.h.bf16 %v599_v11  ;;  %v591_v28 = vsel %vm590_vm1, 1, %v3582_v1  ;;  %s4955_s28 = smov (!%p530_p5, %s3421_s28), 31  ;;  %s3601_s19 = smov 27  }
  0x14   : > { %v608_v29 = vunpack.c.l.bf16 %v600_v15  ;;  %v609_v30 = vunpack.c.h.bf16 %v600_v15  ;;  %vm3711_vm2 = vcmp.eq.s32.totalorder %v648_v13, 1  ;;  %vm3715_vm3 = vcmp.eq.s32.totalorder %v649_v14, 1  ;;  %s2966_s29 = sshll.u32 %s4955_s28, 2  ;;  %s556_s20 = scalar_lea.vmem %s4834_s9, %s4955_s28 }
  0x15   : > { %627 = vperm.xlu1 %3570, %v624_v2   ;;  %585 = vperm.xlu0 %3569, %v624_v2   ;;  %vm3719_vm4 = vcmp.eq.s32.totalorder %v650_v16, 1  ;;  %vm3723_vm5 = vcmp.eq.s32.totalorder %v651_v17, 1  ;;  %vm3727_vm6 = vcmp.eq.s32.totalorder %v652_v18, 1  ;;  %vm3731_vm7 = vcmp.eq.s32.totalorder %v653_v19, 1  ;;  %s533_s15 = scalar_lea.vmem %s4827_s2, %s2966_s29  ;;  %s3593_s28 = smov 1  }
  0x16   : > { %vm3735_vm8 = vcmp.eq.s32.totalorder %v654_v22, 1  ;;  %vm3739_vm9 = vcmp.eq.s32.totalorder %v655_v23, 1  ;;  %v592_v40 = vperm.slane %v591_v28, 0  ;;  %s4847_s29 = smov 10   ;;  %vm816_vm0 = vcmask 891904   ;;  %s3604_s30 = smov 29  }
  0x17   : > { %693 = vperm.xlu2 %3571, %v624_v2   ;;  %vm858_vm1 = vcmask 826368   ;;  %p567_p6 = scmp.lt.s32.totalorder %s3675_s18, 1 }
  0x18   : > { %vm593_vm10 = vcmp.eq.s32.totalorder %v592_v40, 1 }
  0x19   : > { %s4957_s18 = smov (!%p567_p6, %s3675_s18), 1 }
  0x7f   : > { %v614_v10 = vpop.permute.xlu1 %613  ;;  %v579_v24 = vpop.permute.xlu0 %578 }
  0x80   : > { %v581_v37 = vmul.f32 %v579_v24, %v574_v8  ;;  %v616_v41 = vmul.f32 %v614_v10, %v602_v12  ;;  %v617_v42 = vmul.f32 %v614_v10, %v603_v20  ;;  %v618_v43 = vmul.f32 %v614_v10, %v604_v21 }
  0x81   : > { %v619_v44 = vmul.f32 %v614_v10, %v605_v25  ;;  %v620_v45 = vmul.f32 %v614_v10, %v606_v26  ;;  %v621_v46 = vmul.f32 %v614_v10, %v607_v27  ;;  %v622_v47 = vmul.f32 %v614_v10, %v608_v29 }
  0x82   : > { %v623_v48 = vmul.f32 %v614_v10, %v609_v30  ;;  %v687_v30 = vpop.permute.xlu2 %686 }
  0x87   : > { %v628_v49 = vpop.permute.xlu1 %627  ;;  %v586_v7 = vpop.permute.xlu0 %585 }
  0x88   : > { %v630_v50 = vadd.f32 %v628_v49, %v616_v41  ;;  %v631_v51 = vadd.f32 %v628_v49, %v617_v42  ;;  %v632_v52 = vadd.f32 %v628_v49, %v618_v43  ;;  %v633_v53 = vadd.f32 %v628_v49, %v619_v44  ;;  %v681_v44 = vld [vmem:[%s556_s20] sm:$0x1]  ;;  %s3602_s20 = smov 90  }
  0x89   : > { %v634_v54 = vadd.f32 %v628_v49, %v620_v45  ;;  %v635_v55 = vadd.f32 %v628_v49, %v621_v46  ;;  %v636_v56 = vadd.f32 %v628_v49, %v622_v47  ;;  %v637_v57 = vadd.f32 %v628_v49, %v623_v48 }
  0x8a   : > { %v638_v58 = vmax.f32 %v630_v50, 0.0  ;;  %v639_v59 = vmax.f32 %v631_v51, 0.0  ;;  %v640_v60 = vmax.f32 %v632_v52, 0.0  ;;  %v641_v61 = vmax.f32 %v633_v53, 0.0  ;;  %v694_v43 = vpop.permute.xlu2 %693 }
  0x8b   : > { %v642_v62 = vmax.f32 %v634_v54, 0.0  ;;  %v643_v63 = vmax.f32 %v635_v55, 0.0  ;;  %v644_v0 = vmax.f32 %v636_v56, 0.0  ;;  %v645_v2 = vmax.f32 %v637_v57, 0.0 }
  0x8c   : > { %v664_v3 = vsel %vm3711_vm2, %v638_v58, 0.0  ;;  %v665_v4 = vsel %vm3715_vm3, %v639_v59, 0.0  ;;  %v666_v5 = vsel %vm3719_vm4, %v640_v60, 0.0  ;;  %v667_v6 = vsel %vm3723_vm5, %v641_v61, 0.0 }
  0x8d   : > { %v668_v8 = vsel %vm3727_vm6, %v642_v62, 0.0  ;;  %v669_v9 = vsel %vm3731_vm7, %v643_v63, 0.0  ;;  %v670_v10 = vsel %vm3735_vm8, %v644_v0, 0.0  ;;  %v671_v11 = vsel %vm3739_vm9, %v645_v2, 0.0 }
  0x8e   : > { %v3759_v12 = vpack.c.bf16 %v665_v4, %v664_v3  ;;  %v3761_v13 = vpack.c.bf16 %v667_v6, %v666_v5  ;;  %v3763_v14 = vpack.c.bf16 %v669_v9, %v668_v8  ;;  %v3765_v15 = vpack.c.bf16 %v671_v11, %v670_v10 }
  0x8f   : > { %v588_v16 = vadd.f32 %v586_v7, %v581_v37  ;;  %v680_v37 = vld [vmem:[%s533_s15] sm:$0xf]  ;;  %vm698_vm11 = vcmp.gt.f32.partialorder %v681_v44, 0.5  ;;  %s3598_s15 = smov 89  }
  0x90   : > { %676 = vst [vmem:[#allocation2 + $0x4] sm:$0xff] %v3759_v12  ;;  %v682_v40 = vunpack.c.l.bf16 %v680_v37  ;;  %v699_v46 = vsel %vm698_vm11, 1, %v3582_v1  ;;  %vm942_vm11 = vcmask 809984  }
  0x91   : > { %677 = vst [vmem:[#allocation2 + $0xc] sm:$0xff] %v3761_v13  ;;  %v589_v17 = vmax.f32 %v588_v16, 0.0  ;;  %v700_v48 = vperm.slane %v699_v46, 0 }
  0x92   : > { %678 = vst [vmem:[#allocation2 + $0x14] sm:$0xff] %v3763_v14  ;;  %v689_v42 = vmul.f32 %v687_v30, %v682_v40 }
  0x93   : > { %679 = vst [vmem:[#allocation2 + $0x1c] sm:$0xff] %v3765_v15  ;;  %v594_v18 = vsel %vm593_vm10, %v589_v17, 0.0  ;;  %vm701_vm12 = vcmp.eq.s32.totalorder %v700_v48, 1  ;;  %vm900_vm10 = vcmask 818176  }
  0x94   : > { %v595_v19 = vpack.c.bf16 %v594_v18, %v594_v18  ;;  %1256 = vst [vmem:[#allocation3 + $0x1a0] sm:$0xff] %v3759_v12  ;;  %v696_v45 = vadd.f32 %v694_v43, %v689_v42 }
  0x96   : > { %596 = vst [vmem:[#allocation2] sm:$0xf] %v595_v19  ;;  %v697_v47 = vmax.f32 %v696_v45, 0.0 }
  0x98   : > { %v3772_v20 = vld [vmem:[#allocation2 + $0x8] sm:$0xff]  ;;  %v702_v49 = vsel %vm701_vm12, %v697_v47, 0.0  ;;  %vm4846_vm12 = vcmask 744448  }
  0x99   : > { %v1253_v21 = vld [vmem:[#allocation2 + $0xc] sm:$0xff]  ;;  %717 = vrot.lane.b32.xlu1 %v3772_v20, %s3583_s25  ;;  %v1254_v23 = vld [vmem:[#allocation2 + $0x14] sm:$0xff]  ;;  %v703_v50 = vpack.c.bf16 %v702_v49, %v702_v49 }
  0x9a   : > { %v3774_v22 = vld [vmem:[#allocation2 + $0x10] sm:$0xff]  ;;  %1257 = vst [vmem:[#allocation3 + $0x1a8] sm:$0xff] %v1253_v21  ;;  %v1255_v25 = vld [vmem:[#allocation2 + $0x1c] sm:$0xff] }
  0x9b   : > { %719 = vrot.lane.b32.xlu2 %v3774_v22, %s3583_s25  ;;  %1258 = vst [vmem:[#allocation3 + $0x1b0] sm:$0xff] %v1254_v23  ;;  %v709_v26 = vld [vmem:[#allocation2 + $0x20] sm:$0xf]  ;;  %v3782_v27 = vld [vmem:[#allocation2 + $0x18] sm:$0xff] }
  0x9c   : > { %1259 = vst [vmem:[#allocation3 + $0x1b8] sm:$0xff] %v1255_v25  ;;  %v752_v28 = vld [vmem:[#allocation2 + $0x20] sm:$0xf] }
  0x9d   : > { %v3778_v24 = vld [vmem:[#allocation2] sm:$0xff]  ;;  %704 = vst [vmem:[#allocation2 + $0x24] sm:$0xf] %v703_v50 }
  0x9e   : > { %715 = vrot.lane.b32.xlu0 %v3778_v24, %s3583_s25  ;;  %v794_v29 = vld [vmem:[#allocation2 + $0x20] sm:$0xf] }
  0x9f   : > { %v836_v41 = vld [vmem:[#allocation2 + $0x20] sm:$0xf] }
  0xa0   : > { %v878_v51 = vld [vmem:[#allocation2 + $0x20] sm:$0xf] }
  0xa1   : > { %723 = vrot.lane.b32.xlu1 %v709_v26, %s3583_s25  ;;  %v920_v1 = vld [vmem:[#allocation2 + $0x20] sm:$0xf] }
  0xa3   : > { %758 = vrot.lane.b32.xlu2 %v3778_v24, %s3584_s26 }
  0xa6   : > { %721 = vrot.lane.b32.xlu0 %v3782_v27, %s3583_s25  ;;  %s3590_s25 = smov 127  }
  0xa9   : > { %762 = vrot.lane.b32.xlu1 %v3774_v22, %s3584_s26 }
  0xab   : > { %764 = vrot.lane.b32.xlu2 %v3782_v27, %s3584_s26 }
  0xae   : > { %760 = vrot.lane.b32.xlu0 %v3772_v20, %s3584_s26 }
  0xb1   : > { %800 = vrot.lane.b32.xlu1 %v3778_v24, %s3585_s27 }
  0xb3   : > { %802 = vrot.lane.b32.xlu2 %v3772_v20, %s3585_s27 }
  0xb6   : > { %766 = vrot.lane.b32.xlu0 %v752_v28, %s3584_s26  ;;  %s3591_s26 = smov 119  }
  0xb9   : > { %806 = vrot.lane.b32.xlu1 %v3782_v27, %s3585_s27 }
  0xbb   : > { %808 = vrot.lane.b32.xlu2 %v794_v29, %s3585_s27 }
  0xbe   : > { %804 = vrot.lane.b32.xlu0 %v3774_v22, %s3585_s27  ;;  %s4840_s27 = smov 17  }
  0xc1   : > { %844 = vrot.lane.b32.xlu1 %v3772_v20, %s3586_s12 }
  0xc3   : > { %846 = vrot.lane.b32.xlu2 %v3774_v22, %s3586_s12 }
  0xc6   : > { %842 = vrot.lane.b32.xlu0 %v3778_v24, %s3586_s12 }
  0xc9   : > { %850 = vrot.lane.b32.xlu1 %v836_v41, %s3586_s12 }
  0xcb   : > { %884 = vrot.lane.b32.xlu2 %v3778_v24, %s3587_s23 }
  0xce   : > { %848 = vrot.lane.b32.xlu0 %v3782_v27, %s3586_s12  ;;  %s4850_s12 = smov 9  }
  0xd1   : > { %888 = vrot.lane.b32.xlu1 %v3774_v22, %s3587_s23 }
  0xd3   : > { %890 = vrot.lane.b32.xlu2 %v3782_v27, %s3587_s23 }
  0xd6   : > { %886 = vrot.lane.b32.xlu0 %v3772_v20, %s3587_s23 }
  0xd9   : > { %926 = vrot.lane.b32.xlu1 %v3778_v24, %s3588_s21 }
  0xdb   : > { %928 = vrot.lane.b32.xlu2 %v3772_v20, %s3588_s21 }
  0xde   : > { %892 = vrot.lane.b32.xlu0 %v878_v51, %s3587_s23  ;;  %s4852_s23 = smov 11  }
  0xe1   : > { %932 = vrot.lane.b32.xlu1 %v3782_v27, %s3588_s21 }
  0xe3   : > { %934 = vrot.lane.b32.xlu2 %v920_v1, %s3588_s21 }
  0xe6   : > { %930 = vrot.lane.b32.xlu0 %v3774_v22, %s3588_s21  ;;  %s3603_s21 = smov 37  }
  0xe9   : > { %970 = vrot.lane.b32.xlu1 %v3772_v20, %s4838_s22 }
  0xeb   : > { %972 = vrot.lane.b32.xlu2 %v3774_v22, %s4838_s22 }
  0xee   : > { %968 = vrot.lane.b32.xlu0 %v3778_v24, %s4838_s22  ;;  %s4842_s22 = smov 39  }
  0xf1   : > { %1272 = vrot.lane.b32.xlu1 %v3761_v13, %s3590_s25 }
  0xf3   : > { %1312 = vrot.lane.b32.xlu2 %v3759_v12, %s3591_s26 }
  0xf5   : > { %v720_v52 = vpop.permute.xlu2 %719 }
  0xf6   : > { %1270 = vrot.lane.b32.xlu0 %v3759_v12, %s3590_s25  ;;  %v727_v56 = vrot.slane %v720_v52, 4 }
  0xf9   : > { %1774 = vrot.lane.b32.xlu1 %v3759_v12, %s4840_s27 }
  0xfb   : > { %1776 = vrot.lane.b32.xlu2 %v3761_v13, %s4840_s27 }
  0xfd   : > { %v3829_v53 = vpop.permute.xlu2 %758 }
  0xfe   : > { %1314 = vrot.lane.b32.xlu0 %v3761_v13, %s3591_s26  ;;  %v768_v25 = vrot.slane %v3829_v53, 4 }
 0x101   : > { %1222 = vrot.lane.b32.xlu1 %v3772_v20, %s3593_s28 }
 0x103   : > { %1136 = vrot.lane.b32.xlu2 %v3778_v24, %s4847_s29 }
 0x105   : > { %v3837_v54 = vpop.permute.xlu2 %764 }
 0x106   : > { %1220 = vrot.lane.b32.xlu0 %v3778_v24, %s3593_s28  ;;  %v771_v10 = vrot.slane %v3837_v54, 4 }
 0x109   : > { %1178 = vrot.lane.b32.xlu1 %v3778_v24, %s4850_s12 }
 0x10b   : > { %1180 = vrot.lane.b32.xlu2 %v3772_v20, %s4850_s12  ;;  %v718_v55 = vpop.permute.xlu1 %717 }
 0x10c   : > { %v726_v58 = vrot.slane %v718_v55, 4 }
 0x10d   : > { %v3845_v57 = vpop.permute.xlu2 %802 }
 0x10e   : > { %1138 = vrot.lane.b32.xlu0 %v3772_v20, %s4847_s29  ;;  %v734_v59 = vsel %vm730_vm13, %v726_v58, %v727_v56  ;;  %v811_v37 = vrot.slane %v3845_v57, 4 }
 0x10f   : > { %v735_v60 = vsel %vm732_vm14, %v718_v55, %v734_v59 }
 0x110   : > { %745 = vst [vmem:[#allocation3 + $0x8] sm:$0xff] %v735_v60  ;;  %v716_v61 = vpop.permute.xlu0 %715 }
 0x111   : > { %v725_v62 = vrot.slane %v716_v61, 4  ;;  %1692 = vrot.lane.b32.xlu1 %v3761_v13, %s3596_s13 }
 0x113   : > { %1732 = vrot.lane.b32.xlu2 %v3759_v12, %s3597_s14  ;;  %v731_v63 = vsel %vm730_vm13, %v725_v62, %v726_v58  ;;  %v724_v0 = vpop.permute.xlu1 %723 }
 0x114   : > { %v733_v2 = vsel %vm732_vm14, %v716_v61, %v731_v63  ;;  %v729_v4 = vrot.slane %v724_v0, 4 }
 0x115   : > { %v809_v3 = vpop.permute.xlu2 %808  ;;  %744 = vst [vmem:[#allocation3] sm:$0xff] %v733_v2 }
 0x116   : > { %1690 = vrot.lane.b32.xlu0 %v3759_v12, %s3596_s13  ;;  %v814_v50 = vrot.slane %v809_v3, 4 }
 0x118   : > { %v722_v5 = vpop.permute.xlu0 %721 }
 0x119   : > { %v728_v6 = vrot.slane %v722_v5, 4  ;;  %1052 = vrot.lane.b32.xlu1 %v3778_v24, %s3598_s15 }
 0x11b   : > { %1054 = vrot.lane.b32.xlu2 %v3772_v20, %s3598_s15  ;;  %v736_v7 = vsel %vm730_vm13, %v727_v56, %v728_v6  ;;  %v738_v8 = vsel %vm730_vm13, %v728_v6, %v729_v4  ;;  %v763_v9 = vpop.permute.xlu1 %762 }
 0x11c   : > { %v737_v11 = vsel %vm732_vm14, %v720_v52, %v736_v7  ;;  %v739_v16 = vsel %vm732_vm14, %v722_v5, %v738_v8  ;;  %v770_v18 = vrot.slane %v763_v9, 4  ;;  %vm4851_vm14 = vcmask 1039360  }
 0x11d   : > { %v3868_v17 = vpop.permute.xlu2 %846  ;;  %746 = vst [vmem:[#allocation3 + $0x10] sm:$0xff] %v737_v11 }
 0x11e   : > { %747 = vst [vmem:[#allocation3 + $0x18] sm:$0xff] %v739_v16  ;;  %1734 = vrot.lane.b32.xlu0 %v3761_v13, %s3597_s14  ;;  %v778_v19 = vsel %vm730_vm13, %v770_v18, %v771_v10  ;;  %v854_v61 = vrot.slane %v3868_v17, 4 }
 0x11f   : > { %v779_v21 = vsel %vm774_vm15, %v763_v9, %v778_v19 }
 0x120   : > { %788 = vst [vmem:[#allocation3 + $0x30] sm:$0xff] %v779_v21  ;;  %v761_v23 = vpop.permute.xlu0 %760 }
 0x121   : > { %v769_v26 = vrot.slane %v761_v23, 4  ;;  %1096 = vrot.lane.b32.xlu1 %v3772_v20, %s4852_s23 }
 0x123   : > { %1606 = vrot.lane.b32.xlu2 %v3759_v12, %s3600_s16  ;;  %v773_v28 = vsel %vm730_vm13, %v768_v25, %v769_v26  ;;  %v776_v29 = vsel %vm730_vm13, %v769_v26, %v770_v18  ;;  %v801_v30 = vpop.permute.xlu1 %800 }
 0x124   : > { %v775_v40 = vsel %vm774_vm15, %v3829_v53, %v773_v28  ;;  %v777_v41 = vsel %vm774_vm15, %v761_v23, %v776_v29  ;;  %v810_v43 = vrot.slane %v801_v30, 4 }
 0x125   : > { %v3885_v42 = vpop.permute.xlu2 %884  ;;  %786 = vst [vmem:[#allocation3 + $0x20] sm:$0xff] %v775_v40 }
 0x126   : > { %787 = vst [vmem:[#allocation3 + $0x28] sm:$0xff] %v777_v41  ;;  %1094 = vrot.lane.b32.xlu0 %v3778_v24, %s4852_s23  ;;  %v815_v44 = vsel %vm730_vm13, %v810_v43, %v811_v37 }
 0x127   : > { %v817_v45 = vsel %vm816_vm0, %v801_v30, %v815_v44 }
 0x128   : > { %828 = vst [vmem:[#allocation3 + $0x40] sm:$0xff] %v817_v45  ;;  %v767_v46 = vpop.permute.xlu0 %766 }
 0x129   : > { %v772_v47 = vrot.slane %v767_v46, 4  ;;  %1648 = vrot.lane.b32.xlu1 %v3759_v12, %s3601_s19 }
 0x12b   : > { %1650 = vrot.lane.b32.xlu2 %v3761_v13, %s3601_s19  ;;  %v780_v48 = vsel %vm730_vm13, %v771_v10, %v772_v47  ;;  %v807_v49 = vpop.permute.xlu1 %806 }
 0x12c   : > { %v781_v51 = vsel %vm774_vm15, %v3837_v54, %v780_v48  ;;  %v813_v52 = vrot.slane %v807_v49, 4  ;;  %vm4857_vm15 = vcmask 138240  }
 0x12d   : > { %v3898_v1 = vpop.permute.xlu2 %890  ;;  %789 = vst [vmem:[#allocation3 + $0x38] sm:$0xff] %v781_v51 }
 0x12e   : > { %1608 = vrot.lane.b32.xlu0 %v3761_v13, %s3600_s16  ;;  %v822_v53 = vsel %vm730_vm13, %v813_v52, %v814_v50  ;;  %v897_v19 = vrot.slane %v3898_v1, 4 }
 0x12f   : > { %v823_v55 = vsel %vm816_vm0, %v807_v49, %v822_v53 }
 0x130   : > { %831 = vst [vmem:[#allocation3 + $0x58] sm:$0xff] %v823_v55  ;;  %v805_v56 = vpop.permute.xlu0 %804 }
 0x131   : > { %v812_v58 = vrot.slane %v805_v56, 4  ;;  %1012 = vrot.lane.b32.xlu1 %v3772_v20, %s3602_s20 }
 0x133   : > { %1274 = vrot.lane.b32.xlu2 %v3763_v14, %s3590_s25  ;;  %v818_v54 = vsel %vm730_vm13, %v811_v37, %v812_v58  ;;  %v820_v59 = vsel %vm730_vm13, %v812_v58, %v813_v52  ;;  %v845_v60 = vpop.permute.xlu1 %844  ;;  %v894_v37 = vrot.slane %v3885_v42, 4 }
 0x134   : > { %v819_v62 = vsel %vm816_vm0, %v3845_v57, %v818_v54  ;;  %v821_v63 = vsel %vm816_vm0, %v805_v56, %v820_v59  ;;  %v853_v2 = vrot.slane %v845_v60, 4  ;;  %vm1328_vm0 = vcmask 973824  }
 0x135   : > { %v3914_v0 = vpop.permute.xlu2 %928  ;;  %829 = vst [vmem:[#allocation3 + $0x48] sm:$0xff] %v819_v62 }
 0x136   : > { %830 = vst [vmem:[#allocation3 + $0x50] sm:$0xff] %v821_v63  ;;  %1010 = vrot.lane.b32.xlu0 %v3778_v24, %s3602_s20  ;;  %v860_v20 = vsel %vm730_vm13, %v853_v2, %v854_v61  ;;  %v937_v44 = vrot.slane %v3914_v0, 4 }
 0x137   : > { %v861_v3 = vsel %vm858_vm1, %v845_v60, %v860_v20 }
 0x138   : > { %871 = vst [vmem:[#allocation3 + $0x68] sm:$0xff] %v861_v3  ;;  %v843_v4 = vpop.permute.xlu0 %842 }
 0x139   : > { %v852_v5 = vrot.slane %v843_v4, 4  ;;  %1522 = vrot.lane.b32.xlu1 %v3759_v12, %s3603_s21 }
 0x13b   : > { %1524 = vrot.lane.b32.xlu2 %v3761_v13, %s3603_s21  ;;  %v857_v57 = vsel %vm730_vm13, %v852_v5, %v853_v2  ;;  %v851_v6 = vpop.permute.xlu1 %850 }
 0x13c   : > { %v859_v7 = vsel %vm858_vm1, %v843_v4, %v857_v57  ;;  %v856_v8 = vrot.slane %v851_v6, 4 }
 0x13d   : > { %v935_v24 = vpop.permute.xlu2 %934  ;;  %870 = vst [vmem:[#allocation3 + $0x60] sm:$0xff] %v859_v7 }
 0x13e   : > { %1316 = vrot.lane.b32.xlu0 %v3763_v14, %s3591_s26  ;;  %v940_v55 = vrot.slane %v935_v24, 4 }
 0x140   : > { %v849_v9 = vpop.permute.xlu0 %848 }
 0x141   : > { %v855_v10 = vrot.slane %v849_v9, 4  ;;  %1566 = vrot.lane.b32.xlu1 %v3761_v13, %s3604_s30 }
 0x143   : > { %1778 = vrot.lane.b32.xlu2 %v3763_v14, %s4840_s27  ;;  %v862_v11 = vsel %vm730_vm13, %v854_v61, %v855_v10  ;;  %v864_v16 = vsel %vm730_vm13, %v855_v10, %v856_v8  ;;  %v889_v18 = vpop.permute.xlu1 %888  ;;  %s3606_s27 = smov 38  }
 0x144   : > { %v863_v21 = vsel %vm858_vm1, %v3868_v17, %v862_v11  ;;  %v865_v23 = vsel %vm858_vm1, %v849_v9, %v864_v16  ;;  %v896_v26 = vrot.slane %v889_v18, 4  ;;  %vm4849_vm1 = vcmask 7168  }
 0x145   : > { %v3938_v25 = vpop.permute.xlu2 %972  ;;  %872 = vst [vmem:[#allocation3 + $0x70] sm:$0xff] %v863_v21 }
 0x146   : > { %873 = vst [vmem:[#allocation3 + $0x78] sm:$0xff] %v865_v23  ;;  %1564 = vrot.lane.b32.xlu0 %v3759_v12, %s3604_s30  ;;  %v904_v28 = vsel %vm730_vm13, %v896_v26, %v897_v19  ;;  %v980_v20 = vrot.slane %v3938_v25, 4 }
 0x147   : > { %v905_v29 = vsel %vm900_vm10, %v889_v18, %v904_v28 }
 0x148   : > { %914 = vst [vmem:[#allocation3 + $0x90] sm:$0xff] %v905_v29  ;;  %v887_v30 = vpop.permute.xlu0 %886 }
 0x149   : > { %v895_v40 = vrot.slane %v887_v30, 4  ;;  %1438 = vrot.lane.b32.xlu1 %v3759_v12, %s4842_s22 }
 0x14b   : > { %1440 = vrot.lane.b32.xlu2 %v3761_v13, %s4842_s22  ;;  %v899_v17 = vsel %vm730_vm13, %v894_v37, %v895_v40  ;;  %v902_v41 = vsel %vm730_vm13, %v895_v40, %v896_v26  ;;  %v927_v43 = vpop.permute.xlu1 %926  ;;  %s4844_s22 = smov 118  }
 0x14c   : > { %v901_v45 = vsel %vm900_vm10, %v3885_v42, %v899_v17  ;;  %v903_v46 = vsel %vm900_vm10, %v887_v30, %v902_v41  ;;  %v936_v48 = vrot.slane %v927_v43, 4 }
 0x14d   : > { %v3955_v47 = vpop.permute.xlu2 %1312  ;;  %912 = vst [vmem:[#allocation3 + $0x80] sm:$0xff] %v901_v45 }
 0x14e   : > { %913 = vst [vmem:[#allocation3 + $0x88] sm:$0xff] %v903_v46  ;;  %1224 = vrot.lane.b32.xlu0 %v3774_v22, %s3593_s28  ;;  %v941_v49 = vsel %vm730_vm13, %v936_v48, %v937_v44  ;;  %v1322_v41 = vrot.slane %v3955_v47, 4 }
 0x14f   : > { %v943_v50 = vsel %vm942_vm11, %v927_v43, %v941_v49 }
 0x150   : > { %954 = vst [vmem:[#allocation3 + $0xa0] sm:$0xff] %v943_v50  ;;  %v893_v51 = vpop.permute.xlu0 %892 }
 0x151   : > { %v898_v52 = vrot.slane %v893_v51, 4  ;;  %1482 = vrot.lane.b32.xlu1 %v3761_v13, %s3606_s27 }
 0x153   : > { %1140 = vrot.lane.b32.xlu2 %v3774_v22, %s4847_s29  ;;  %v906_v42 = vsel %vm730_vm13, %v897_v19, %v898_v52  ;;  %v933_v53 = vpop.permute.xlu1 %932 }
 0x154   : > { %v907_v56 = vsel %vm900_vm10, %v3898_v1, %v906_v42  ;;  %v939_v54 = vrot.slane %v933_v53, 4  ;;  %vm4848_vm10 = vcmask 72704  }
 0x155   : > { %v3968_v58 = vpop.permute.xlu2 %1776  ;;  %915 = vst [vmem:[#allocation3 + $0x98] sm:$0xff] %v907_v56 }
 0x156   : > { %1480 = vrot.lane.b32.xlu0 %v3759_v12, %s3606_s27  ;;  %v948_v59 = vsel %vm730_vm13, %v939_v54, %v940_v55  ;;  %v1785_v23 = vrot.slane %v3968_v58, 4 }
 0x157   : > { %v949_v60 = vsel %vm942_vm11, %v933_v53, %v948_v59 }
 0x158   : > { %957 = vst [vmem:[#allocation3 + $0xb8] sm:$0xff] %v949_v60  ;;  %v931_v61 = vpop.permute.xlu0 %930 }
 0x159   : > { %v938_v62 = vrot.slane %v931_v61, 4  ;;  %1354 = vrot.lane.b32.xlu1 %v3759_v12, %s4844_s22 }
 0x15b   : > { %1356 = vrot.lane.b32.xlu2 %v3761_v13, %s4844_s22  ;;  %v944_v1 = vsel %vm730_vm13, %v937_v44, %v938_v62  ;;  %v946_v63 = vsel %vm730_vm13, %v938_v62, %v939_v54  ;;  %v971_v2 = vpop.permute.xlu1 %970  ;;  %s4854_s22 = smov 117  }
 0x15c   : > { %v945_v3 = vsel %vm942_vm11, %v3914_v0, %v944_v1  ;;  %v947_v4 = vsel %vm942_vm11, %v931_v61, %v946_v63  ;;  %v979_v57 = vrot.slane %v971_v2, 4  ;;  %vm1152_vm11 = vcmask 80896  }
 0x15d   : > { %v3984_v5 = vpop.permute.xlu2 %1136  ;;  %955 = vst [vmem:[#allocation3 + $0xa8] sm:$0xff] %v945_v3 }
 0x15e   : > { %956 = vst [vmem:[#allocation3 + $0xb0] sm:$0xff] %v947_v4  ;;  %1182 = vrot.lane.b32.xlu0 %v3774_v22, %s4850_s12  ;;  %v986_v6 = vsel %vm730_vm13, %v979_v57, %v980_v20 }
 0x15f   : > { %v987_v7 = vsel %vm4846_vm12, %v971_v2, %v986_v6  ;;  %v1146_v6 = vrot.slane %v3984_v5, 4 }
 0x160   : > { %997 = vst [vmem:[#allocation3 + $0xc8] sm:$0xff] %v987_v7  ;;  %v969_v24 = vpop.permute.xlu0 %968 }
 0x161   : > { %v978_v8 = vrot.slane %v969_v24, 4  ;;  %1398 = vrot.lane.b32.xlu1 %v3761_v13, %s4854_s22 }
 0x163   : > { %1694 = vrot.lane.b32.xlu2 %v3763_v14, %s3596_s13  ;;  %v983_v0 = vsel %vm730_vm13, %v978_v8, %v979_v57  ;;  %v3997_v9 = vpop.permute.xlu1 %1272  ;;  %v3482_v8 = vld [vmem:[#allocation3 + $0x19c] sm:$0xf0] }
 0x164   : > { %v985_v10 = vsel %vm4846_vm12, %v969_v24, %v983_v0  ;;  %v1281_v16 = vrot.slane %v3997_v9, 4  ;;  %vm4861_vm12 = vcmask 154624  }
 0x165   : > { %v4000_v11 = vpop.permute.xlu2 %1180  ;;  %996 = vst [vmem:[#allocation3 + $0xc0] sm:$0xff] %v985_v10 }
 0x166   : > { %1396 = vrot.lane.b32.xlu0 %v3759_v12, %s4854_s22  ;;  %v1189_v59 = vrot.slane %v4000_v11, 4 }
 0x168   : > { %v1271_v18 = vpop.permute.xlu0 %1270 }
 0x169   : > { %v1280_v13 = vrot.slane %v1271_v18, 4  ;;  %1056 = vrot.lane.b32.xlu1 %v3774_v22, %s3598_s15 }
 0x16b   : > { %1098 = vrot.lane.b32.xlu2 %v3774_v22, %s4852_s23  ;;  %v1285_v19 = vsel %vm730_vm13, %v1280_v13, %v1281_v16  ;;  %v1775_v21 = vpop.permute.xlu1 %1774 }
 0x16c   : > { %v1287_v12 = vsel %vm4851_vm14, %v1271_v18, %v1285_v19  ;;  %v1784_v28 = vrot.slane %v1775_v21, 4  ;;  %v3170_v19 = vld [vmem:[#allocation3 + $0x1a0] sm:$0xf0] }
 0x16d   : > { %v4014_v26 = vpop.permute.xlu2 %1732  ;;  %1298 = vst [vmem:[#allocation3 + $0x1c0] sm:$0xff] %v1287_v12 }
 0x16e   : > { %1736 = vrot.lane.b32.xlu0 %v3763_v14, %s3597_s14  ;;  %v1789_v29 = vsel %vm730_vm13, %v1784_v28, %v1785_v23 }
 0x16f   : > { %v1791_v30 = vsel %vm4857_vm15, %v1775_v21, %v1789_v29 }
 0x170   : > { %v4022_v37 = vpop.permute.xlu0 %1314  ;;  %v2242_v40 = vunpack.c.l.b16 %v1791_v30  ;;  %v2243_v17 = vunpack.c.h.b16 %v1791_v30 }
 0x171   : > { %v1323_v43 = vrot.slane %v4022_v37, 4  ;;  %1318 = vrot.lane.b32.xlu1 %v3765_v15, %s3591_s26 }
 0x172   : > { %v2354_v44 = vpack.c.b16 %v2242_v40, %v2242_v40  ;;  %v2355_v45 = vpack.c.b16 %v2243_v17, %v2243_v17 }
 0x173   : > { %1610 = vrot.lane.b32.xlu2 %v3763_v14, %s3600_s16  ;;  %v1327_v46 = vsel %vm730_vm13, %v1322_v41, %v1323_v43  ;;  %v4033_v48 = vpop.permute.xlu1 %1222 }
 0x174   : > { %v1329_v49 = vsel %vm1328_vm0, %v3955_v47, %v1327_v46  ;;  %v2471_v51 = vsel %vm730_vm13, %v2354_v44, 0  ;;  %v2474_v52 = vsel %vm730_vm13, %v2355_v45, 0  ;;  %v1231_v42 = vrot.slane %v4033_v48, 4  ;;  %v3200_v56 = vld [vmem:[#allocation3 + $0x1c0] sm:$0xf] }
 0x175   : > { %v4037_v50 = vpop.permute.xlu2 %1054  ;;  %1340 = vst [vmem:[#allocation3 + $0x1e0] sm:$0xff] %v1329_v49  ;;  %2509 = vmatpush.bf16.msra.mxu1 %v2471_v51  ;;  %2535 = vmatpush.bf16.msra.mxu3 %v2474_v52  ;;  %v3486_v54 = vld [vmem:[#allocation3 + $0x1c4] sm:$0xf] }
 0x176   : > { %1276 = vrot.lane.b32.xlu0 %v3765_v15, %s3590_s25  ;;  %v1063_v45 = vrot.slane %v4037_v50, 4 }
 0x178   : > { %v1221_v53 = vpop.permute.xlu0 %1220 }
 0x179   : > { %v1230_v55 = vrot.slane %v1221_v53, 4  ;;  %1014 = vrot.lane.b32.xlu1 %v3774_v22, %s3602_s20 }
 0x17b   : > { %1226 = vrot.lane.b32.xlu2 %v3782_v27, %s3593_s28  ;;  %v1235_v47 = vsel %vm730_vm13, %v1230_v55, %v1231_v42  ;;  %v1179_v15 = vpop.permute.xlu1 %1178 }
 0x17c   : > { %v1237_v60 = vsel %vm4849_vm1, %v1221_v53, %v1235_v47  ;;  %v3490_v61 = vld [vmem:[#allocation3 + $0x1dc] sm:$0xf0]  ;;  %v3202_v62 = vld [vmem:[#allocation3 + $0x1e0] sm:$0xf0]  ;;  %v1188_v22 = vrot.slane %v1179_v15, 4  ;;  %vm4853_vm1 = vcmask 146432  }
 0x17d   : > { %v4053_v1 = vpop.permute.xlu2 %1606  ;;  %1248 = vst [vmem:[#allocation3 + $0x180] sm:$0xff] %v1237_v60  ;;  %v3201_v63 = vor.u32 %v3490_v61, %v3200_v56  ;;  %v3205_v2 = vor.u32 %v3486_v54, %v3202_v62  ;;  %v1742_v62 = vrot.slane %v4014_v26, 4 }
 0x17e   : > { %1652 = vrot.lane.b32.xlu0 %v3763_v14, %s3601_s19  ;;  %v1193_v3 = vsel %vm730_vm13, %v1188_v22, %v1189_v59 }
 0x17f   : > { %2494 = vmatpush.bf16.msra.mxu0 %v3201_v63  ;;  %2520 = vmatpush.bf16.msra.mxu2 %v3205_v2  ;;  %v1195_v4 = vsel %vm4848_vm10, %v1179_v15, %v1193_v3  ;;  %vm4856_vm10 = vcmask 728064   ;;  %v4123_v3 = vld [vmem:[#allocation2 + $0x1c] sm:$0xff] }
 0x180   : > { %1206 = vst [vmem:[#allocation3 + $0x160] sm:$0xff] %v1195_v4  ;;  %v4061_v57 = vpop.permute.xlu0 %1138 }
 0x181   : > { %v1147_v7 = vrot.slane %v4061_v57, 4  ;;  %1568 = vrot.lane.b32.xlu1 %v3763_v14, %s3604_s30 }
 0x183   : > { %1142 = vrot.lane.b32.xlu2 %v3782_v27, %s4847_s29  ;;  %v1151_v24 = vsel %vm730_vm13, %v1146_v6, %v1147_v7  ;;  %v4072_v0 = vpop.permute.xlu1 %1692  ;;  %s4892_s29 = smov 39  }
 0x184   : > { %v1153_v10 = vsel %vm1152_vm11, %v3984_v5, %v1151_v24  ;;  %v3168_v18 = vld [vmem:[#allocation3 + $0x180] sm:$0xf]  ;;  %v3478_v13 = vld [vmem:[#allocation3 + $0x184] sm:$0xf]  ;;  %v1701_v29 = vrot.slane %v4072_v0, 4  ;;  %v1388_v24 = vld [vmem:[#allocation2 + $0x14] sm:$0xff] }
 0x185   : > { %v4076_v21 = vpop.permute.xlu2 %1650  ;;  %1164 = vst [vmem:[#allocation3 + $0x140] sm:$0xff] %v1153_v10  ;;  %v3169_v12 = vor.u32 %v3482_v8, %v3168_v18  ;;  %v3173_v28 = vor.u32 %v3478_v13, %v3170_v19 }
 0x186   : > { %1526 = vrot.lane.b32.xlu0 %v3763_v14, %s3603_s21  ;;  %v1659_v19 = vrot.slane %v4076_v21, 4 }
 0x187   : > { %2495 = vmatpush.bf16.msra.mxu0 %v3169_v12  ;;  %2521 = vmatpush.bf16.msra.mxu2 %v3173_v28  ;;  %v3474_v5 = vld [vmem:[#allocation3 + $0x15c] sm:$0xf0]  ;;  %v3138_v17 = vld [vmem:[#allocation3 + $0x160] sm:$0xf0] }
 0x188   : > { %v1691_v30 = vpop.permute.xlu0 %1690 }
 0x189   : > { %v1700_v40 = vrot.slane %v1691_v30, 4  ;;  %1442 = vrot.lane.b32.xlu1 %v3763_v14, %s4892_s29 }
 0x18b   : > { %1484 = vrot.lane.b32.xlu2 %v3763_v14, %s3606_s27  ;;  %v1705_v41 = vsel %vm730_vm13, %v1700_v40, %v1701_v29  ;;  %v1053_v44 = vpop.permute.xlu1 %1052 }
 0x18c   : > { %v1707_v46 = vsel %vm4861_vm12, %v1691_v30, %v1705_v41  ;;  %v3136_v49 = vld [vmem:[#allocation3 + $0x140] sm:$0xf]  ;;  %v3470_v51 = vld [vmem:[#allocation3 + $0x144] sm:$0xf]  ;;  %v1062_v53 = vrot.slane %v1053_v44, 4 }
 0x18d   : > { %v4090_v52 = vpop.permute.xlu2 %1274  ;;  %1718 = vst [vmem:[#allocation3 + $0x300] sm:$0xff] %v1707_v46  ;;  %v3137_v55 = vor.u32 %v3474_v5, %v3136_v49  ;;  %v3141_v14 = vor.u32 %v3470_v51, %v3138_v17 }
 0x18e   : > { %v1282_v47 = vrot.slane %v4090_v52, 4  ;;  %1184 = vrot.lane.b32.xlu0 %v3782_v27, %s4850_s12  ;;  %v1067_v56 = vsel %vm730_vm13, %v1062_v53, %v1063_v45  ;;  %s4893_s12 = smov 17  }
 0x18f   : > { %2496 = vmatpush.bf16.msra.mxu0 %v3137_v55  ;;  %2522 = vmatpush.bf16.msra.mxu2 %v3141_v14  ;;  %v1069_v15 = vsel %vm4856_vm10, %v1053_v44, %v1067_v56  ;;  %v1616_v55 = vrot.slane %v4053_v1, 4  ;;  %vm4864_vm10 = vcmask 228352  }
 0x190   : > { %v1288_v54 = vsel %vm730_vm13, %v1281_v16, %v1282_v47  ;;  %1080 = vst [vmem:[#allocation3 + $0x100] sm:$0xff] %v1069_v15  ;;  %v4106_v61 = vpop.permute.xlu0 %1734 }
 0x191   : > { %v1289_v60 = vsel %vm4851_vm14, %v3997_v9, %v1288_v54  ;;  %v1743_v22 = vrot.slane %v4106_v61, 4  ;;  %1058 = vrot.lane.b32.xlu1 %v3782_v27, %s3598_s15  ;;  %vm4873_vm14 = vcmask 89088  }
 0x192   : > { %1299 = vst [vmem:[#allocation3 + $0x1c8] sm:$0xff] %v1289_v60 }
 0x193   : > { %1100 = vrot.lane.b32.xlu2 %v3782_v27, %s4852_s23  ;;  %v1747_v16 = vsel %vm730_vm13, %v1742_v62, %v1743_v22  ;;  %v4117_v9 = vpop.permute.xlu1 %1096  ;;  %s4894_s23 = smov 91  }
 0x194   : > { %v1749_v63 = vsel %vm4853_vm1, %v4014_v26, %v1747_v16  ;;  %v1105_v4 = vrot.slane %v4117_v9, 4  ;;  %v3360_v10 = vld [vmem:[#allocation3 + $0x300] sm:$0xf]  ;;  %v3526_v18 = vld [vmem:[#allocation3 + $0x304] sm:$0xf]  ;;  %vm4858_vm1 = vcmask 220160  }
 0x195   : > { %v4121_v2 = vpop.permute.xlu2 %1524  ;;  %1760 = vst [vmem:[#allocation3 + $0x320] sm:$0xff] %v1749_v63  ;;  %v1003_v63 = vld [vmem:[#allocation2 + $0x18] sm:$0xff] }
 0x196   : > { %1780 = vrot.lane.b32.xlu0 %v4123_v3, %s4893_s12 }
 0x197   : > { %v3462_v60 = vld [vmem:[#allocation3 + $0x104] sm:$0xf] }
 0x198   : > { %v1095_v6 = vpop.permute.xlu0 %1094 }
 0x199   : > { %v1104_v8 = vrot.slane %v1095_v6, 4  ;;  %1400 = vrot.lane.b32.xlu1 %v1388_v24, %s4854_s22  ;;  %s4895_s22 = smov 118  }
 0x19b   : > { %974 = vrot.lane.b32.xlu2 %v3782_v27, %s4894_s23  ;;  %v1109_v26 = vsel %vm730_vm13, %v1104_v8, %v1105_v4  ;;  %v1649_v13 = vpop.permute.xlu1 %1648 }
 0x19c   : > { %v1111_v12 = vsel %vm4873_vm14, %v1095_v6, %v1109_v26  ;;  %v3530_v28 = vld [vmem:[#allocation3 + $0x31c] sm:$0xf0]  ;;  %v3362_v30 = vld [vmem:[#allocation3 + $0x320] sm:$0xf0]  ;;  %v1658_v5 = vrot.slane %v1649_v13, 4 }
 0x19d   : > { %v4136_v40 = vpop.permute.xlu2 %1778  ;;  %1122 = vst [vmem:[#allocation3 + $0x120] sm:$0xff] %v1111_v12  ;;  %v3361_v17 = vor.u32 %v3530_v28, %v3360_v10  ;;  %v3365_v27 = vor.u32 %v3526_v18, %v3362_v30  ;;  %v1306_v10 = vld [vmem:[#allocation2 + $0x24] sm:$0xf]  ;;  %v1533_v30 = vrot.slane %v4121_v2, 4 }
 0x19e   : > { %v1786_v41 = vrot.slane %v4136_v40, 4  ;;  %1358 = vrot.lane.b32.xlu0 %v1388_v24, %s4895_s22  ;;  %v1663_v44 = vsel %vm730_vm13, %v1658_v5, %v1659_v19 }
 0x19f   : > { %2510 = vmatpush.bf16.msra.mxu1 %v3361_v17  ;;  %2536 = vmatpush.bf16.msra.mxu3 %v3365_v27  ;;  %v1665_v49 = vsel %vm4858_vm1, %v1649_v13, %v1663_v44  ;;  %vm4859_vm1 = vcmask 302080  }
 0x1a0   : > { %v1792_v46 = vsel %vm730_vm13, %v1785_v23, %v1786_v41  ;;  %1676 = vst [vmem:[#allocation3 + $0x2e0] sm:$0xff] %v1665_v49  ;;  %v4153_v53 = vpop.permute.xlu0 %1608  ;;  %v1264_v49 = vld [vmem:[#allocation2 + $0x24] sm:$0xf] }
 0x1a1   : > { %v4151_v51 = vsel %vm4857_vm15, %v3968_v58, %v1792_v46  ;;  %v1617_v14 = vrot.slane %v4153_v53, 4  ;;  %1696 = vrot.lane.b32.xlu1 %v4123_v3, %s3596_s13  ;;  %v3104_v58 = vld [vmem:[#allocation3 + $0x100] sm:$0xf]  ;;  %vm4860_vm15 = vcmask 736256  }
 0x1a3   : > { %1738 = vrot.lane.b32.xlu2 %v4123_v3, %s3597_s14  ;;  %v1621_v23 = vsel %vm730_vm13, %v1616_v55, %v1617_v14  ;;  %v4164_v56 = vpop.permute.xlu1 %1012 }
 0x1a4   : > { %v1623_v54 = vsel %vm4864_vm10, %v4053_v1, %v1621_v23  ;;  %v3466_v15 = vld [vmem:[#allocation3 + $0x11c] sm:$0xf0]  ;;  %v3106_v62 = vld [vmem:[#allocation3 + $0x120] sm:$0xf0]  ;;  %v1021_v8 = vrot.slane %v4164_v56, 4 }
 0x1a5   : > { %v4168_v16 = vpop.permute.xlu2 %1440  ;;  %1634 = vst [vmem:[#allocation3 + $0x2c0] sm:$0xff] %v1623_v54  ;;  %v3105_v6 = vor.u32 %v3466_v15, %v3104_v58  ;;  %v3109_v24 = vor.u32 %v3462_v60, %v3106_v62 }
 0x1a6   : > { %1016 = vrot.lane.b32.xlu0 %v1003_v63, %s3602_s20 }
 0x1a7   : > { %2497 = vmatpush.bf16.msra.mxu0 %v3105_v6  ;;  %2523 = vmatpush.bf16.msra.mxu2 %v3109_v24  ;;  %v3522_v1 = vld [vmem:[#allocation3 + $0x2dc] sm:$0xf0]  ;;  %v3330_v13 = vld [vmem:[#allocation3 + $0x2e0] sm:$0xf0]  ;;  %v1768_v6 = vld [vmem:[#allocation2 + $0x24] sm:$0xf] }
 0x1a8   : > { %v1011_v26 = vpop.permute.xlu0 %1010 }
 0x1a9   : > { %v1020_v18 = vrot.slane %v1011_v26, 4  ;;  %1320 = vrot.lane.b32.xlu1 %v1306_v10, %s3591_s26  ;;  %v3072_v10 = vld [vmem:[#allocation3 + $0xc0] sm:$0xf] }
 0x1ab   : > { %1612 = vrot.lane.b32.xlu2 %v4123_v3, %s3600_s16  ;;  %v1025_v12 = vsel %vm730_vm13, %v1020_v18, %v1021_v8  ;;  %v1523_v28 = vpop.permute.xlu1 %1522 }
 0x1ac   : > { %v1027_v5 = vsel %vm4860_vm15, %v1011_v26, %v1025_v12  ;;  %v3328_v17 = vld [vmem:[#allocation3 + $0x2c0] sm:$0xf]  ;;  %v3518_v27 = vld [vmem:[#allocation3 + $0x2c4] sm:$0xf]  ;;  %v1532_v46 = vrot.slane %v1523_v28, 4  ;;  %vm4862_vm15 = vcmask 318464  }
 0x1ad   : > { %v4180_v44 = vpop.permute.xlu2 %1140  ;;  %1038 = vst [vmem:[#allocation3 + $0xe0] sm:$0xff] %v1027_v5  ;;  %v3329_v55 = vor.u32 %v3522_v1, %v3328_v17  ;;  %v3333_v23 = vor.u32 %v3518_v27, %v3330_v13  ;;  %v1214_v26 = vld [vmem:[#allocation2 + $0x20] sm:$0xf]  ;;  %v3454_v13 = vld [vmem:[#allocation3 + $0xc4] sm:$0xf] }
 0x1ae   : > { %v1148_v58 = vrot.slane %v4180_v44, 4  ;;  %1278 = vrot.lane.b32.xlu0 %v1264_v49, %s3590_s25  ;;  %v1537_v54 = vsel %vm730_vm13, %v1532_v46, %v1533_v30  ;;  %v3450_v27 = vld [vmem:[#allocation3 + $0x9c] sm:$0xf0]  ;;  %v3042_v46 = vld [vmem:[#allocation3 + $0xa0] sm:$0xf0]  ;;  %s4896_s25 = smov 10  }
 0x1af   : > { %2511 = vmatpush.bf16.msra.mxu1 %v3329_v55  ;;  %2537 = vmatpush.bf16.msra.mxu3 %v3333_v23  ;;  %v1539_v60 = vsel %vm4859_vm1, %v1523_v28, %v1537_v54  ;;  %v3040_v55 = vld [vmem:[#allocation3 + $0x80] sm:$0xf]  ;;  %vm1580_vm1 = vcmask 236544  }
 0x1b0   : > { %v1154_v15 = vsel %vm730_vm13, %v1147_v7, %v1148_v58  ;;  %1550 = vst [vmem:[#allocation3 + $0x280] sm:$0xff] %v1539_v60  ;;  %v4195_v63 = vpop.permute.xlu0 %1316  ;;  %v3041_v54 = vor.u32 %v3450_v27, %v3040_v55  ;;  %v1130_v60 = vld [vmem:[#allocation2 + $0x20] sm:$0xf] }
 0x1b1   : > { %v1155_v62 = vsel %vm1152_vm11, %v4061_v57, %v1154_v15  ;;  %v1324_v24 = vrot.slane %v4195_v63, 4  ;;  %1782 = vrot.lane.b32.xlu1 %v1768_v6, %s4893_s12  ;;  %v3010_v6 = vld [vmem:[#allocation3 + $0x60] sm:$0xf0]  ;;  %s4898_s12 = smov 9  }
 0x1b2   : > { %1165 = vst [vmem:[#allocation3 + $0x148] sm:$0xff] %v1155_v62  ;;  %v3442_v62 = vld [vmem:[#allocation3 + $0x5c] sm:$0xf0] }
 0x1b3   : > { %1228 = vrot.lane.b32.xlu2 %v1214_v26, %s3593_s28  ;;  %v1330_v7 = vsel %vm730_vm13, %v1323_v43, %v1324_v24  ;;  %v4205_v57 = vpop.permute.xlu1 %1566 }
 0x1b4   : > { %v1331_v18 = vsel %vm1328_vm0, %v4022_v37, %v1330_v7  ;;  %v3458_v1 = vld [vmem:[#allocation3 + $0xdc] sm:$0xf0]  ;;  %v3074_v12 = vld [vmem:[#allocation3 + $0xe0] sm:$0xf0]  ;;  %v1575_v43 = vrot.slane %v4205_v57, 4 }
 0x1b5   : > { %v4209_v28 = vpop.permute.xlu2 %1356  ;;  %1341 = vst [vmem:[#allocation3 + $0x1e8] sm:$0xff] %v1331_v18  ;;  %v3073_v5 = vor.u32 %v3458_v1, %v3072_v10  ;;  %v3077_v17 = vor.u32 %v3454_v13, %v3074_v12  ;;  %v3446_v37 = vld [vmem:[#allocation3 + $0x84] sm:$0xf]  ;;  %v3008_v7 = vld [vmem:[#allocation3 + $0x40] sm:$0xf]  ;;  %v2245_v18 = vunpack.c.h.b16 %v4151_v51  ;;  %v1449_v1 = vrot.slane %v4168_v16, 4 }
 0x1b6   : > { %1654 = vrot.lane.b32.xlu0 %v4123_v3, %s3601_s19  ;;  %v3045_v15 = vor.u32 %v3446_v37, %v3042_v46  ;;  %v3438_v12 = vld [vmem:[#allocation3 + $0x44] sm:$0xf]  ;;  %v3009_v27 = vor.u32 %v3442_v62, %v3008_v7 }
 0x1b7   : > { %2498 = vmatpush.bf16.msra.mxu0 %v3073_v5  ;;  %2524 = vmatpush.bf16.msra.mxu2 %v3077_v17  ;;  %v3013_v46 = vor.u32 %v3438_v12, %v3010_v6  ;;  %v2357_v62 = vpack.c.b16 %v2245_v18, %v2245_v18  ;;  %v1806_v6 = vld [vmem:[%s4828_s3] sm:$0xf]  ;;  %v3430_v12 = vld [vmem:[#allocation3 + $0x4] sm:$0xf] }
 0x1b8   : > { %v1565_v49 = vpop.permute.xlu0 %1564  ;;  %1922 = vst [vmem:[#allocation1] ss:$4 sm:$0xff] %v1806_v6 }
 0x1b9   : > { %v1574_v23 = vrot.slane %v1565_v49, 4  ;;  %1570 = vrot.lane.b32.xlu1 %v4123_v3, %s3604_s30 }
 0x1bb   : > { %1144 = vrot.lane.b32.xlu2 %v1130_v60, %s4896_s25  ;;  %v1579_v26 = vsel %vm730_vm13, %v1574_v23, %v1575_v43  ;;  %2499 = vmatpush.bf16.msra.mxu0 %v3041_v54  ;;  %v1439_v10 = vpop.permute.xlu1 %1438  ;;  %v3434_v23 = vld [vmem:[#allocation3 + $0x1c] sm:$0xf0]  ;;  %v2978_v54 = vld [vmem:[#allocation3 + $0x20] sm:$0xf0] }
 0x1bc   : > { %2525 = vmatpush.bf16.msra.mxu2 %v3045_v15  ;;  %v1581_v13 = vsel %vm1580_vm1, %v1565_v49, %v1579_v26  ;;  %v1448_v17 = vrot.slane %v1439_v10, 4  ;;  %v3210_v60 = vld [vmem:[#allocation3 + $0x1e8] sm:$0xf0] }
 0x1bd   : > { %v4223_v5 = vpop.permute.xlu2 %1694  ;;  %1592 = vst [vmem:[#allocation3 + $0x2a0] sm:$0xff] %v1581_v13  ;;  %v2976_v13 = vld [vmem:[#allocation3] sm:$0xf] }
 0x1be   : > { %v4866_v55 = vrot.slane %v4223_v5, 4  ;;  %1528 = vrot.lane.b32.xlu0 %v4123_v3, %s3603_s21  ;;  %v1453_v37 = vsel %vm730_vm13, %v1448_v17, %v1449_v1 }
 0x1bf   : > { %2500 = vmatpush.bf16.msra.mxu0 %v3009_v27  ;;  %v1455_v15 = vsel %vm4862_vm15, %v1439_v10, %v1453_v37  ;;  %v2981_v27 = vor.u32 %v3430_v12, %v2978_v54  ;;  %v3487_v10 = vld [vmem:[#allocation3 + $0x1cc] sm:$0xf]  ;;  %v3296_v37 = vld [vmem:[#allocation3 + $0x280] sm:$0xf]  ;;  %vm4863_vm15 = vcmask 965632  }
 0x1c0   : > { %2526 = vmatpush.bf16.msra.mxu2 %v3013_v46  ;;  %v1708_v49 = vsel %vm730_vm13, %v1701_v29, %v4866_v55  ;;  %1466 = vst [vmem:[#allocation3 + $0x240] sm:$0xff] %v1455_v15  ;;  %v4242_v7 = vpop.permute.xlu0 %1224  ;;  %v2977_v29 = vor.u32 %v3434_v23, %v2976_v13  ;;  %v3213_v18 = vor.u32 %v3487_v10, %v3210_v60  ;;  %v2480_v46 = vsel %vm730_vm13, %v2357_v62, 0  ;;  %v3510_v15 = vld [vmem:[#allocation3 + $0x284] sm:$0xf]  ;;  %v1046_v10 = vld [vmem:[#allocation2 + $0x20] sm:$0xf] }
 0x1c1   : > { %v1709_v26 = vsel %vm4861_vm12, %v4072_v0, %v1708_v49  ;;  %v1232_v17 = vrot.slane %v4242_v7, 4  ;;  %1444 = vrot.lane.b32.xlu1 %v4123_v3, %s4892_s29  ;;  %vm4897_vm12 = vcmask 7168   ;;  %v3208_v55 = vld [vmem:[#allocation3 + $0x1c8] sm:$0xf] }
 0x1c2   : > { %1719 = vst [vmem:[#allocation3 + $0x308] sm:$0xff] %v1709_v26  ;;  %v1172_v26 = vld [vmem:[#allocation2 + $0x20] sm:$0xf] }
 0x1c3   : > { %1486 = vrot.lane.b32.xlu2 %v4123_v3, %s3606_s27  ;;  %v1238_v0 = vsel %vm730_vm13, %v1231_v42, %v1232_v17  ;;  %2501 = vmatpush.bf16.msra.mxu0 %v2977_v29  ;;  %v4255_v23 = vpop.permute.xlu1 %1482 }
 0x1c4   : > { %2527 = vmatpush.bf16.msra.mxu2 %v2981_v27  ;;  %v1239_v54 = vsel %vm4897_vm12, %v4033_v48, %v1238_v0  ;;  %v3514_v49 = vld [vmem:[#allocation3 + $0x29c] sm:$0xf0]  ;;  %v3298_v60 = vld [vmem:[#allocation3 + $0x2a0] sm:$0xf0]  ;;  %v1491_v62 = vrot.slane %v4255_v23, 4  ;;  %vm4869_vm12 = vcmask 310272  }
 0x1c5   : > { %v4259_v6 = vpop.permute.xlu2 %1098  ;;  %1249 = vst [vmem:[#allocation3 + $0x188] sm:$0xff] %v1239_v54  ;;  %v3297_v42 = vor.u32 %v3514_v49, %v3296_v37  ;;  %v3301_v13 = vor.u32 %v3510_v15, %v3298_v60  ;;  %v3178_v37 = vld [vmem:[#allocation3 + $0x1a8] sm:$0xf0]  ;;  %v4867_v54 = vrot.slane %v4209_v28, 4 }
 0x1c6   : > { %v1106_v12 = vrot.slane %v4259_v6, 4  ;;  %1186 = vrot.lane.b32.xlu0 %v1172_v26, %s4898_s12 }
 0x1c7   : > { %2572 = vmatpush.bf16.msrb.mxu0 %v3213_v18  ;;  %2512 = vmatpush.bf16.msra.mxu1 %v3297_v42  ;;  %v1726_v18 = vld [vmem:[#allocation2 + $0x24] sm:$0xf] }
 0x1c8   : > { %2587 = vmatpush.bf16.msrb.mxu2 %v2480_v46  ;;  %2538 = vmatpush.bf16.msra.mxu3 %v3301_v13  ;;  %v1112_v48 = vsel %vm730_vm13, %v1105_v4, %v1106_v12  ;;  %v1481_v27 = vpop.permute.xlu0 %1480  ;;  %v4272_v46 = vld.sshfl [vmem:[#allocation1] sm:$0xff pattern:$0x73625140]  ;;  %v1684_v42 = vld [vmem:[#allocation2 + $0x24] sm:$0xf] }
 0x1c9   : > { %v1113_v29 = vsel %vm4873_vm14, %v4117_v9, %v1112_v48  ;;  %v1490_v0 = vrot.slane %v1481_v27, 4  ;;  %1740 = vrot.lane.b32.xlu1 %v1726_v18, %s3597_s14  ;;  %2528 = vmatmul.bf16.vlgmr.msra.gmra.mxu2 %v4272_v46  ;;  %s4901_s14 = smov 11  }
 0x1ca   : > { %1123 = vst [vmem:[#allocation3 + $0x128] sm:$0xff] %v1113_v29  ;;  %2502 = vmatmul.bf16.vlgmr.msra.gmra.mxu0 %v4272_v46 }
 0x1cb   : > { %1060 = vrot.lane.b32.xlu2 %v1046_v10, %s3598_s15  ;;  %v1495_v4 = vsel %vm730_vm13, %v1490_v0, %v1491_v62  ;;  %v1355_v9 = vpop.permute.xlu1 %1354 }
 0x1cc   : > { %v1497_v49 = vsel %vm4869_vm12, %v1481_v27, %v1495_v4  ;;  %v3479_v15 = vld [vmem:[#allocation3 + $0x18c] sm:$0xf]  ;;  %v1364_v26 = vrot.slane %v1355_v9, 4 }
 0x1cd   : > { %v4282_v60 = vpop.permute.xlu2 %1610  ;;  %1508 = vst [vmem:[#allocation3 + $0x260] sm:$0xff] %v1497_v49  ;;  %v3181_v13 = vor.u32 %v3479_v15, %v3178_v37  ;;  %v3264_v37 = vld [vmem:[#allocation3 + $0x240] sm:$0xf]  ;;  %v3502_v15 = vld [vmem:[#allocation3 + $0x244] sm:$0xf] }
 0x1ce   : > { %v1618_v48 = vrot.slane %v4282_v60, 4  ;;  %1698 = vrot.lane.b32.xlu0 %v1684_v42, %s3596_s13  ;;  %v1369_v29 = vsel %vm730_vm13, %v1364_v26, %v4867_v54  ;;  %s4899_s13 = smov 117  }
 0x1cf   : > { %2573 = vmatpush.bf16.msrb.mxu0 %v3181_v13  ;;  %v1371_v10 = vsel %vm4863_vm15, %v1355_v9, %v1369_v29  ;;  %vm4900_vm15 = vcmask 72704   ;;  %v1088_v13 = vld [vmem:[#allocation2 + $0x20] sm:$0xf] }
 0x1d0   : > { %v1624_v27 = vsel %vm730_vm13, %v1617_v14, %v1618_v48  ;;  %1382 = vst [vmem:[#allocation3 + $0x200] sm:$0xff] %v1371_v10  ;;  %v4297_v0 = vpop.permute.xlu0 %1182 }
 0x1d1   : > { %v1625_v18 = vsel %vm4864_vm10, %v4153_v53, %v1624_v27  ;;  %v1190_v4 = vrot.slane %v4297_v0, 4  ;;  %1360 = vrot.lane.b32.xlu1 %v4123_v3, %s4895_s22  ;;  %vm1412_vm10 = vcmask 957440  }
 0x1d2   : > { %1635 = vst [vmem:[#allocation3 + $0x2c8] sm:$0xff] %v1625_v18 }
 0x1d3   : > { %1402 = vrot.lane.b32.xlu2 %v4123_v3, %s4899_s13  ;;  %v1196_v14 = vsel %vm730_vm13, %v1189_v59, %v1190_v4  ;;  %v4309_v53 = vpop.permute.xlu1 %1398 }
 0x1d4   : > { %v1197_v9 = vsel %vm4900_vm15, %v4000_v11, %v1196_v14  ;;  %v3506_v49 = vld [vmem:[#allocation3 + $0x25c] sm:$0xf0]  ;;  %v3266_v26 = vld [vmem:[#allocation3 + $0x260] sm:$0xf0]  ;;  %v1407_v59 = vrot.slane %v4309_v53, 4  ;;  %vm4902_vm15 = vcmask 7168  }
 0x1d5   : > { %v4313_v42 = vpop.permute.xlu2 %1226  ;;  %1207 = vst [vmem:[#allocation3 + $0x168] sm:$0xff] %v1197_v9  ;;  %v3265_v3 = vor.u32 %v3506_v49, %v3264_v37  ;;  %v3269_v29 = vor.u32 %v3502_v15, %v3266_v26  ;;  %v1642_v14 = vld [vmem:[#allocation2 + $0x24] sm:$0xf]  ;;  %v962_v9 = vld [vmem:[#allocation2 + $0x20] sm:$0xf] }
 0x1d6   : > { %v4868_v27 = vrot.slane %v4313_v42, 4  ;;  %1102 = vrot.lane.b32.xlu0 %v1088_v13, %s4901_s14  ;;  %v3471_v26 = vld [vmem:[#allocation3 + $0x14c] sm:$0xf] }
 0x1d7   : > { %2513 = vmatpush.bf16.msra.mxu1 %v3265_v3  ;;  %2539 = vmatpush.bf16.msra.mxu3 %v3269_v29  ;;  %v1600_v29 = vld [vmem:[#allocation2 + $0x24] sm:$0xf] }
 0x1d8   : > { %v1240_v11 = vsel %vm730_vm13, %v1232_v17, %v4868_v27  ;;  %v1397_v18 = vpop.permute.xlu0 %1396  ;;  %v4378_v27 = vld.sshfl [vmem:[#allocation1 + $0x8] sm:$0xff pattern:$0x73625140] }
 0x1d9   : > { %v1241_v10 = vsel %vm4902_vm15, %v4242_v7, %v1240_v11  ;;  %v1406_v37 = vrot.slane %v1397_v18, 4  ;;  %1656 = vrot.lane.b32.xlu1 %v1642_v14, %s3601_s19  ;;  %vm4903_vm15 = vcmask 728064  }
 0x1da   : > { %1250 = vst [vmem:[#allocation3 + $0x190] sm:$0xff] %v1241_v10 }
 0x1db   : > { %976 = vrot.lane.b32.xlu2 %v962_v9, %s4894_s23  ;;  %v1411_v49 = vsel %vm730_vm13, %v1406_v37, %v1407_v59  ;;  %v4330_v17 = vpop.permute.xlu1 %1056 }
 0x1dc   : > { %v1413_v15 = vsel %vm1412_vm10, %v1397_v18, %v1411_v49  ;;  %v3146_v7 = vld [vmem:[#allocation3 + $0x168] sm:$0xf0]  ;;  %v1064_v3 = vrot.slane %v4330_v17, 4  ;;  %v2244_v18 = vunpack.c.l.b16 %v4151_v51  ;;  %v1558_v51 = vld [vmem:[#allocation2 + $0x24] sm:$0xf] }
 0x1dd   : > { %v4333_v13 = vpop.permute.xlu2 %1142  ;;  %1424 = vst [vmem:[#allocation3 + $0x220] sm:$0xff] %v1413_v15  ;;  %v3149_v11 = vor.u32 %v3471_v26, %v3146_v7  ;;  %v1516_v26 = vld [vmem:[#allocation2 + $0x24] sm:$0xf] }
 0x1de   : > { %v4865_v10 = vrot.slane %v4333_v13, 4  ;;  %1614 = vrot.lane.b32.xlu0 %v1600_v29, %s3600_s16  ;;  %v1070_v14 = vsel %vm730_vm13, %v1063_v45, %v1064_v3  ;;  %v2356_v7 = vpack.c.b16 %v2244_v18, %v2244_v18 }
 0x1df   : > { %2574 = vmatpush.bf16.msrb.mxu0 %v3149_v11  ;;  %v1071_v9 = vsel %vm4903_vm15, %v4037_v50, %v1070_v14  ;;  %v3491_v11 = vld [vmem:[#allocation3 + $0x1e4] sm:$0xf0]  ;;  %vm4904_vm15 = vcmask 146432  }
 0x1e0   : > { %v1156_v37 = vsel %vm730_vm13, %v1148_v58, %v4865_v10  ;;  %1081 = vst [vmem:[#allocation3 + $0x108] sm:$0xff] %v1071_v9  ;;  %v4353_v15 = vpop.permute.xlu0 %1736  ;;  %v3494_v58 = vld [vmem:[#allocation3 + $0x204] sm:$0xf]  ;;  %v2477_v54 = vsel %vm730_vm13, %v2356_v7, 0 }
 0x1e1   : > { %v1157_v49 = vsel %vm1152_vm11, %v4180_v44, %v1156_v37  ;;  %v1744_v45 = vrot.slane %v4353_v15, 4  ;;  %1530 = vrot.lane.b32.xlu1 %v1516_v26, %s3603_s21  ;;  %v3232_v44 = vld [vmem:[#allocation3 + $0x200] sm:$0xf]  ;;  %v1004_v26 = vld [vmem:[#allocation2 + $0x20] sm:$0xf] }
 0x1e2   : > { %1166 = vst [vmem:[#allocation3 + $0x150] sm:$0xff] %v1157_v49 }
 0x1e3   : > { %1572 = vrot.lane.b32.xlu2 %v1558_v51, %s3604_s30  ;;  %v1750_v50 = vsel %vm730_vm13, %v1743_v22, %v1744_v45  ;;  %v4363_v29 = vpop.permute.xlu1 %1318 }
 0x1e4   : > { %v1751_v14 = vsel %vm4904_vm15, %v4106_v61, %v1750_v50  ;;  %v3498_v37 = vld [vmem:[#allocation3 + $0x21c] sm:$0xf0]  ;;  %v3234_v9 = vld [vmem:[#allocation3 + $0x220] sm:$0xf0]  ;;  %v1325_v18 = vrot.slane %v4363_v29, 4  ;;  %v3209_v50 = vor.u32 %v3491_v11, %v3208_v55  ;;  %vm2466_vm15 = vcmask 719872  }
 0x1e5   : > { %v4367_v49 = vpop.permute.xlu2 %1484  ;;  %1761 = vst [vmem:[#allocation3 + $0x328] sm:$0xff] %v1751_v14  ;;  %v3233_v51 = vor.u32 %v3498_v37, %v3232_v44  ;;  %v3237_v10 = vor.u32 %v3494_v58, %v3234_v9  ;;  %v3176_v14 = vld [vmem:[#allocation3 + $0x188] sm:$0xf] }
 0x1e6   : > { %v1492_v22 = vrot.slane %v4367_v49, 4  ;;  %1018 = vrot.lane.b32.xlu0 %v1004_v26, %s3602_s20  ;;  %v1332_v61 = vsel %vm730_vm13, %v1324_v24, %v1325_v18  ;;  %v3114_v24 = vld [vmem:[#allocation3 + $0x128] sm:$0xf0]  ;;  %v3368_v26 = vld [vmem:[#allocation3 + $0x308] sm:$0xf] }
 0x1e7   : > { %2514 = vmatpush.bf16.msra.mxu1 %v3233_v51  ;;  %2540 = vmatpush.bf16.msra.mxu3 %v3237_v10  ;;  %v1333_v58 = vsel %vm1328_vm0, %v4195_v63, %v1332_v61  ;;  %v3463_v37 = vld [vmem:[#allocation3 + $0x10c] sm:$0xf]  ;;  %v1474_v10 = vld [vmem:[#allocation2 + $0x24] sm:$0xf] }
 0x1e8   : > { %v1498_v44 = vsel %vm730_vm13, %v1491_v62, %v1492_v22  ;;  %1342 = vst [vmem:[#allocation3 + $0x1f0] sm:$0xff] %v1333_v58  ;;  %v4389_v7 = vpop.permute.xlu0 %1276  ;;  %v3117_v11 = vor.u32 %v3463_v37, %v3114_v24  ;;  %v3483_v62 = vld [vmem:[#allocation3 + $0x1a4] sm:$0xf0]  ;;  %v3527_v51 = vld [vmem:[#allocation3 + $0x30c] sm:$0xf] }
 0x1e9   : > { %v1499_v55 = vsel %vm4869_vm12, %v4255_v23, %v1498_v44  ;;  %v1283_v9 = vrot.slane %v4389_v7, 4  ;;  %1488 = vrot.lane.b32.xlu1 %v1474_v10, %s3606_s27  ;;  %v3177_v63 = vor.u32 %v3483_v62, %v3176_v14  ;;  %v1348_v23 = vld [vmem:[#allocation2 + $0x24] sm:$0xf]  ;;  %vm4905_vm12 = vcmask 1039360   ;;  %v3144_v62 = vld [vmem:[#allocation3 + $0x148] sm:$0xf] }
 0x1ea   : > { %1509 = vst [vmem:[#allocation3 + $0x268] sm:$0xff] %v1499_v55  ;;  %3391 = vmatmul.msk.bf16.vlgmr.msra.gmra.mxu3 %vm2466_vm15, %v4378_v27  ;;  %3390 = vmatmul.msk.bf16.vlgmr.msra.gmra.mxu1 %vm2466_vm15, %v4378_v27  ;;  %s4949_s27 = sshll.u32 %s4951_s24, 2  ;;  %s2973_s24 = sshll.u32 %s4957_s18, 2 }
 0x1eb   : > { %2546 = vmatpush.bf16.msrb.mxu1 %v3209_v50  ;;  %2561 = vmatpush.bf16.msrb.mxu3 %v2477_v54  ;;  %v1290_v54 = vsel %vm730_vm13, %v1282_v47, %v1283_v9  ;;  %v4403_v61 = vpop.permute.xlu1 %1014  ;;  %v3475_v50 = vld [vmem:[#allocation3 + $0x164] sm:$0xf0]  ;;  %v1432_v47 = vld [vmem:[#allocation2 + $0x24] sm:$0xf]  ;;  %s4769_s23 = scalar_lea.vmem %s4835_s10, %s4949_s27  ;;  %s570_s20 = scalar_lea.vmem %s4836_s11, %s2973_s24 }
 0x1ec   : > { %1362 = vrot.lane.b32.xlu2 %v1348_v23, %s4895_s22  ;;  %2575 = vmatpush.bf16.msrb.mxu0 %v3117_v11  ;;  %v1291_v44 = vsel %vm4905_vm12, %v4090_v52, %v1290_v54  ;;  %v3531_v58 = vld [vmem:[#allocation3 + $0x324] sm:$0xf0]  ;;  %v3370_v14 = vld [vmem:[#allocation3 + $0x328] sm:$0xf0]  ;;  %v1022_v24 = vrot.slane %v4403_v61, 4  ;;  %vm4906_vm12 = vcmask 736256  }
 0x1ed   : > { %v4407_v37 = vpop.permute.xlu2 %1100  ;;  %1300 = vst [vmem:[#allocation3 + $0x1d0] sm:$0xff] %v1291_v44  ;;  %v3369_v55 = vor.u32 %v3531_v58, %v3368_v26  ;;  %v3373_v10 = vor.u32 %v3527_v51, %v3370_v14  ;;  %v1915_v23 = vld [vmem:[%s4829_s4] sm:$0xf]  ;;  %v3112_v51 = vld [vmem:[#allocation3 + $0x108] sm:$0xf] }
 0x1ee   : > { %v4870_v11 = vrot.slane %v4407_v37, 4  ;;  %1446 = vrot.lane.b32.xlu0 %v1432_v47, %s4892_s29  ;;  %v1028_v52 = vsel %vm730_vm13, %v1021_v8, %v1022_v24  ;;  %v3467_v58 = vld [vmem:[#allocation3 + $0x124] sm:$0xf0] }
 0x1ef   : > { %2547 = vmatpush.bf16.msrb.mxu1 %v3177_v63  ;;  %v3145_v63 = vor.u32 %v3475_v50, %v3144_v62  ;;  %2562 = vmatpush.bf16.msrb.mxu3 %v3369_v55  ;;  %v1029_v26 = vsel %vm4906_vm12, %v4164_v56, %v1028_v52  ;;  %v3113_v14 = vor.u32 %v3467_v58, %v3112_v51  ;;  %vm4907_vm12 = vcmask 220160   ;;  %v3080_v52 = vld [vmem:[#allocation3 + $0xc8] sm:$0xf] }
 0x1f0   : > { %2588 = vmatpush.bf16.msrb.mxu2 %v3373_v10  ;;  %v1114_v54 = vsel %vm730_vm13, %v1106_v12, %v4870_v11  ;;  %1039 = vst [vmem:[#allocation3 + $0xe8] sm:$0xff] %v1029_v26  ;;  %v4429_v50 = vpop.permute.xlu0 %1652  ;;  %v1390_v10 = vld [vmem:[#allocation2 + $0x24] sm:$0xf] }
 0x1f1   : > { %v1115_v8 = vsel %vm4873_vm14, %v4259_v6, %v1114_v54  ;;  %v1660_v44 = vrot.slane %v4429_v50, 4  ;;  %1918 = vperm.xlu1 %3570, %v1915_v23   ;;  %v3455_v54 = vld [vmem:[#allocation3 + $0xcc] sm:$0xf]  ;;  %vm4911_vm14 = vcmask 146432  }
 0x1f2   : > { %1124 = vst [vmem:[#allocation3 + $0x130] sm:$0xff] %v1115_v8 }
 0x1f3   : > { %2548 = vmatpush.bf16.msrb.mxu1 %v3145_v63  ;;  %v1666_v56 = vsel %vm730_vm13, %v1659_v19, %v1660_v44  ;;  %v4437_v12 = vpop.permute.xlu1 %1568 }
 0x1f4   : > { %v1667_v6 = vsel %vm4907_vm12, %v4076_v21, %v1666_v56  ;;  %v1576_v55 = vrot.slane %v4437_v12, 4  ;;  %vm4908_vm12 = vcmask 744448   ;;  %v3451_v56 = vld [vmem:[#allocation3 + $0xa4] sm:$0xf0] }
 0x1f5   : > { %v4441_v47 = vpop.permute.xlu2 %974  ;;  %1677 = vst [vmem:[#allocation3 + $0x2e8] sm:$0xff] %v1667_v6  ;;  %v3050_v6 = vld [vmem:[#allocation3 + $0xa8] sm:$0xf0] }
 0x1f6   : > { %v4871_v62 = vrot.slane %v4441_v47, 4  ;;  %1404 = vrot.lane.b32.xlu0 %v1390_v10, %s4899_s13  ;;  %v1582_v19 = vsel %vm730_vm13, %v1575_v43, %v1576_v55  ;;  %v3519_v10 = vld [vmem:[#allocation3 + $0x2cc] sm:$0xf] }
 0x1f7   : > { %2549 = vmatpush.bf16.msrb.mxu1 %v3113_v14  ;;  %v1583_v63 = vsel %vm1580_vm1, %v4205_v57, %v1582_v19  ;;  %v3459_v23 = vld [vmem:[#allocation3 + $0xe4] sm:$0xf0]  ;;  %v3082_v26 = vld [vmem:[#allocation3 + $0xe8] sm:$0xf0] }
 0x1f8   : > { %v988_v21 = vsel %vm730_vm13, %v980_v20, %v4871_v62  ;;  %1593 = vst [vmem:[#allocation3 + $0x2a8] sm:$0xff] %v1583_v63  ;;  %v4460_v8 = vpop.permute.xlu0 %1526  ;;  %v3081_v43 = vor.u32 %v3459_v23, %v3080_v52  ;;  %v3085_v58 = vor.u32 %v3455_v54, %v3082_v26  ;;  %v3048_v20 = vld [vmem:[#allocation3 + $0x88] sm:$0xf]  ;;  %v3447_v52 = vld [vmem:[#allocation3 + $0x8c] sm:$0xf] }
 0x1f9   : > { %v989_v51 = vsel %vm4908_vm12, %v3938_v25, %v988_v21  ;;  %v4872_v14 = vrot.slane %v4460_v8, 4  ;;  %v3336_v25 = vld [vmem:[#allocation3 + $0x2c8] sm:$0xf]  ;;  %vm4909_vm12 = vcmask 302080  }
 0x1fa   : > { %998 = vst [vmem:[#allocation3 + $0xd0] sm:$0xff] %v989_v51  ;;  %2576 = vmatpush.bf16.msrb.mxu0 %v3085_v58  ;;  %v3049_v51 = vor.u32 %v3451_v56, %v3048_v20  ;;  %v3443_v62 = vld [vmem:[#allocation3 + $0x64] sm:$0xf0] }
 0x1fb   : > { %2550 = vmatpush.bf16.msrb.mxu1 %v3081_v43  ;;  %v1540_v57 = vsel %vm730_vm13, %v1533_v30, %v4872_v14  ;;  %v4468_v19 = vpop.permute.xlu1 %1442  ;;  %v3053_v43 = vor.u32 %v3447_v52, %v3050_v6  ;;  %v3018_v14 = vld [vmem:[#allocation3 + $0x68] sm:$0xf0]  ;;  %v3016_v20 = vld [vmem:[#allocation3 + $0x48] sm:$0xf] }
 0x1fc   : > { %v1541_v21 = vsel %vm4909_vm12, %v4121_v2, %v1540_v57  ;;  %v3523_v63 = vld [vmem:[#allocation3 + $0x2e4] sm:$0xf0]  ;;  %v3338_v23 = vld [vmem:[#allocation3 + $0x2e8] sm:$0xf0]  ;;  %v1450_v26 = vrot.slane %v4468_v19, 4  ;;  %vm4910_vm12 = vcmask 318464  }
 0x1fd   : > { %v4472_v54 = vpop.permute.xlu2 %1738  ;;  %1551 = vst [vmem:[#allocation3 + $0x288] sm:$0xff] %v1541_v21  ;;  %v3337_v58 = vor.u32 %v3523_v63, %v3336_v25  ;;  %v3341_v11 = vor.u32 %v3519_v10, %v3338_v23  ;;  %v3439_v57 = vld [vmem:[#allocation3 + $0x4c] sm:$0xf]  ;;  %v3017_v10 = vor.u32 %v3443_v62, %v3016_v20  ;;  %v3435_v21 = vld [vmem:[#allocation3 + $0x24] sm:$0xf0] }
 0x1fe   : > { %v1745_v30 = vrot.slane %v4472_v54, 4  ;;  %v1456_v2 = vsel %vm730_vm13, %v1449_v1, %v1450_v26  ;;  %2577 = vmatpush.bf16.msrb.mxu0 %v3053_v43  ;;  %v3021_v52 = vor.u32 %v3439_v57, %v3018_v14  ;;  %v2986_v63 = vld [vmem:[#allocation3 + $0x28] sm:$0xf0] }
 0x1ff   : > { %2551 = vmatpush.bf16.msrb.mxu1 %v3049_v51  ;;  %2563 = vmatpush.bf16.msrb.mxu3 %v3337_v58  ;;  %v1457_v6 = vsel %vm4910_vm12, %v4168_v16, %v1456_v2  ;;  %v3306_v23 = vld [vmem:[#allocation3 + $0x2a8] sm:$0xf0]  ;;  %v2984_v51 = vld [vmem:[#allocation3 + $0x8] sm:$0xf]  ;;  %vm4913_vm12 = vcmask 728064  }
 0x200   : > { %2589 = vmatpush.bf16.msrb.mxu2 %v3341_v11  ;;  %v1752_v56 = vsel %vm730_vm13, %v1744_v45, %v1745_v30  ;;  %1467 = vst [vmem:[#allocation3 + $0x248] sm:$0xff] %v1457_v6  ;;  %v4490_v1 = vpop.permute.xlu0 %1184  ;;  %v3515_v45 = vld [vmem:[#allocation3 + $0x2a4] sm:$0xf0]  ;;  %v3431_v62 = vld [vmem:[#allocation3 + $0xc] sm:$0xf]  ;;  %v2985_v6 = vor.u32 %v3435_v21, %v2984_v51 }
 0x201   : > { %v1753_v25 = vsel %vm4911_vm14, %v4353_v15, %v1752_v56  ;;  %v1191_v11 = vrot.slane %v4490_v1, 4  ;;  %vm4912_vm14 = vcmask 72704   ;;  %v2989_v20 = vor.u32 %v3431_v62, %v2986_v63 }
 0x202   : > { %1762 = vst [vmem:[#allocation3 + $0x330] sm:$0xff] %v1753_v25  ;;  %2578 = vmatpush.bf16.msrb.mxu0 %v3021_v52 }
 0x203   : > { %2552 = vmatpush.bf16.msrb.mxu1 %v3017_v10  ;;  %v1198_v16 = vsel %vm730_vm13, %v1190_v4, %v1191_v11  ;;  %v4498_v15 = vpop.permute.xlu1 %1058 }
 0x204   : > { %v1199_v14 = vsel %vm4912_vm14, %v4297_v0, %v1198_v16  ;;  %v3304_v43 = vld [vmem:[#allocation3 + $0x288] sm:$0xf]  ;;  %v3511_v58 = vld [vmem:[#allocation3 + $0x28c] sm:$0xf]  ;;  %v1065_v56 = vrot.slane %v4498_v15, 4  ;;  %vm4914_vm14 = vcmask 228352  }
 0x205   : > { %v4502_v2 = vpop.permute.xlu2 %1612  ;;  %1208 = vst [vmem:[#allocation3 + $0x170] sm:$0xff] %v1199_v14  ;;  %v3305_v57 = vor.u32 %v3515_v45, %v3304_v43  ;;  %v3309_v25 = vor.u32 %v3511_v58, %v3306_v23  ;;  %v3507_v0 = vld [vmem:[#allocation3 + $0x264] sm:$0xf0]  ;;  %v3274_v23 = vld [vmem:[#allocation3 + $0x268] sm:$0xf0] }
 0x206   : > { %v4875_v4 = vrot.slane %v4502_v2, 4  ;;  %v1072_v10 = vsel %vm730_vm13, %v1064_v3, %v1065_v56  ;;  %2579 = vmatpush.bf16.msrb.mxu0 %v2989_v20 }
 0x207   : > { %2553 = vmatpush.bf16.msrb.mxu1 %v2985_v6  ;;  %2564 = vmatpush.bf16.msrb.mxu3 %v3305_v57  ;;  %v1073_v21 = vsel %vm4913_vm12, %v4330_v17, %v1072_v10  ;;  %v3272_v63 = vld [vmem:[#allocation3 + $0x248] sm:$0xf]  ;;  %v3503_v45 = vld [vmem:[#allocation3 + $0x24c] sm:$0xf]  ;;  %vm4915_vm12 = vcmask 138240  }
 0x208   : > { %2590 = vmatpush.bf16.msrb.mxu2 %v3309_v25  ;;  %v1626_v52 = vsel %vm730_vm13, %v1618_v48, %v4875_v4  ;;  %1082 = vst [vmem:[#allocation3 + $0x110] sm:$0xff] %v1073_v21  ;;  %v4520_v16 = vpop.permute.xlu0 %1780  ;;  %v3273_v51 = vor.u32 %v3507_v0, %v3272_v63  ;;  %v3277_v62 = vor.u32 %v3503_v45, %v3274_v23 }
 0x209   : > { %v1627_v3 = vsel %vm4914_vm14, %v4282_v60, %v1626_v52  ;;  %v1787_v14 = vrot.slane %v4520_v16, 4  ;;  %2580 = vmatmul.bf16.vlgmr.msrb.gmra.mxu0 %v4272_v46  ;;  %vm4917_vm14 = vcmask 7168   ;;  %v3532_v4 = vld [vmem:[#allocation3 + $0x32c] sm:$0xf0] }
 0x20a   : > { %1636 = vst [vmem:[#allocation3 + $0x2d0] sm:$0xff] %v1627_v3  ;;  %2554 = vmatmul.bf16.vlgmr.msrb.gmra.mxu1 %v4272_v46 }
 0x20b   : > { %v1794_v48 = vsel %vm730_vm13, %v1786_v41, %v1787_v14  ;;  %2565 = vmatpush.bf16.msrb.mxu3 %v3273_v51  ;;  %v4530_v60 = vpop.permute.xlu1 %1400  ;;  %v4916_v41 = vrot.slane %v4313_v42, 4 }
 0x20c   : > { %2591 = vmatpush.bf16.msrb.mxu2 %v3277_v62  ;;  %v1795_v17 = vsel %vm4915_vm12, %v4136_v40, %v1794_v48  ;;  %v1408_v58 = vrot.slane %v4530_v60, 4  ;;  %vm4919_vm12 = vcmask 965632  }
 0x20d   : > { %v1229_v43 = vpop.permute.xlu2 %1228  ;;  %v2246_v20 = vunpack.c.l.b16 %v1795_v17  ;;  %v2247_v57 = vunpack.c.h.b16 %v1795_v17 }
 0x20e   : > { %v1234_v6 = vrot.slane %v1229_v43, 4  ;;  %v1414_v25 = vsel %vm730_vm13, %v1407_v59, %v1408_v58  ;;  %v4920_v43 = vrot.slane %v4223_v5, 4 }
 0x20f   : > { %v1415_v0 = vsel %vm1412_vm10, %v4309_v53, %v1414_v25  ;;  %v2358_v40 = vpack.c.b16 %v2246_v20, %v2246_v20  ;;  %v2359_v52 = vpack.c.b16 %v2247_v57, %v2247_v57  ;;  %v4918_v53 = vrot.slane %v4209_v28, 4 }
 0x210   : > { %v1242_v10 = vsel %vm730_vm13, %v4916_v41, %v1234_v6  ;;  %1425 = vst [vmem:[#allocation3 + $0x228] sm:$0xff] %v1415_v0  ;;  %v4547_v63 = vpop.permute.xlu0 %1358  ;;  %v4921_v20 = vrot.slane %v4333_v13, 4 }
 0x211   : > { %v1243_v21 = vsel %vm4917_vm14, %v4313_v42, %v1242_v10  ;;  %v1366_v45 = vrot.slane %v4547_v63, 4  ;;  %v2483_v59 = vsel %vm730_vm13, %v2358_v40, 0  ;;  %v2486_v23 = vsel %vm730_vm13, %v2359_v52, 0  ;;  %v3492_v52 = vld [vmem:[#allocation3 + $0x1ec] sm:$0xf0] }
 0x212   : > { %1251 = vst [vmem:[#allocation3 + $0x198] sm:$0xff] %v1243_v21  ;;  %2613 = vmatpush.bf16.msra.mxu1 %v2483_v59  ;;  %2639 = vmatpush.bf16.msra.mxu0 %v2486_v23  ;;  %vm4922_vm14 = vcmask 154624   ;;  %v3488_v23 = vld [vmem:[#allocation3 + $0x1d4] sm:$0xf] }
 0x213   : > { %v1372_v3 = vsel %vm730_vm13, %v4918_v53, %v1366_v45  ;;  %v4557_v51 = vpop.permute.xlu1 %1696  ;;  %v3218_v53 = vld [vmem:[#allocation3 + $0x1f0] sm:$0xf0] }
 0x214   : > { %v1373_v42 = vsel %vm4919_vm12, %v4209_v28, %v1372_v3  ;;  %v1703_v48 = vrot.slane %v4557_v51, 4  ;;  %vm4924_vm12 = vcmask 310272  }
 0x215   : > { %v1145_v62 = vpop.permute.xlu2 %1144  ;;  %1383 = vst [vmem:[#allocation3 + $0x208] sm:$0xff] %v1373_v42 }
 0x216   : > { %v1150_v17 = vrot.slane %v1145_v62, 4  ;;  %v1710_v6 = vsel %vm730_vm13, %v4920_v43, %v1703_v48 }
 0x217   : > { %v1711_v25 = vsel %vm4922_vm14, %v4223_v5, %v1710_v6  ;;  %v3499_v0 = vld [vmem:[#allocation3 + $0x224] sm:$0xf0]  ;;  %v3242_v40 = vld [vmem:[#allocation3 + $0x228] sm:$0xf0]  ;;  %v3216_v5 = vld [vmem:[#allocation3 + $0x1d0] sm:$0xf] }
 0x218   : > { %v1158_v57 = vsel %vm730_vm13, %v4921_v20, %v1150_v17  ;;  %1720 = vst [vmem:[#allocation3 + $0x310] sm:$0xff] %v1711_v25  ;;  %v4574_v41 = vpop.permute.xlu0 %1016  ;;  %v3221_v25 = vor.u32 %v3488_v23, %v3218_v53  ;;  %vm4926_vm14 = vcmask 138240  }
 0x219   : > { %v1159_v28 = vsel %vm1152_vm11, %v4333_v13, %v1158_v57  ;;  %v4874_v10 = vrot.slane %v4574_v41, 4  ;;  %vm4923_vm11 = vcmask 736256   ;;  %v3217_v57 = vor.u32 %v3492_v52, %v3216_v5 }
 0x21a   : > { %1167 = vst [vmem:[#allocation3 + $0x158] sm:$0xff] %v1159_v28  ;;  %v3184_v28 = vld [vmem:[#allocation3 + $0x190] sm:$0xf] }
 0x21b   : > { %v1030_v21 = vsel %vm730_vm13, %v1022_v24, %v4874_v10  ;;  %v1321_v59 = vpop.permute.xlu1 %1320  ;;  %v3480_v10 = vld [vmem:[#allocation3 + $0x194] sm:$0xf] }
 0x21c   : > { %v1031_v13 = vsel %vm4923_vm11, %v4403_v61, %v1030_v21  ;;  %v3240_v3 = vld [vmem:[#allocation3 + $0x208] sm:$0xf]  ;;  %v3495_v42 = vld [vmem:[#allocation3 + $0x20c] sm:$0xf]  ;;  %v1326_v17 = vrot.slane %v1321_v59, 4  ;;  %vm4927_vm11 = vcmask 728064  }
 0x21d   : > { %v4584_v62 = vpop.permute.xlu2 %1486  ;;  %1040 = vst [vmem:[#allocation3 + $0xf0] sm:$0xff] %v1031_v13  ;;  %v3241_v43 = vor.u32 %v3499_v0, %v3240_v3  ;;  %v3245_v6 = vor.u32 %v3495_v42, %v3242_v40  ;;  %v3378_v59 = vld [vmem:[#allocation3 + $0x330] sm:$0xf0]  ;;  %v3484_v13 = vld [vmem:[#allocation3 + $0x1ac] sm:$0xf0] }
 0x21e   : > { %v1493_v20 = vrot.slane %v4584_v62, 4  ;;  %v1334_v24 = vsel %vm730_vm13, %v1325_v18, %v1326_v17  ;;  %v3186_v3 = vld [vmem:[#allocation3 + $0x1b0] sm:$0xf0]  ;;  %v3476_v42 = vld [vmem:[#allocation3 + $0x16c] sm:$0xf0] }
 0x21f   : > { %2566 = vmatpush.bf16.msrb.mxu3 %v3241_v43  ;;  %2592 = vmatpush.bf16.msrb.mxu2 %v3245_v6  ;;  %v1335_v0 = vsel %vm1328_vm0, %v4363_v29, %v1334_v24  ;;  %v3376_v40 = vld [vmem:[#allocation3 + $0x310] sm:$0xf]  ;;  %v3528_v21 = vld [vmem:[#allocation3 + $0x314] sm:$0xf]  ;;  %v3185_v29 = vor.u32 %v3484_v13, %v3184_v28  ;;  %vm4925_vm0 = vcmask 1039360  }
 0x220   : > { %v1500_v61 = vsel %vm730_vm13, %v1492_v22, %v1493_v20  ;;  %1343 = vst [vmem:[#allocation3 + $0x1f8] sm:$0xff] %v1335_v0  ;;  %v1279_v52 = vpop.permute.xlu0 %1278  ;;  %v3377_v5 = vor.u32 %v3532_v4, %v3376_v40  ;;  %v3381_v23 = vor.u32 %v3528_v21, %v3378_v59  ;;  %v3189_v22 = vor.u32 %v3480_v10, %v3186_v3  ;;  %v3154_v17 = vld [vmem:[#allocation3 + $0x170] sm:$0xf0]  ;;  %v3120_v40 = vld [vmem:[#allocation3 + $0x110] sm:$0xf] }
 0x221   : > { %v1501_v18 = vsel %vm4924_vm12, %v4367_v49, %v1500_v61  ;;  %v1284_v53 = vrot.slane %v1279_v52, 4  ;;  %v3472_v10 = vld [vmem:[#allocation3 + $0x154] sm:$0xf]  ;;  %v3468_v52 = vld [vmem:[#allocation3 + $0x12c] sm:$0xf0]  ;;  %vm4928_vm12 = vcmask 220160  }
 0x222   : > { %1510 = vst [vmem:[#allocation3 + $0x270] sm:$0xff] %v1501_v18  ;;  %3392 = vmatmul.msk.bf16.vlgmr.msrb.gmra.mxu3 %vm2466_vm15, %v4378_v27  ;;  %3393 = vmatmul.msk.bf16.vlgmr.msrb.gmra.mxu2 %vm2466_vm15, %v4378_v27  ;;  %v3157_v61 = vor.u32 %v3472_v10, %v3154_v17  ;;  %v3464_v21 = vld [vmem:[#allocation3 + $0x114] sm:$0xf] }
 0x223   : > { %2598 = vmatpush.bf16.msra.mxu3 %v3217_v57  ;;  %2624 = vmatpush.bf16.msra.mxu2 %v3221_v25  ;;  %v1292_v49 = vsel %vm730_vm13, %v1283_v9, %v1284_v53  ;;  %v1783_v4 = vpop.permute.xlu1 %1782  ;;  %v3152_v25 = vld [vmem:[#allocation3 + $0x150] sm:$0xf] }
 0x224   : > { %2614 = vmatpush.bf16.msra.mxu1 %v3377_v5  ;;  %2640 = vmatpush.bf16.msra.mxu0 %v3381_v23  ;;  %v1293_v43 = vsel %vm4925_vm0, %v4389_v7, %v1292_v49  ;;  %v1788_v24 = vrot.slane %v1783_v4, 4  ;;  %v3153_v28 = vor.u32 %v3476_v42, %v3152_v25  ;;  %v3122_v5 = vld [vmem:[#allocation3 + $0x130] sm:$0xf0]  ;;  %v3121_v23 = vor.u32 %v3468_v52, %v3120_v40  ;;  %v3088_v4 = vld [vmem:[#allocation3 + $0xd0] sm:$0xf] }
 0x225   : > { %v1061_v6 = vpop.permute.xlu2 %1060  ;;  %1301 = vst [vmem:[#allocation3 + $0x1d8] sm:$0xff] %v1293_v43  ;;  %v3090_v13 = vld [vmem:[#allocation3 + $0xf0] sm:$0xf0]  ;;  %vm4930_vm0 = vcmask 302080  }
 0x226   : > { %v1066_v57 = vrot.slane %v1061_v6, 4  ;;  %v1796_v9 = vsel %vm730_vm13, %v1787_v14, %v1788_v24  ;;  %v3456_v42 = vld [vmem:[#allocation3 + $0xd4] sm:$0xf]  ;;  %v3452_v24 = vld [vmem:[#allocation3 + $0xac] sm:$0xf0] }
 0x227   : > { %2599 = vmatpush.bf16.msra.mxu3 %v3185_v29  ;;  %2625 = vmatpush.bf16.msra.mxu2 %v3189_v22  ;;  %v4616_v7 = vsel %vm4926_vm14, %v4520_v16, %v1796_v9  ;;  %v3093_v43 = vor.u32 %v3456_v42, %v3090_v13  ;;  %v3056_v9 = vld [vmem:[#allocation3 + $0x90] sm:$0xf]  ;;  %v3026_v52 = vld [vmem:[#allocation3 + $0x70] sm:$0xf0]  ;;  %vm4932_vm14 = vcmask 318464  }
 0x228   : > { %v1074_v0 = vsel %vm730_vm13, %v1065_v56, %v1066_v57  ;;  %v4620_v18 = vpop.permute.xlu0 %1654  ;;  %v3125_v56 = vor.u32 %v3464_v21, %v3122_v5  ;;  %v3058_v57 = vld [vmem:[#allocation3 + $0xb0] sm:$0xf0]  ;;  %v2248_v5 = vunpack.c.l.b16 %v4616_v7 }
 0x229   : > { %v1075_v59 = vsel %vm4927_vm11, %v4498_v15, %v1074_v0  ;;  %v1661_v14 = vrot.slane %v4620_v18, 4  ;;  %v3460_v15 = vld [vmem:[#allocation3 + $0xec] sm:$0xf0]  ;;  %v3520_v21 = vld [vmem:[#allocation3 + $0x2d4] sm:$0xf]  ;;  %vm4933_vm11 = vcmask 744448  }
 0x22a   : > { %1083 = vst [vmem:[#allocation3 + $0x118] sm:$0xff] %v1075_v59  ;;  %v3089_v17 = vor.u32 %v3460_v15, %v3088_v4  ;;  %v3444_v0 = vld [vmem:[#allocation3 + $0x6c] sm:$0xf0] }
 0x22b   : > { %2600 = vmatpush.bf16.msra.mxu3 %v3153_v28  ;;  %2626 = vmatpush.bf16.msra.mxu2 %v3157_v61  ;;  %v1668_v16 = vsel %vm730_vm13, %v1660_v44, %v1661_v14  ;;  %v4628_v53 = vpop.permute.xlu1 %1570  ;;  %v3448_v28 = vld [vmem:[#allocation3 + $0x94] sm:$0xf]  ;;  %v3057_v61 = vor.u32 %v3452_v24, %v3056_v9  ;;  %v4931_v24 = vrot.slane %v4441_v47, 4 }
 0x22c   : > { %v1669_v3 = vsel %vm4928_vm12, %v4429_v50, %v1668_v16  ;;  %v1577_v22 = vrot.slane %v4628_v53, 4  ;;  %v2994_v9 = vld [vmem:[#allocation3 + $0x30] sm:$0xf0]  ;;  %vm4934_vm12 = vcmask 72704  }
 0x22d   : > { %v4632_v29 = vpop.permute.xlu2 %1402  ;;  %1678 = vst [vmem:[#allocation3 + $0x2f0] sm:$0xff] %v1669_v3  ;;  %v2249_v3 = vunpack.c.h.b16 %v4616_v7 }
 0x22e   : > { %v1409_v49 = vrot.slane %v4632_v29, 4  ;;  %v1584_v44 = vsel %vm730_vm13, %v1576_v55, %v1577_v22 }
 0x22f   : > { %2601 = vmatpush.bf16.msra.mxu3 %v3121_v23  ;;  %2627 = vmatpush.bf16.msra.mxu2 %v3125_v56  ;;  %v1585_v6 = vsel %vm1580_vm1, %v4437_v12, %v1584_v44  ;;  %v4929_v12 = vrot.slane %v4460_v8, 4 }
 0x230   : > { %v1416_v50 = vsel %vm730_vm13, %v1408_v58, %v1409_v49  ;;  %1594 = vst [vmem:[#allocation3 + $0x2b0] sm:$0xff] %v1585_v6  ;;  %v4650_v55 = vpop.permute.xlu0 %1528  ;;  %v3061_v58 = vor.u32 %v3448_v28, %v3058_v57  ;;  %v2360_v28 = vpack.c.b16 %v2248_v5, %v2248_v5 }
 0x231   : > { %v1417_v25 = vsel %vm1412_vm10, %v4530_v60, %v1416_v50  ;;  %v1535_v10 = vrot.slane %v4650_v55, 4  ;;  %v3344_v60 = vld [vmem:[#allocation3 + $0x2d0] sm:$0xf] }
 0x232   : > { %1426 = vst [vmem:[#allocation3 + $0x230] sm:$0xff] %v1417_v25  ;;  %v3436_v25 = vld [vmem:[#allocation3 + $0x2c] sm:$0xf0]  ;;  %v2489_v5 = vsel %vm730_vm13, %v2360_v28, 0 }
 0x233   : > { %2602 = vmatpush.bf16.msra.mxu3 %v3089_v17  ;;  %2628 = vmatpush.bf16.msra.mxu2 %v3093_v43  ;;  %v1542_v40 = vsel %vm730_vm13, %v4929_v12, %v1535_v10  ;;  %v4658_v59 = vpop.permute.xlu1 %1444  ;;  %v3024_v17 = vld [vmem:[#allocation3 + $0x50] sm:$0xf]  ;;  %v3440_v43 = vld [vmem:[#allocation3 + $0x54] sm:$0xf] }
 0x234   : > { %v1543_v23 = vsel %vm4930_vm0, %v4460_v8, %v1542_v40  ;;  %v3524_v56 = vld [vmem:[#allocation3 + $0x2ec] sm:$0xf0]  ;;  %v3346_v16 = vld [vmem:[#allocation3 + $0x2f0] sm:$0xf0]  ;;  %v1451_v13 = vrot.slane %v4658_v59, 4  ;;  %v3025_v50 = vor.u32 %v3444_v0, %v3024_v17  ;;  %v3029_v6 = vor.u32 %v3440_v43, %v3026_v52 }
 0x235   : > { %v977_v15 = vpop.permute.xlu2 %976  ;;  %1552 = vst [vmem:[#allocation3 + $0x290] sm:$0xff] %v1543_v23  ;;  %v3345_v4 = vor.u32 %v3524_v56, %v3344_v60  ;;  %v3349_v42 = vor.u32 %v3520_v21, %v3346_v16  ;;  %v2992_v12 = vld [vmem:[#allocation3 + $0x10] sm:$0xf]  ;;  %v3432_v40 = vld [vmem:[#allocation3 + $0x14] sm:$0xf]  ;;  %vm4935_vm0 = vcmask 146432  }
 0x236   : > { %v982_v44 = vrot.slane %v977_v15, 4  ;;  %v1458_v8 = vsel %vm730_vm13, %v1450_v26, %v1451_v13  ;;  %v2993_v60 = vor.u32 %v3436_v25, %v2992_v12  ;;  %v2997_v21 = vor.u32 %v3432_v40, %v2994_v9 }
 0x237   : > { %2603 = vmatpush.bf16.msra.mxu3 %v3057_v61  ;;  %2629 = vmatpush.bf16.msra.mxu2 %v3061_v58  ;;  %v1459_v57 = vsel %vm4932_vm14, %v4468_v19, %v1458_v8  ;;  %v2361_v58 = vpack.c.b16 %v2249_v3, %v2249_v3  ;;  %v3516_v52 = vld [vmem:[#allocation3 + $0x2ac] sm:$0xf0]  ;;  %v3314_v23 = vld [vmem:[#allocation3 + $0x2b0] sm:$0xf0]  ;;  %vm4936_vm14 = vcmask 154624  }
 0x238   : > { %2615 = vmatpush.bf16.msra.mxu1 %v3345_v4  ;;  %2641 = vmatpush.bf16.msra.mxu0 %v3349_v42  ;;  %v990_v7 = vsel %vm730_vm13, %v4931_v24, %v982_v44  ;;  %1468 = vst [vmem:[#allocation3 + $0x250] sm:$0xff] %v1459_v57  ;;  %v1187_v26 = vpop.permute.xlu0 %1186  ;;  %v3508_v8 = vld [vmem:[#allocation3 + $0x26c] sm:$0xf0] }
 0x239   : > { %v991_v61 = vsel %vm4933_vm11, %v4441_v47, %v990_v7  ;;  %v1192_v0 = vrot.slane %v1187_v26, 4  ;;  %v2492_v16 = vsel %vm730_vm13, %v2361_v58, 0  ;;  %v3282_v7 = vld [vmem:[#allocation3 + $0x270] sm:$0xf0] }
 0x23a   : > { %999 = vst [vmem:[#allocation3 + $0xd8] sm:$0xff] %v991_v61 }
 0x23b   : > { %2604 = vmatpush.bf16.msra.mxu3 %v3025_v50  ;;  %2630 = vmatpush.bf16.msra.mxu2 %v3029_v6  ;;  %v1200_v19 = vsel %vm730_vm13, %v1191_v11, %v1192_v0  ;;  %v1741_v47 = vpop.permute.xlu1 %1740 }
 0x23c   : > { %v1201_v56 = vsel %vm4934_vm12, %v4490_v1, %v1200_v19  ;;  %v3312_v15 = vld [vmem:[#allocation3 + $0x290] sm:$0xf]  ;;  %v3512_v3 = vld [vmem:[#allocation3 + $0x294] sm:$0xf]  ;;  %v1746_v42 = vrot.slane %v1741_v47, 4  ;;  %vm4940_vm12 = vcmask 89088  }
 0x23d   : > { %v1573_v4 = vpop.permute.xlu2 %1572  ;;  %1209 = vst [vmem:[#allocation3 + $0x178] sm:$0xff] %v1201_v56  ;;  %v3313_v44 = vor.u32 %v3516_v52, %v3312_v15  ;;  %v3317_v17 = vor.u32 %v3512_v3, %v3314_v23  ;;  %v4939_v23 = vrot.slane %v4407_v37, 4  ;;  %v3493_v3 = vld [vmem:[#allocation3 + $0x1f4] sm:$0xf0] }
 0x23e   : > { %v1578_v11 = vrot.slane %v1573_v4, 4  ;;  %v1754_v43 = vsel %vm730_vm13, %v1745_v30, %v1746_v42  ;;  %v3226_v4 = vld [vmem:[#allocation3 + $0x1f8] sm:$0xf0] }
 0x23f   : > { %2605 = vmatpush.bf16.msra.mxu3 %v2993_v60  ;;  %2631 = vmatpush.bf16.msra.mxu2 %v2997_v21  ;;  %v1755_v50 = vsel %vm4935_vm0, %v4472_v54, %v1754_v43  ;;  %v3280_v6 = vld [vmem:[#allocation3 + $0x250] sm:$0xf]  ;;  %v3504_v24 = vld [vmem:[#allocation3 + $0x254] sm:$0xf]  ;;  %v3489_v43 = vld [vmem:[#allocation3 + $0x1dc] sm:$0xf] }
 0x240   : > { %2616 = vmatpush.bf16.msra.mxu1 %v3313_v44  ;;  %v1586_v1 = vsel %vm730_vm13, %v1577_v22, %v1578_v11  ;;  %2642 = vmatpush.bf16.msra.mxu0 %v3317_v17  ;;  %1763 = vst [vmem:[#allocation3 + $0x338] sm:$0xff] %v1755_v50  ;;  %v1699_v57 = vpop.permute.xlu0 %1698  ;;  %v3281_v25 = vor.u32 %v3508_v8, %v3280_v6  ;;  %v3500_v17 = vld [vmem:[#allocation3 + $0x22c] sm:$0xf0]  ;;  %v3224_v11 = vld [vmem:[#allocation3 + $0x1d8] sm:$0xf]  ;;  %vm4941_vm0 = vcmask 220160  }
 0x241   : > { %v1587_v30 = vsel %vm1580_vm1, %v4628_v53, %v1586_v1  ;;  %v3285_v9 = vor.u32 %v3504_v24, %v3282_v7  ;;  %v1704_v28 = vrot.slane %v1699_v57, 4  ;;  %vm4937_vm1 = vcmask 965632   ;;  %v3250_v50 = vld [vmem:[#allocation3 + $0x230] sm:$0xf0] }
 0x242   : > { %2606 = vmatmul.bf16.vlgmr.msra.gmra.mxu3 %v4272_v46  ;;  %2632 = vmatmul.bf16.vlgmr.msra.gmra.mxu2 %v4272_v46  ;;  %1595 = vst [vmem:[#allocation3 + $0x2b8] sm:$0xff] %v1587_v30  ;;  %vm4938_vm11 = vmmov %vm4937_vm1 }
 0x243   : > { %2665 = vmatpush.bf16.msrb.mxu3 %v2489_v5  ;;  %2691 = vmatpush.bf16.msrb.mxu2 %v2492_v16  ;;  %v1712_v22 = vsel %vm730_vm13, %v1703_v48, %v1704_v28  ;;  %v1361_v54 = vpop.permute.xlu1 %1360  ;;  %v3481_v28 = vld [vmem:[#allocation3 + $0x19c] sm:$0xf] }
 0x244   : > { %2617 = vmatpush.bf16.msra.mxu1 %v3281_v25  ;;  %v1713_v61 = vsel %vm4936_vm14, %v4557_v51, %v1712_v22  ;;  %2643 = vmatpush.bf16.msra.mxu0 %v3285_v9  ;;  %v1367_v46 = vrot.slane %v1361_v54, 4  ;;  %v3225_v25 = vor.u32 %v3493_v3, %v3224_v11  ;;  %v3229_v9 = vor.u32 %v3489_v43, %v3226_v4  ;;  %v3128_v43 = vld [vmem:[#allocation3 + $0x118] sm:$0xf] }
 0x245   : > { %1721 = vst [vmem:[#allocation3 + $0x318] sm:$0xff] %v1713_v61  ;;  %v4942_v22 = vrot.slane %v4502_v2, 4  ;;  %vm4943_vm14 = vcmask 228352  }
 0x246   : > { %v1363_v26 = vpop.permute.xlu2 %1362  ;;  %v1374_v58 = vsel %vm730_vm13, %v1366_v45, %v1367_v46 }
 0x247   : > { %v1368_v53 = vrot.slane %v1363_v26, 4  ;;  %v1375_v0 = vsel %vm4937_vm1, %v4547_v63, %v1374_v58  ;;  %v4707_v40 = vpop.f32.mrf.mxu0  ;;  %v3533_v21 = vld [vmem:[#allocation3 + $0x334] sm:$0xf0]  ;;  %v3386_v52 = vld [vmem:[#allocation3 + $0x338] sm:$0xf0]  ;;  %vm4944_vm1 = vcmask 302080  }
 0x248   : > { %1384 = vst [vmem:[#allocation3 + $0x210] sm:$0xff] %v1375_v0  ;;  %v1103_v48 = vpop.permute.xlu0 %1102  ;;  %v3485_v26 = vld [vmem:[#allocation3 + $0x1b4] sm:$0xf0] }
 0x249   : > { %v1376_v12 = vsel %vm730_vm13, %v1367_v46, %v1368_v53  ;;  %v1108_v60 = vrot.slane %v1103_v48, 4  ;;  %v3194_v53 = vld [vmem:[#allocation3 + $0x1b8] sm:$0xf0] }
 0x24a   : > { %v1377_v51 = vsel %vm4938_vm11, %v1361_v54, %v1376_v12  ;;  %v3197_v0 = vor.u32 %v3481_v28, %v3194_v53  ;;  %vm4946_vm11 = vcmask 736256  }
 0x24b   : > { %1385 = vst [vmem:[#allocation3 + $0x218] sm:$0xff] %v1377_v51  ;;  %v1116_v19 = vsel %vm730_vm13, %v4939_v23, %v1108_v60  ;;  %v1657_v45 = vpop.permute.xlu1 %1656  ;;  %v3477_v51 = vld [vmem:[#allocation3 + $0x174] sm:$0xf0]  ;;  %v3162_v60 = vld [vmem:[#allocation3 + $0x178] sm:$0xf0] }
 0x24c   : > { %v1117_v63 = vsel %vm4940_vm12, %v4407_v37, %v1116_v19  ;;  %v3384_v5 = vld [vmem:[#allocation3 + $0x318] sm:$0xf]  ;;  %v3529_v47 = vld [vmem:[#allocation3 + $0x31c] sm:$0xf]  ;;  %v1662_v56 = vrot.slane %v1657_v45, 4  ;;  %v4715_v42 = vpop.f32.mrf.mxu2  ;;  %vm4947_vm12 = vcmask 310272  }
 0x24d   : > { %1125 = vst [vmem:[#allocation3 + $0x138] sm:$0xff] %v1117_v63  ;;  %v3385_v16 = vor.u32 %v3533_v21, %v3384_v5  ;;  %v3389_v15 = vor.u32 %v3529_v47, %v3386_v52  ;;  %v3160_v52 = vld [vmem:[#allocation3 + $0x158] sm:$0xf]  ;;  %v3473_v23 = vld [vmem:[#allocation3 + $0x15c] sm:$0xf]  ;;  %v4945_v47 = vrot.slane %v4574_v41, 4 }
 0x24e   : > { %v1670_v44 = vsel %vm730_vm13, %v1661_v14, %v1662_v56  ;;  %v3192_v14 = vld [vmem:[#allocation3 + $0x198] sm:$0xf]  ;;  %v3165_v45 = vor.u32 %v3473_v23, %v3162_v60 }
 0x24f   : > { %2666 = vmatpush.bf16.msrb.mxu3 %v3385_v16  ;;  %2692 = vmatpush.bf16.msrb.mxu2 %v3389_v15  ;;  %v1671_v37 = vsel %vm4941_vm0, %v4620_v18, %v1670_v44  ;;  %v3248_v8 = vld [vmem:[#allocation3 + $0x210] sm:$0xf]  ;;  %v3496_v1 = vld [vmem:[#allocation3 + $0x214] sm:$0xf]  ;;  %v2505_v30 = vpop.f32.mrf.mxu0  ;;  %v3193_v58 = vor.u32 %v3485_v26, %v3192_v14  ;;  %vm4948_vm0 = vcmask 318464  }
 0x250   : > { %1679 = vst [vmem:[#allocation3 + $0x2f8] sm:$0xff] %v1671_v37  ;;  %v1615_v6 = vpop.permute.xlu0 %1614  ;;  %v3249_v24 = vor.u32 %v3500_v17, %v3248_v8  ;;  %v3253_v7 = vor.u32 %v3496_v1, %v3250_v50  ;;  %v3465_v37 = vld [vmem:[#allocation3 + $0x11c] sm:$0xf] }
 0x251   : > { %v1620_v57 = vrot.slane %v1615_v6, 4  ;;  %v3517_v6 = vld [vmem:[#allocation3 + $0x2b4] sm:$0xf0]  ;;  %v3322_v30 = vld [vmem:[#allocation3 + $0x2b8] sm:$0xf0] }
 0x252   : > { %2618 = vmatpush.bf16.msra.mxu1 %v3249_v24  ;;  %2644 = vmatpush.bf16.msra.mxu0 %v3253_v7 }
 0x253   : > { %v1628_v54 = vsel %vm730_vm13, %v4942_v22, %v1620_v57  ;;  %v1531_v18 = vpop.permute.xlu1 %1530  ;;  %v3096_v22 = vld [vmem:[#allocation3 + $0xd8] sm:$0xf] }
 0x254   : > { %v1629_v61 = vsel %vm4943_vm14, %v4502_v2, %v1628_v54  ;;  %v1536_v46 = vrot.slane %v1531_v18, 4  ;;  %v2531_v12 = vpop.f32.mrf.mxu2  ;;  %v3469_v16 = vld [vmem:[#allocation3 + $0x134] sm:$0xf0] }
 0x255   : > { %1637 = vst [vmem:[#allocation3 + $0x2d8] sm:$0xff] %v1629_v61  ;;  %3394 = vmatmul.msk.bf16.vlgmr.msra.gmra.mxu1 %vm2466_vm15, %v4378_v27  ;;  %3395 = vmatmul.msk.bf16.vlgmr.msra.gmra.mxu0 %vm2466_vm15, %v4378_v27  ;;  %v3161_v27 = vor.u32 %v3477_v51, %v3160_v52  ;;  %v3129_v1 = vor.u32 %v3469_v16, %v3128_v43  ;;  %v3457_v61 = vld [vmem:[#allocation3 + $0xdc] sm:$0xf]  ;;  %v3064_v12 = vld [vmem:[#allocation3 + $0x98] sm:$0xf] }
 0x256   : > { %2650 = vmatpush.bf16.msrb.mxu1 %v3225_v25  ;;  %2676 = vmatpush.bf16.msrb.mxu0 %v3229_v9  ;;  %v1544_v48 = vsel %vm730_vm13, %v1535_v10, %v1536_v46 }
 0x257   : > { %v1545_v2 = vsel %vm4944_vm1, %v4650_v55, %v1544_v48  ;;  %v3525_v63 = vld [vmem:[#allocation3 + $0x2f4] sm:$0xf0]  ;;  %v3354_v5 = vld [vmem:[#allocation3 + $0x2f8] sm:$0xf0] }
 0x258   : > { %1553 = vst [vmem:[#allocation3 + $0x298] sm:$0xff] %v1545_v2  ;;  %v1019_v21 = vpop.permute.xlu0 %1018  ;;  %v3130_v55 = vld [vmem:[#allocation3 + $0x138] sm:$0xf0] }
 0x259   : > { %v1024_v19 = vrot.slane %v1019_v21, 4  ;;  %v3133_v50 = vor.u32 %v3465_v37, %v3130_v55  ;;  %v3449_v2 = vld [vmem:[#allocation3 + $0x9c] sm:$0xf]  ;;  %v3032_v55 = vld [vmem:[#allocation3 + $0x58] sm:$0xf] }
 0x25a   : > { %2651 = vmatpush.bf16.msrb.mxu1 %v3193_v58  ;;  %2677 = vmatpush.bf16.msrb.mxu0 %v3197_v0  ;;  %v3453_v58 = vld [vmem:[#allocation3 + $0xb4] sm:$0xf0]  ;;  %v3066_v0 = vld [vmem:[#allocation3 + $0xb8] sm:$0xf0] }
 0x25b   : > { %v1032_v10 = vsel %vm730_vm13, %v4945_v47, %v1024_v19  ;;  %v1489_v56 = vpop.permute.xlu1 %1488  ;;  %v3065_v60 = vor.u32 %v3453_v58, %v3064_v12  ;;  %v3069_v21 = vor.u32 %v3449_v2, %v3066_v0  ;;  %v3445_v19 = vld [vmem:[#allocation3 + $0x74] sm:$0xf0] }
 0x25c   : > { %v1033_v15 = vsel %vm4946_vm11, %v4574_v41, %v1032_v10  ;;  %v3352_v3 = vld [vmem:[#allocation3 + $0x2d8] sm:$0xf]  ;;  %v3521_v4 = vld [vmem:[#allocation3 + $0x2dc] sm:$0xf]  ;;  %v1494_v44 = vrot.slane %v1489_v56, 4 }
 0x25d   : > { %1041 = vst [vmem:[#allocation3 + $0xf8] sm:$0xff] %v1033_v15  ;;  %v3353_v17 = vor.u32 %v3525_v63, %v3352_v3  ;;  %v3357_v11 = vor.u32 %v3521_v4, %v3354_v5  ;;  %v3441_v15 = vld [vmem:[#allocation3 + $0x5c] sm:$0xf]  ;;  %v3033_v4 = vor.u32 %v3445_v19, %v3032_v55 }
 0x25e   : > { %2652 = vmatpush.bf16.msrb.mxu1 %v3161_v27  ;;  %2678 = vmatpush.bf16.msrb.mxu0 %v3165_v45  ;;  %v1502_v8 = vsel %vm730_vm13, %v1493_v20, %v1494_v44  ;;  %v3034_v27 = vld [vmem:[#allocation3 + $0x78] sm:$0xf0] }
 0x25f   : > { %2667 = vmatpush.bf16.msrb.mxu3 %v3353_v17  ;;  %2693 = vmatpush.bf16.msrb.mxu2 %v3357_v11  ;;  %v1503_v41 = vsel %vm4947_vm12, %v4584_v62, %v1502_v8  ;;  %v3320_v24 = vld [vmem:[#allocation3 + $0x298] sm:$0xf]  ;;  %v3513_v7 = vld [vmem:[#allocation3 + $0x29c] sm:$0xf]  ;;  %v3037_v44 = vor.u32 %v3441_v15, %v3034_v27 }
 0x260   : > { %1511 = vst [vmem:[#allocation3 + $0x278] sm:$0xff] %v1503_v41  ;;  %v1447_v57 = vpop.permute.xlu0 %1446  ;;  %v3321_v25 = vor.u32 %v3517_v6, %v3320_v24  ;;  %v3325_v9 = vor.u32 %v3513_v7, %v3322_v30  ;;  %v3433_v6 = vld [vmem:[#allocation3 + $0x1c] sm:$0xf] }
 0x261   : > { %v1452_v14 = vrot.slane %v1447_v57, 4 }
 0x262   : > { %2653 = vmatpush.bf16.msrb.mxu1 %v3129_v1  ;;  %2679 = vmatpush.bf16.msrb.mxu0 %v3133_v50  ;;  %v3000_v50 = vld [vmem:[#allocation3 + $0x18] sm:$0xf] }
 0x263   : > { %v1460_v20 = vsel %vm730_vm13, %v1451_v13, %v1452_v14  ;;  %2668 = vmatpush.bf16.msrb.mxu3 %v3321_v25  ;;  %2694 = vmatpush.bf16.msrb.mxu2 %v3325_v9  ;;  %v4749_v28 = vpop.permute.xlu1 %1918  ;;  %v3256_v25 = vld [vmem:[#allocation3 + $0x218] sm:$0xf] }
 0x264   : > { %v1461_v62 = vsel %vm4948_vm0, %v4658_v59, %v1460_v20  ;;  %v2504_v54 = vadd.f32 %v4707_v40, %v4749_v28  ;;  %v3461_v18 = vld [vmem:[#allocation3 + $0xf4] sm:$0xf0]  ;;  %v3098_v46 = vld [vmem:[#allocation3 + $0xf8] sm:$0xf0]  ;;  %v2530_v45 = vadd.f32 %v4715_v42, %v4749_v28 }
 0x265   : > { %1469 = vst [vmem:[#allocation3 + $0x258] sm:$0xff] %v1461_v62  ;;  %v3097_v26 = vor.u32 %v3461_v18, %v3096_v22  ;;  %v3101_v53 = vor.u32 %v3457_v61, %v3098_v46  ;;  %v3437_v42 = vld [vmem:[#allocation3 + $0x34] sm:$0xf0]  ;;  %v3497_v20 = vld [vmem:[#allocation3 + $0x21c] sm:$0xf] }
 0x266   : > { %v3001_v7 = vor.u32 %v3437_v42, %v3000_v50  ;;  %v3572_v61 = vld.sshfl [vmem:[#allocation1] sm:$0xff pattern:$0x73625140]  ;;  %v3573_v46 = vld.sshfl [vmem:[#allocation1 + $0x8] sm:$0xff pattern:$0x73625140] }
 0x267   : > { %2654 = vmatpush.bf16.msrb.mxu1 %v3097_v26  ;;  %2680 = vmatpush.bf16.msrb.mxu0 %v3101_v53  ;;  %v2516_v13 = vpop.f32.mrf.mxu1  ;;  %v3509_v52 = vld [vmem:[#allocation3 + $0x274] sm:$0xf0]  ;;  %v3290_v40 = vld [vmem:[#allocation3 + $0x278] sm:$0xf0] }
 0x268   : > { %v1405_v48 = vpop.permute.xlu0 %1404  ;;  %v2517_v51 = vadd.f32 %v2516_v13, %v2504_v54 }
 0x269   : > { %v1410_v59 = vrot.slane %v1405_v48, 4 }
 0x26a   : > { %v2745_v5 = vsel %vm3711_vm2, %v2517_v51, 0.0 }
 0x26b   : > { %v1418_v23 = vsel %vm730_vm13, %v1409_v49, %v1410_v59  ;;  %2655 = vmatpush.bf16.msrb.mxu1 %v3065_v60  ;;  %2681 = vmatpush.bf16.msrb.mxu0 %v3069_v21  ;;  %v2770_v17 = vmul.f32 %v2745_v5, %v2745_v5  ;;  %v2753_v37 = vsel %vm730_vm13, %v2745_v5, 0.0 }
 0x26c   : > { %v1419_v63 = vsel %vm1412_vm10, %v4632_v29, %v1418_v23  ;;  %v3288_v47 = vld [vmem:[#allocation3 + $0x258] sm:$0xf]  ;;  %v3505_v10 = vld [vmem:[#allocation3 + $0x25c] sm:$0xf] }
 0x26d   : > { %1427 = vst [vmem:[#allocation3 + $0x238] sm:$0xff] %v1419_v63  ;;  %v2542_v56 = vpop.f32.mrf.mxu3  ;;  %v3289_v16 = vor.u32 %v3509_v52, %v3288_v47  ;;  %v3293_v49 = vor.u32 %v3505_v10, %v3290_v40  ;;  %v3002_v29 = vld [vmem:[#allocation3 + $0x38] sm:$0xf0]  ;;  %v2778_v57 = vsel %vm730_vm13, %v2770_v17, 0.0 }
 0x26e   : > { %v2543_v3 = vadd.f32 %v2542_v56, %v2530_v45  ;;  %v3005_v30 = vor.u32 %v3433_v6, %v3002_v29 }
 0x26f   : > { %2669 = vmatpush.bf16.msrb.mxu3 %v3289_v16  ;;  %2695 = vmatpush.bf16.msrb.mxu2 %v3293_v49  ;;  %v2518_v11 = vpop.f32.mrf.mxu1 }
 0x270   : > { %v2710_v31 = vrot.slane %v2543_v3, 4  ;;  %v2746_v43 = vsel %vm3715_vm3, %v2543_v3, 0.0  ;;  %2656 = vmatpush.bf16.msrb.mxu1 %v3033_v4  ;;  %2682 = vmatpush.bf16.msrb.mxu0 %v3037_v44 }
 0x271   : > { %v2754_v8 = vsel %vm730_vm13, %v2746_v43, 0.0  ;;  %v2771_v1 = vmul.f32 %v2746_v43, %v2746_v43 }
 0x272   : > { %v2714_v41 = vsel %vm730_vm13, %v2517_v51, %v2710_v31  ;;  %v2755_v24 = vadd.f32 %v2754_v8, %v2753_v37 }
 0x273   : > { %2722 = vst [vmem:[%s4769_s23] sm:$0xff] %v2714_v41  ;;  %v2779_v32 = vsel %vm730_vm13, %v2771_v1, 0.0 }
 0x274   : > { %v2780_v9 = vadd.f32 %v2779_v32, %v2778_v57  ;;  %2657 = vmatpush.bf16.msrb.mxu1 %v3001_v7  ;;  %2683 = vmatpush.bf16.msrb.mxu0 %v3005_v30  ;;  %v3501_v14 = vld [vmem:[#allocation3 + $0x234] sm:$0xf0]  ;;  %v3258_v22 = vld [vmem:[#allocation3 + $0x238] sm:$0xf0] }
 0x275   : > { %v3257_v62 = vor.u32 %v3501_v14, %v3256_v25  ;;  %v3261_v54 = vor.u32 %v3497_v20, %v3258_v22  ;;  %v2544_v18 = vpop.f32.mrf.mxu3 }
 0x277   : > { %2658 = vmatmul.bf16.vlgmr.msrb.gmra.mxu1 %v3572_v61  ;;  %2670 = vmatpush.bf16.msrb.mxu3 %v3257_v62 }
 0x278   : > { %2684 = vmatmul.bf16.vlgmr.msrb.gmra.mxu0 %v3572_v61  ;;  %2696 = vmatpush.bf16.msrb.mxu2 %v3261_v54 }
 0x27a   : > { %3396 = vmatmul.msk.bf16.vlgmr.msrb.gmra.mxu3 %vm2466_vm15, %v3573_v46 }
 0x27b   : > { %3397 = vmatmul.msk.bf16.vlgmr.msrb.gmra.mxu2 %vm2466_vm15, %v3573_v46 }
 0x286   : > { %v2581_v53 = vpop.f32.mrf.mxu0 }
 0x287   : > { %v2555_v26 = vpop.f32.mrf.mxu1  ;;  %v2582_v12 = vadd.f32 %v2581_v53, %v4749_v28 }
 0x288   : > { %v2556_v13 = vadd.f32 %v2555_v26, %v4749_v28 }
 0x28e   : > { %v2583_v0 = vpop.f32.mrf.mxu0 }
 0x28f   : > { %v2557_v58 = vpop.f32.mrf.mxu1 }
 0x2a5   : > { %v2568_v48 = vpop.f32.mrf.mxu3  ;;  %v2594_v51 = vpop.f32.mrf.mxu2 }
 0x2a6   : > { %v2569_v60 = vadd.f32 %v2568_v48, %v2556_v13  ;;  %v2595_v2 = vadd.f32 %v2594_v51, %v2582_v12 }
 0x2a8   : > { %v2747_v59 = vsel %vm3719_vm4, %v2569_v60, 0.0  ;;  %v2711_v21 = vrot.slane %v2595_v2, 4  ;;  %v2748_v52 = vsel %vm3723_vm5, %v2595_v2, 0.0 }
 0x2a9   : > { %v2756_v40 = vsel %vm730_vm13, %v2747_v59, 0.0  ;;  %v2772_v23 = vmul.f32 %v2747_v59, %v2747_v59  ;;  %v2773_v19 = vmul.f32 %v2748_v52, %v2748_v52  ;;  %v2758_v5 = vsel %vm730_vm13, %v2748_v52, 0.0 }
 0x2aa   : > { %v2757_v27 = vadd.f32 %v2756_v40, %v2755_v24  ;;  %v2715_v45 = vsel %vm730_vm13, %v2569_v60, %v2711_v21 }
 0x2ab   : > { %v2781_v63 = vsel %vm730_vm13, %v2772_v23, 0.0  ;;  %2723 = vst [vmem:[%s4769_s23 + $0x8] sm:$0xff] %v2715_v45  ;;  %v2783_v33 = vsel %vm730_vm13, %v2773_v19, 0.0  ;;  %v2795_v23 = vlaneseq }
 0x2ac   : > { %v2782_v47 = vadd.f32 %v2781_v63, %v2780_v9  ;;  %v2759_v10 = vadd.f32 %v2758_v5, %v2757_v27 }
 0x2ad   : > { %v2570_v56 = vpop.f32.mrf.mxu3  ;;  %v2596_v34 = vpop.f32.mrf.mxu2  ;;  %v2796_v19 = vand.u32 127, %v2795_v23 }
 0x2ae   : > { %v2784_v16 = vadd.f32 %v2783_v33, %v2782_v47 }
 0x2af   : > { %vm2798_vm2 = vcmp.eq.s32.totalorder %v2796_v19, 1  ;;  %vm2797_vm3 = vcmp.eq.s32.totalorder %v2796_v19, 0 }
 0x2c5   : > { %v2607_v49 = vpop.f32.mrf.mxu3  ;;  %v2633_v55 = vpop.f32.mrf.mxu2 }
 0x2c6   : > { %v2634_v4 = vadd.f32 %v2633_v55, %v4749_v28  ;;  %v2608_v42 = vadd.f32 %v2607_v49, %v4749_v28 }
 0x2cd   : > { %v2609_v15 = vpop.f32.mrf.mxu3  ;;  %v2635_v3 = vpop.f32.mrf.mxu2 }
 0x2d2   : > { %v2620_v44 = vpop.f32.mrf.mxu1  ;;  %v2646_v17 = vpop.f32.mrf.mxu0 }
 0x2d3   : > { %v2647_v29 = vadd.f32 %v2646_v17, %v2634_v4  ;;  %v2621_v11 = vadd.f32 %v2620_v44, %v2608_v42 }
 0x2d5   : > { %v2712_v31 = vrot.slane %v2647_v29, 4  ;;  %v2749_v1 = vsel %vm3727_vm6, %v2621_v11, 0.0  ;;  %v2750_v7 = vsel %vm3731_vm7, %v2647_v29, 0.0 }
 0x2d6   : > { %v2774_v41 = vmul.f32 %v2749_v1, %v2749_v1  ;;  %v2760_v24 = vsel %vm730_vm13, %v2749_v1, 0.0  ;;  %v2775_v32 = vmul.f32 %v2750_v7, %v2750_v7  ;;  %v2762_v18 = vsel %vm730_vm13, %v2750_v7, 0.0 }
 0x2d7   : > { %v2716_v43 = vsel %vm730_vm13, %v2621_v11, %v2712_v31  ;;  %v2761_v57 = vadd.f32 %v2760_v24, %v2759_v10 }
 0x2d8   : > { %2724 = vst [vmem:[%s4769_s23 + $0x10] sm:$0xff] %v2716_v43  ;;  %v2785_v30 = vsel %vm730_vm13, %v2774_v41, 0.0  ;;  %v2787_v46 = vsel %vm730_vm13, %v2775_v32, 0.0 }
 0x2d9   : > { %v2786_v22 = vadd.f32 %v2785_v30, %v2784_v16  ;;  %v2763_v36 = vadd.f32 %v2762_v18, %v2761_v57 }
 0x2da   : > { %v2622_v37 = vpop.f32.mrf.mxu1  ;;  %v2648_v8 = vpop.f32.mrf.mxu0 }
 0x2db   : > { %v2788_v48 = vadd.f32 %v2787_v46, %v2786_v22 }
 0x2f4   : > { %v2659_v50 = vpop.f32.mrf.mxu1 }
 0x2f5   : > { %v2685_v6 = vpop.f32.mrf.mxu0  ;;  %v2660_v25 = vadd.f32 %v2659_v50, %v4749_v28 }
 0x2f6   : > { %v2686_v14 = vadd.f32 %v2685_v6, %v4749_v28 }
 0x2fc   : > { %v2661_v9 = vpop.f32.mrf.mxu1 }
 0x2fd   : > { %v2672_v20 = vpop.f32.mrf.mxu3  ;;  %v2687_v35 = vpop.f32.mrf.mxu0 }
 0x2fe   : > { %v2673_v62 = vadd.f32 %v2672_v20, %v2660_v25  ;;  %v2698_v54 = vpop.f32.mrf.mxu2 }
 0x2ff   : > { %v2699_v61 = vadd.f32 %v2698_v54, %v2686_v14 }
 0x300   : > { %v2751_v26 = vsel %vm3735_vm8, %v2673_v62, 0.0 }
 0x301   : > { %v2764_v53 = vsel %vm730_vm13, %v2751_v26, 0.0  ;;  %v2776_v58 = vmul.f32 %v2751_v26, %v2751_v26  ;;  %v2713_v0 = vrot.slane %v2699_v61, 4  ;;  %v2752_v28 = vsel %vm3739_vm9, %v2699_v61, 0.0 }
 0x302   : > { %v2777_v13 = vmul.f32 %v2752_v28, %v2752_v28  ;;  %v2765_v12 = vadd.f32 %v2764_v53, %v2763_v36  ;;  %v2766_v60 = vsel %vm730_vm13, %v2752_v28, 0.0 }
 0x303   : > { %v2717_v51 = vsel %vm730_vm13, %v2673_v62, %v2713_v0  ;;  %v2789_v2 = vsel %vm730_vm13, %v2776_v58, 0.0 }
 0x304   : > { %2725 = vst [vmem:[%s4769_s23 + $0x18] sm:$0xff] %v2717_v51  ;;  %v2767_v38 = vadd.f32 %v2766_v60, %v2765_v12  ;;  %v2790_v59 = vadd.f32 %v2789_v2, %v2788_v48  ;;  %v2791_v52 = vsel %vm730_vm13, %v2777_v13, 0.0 }
 0x305   : > { %v2674_v21 = vpop.f32.mrf.mxu3 }
 0x306   : > { %v2700_v40 = vpop.f32.mrf.mxu2  ;;  %2768 = vadd.xlane.f32.xlu0 %v2767_v38  ;;  %v2792_v39 = vadd.f32 %v2791_v52, %v2790_v59 }
 0x308   : > { %2793 = vadd.xlane.f32.xlu2 %v2792_v39 }
 0x379   : > { %v2769_v45 = vpop.xlane.xlu0 %2768 }
 0x37b   : > { %v2794_v27 = vpop.xlane.xlu2 %2793 }
 0x37c   : > { %v2799_v63 = vsel %vm2798_vm2, %v2794_v27, 0.0 }
 0x37d   : > { %v2800_v5 = vsel %vm2797_vm3, %v2769_v45, %v2799_v63 }
 0x37e   : > { %2801 = vst [vmem:[%s570_s20] sm:$0xf] %v2800_v5 }
 0x37f PF: > { %s22_s17 = sadd.s32 1, %s3580_s17  }
 0x380   : > { %p19_p7 = scmp.ge.s32.totalorder %s22_s17, 4  }
 0x382   :  { %21 = sbr.rel (!%p19_p7) target bundleno = 1 (0x1), region = 117 }

</bundles_post_ra>
